<compile_context>
chip_gen: v7x
topology: tpu7x:2x2x1
jax: 0.10.0
libtpu: 0.0.40
codegen_flags: <defaults>
</compile_context>

<pallas_src>
import functools

import jax
import jax.numpy as jnp
from jax import lax
from jax.experimental import pallas as pl
from jax.experimental.pallas import tpu as pltpu


def _round_up(x, m):
    return (x + m - 1) // m * m


def _device_kind():
    try:
        return jax.devices()[0].device_kind.lower()
    except Exception:
        return ""


def _auto_compute_dtype():
    # bf16 MXU operands (f32 accumulate) on v6e / v7x: 2x MXU rate and half the
    # HBM/VMEM traffic for the 9x-inflated 27-channel input.  f32 elsewhere.
    kind = _device_kind()
    if ("v6" in kind) or ("v7" in kind):
        return jnp.bfloat16
    return jnp.float32


def _physical_vmem_bytes():
    kind = _device_kind()
    if "v7" in kind:
        return 64 * 1024 * 1024      # v7x: 64 MiB per TensorCore
    return 128 * 1024 * 1024         # v5e / v6e


def _vmem_estimate(tile_h, wb, cdtb):
    """Rough per-grid-step VMEM footprint (bytes) of the fused kernel."""
    h1 = tile_h + 4
    p1 = h1 * wb
    p3 = tile_h * wb
    # always-resident: double-buffered input windows (main + halo) and output
    resident = (2 * tile_h * 27 * wb * cdtb
                + 2 * 16 * 27 * wb * cdtb
                + 2 * 3 * p3 * 4)
    xflat = (tile_h + 12) * 27 * wb * cdtb
    ph_conv1 = xflat + 64 * p1 * 4
    ph_conv2 = 64 * p1 * cdtb + 32 * p1 * 4
    ph_conv3 = 2 * 32 * p1 * cdtb + 160 * p1 * cdtb + 3 * p3 * 4
    return int(1.2 * (resident + max(ph_conv1, ph_conv2, ph_conv3))) + (2 << 20)


def _pick_tile_h(H, wb, cdtb, budget):
    """Largest multiple-of-16 row tile whose footprint fits the VMEM budget."""
    cap = max(16, min(128, _round_up(H, 16)))
    tile = 16
    th = 16
    while th <= cap:
        if _vmem_estimate(th, wb, cdtb) <= budget:
            tile = th
        th += 16
    return tile


def _srcnn_fused_kernel(xm_ref, xh_ref, w1_ref, b1_ref, w2_ref, b2_ref,
                        w3_ref, b3_ref, o_ref, *, tile_h, wb, img_h, img_w):
    """One (batch, row-tile) step of the fused SRCNN forward pass.

    xm_ref: (1, tile_h, 27, wb)  kx-unrolled input rows of this tile
    xh_ref: (1, 16,     27, wb)  next 16 rows (12 of them are the halo)
    w1_ref: (9, 64, 27)   conv1, per-ky tap, cols ordered (kx, cin)
    w2_ref: (32, 64)      conv2 (1x1), transposed
    w3_ref: (5, 3, 160)   conv3, per-ky tap, cols ordered (kx, cin)
    o_ref : (1, 3, tile_h*wb)  channel-major, lane-dense output block
    """
    h1 = tile_h + 4            # conv1/conv2 rows computed (incl. conv3 halo)
    p1 = h1 * wb               # pixels per activation row-slab
    p3 = tile_h * wb           # output pixels
    cdt = xm_ref.dtype

    # ---- assemble the (27, (tile_h+12)*wb) pixels-on-lanes input slab ------
    # Row slices hit only outer dims (free); the concat pieces are 128-lane
    # aligned (wb % 128 == 0), so this is plain vreg placement, no shuffles.
    row_slabs = ([xm_ref[0, r] for r in range(tile_h)]
                 + [xh_ref[0, r] for r in range(12)])
    xflat = jnp.concatenate(row_slabs, axis=-1)

    # ---- conv1: 9 ky taps, (64,27) @ (27,p1); tap slices are 128-aligned ----
    acc1 = jnp.zeros((64, p1), jnp.float32)
    for ky in range(9):
        acc1 = acc1 + jnp.dot(w1_ref[ky], xflat[:, ky * wb: ky * wb + p1],
                              preferred_element_type=jnp.float32)
    y1 = jnp.maximum(acc1 + b1_ref[...], 0.0).astype(cdt)

    # ---- conv2 (1x1): single (32,64) @ (64,p1) matmul -----------------------
    y2 = jnp.dot(w2_ref[...], y1, preferred_element_type=jnp.float32)
    y2 = jnp.maximum(y2 + b2_ref[...], 0.0)

    # ---- zero the out-of-image ring so conv3 sees PyTorch zero padding ------
    t = pl.program_id(1)
    p_idx = lax.broadcasted_iota(jnp.int32, (1, p1), 1)      # flat pixel index
    row_lo = (2 - t * tile_h) * wb
    row_hi = (img_h + 2 - t * tile_h) * wb
    c_idx = lax.broadcasted_iota(jnp.int32, (1, wb), 1)
    c_full = jnp.tile(c_idx, (1, h1))                          # column index
    valid = ((p_idx >= row_lo) & (p_idx < row_hi)
             & (c_full >= 2) & (c_full < img_w + 2))
    y2 = jnp.where(valid, y2, 0.0).astype(cdt)

    # ---- conv3: kx folded into K (160) via 4 small lane shifts; 5 ky taps ---
    # (the ky tap slices below are 128-aligned column slices -> free)
    y2p = jnp.concatenate([y2, jnp.zeros((32, 128), cdt)], axis=-1)
    y2kx = jnp.concatenate([y2p[:, kx: kx + p1] for kx in range(5)], axis=0)
    acc3 = jnp.zeros((3, p3), jnp.float32)
    for ky in range(5):
        acc3 = acc3 + jnp.dot(w3_ref[ky], y2kx[:, ky * wb: ky * wb + p3],
                              preferred_element_type=jnp.float32)

    # lane-dense channel-major store (no post-kernel transpose needed)
    o_ref[0] = (acc3 + b3_ref[...]).astype(o_ref.dtype)


def srcnn_forward_pallas(params, x_nchw, compute_dtype=None):
    N, C, H, W = x_nchw.shape
    assert C == 3, "SRCNN expects 3 input channels"
    cdt = compute_dtype if compute_dtype is not None else _auto_compute_dtype()
    cdtb = jnp.dtype(cdt).itemsize

    wb = _round_up(W + 4, 128)           # in-kernel working width (lane axis)
    phys = _physical_vmem_bytes()
    tile_h = _pick_tile_h(H, wb, cdtb, int(phys * 0.40))
    num_tiles = -(-H // tile_h)          # ceil: arbitrary H supported
    ht = tile_h // 16
    rows = num_tiles * tile_h + 16       # padded input rows (6-row top halo)

    w1, b1 = params["conv1"]             # HWIO (9, 9, 3, 64)
    w2, b2 = params["conv2"]             # (1, 1, 64, 32)
    w3, b3 = params["conv3"]             # (5, 5, 32, 3)
    w1t = jnp.transpose(w1, (0, 3, 1, 2)).reshape(9, 64, 27).astype(cdt)
    w2t = jnp.transpose(w2.reshape(64, 32)).astype(cdt)
    w3t = jnp.transpose(w3, (0, 3, 1, 2)).reshape(5, 3, 160).astype(cdt)
    b1r = b1.reshape(64, 1).astype(jnp.float32)
    b2r = b2.reshape(32, 1).astype(jnp.float32)
    b3r = b3.reshape(3, 1).astype(jnp.float32)

    # Single zero-pad for the fused net's combined halo, then kx-unroll the
    # 9 conv1 column taps into 27 "channels" (cheap: 3-channel source).
    # HBM layout (N, rows, 27, wb): channel index = kx*3 + cin.
    xc = x_nchw.astype(cdt)
    xpad = jnp.pad(xc, ((0, 0), (0, 0), (6, rows - 6 - H), (6, wb + 2 - W)))
    xk = jnp.stack([xpad[:, :, :, kx:kx + wb] for kx in range(9)], axis=1)
    xk = xk.transpose(0, 3, 1, 2, 4).reshape(N, rows, 27, wb)

    kernel = functools.partial(_srcnn_fused_kernel, tile_h=tile_h, wb=wb,
                               img_h=H, img_w=W)

    vmem_limit = min(int(phys * 0.75),
                     max(64 * 1024 * 1024,
                         int(1.5 * _vmem_estimate(tile_h, wb, cdtb))))

    out_flat = pl.pallas_call(
        kernel,
        out_shape=jax.ShapeDtypeStruct((N, 3, num_tiles * tile_h * wb),
                                       jnp.float32),
        grid_spec=pltpu.PrefetchScalarGridSpec(
            num_scalar_prefetch=0,
            grid=(N, num_tiles),
            in_specs=[
                # main tile rows and the 16-row halo window of the SAME array
                # (no duplicated/stacked copy in HBM)
                pl.BlockSpec((1, tile_h, 27, wb), lambda n, t: (n, t, 0, 0)),
                pl.BlockSpec((1, 16, 27, wb),
                             lambda n, t: (n, (t + 1) * ht, 0, 0)),
                pl.BlockSpec((9, 64, 27), lambda n, t: (0, 0, 0)),
                pl.BlockSpec((64, 1), lambda n, t: (0, 0)),
                pl.BlockSpec((32, 64), lambda n, t: (0, 0)),
                pl.BlockSpec((32, 1), lambda n, t: (0, 0)),
                pl.BlockSpec((5, 3, 160), lambda n, t: (0, 0, 0)),
                pl.BlockSpec((3, 1), lambda n, t: (0, 0)),
            ],
            out_specs=pl.BlockSpec((1, 3, tile_h * wb),
                                   lambda n, t: (n, 0, t)),
        ),
        compiler_params=pltpu.CompilerParams(
            dimension_semantics=("parallel", "parallel"),
            vmem_limit_bytes=vmem_limit),
    )(xk, xk, w1t, b1r, w2t, b2r, w3t, b3r)

    # contiguous reshape + tiny slice on the 3-channel output (already NCHW)
    out = out_flat.reshape(N, 3, num_tiles * tile_h, wb)
    return out[:, :, :H, :W]


srcnn_forward = jax.jit(srcnn_forward_pallas, static_argnames=("compute_dtype",))


def init_srcnn_params(key):
    def conv_init(k, ksize, cin, cout):
        wkey, bkey = jax.random.split(k)
        fan_in = cin * ksize * ksize
        bound = 1.0 / (fan_in ** 0.5)
        w = jax.random.uniform(
            wkey, (ksize, ksize, cin, cout), jnp.float32, -bound, bound)
        b = jax.random.uniform(bkey, (cout,), jnp.float32, -bound, bound)
        return w, b

    k1, k2, k3 = jax.random.split(key, 3)
    return {
        "conv1": conv_init(k1, 9, 3, 64),
        "conv2": conv_init(k2, 1, 64, 32),
        "conv3": conv_init(k3, 5, 32, 3),
    }


def _reference_forward(params, x_nchw, compute_dtype=jnp.float32):
    """Pure-XLA reference (lax.conv, NCHW/OIHW) with matching operand casts."""
    def conv(x, w_hwio, b, pad):
        y = lax.conv_general_dilated(
            x.astype(compute_dtype),
            jnp.transpose(w_hwio, (3, 2, 0, 1)).astype(compute_dtype),
            window_strides=(1, 1),
            padding=((pad, pad), (pad, pad)),
            dimension_numbers=("NCHW", "OIHW", "NCHW"),
            preferred_element_type=jnp.float32)
        return y + b[None, :, None, None]

    w1, b1 = params["conv1"]
    w2, b2 = params["conv2"]
    w3, b3 = params["conv3"]
    h = jax.nn.relu(conv(x_nchw.astype(jnp.float32), w1, b1, 4))
    h = jax.nn.relu(conv(h, w2, b2, 0))
    return conv(h, w3, b3, 2)


if __name__ == "__main__":
    key = jax.random.PRNGKey(0)
    pkey, xkey = jax.random.split(key)
    params = init_srcnn_params(pkey)
    x = jax.random.normal(xkey, (2, 3, 16, 16), dtype=jnp.float32)

    # 1) exact PyTorch (f32) semantics
    out32 = jax.block_until_ready(
        srcnn_forward(params, x, compute_dtype=jnp.float32))
    ref32 = jax.block_until_ready(_reference_forward(params, x, jnp.float32))
    assert out32.shape == (2, 3, 16, 16), out32.shape
    err32 = float(jnp.max(jnp.abs(out32 - ref32)))
    assert err32 < 1e-3, f"f32 max abs error vs reference: {err32}"

    # 2) auto path (bf16 MXU operands on v6e/v7x) vs matched-cast reference
    cdt = _auto_compute_dtype()
    out_a = jax.block_until_ready(srcnn_forward(params, x, compute_dtype=cdt))
    ref_a = jax.block_until_ready(_reference_forward(params, x, cdt))
    err_a = float(jnp.max(jnp.abs(out_a - ref_a)))
    assert err_a < 2e-3, f"{cdt} max abs error vs matched reference: {err_a}"

    print("KERNEL_OK")
</pallas_src>

<mosaic_0001>
module attributes {stable_mosaic.version = 11 : i64} {
  func.func @_srcnn_fused_kernel(%arg0: i32, %arg1: i32, %arg2: memref<1x16x27x128xf32, #tpu.memory_space<vmem>>, %arg3: memref<1x16x27x128xf32, #tpu.memory_space<vmem>>, %arg4: memref<9x64x27xf32, #tpu.memory_space<vmem>>, %arg5: memref<64x1xf32, #tpu.memory_space<vmem>>, %arg6: memref<32x64xf32, #tpu.memory_space<vmem>>, %arg7: memref<32x1xf32, #tpu.memory_space<vmem>>, %arg8: memref<5x3x160xf32, #tpu.memory_space<vmem>>, %arg9: memref<3x1xf32, #tpu.memory_space<vmem>>, %arg10: memref<1x3x2048xf32, #tpu.memory_space<vmem>>) attributes {dimension_semantics = [#tpu.dimension_semantics<parallel>, #tpu.dimension_semantics<parallel>], iteration_bounds = array<i64: 2, 1>, scalar_prefetch = 0 : i64, scratch_operands = 0 : i64, tpu.core_type = #tpu.core_type<tc>, window_params = [{transform_indices = @transform_0, window_bounds = array<i64: 1, 16, 27, 128>}, {transform_indices = @transform_1, window_bounds = array<i64: 1, 16, 27, 128>}, {pipeline_mode = #tpu.pipeline_mode<synchronous>, transform_indices = @transform_2, window_bounds = array<i64: 9, 64, 27>}, {pipeline_mode = #tpu.pipeline_mode<synchronous>, transform_indices = @transform_3, window_bounds = array<i64: 64, 1>}, {pipeline_mode = #tpu.pipeline_mode<synchronous>, transform_indices = @transform_4, window_bounds = array<i64: 32, 64>}, {pipeline_mode = #tpu.pipeline_mode<synchronous>, transform_indices = @transform_5, window_bounds = array<i64: 32, 1>}, {pipeline_mode = #tpu.pipeline_mode<synchronous>, transform_indices = @transform_6, window_bounds = array<i64: 5, 3, 160>}, {pipeline_mode = #tpu.pipeline_mode<synchronous>, transform_indices = @transform_7, window_bounds = array<i64: 3, 1>}, {transform_indices = @transform_8, window_bounds = array<i64: 1, 3, 2048>}]} {
    %c0 = arith.constant 0 : index
    %c0_0 = arith.constant 0 : index
    %c0_1 = arith.constant 0 : index
    %c0_2 = arith.constant 0 : index
    %0 = vector.load %arg2[%c0, %c0_0, %c0_1, %c0_2] : memref<1x16x27x128xf32, #tpu.memory_space<vmem>>, vector<1x1x27x128xf32>
    %1 = vector.shape_cast %0 : vector<1x1x27x128xf32> to vector<27x128xf32>
    %c0_3 = arith.constant 0 : index
    %c1 = arith.constant 1 : index
    %c0_4 = arith.constant 0 : index
    %c0_5 = arith.constant 0 : index
    %2 = vector.load %arg2[%c0_3, %c1, %c0_4, %c0_5] : memref<1x16x27x128xf32, #tpu.memory_space<vmem>>, vector<1x1x27x128xf32>
    %3 = vector.shape_cast %2 : vector<1x1x27x128xf32> to vector<27x128xf32>
    %c0_6 = arith.constant 0 : index
    %c2 = arith.constant 2 : index
    %c0_7 = arith.constant 0 : index
    %c0_8 = arith.constant 0 : index
    %4 = vector.load %arg2[%c0_6, %c2, %c0_7, %c0_8] : memref<1x16x27x128xf32, #tpu.memory_space<vmem>>, vector<1x1x27x128xf32>
    %5 = vector.shape_cast %4 : vector<1x1x27x128xf32> to vector<27x128xf32>
    %c0_9 = arith.constant 0 : index
    %c3 = arith.constant 3 : index
    %c0_10 = arith.constant 0 : index
    %c0_11 = arith.constant 0 : index
    %6 = vector.load %arg2[%c0_9, %c3, %c0_10, %c0_11] : memref<1x16x27x128xf32, #tpu.memory_space<vmem>>, vector<1x1x27x128xf32>
    %7 = vector.shape_cast %6 : vector<1x1x27x128xf32> to vector<27x128xf32>
    %c0_12 = arith.constant 0 : index
    %c4 = arith.constant 4 : index
    %c0_13 = arith.constant 0 : index
    %c0_14 = arith.constant 0 : index
    %8 = vector.load %arg2[%c0_12, %c4, %c0_13, %c0_14] : memref<1x16x27x128xf32, #tpu.memory_space<vmem>>, vector<1x1x27x128xf32>
    %9 = vector.shape_cast %8 : vector<1x1x27x128xf32> to vector<27x128xf32>
    %c0_15 = arith.constant 0 : index
    %c5 = arith.constant 5 : index
    %c0_16 = arith.constant 0 : index
    %c0_17 = arith.constant 0 : index
    %10 = vector.load %arg2[%c0_15, %c5, %c0_16, %c0_17] : memref<1x16x27x128xf32, #tpu.memory_space<vmem>>, vector<1x1x27x128xf32>
    %11 = vector.shape_cast %10 : vector<1x1x27x128xf32> to vector<27x128xf32>
    %c0_18 = arith.constant 0 : index
    %c6 = arith.constant 6 : index
    %c0_19 = arith.constant 0 : index
    %c0_20 = arith.constant 0 : index
    %12 = vector.load %arg2[%c0_18, %c6, %c0_19, %c0_20] : memref<1x16x27x128xf32, #tpu.memory_space<vmem>>, vector<1x1x27x128xf32>
    %13 = vector.shape_cast %12 : vector<1x1x27x128xf32> to vector<27x128xf32>
    %c0_21 = arith.constant 0 : index
    %c7 = arith.constant 7 : index
    %c0_22 = arith.constant 0 : index
    %c0_23 = arith.constant 0 : index
    %14 = vector.load %arg2[%c0_21, %c7, %c0_22, %c0_23] : memref<1x16x27x128xf32, #tpu.memory_space<vmem>>, vector<1x1x27x128xf32>
    %15 = vector.shape_cast %14 : vector<1x1x27x128xf32> to vector<27x128xf32>
    %c0_24 = arith.constant 0 : index
    %c8 = arith.constant 8 : index
    %c0_25 = arith.constant 0 : index
    %c0_26 = arith.constant 0 : index
    %16 = vector.load %arg2[%c0_24, %c8, %c0_25, %c0_26] : memref<1x16x27x128xf32, #tpu.memory_space<vmem>>, vector<1x1x27x128xf32>
    %17 = vector.shape_cast %16 : vector<1x1x27x128xf32> to vector<27x128xf32>
    %c0_27 = arith.constant 0 : index
    %c9 = arith.constant 9 : index
    %c0_28 = arith.constant 0 : index
    %c0_29 = arith.constant 0 : index
    %18 = vector.load %arg2[%c0_27, %c9, %c0_28, %c0_29] : memref<1x16x27x128xf32, #tpu.memory_space<vmem>>, vector<1x1x27x128xf32>
    %19 = vector.shape_cast %18 : vector<1x1x27x128xf32> to vector<27x128xf32>
    %c0_30 = arith.constant 0 : index
    %c10 = arith.constant 10 : index
    %c0_31 = arith.constant 0 : index
    %c0_32 = arith.constant 0 : index
    %20 = vector.load %arg2[%c0_30, %c10, %c0_31, %c0_32] : memref<1x16x27x128xf32, #tpu.memory_space<vmem>>, vector<1x1x27x128xf32>
    %21 = vector.shape_cast %20 : vector<1x1x27x128xf32> to vector<27x128xf32>
    %c0_33 = arith.constant 0 : index
    %c11 = arith.constant 11 : index
    %c0_34 = arith.constant 0 : index
    %c0_35 = arith.constant 0 : index
    %22 = vector.load %arg2[%c0_33, %c11, %c0_34, %c0_35] : memref<1x16x27x128xf32, #tpu.memory_space<vmem>>, vector<1x1x27x128xf32>
    %23 = vector.shape_cast %22 : vector<1x1x27x128xf32> to vector<27x128xf32>
    %c0_36 = arith.constant 0 : index
    %c12 = arith.constant 12 : index
    %c0_37 = arith.constant 0 : index
    %c0_38 = arith.constant 0 : index
    %24 = vector.load %arg2[%c0_36, %c12, %c0_37, %c0_38] : memref<1x16x27x128xf32, #tpu.memory_space<vmem>>, vector<1x1x27x128xf32>
    %25 = vector.shape_cast %24 : vector<1x1x27x128xf32> to vector<27x128xf32>
    %c0_39 = arith.constant 0 : index
    %c13 = arith.constant 13 : index
    %c0_40 = arith.constant 0 : index
    %c0_41 = arith.constant 0 : index
    %26 = vector.load %arg2[%c0_39, %c13, %c0_40, %c0_41] : memref<1x16x27x128xf32, #tpu.memory_space<vmem>>, vector<1x1x27x128xf32>
    %27 = vector.shape_cast %26 : vector<1x1x27x128xf32> to vector<27x128xf32>
    %c0_42 = arith.constant 0 : index
    %c14 = arith.constant 14 : index
    %c0_43 = arith.constant 0 : index
    %c0_44 = arith.constant 0 : index
    %28 = vector.load %arg2[%c0_42, %c14, %c0_43, %c0_44] : memref<1x16x27x128xf32, #tpu.memory_space<vmem>>, vector<1x1x27x128xf32>
    %29 = vector.shape_cast %28 : vector<1x1x27x128xf32> to vector<27x128xf32>
    %c0_45 = arith.constant 0 : index
    %c15 = arith.constant 15 : index
    %c0_46 = arith.constant 0 : index
    %c0_47 = arith.constant 0 : index
    %30 = vector.load %arg2[%c0_45, %c15, %c0_46, %c0_47] : memref<1x16x27x128xf32, #tpu.memory_space<vmem>>, vector<1x1x27x128xf32>
    %31 = vector.shape_cast %30 : vector<1x1x27x128xf32> to vector<27x128xf32>
    %c0_48 = arith.constant 0 : index
    %c0_49 = arith.constant 0 : index
    %c0_50 = arith.constant 0 : index
    %c0_51 = arith.constant 0 : index
    %32 = vector.load %arg3[%c0_48, %c0_49, %c0_50, %c0_51] : memref<1x16x27x128xf32, #tpu.memory_space<vmem>>, vector<1x1x27x128xf32>
    %33 = vector.shape_cast %32 : vector<1x1x27x128xf32> to vector<27x128xf32>
    %c0_52 = arith.constant 0 : index
    %c1_53 = arith.constant 1 : index
    %c0_54 = arith.constant 0 : index
    %c0_55 = arith.constant 0 : index
    %34 = vector.load %arg3[%c0_52, %c1_53, %c0_54, %c0_55] : memref<1x16x27x128xf32, #tpu.memory_space<vmem>>, vector<1x1x27x128xf32>
    %35 = vector.shape_cast %34 : vector<1x1x27x128xf32> to vector<27x128xf32>
    %c0_56 = arith.constant 0 : index
    %c2_57 = arith.constant 2 : index
    %c0_58 = arith.constant 0 : index
    %c0_59 = arith.constant 0 : index
    %36 = vector.load %arg3[%c0_56, %c2_57, %c0_58, %c0_59] : memref<1x16x27x128xf32, #tpu.memory_space<vmem>>, vector<1x1x27x128xf32>
    %37 = vector.shape_cast %36 : vector<1x1x27x128xf32> to vector<27x128xf32>
    %c0_60 = arith.constant 0 : index
    %c3_61 = arith.constant 3 : index
    %c0_62 = arith.constant 0 : index
    %c0_63 = arith.constant 0 : index
    %38 = vector.load %arg3[%c0_60, %c3_61, %c0_62, %c0_63] : memref<1x16x27x128xf32, #tpu.memory_space<vmem>>, vector<1x1x27x128xf32>
    %39 = vector.shape_cast %38 : vector<1x1x27x128xf32> to vector<27x128xf32>
    %c0_64 = arith.constant 0 : index
    %c4_65 = arith.constant 4 : index
    %c0_66 = arith.constant 0 : index
    %c0_67 = arith.constant 0 : index
    %40 = vector.load %arg3[%c0_64, %c4_65, %c0_66, %c0_67] : memref<1x16x27x128xf32, #tpu.memory_space<vmem>>, vector<1x1x27x128xf32>
    %41 = vector.shape_cast %40 : vector<1x1x27x128xf32> to vector<27x128xf32>
    %c0_68 = arith.constant 0 : index
    %c5_69 = arith.constant 5 : index
    %c0_70 = arith.constant 0 : index
    %c0_71 = arith.constant 0 : index
    %42 = vector.load %arg3[%c0_68, %c5_69, %c0_70, %c0_71] : memref<1x16x27x128xf32, #tpu.memory_space<vmem>>, vector<1x1x27x128xf32>
    %43 = vector.shape_cast %42 : vector<1x1x27x128xf32> to vector<27x128xf32>
    %c0_72 = arith.constant 0 : index
    %c6_73 = arith.constant 6 : index
    %c0_74 = arith.constant 0 : index
    %c0_75 = arith.constant 0 : index
    %44 = vector.load %arg3[%c0_72, %c6_73, %c0_74, %c0_75] : memref<1x16x27x128xf32, #tpu.memory_space<vmem>>, vector<1x1x27x128xf32>
    %45 = vector.shape_cast %44 : vector<1x1x27x128xf32> to vector<27x128xf32>
    %c0_76 = arith.constant 0 : index
    %c7_77 = arith.constant 7 : index
    %c0_78 = arith.constant 0 : index
    %c0_79 = arith.constant 0 : index
    %46 = vector.load %arg3[%c0_76, %c7_77, %c0_78, %c0_79] : memref<1x16x27x128xf32, #tpu.memory_space<vmem>>, vector<1x1x27x128xf32>
    %47 = vector.shape_cast %46 : vector<1x1x27x128xf32> to vector<27x128xf32>
    %c0_80 = arith.constant 0 : index
    %c8_81 = arith.constant 8 : index
    %c0_82 = arith.constant 0 : index
    %c0_83 = arith.constant 0 : index
    %48 = vector.load %arg3[%c0_80, %c8_81, %c0_82, %c0_83] : memref<1x16x27x128xf32, #tpu.memory_space<vmem>>, vector<1x1x27x128xf32>
    %49 = vector.shape_cast %48 : vector<1x1x27x128xf32> to vector<27x128xf32>
    %c0_84 = arith.constant 0 : index
    %c9_85 = arith.constant 9 : index
    %c0_86 = arith.constant 0 : index
    %c0_87 = arith.constant 0 : index
    %50 = vector.load %arg3[%c0_84, %c9_85, %c0_86, %c0_87] : memref<1x16x27x128xf32, #tpu.memory_space<vmem>>, vector<1x1x27x128xf32>
    %51 = vector.shape_cast %50 : vector<1x1x27x128xf32> to vector<27x128xf32>
    %c0_88 = arith.constant 0 : index
    %c10_89 = arith.constant 10 : index
    %c0_90 = arith.constant 0 : index
    %c0_91 = arith.constant 0 : index
    %52 = vector.load %arg3[%c0_88, %c10_89, %c0_90, %c0_91] : memref<1x16x27x128xf32, #tpu.memory_space<vmem>>, vector<1x1x27x128xf32>
    %53 = vector.shape_cast %52 : vector<1x1x27x128xf32> to vector<27x128xf32>
    %c0_92 = arith.constant 0 : index
    %c11_93 = arith.constant 11 : index
    %c0_94 = arith.constant 0 : index
    %c0_95 = arith.constant 0 : index
    %54 = vector.load %arg3[%c0_92, %c11_93, %c0_94, %c0_95] : memref<1x16x27x128xf32, #tpu.memory_space<vmem>>, vector<1x1x27x128xf32>
    %55 = vector.shape_cast %54 : vector<1x1x27x128xf32> to vector<27x128xf32>
    %56 = tpu.concatenate %1, %3, %5, %7, %9, %11, %13, %15, %17, %19, %21, %23, %25, %27, %29, %31 in 1 : vector<27x128xf32>, vector<27x128xf32>, vector<27x128xf32>, vector<27x128xf32>, vector<27x128xf32>, vector<27x128xf32>, vector<27x128xf32>, vector<27x128xf32>, vector<27x128xf32>, vector<27x128xf32>, vector<27x128xf32>, vector<27x128xf32>, vector<27x128xf32>, vector<27x128xf32>, vector<27x128xf32>, vector<27x128xf32> -> vector<27x2048xf32>
    %57 = tpu.concatenate %33, %35, %37, %39, %41, %43, %45, %47, %49, %51, %53, %55 in 1 : vector<27x128xf32>, vector<27x128xf32>, vector<27x128xf32>, vector<27x128xf32>, vector<27x128xf32>, vector<27x128xf32>, vector<27x128xf32>, vector<27x128xf32>, vector<27x128xf32>, vector<27x128xf32>, vector<27x128xf32>, vector<27x128xf32> -> vector<27x1536xf32>
    %58 = tpu.concatenate %56, %57 in 1 : vector<27x2048xf32>, vector<27x1536xf32> -> vector<27x3584xf32>
    %cst = arith.constant 0.000000e+00 : f32
    %59 = vector.broadcast %cst : f32 to vector<64x2560xf32>
    %c0_96 = arith.constant 0 : index
    %c0_97 = arith.constant 0 : index
    %c0_98 = arith.constant 0 : index
    %60 = vector.load %arg4[%c0_96, %c0_97, %c0_98] : memref<9x64x27xf32, #tpu.memory_space<vmem>>, vector<1x64x27xf32>
    %61 = vector.shape_cast %60 : vector<1x64x27xf32> to vector<64x27xf32>
    %62 = vector.extract_strided_slice %58 {offsets = [0, 0], sizes = [27, 2560], strides = [1, 1]} : vector<27x3584xf32> to vector<27x2560xf32>
    %cst_99 = arith.constant dense<0.000000e+00> : vector<64x2560xf32>
    %63 = tpu.matmul %61, %62, %cst_99 {dimension_numbers = #tpu.dot_dimension_numbers<[1], [0], [0], [1], [0, 0, 1, 1], [], []>} : vector<64x27xf32>, vector<27x2560xf32>, vector<64x2560xf32> -> vector<64x2560xf32>
    %64 = arith.addf %59, %63 : vector<64x2560xf32>
    %c1_100 = arith.constant 1 : index
    %c0_101 = arith.constant 0 : index
    %c0_102 = arith.constant 0 : index
    %65 = vector.load %arg4[%c1_100, %c0_101, %c0_102] : memref<9x64x27xf32, #tpu.memory_space<vmem>>, vector<1x64x27xf32>
    %66 = vector.shape_cast %65 : vector<1x64x27xf32> to vector<64x27xf32>
    %67 = vector.extract_strided_slice %58 {offsets = [0, 128], sizes = [27, 2560], strides = [1, 1]} : vector<27x3584xf32> to vector<27x2560xf32>
    %cst_103 = arith.constant dense<0.000000e+00> : vector<64x2560xf32>
    %68 = tpu.matmul %66, %67, %cst_103 {dimension_numbers = #tpu.dot_dimension_numbers<[1], [0], [0], [1], [0, 0, 1, 1], [], []>} : vector<64x27xf32>, vector<27x2560xf32>, vector<64x2560xf32> -> vector<64x2560xf32>
    %69 = arith.addf %64, %68 : vector<64x2560xf32>
    %c2_104 = arith.constant 2 : index
    %c0_105 = arith.constant 0 : index
    %c0_106 = arith.constant 0 : index
    %70 = vector.load %arg4[%c2_104, %c0_105, %c0_106] : memref<9x64x27xf32, #tpu.memory_space<vmem>>, vector<1x64x27xf32>
    %71 = vector.shape_cast %70 : vector<1x64x27xf32> to vector<64x27xf32>
    %72 = vector.extract_strided_slice %58 {offsets = [0, 256], sizes = [27, 2560], strides = [1, 1]} : vector<27x3584xf32> to vector<27x2560xf32>
    %cst_107 = arith.constant dense<0.000000e+00> : vector<64x2560xf32>
    %73 = tpu.matmul %71, %72, %cst_107 {dimension_numbers = #tpu.dot_dimension_numbers<[1], [0], [0], [1], [0, 0, 1, 1], [], []>} : vector<64x27xf32>, vector<27x2560xf32>, vector<64x2560xf32> -> vector<64x2560xf32>
    %74 = arith.addf %69, %73 : vector<64x2560xf32>
    %c3_108 = arith.constant 3 : index
    %c0_109 = arith.constant 0 : index
    %c0_110 = arith.constant 0 : index
    %75 = vector.load %arg4[%c3_108, %c0_109, %c0_110] : memref<9x64x27xf32, #tpu.memory_space<vmem>>, vector<1x64x27xf32>
    %76 = vector.shape_cast %75 : vector<1x64x27xf32> to vector<64x27xf32>
    %77 = vector.extract_strided_slice %58 {offsets = [0, 384], sizes = [27, 2560], strides = [1, 1]} : vector<27x3584xf32> to vector<27x2560xf32>
    %cst_111 = arith.constant dense<0.000000e+00> : vector<64x2560xf32>
    %78 = tpu.matmul %76, %77, %cst_111 {dimension_numbers = #tpu.dot_dimension_numbers<[1], [0], [0], [1], [0, 0, 1, 1], [], []>} : vector<64x27xf32>, vector<27x2560xf32>, vector<64x2560xf32> -> vector<64x2560xf32>
    %79 = arith.addf %74, %78 : vector<64x2560xf32>
    %c4_112 = arith.constant 4 : index
    %c0_113 = arith.constant 0 : index
    %c0_114 = arith.constant 0 : index
    %80 = vector.load %arg4[%c4_112, %c0_113, %c0_114] : memref<9x64x27xf32, #tpu.memory_space<vmem>>, vector<1x64x27xf32>
    %81 = vector.shape_cast %80 : vector<1x64x27xf32> to vector<64x27xf32>
    %82 = vector.extract_strided_slice %58 {offsets = [0, 512], sizes = [27, 2560], strides = [1, 1]} : vector<27x3584xf32> to vector<27x2560xf32>
    %cst_115 = arith.constant dense<0.000000e+00> : vector<64x2560xf32>
    %83 = tpu.matmul %81, %82, %cst_115 {dimension_numbers = #tpu.dot_dimension_numbers<[1], [0], [0], [1], [0, 0, 1, 1], [], []>} : vector<64x27xf32>, vector<27x2560xf32>, vector<64x2560xf32> -> vector<64x2560xf32>
    %84 = arith.addf %79, %83 : vector<64x2560xf32>
    %c5_116 = arith.constant 5 : index
    %c0_117 = arith.constant 0 : index
    %c0_118 = arith.constant 0 : index
    %85 = vector.load %arg4[%c5_116, %c0_117, %c0_118] : memref<9x64x27xf32, #tpu.memory_space<vmem>>, vector<1x64x27xf32>
    %86 = vector.shape_cast %85 : vector<1x64x27xf32> to vector<64x27xf32>
    %87 = vector.extract_strided_slice %58 {offsets = [0, 640], sizes = [27, 2560], strides = [1, 1]} : vector<27x3584xf32> to vector<27x2560xf32>
    %cst_119 = arith.constant dense<0.000000e+00> : vector<64x2560xf32>
    %88 = tpu.matmul %86, %87, %cst_119 {dimension_numbers = #tpu.dot_dimension_numbers<[1], [0], [0], [1], [0, 0, 1, 1], [], []>} : vector<64x27xf32>, vector<27x2560xf32>, vector<64x2560xf32> -> vector<64x2560xf32>
    %89 = arith.addf %84, %88 : vector<64x2560xf32>
    %c6_120 = arith.constant 6 : index
    %c0_121 = arith.constant 0 : index
    %c0_122 = arith.constant 0 : index
    %90 = vector.load %arg4[%c6_120, %c0_121, %c0_122] : memref<9x64x27xf32, #tpu.memory_space<vmem>>, vector<1x64x27xf32>
    %91 = vector.shape_cast %90 : vector<1x64x27xf32> to vector<64x27xf32>
    %92 = vector.extract_strided_slice %58 {offsets = [0, 768], sizes = [27, 2560], strides = [1, 1]} : vector<27x3584xf32> to vector<27x2560xf32>
    %cst_123 = arith.constant dense<0.000000e+00> : vector<64x2560xf32>
    %93 = tpu.matmul %91, %92, %cst_123 {dimension_numbers = #tpu.dot_dimension_numbers<[1], [0], [0], [1], [0, 0, 1, 1], [], []>} : vector<64x27xf32>, vector<27x2560xf32>, vector<64x2560xf32> -> vector<64x2560xf32>
    %94 = arith.addf %89, %93 : vector<64x2560xf32>
    %c7_124 = arith.constant 7 : index
    %c0_125 = arith.constant 0 : index
    %c0_126 = arith.constant 0 : index
    %95 = vector.load %arg4[%c7_124, %c0_125, %c0_126] : memref<9x64x27xf32, #tpu.memory_space<vmem>>, vector<1x64x27xf32>
    %96 = vector.shape_cast %95 : vector<1x64x27xf32> to vector<64x27xf32>
    %97 = vector.extract_strided_slice %58 {offsets = [0, 896], sizes = [27, 2560], strides = [1, 1]} : vector<27x3584xf32> to vector<27x2560xf32>
    %cst_127 = arith.constant dense<0.000000e+00> : vector<64x2560xf32>
    %98 = tpu.matmul %96, %97, %cst_127 {dimension_numbers = #tpu.dot_dimension_numbers<[1], [0], [0], [1], [0, 0, 1, 1], [], []>} : vector<64x27xf32>, vector<27x2560xf32>, vector<64x2560xf32> -> vector<64x2560xf32>
    %99 = arith.addf %94, %98 : vector<64x2560xf32>
    %c8_128 = arith.constant 8 : index
    %c0_129 = arith.constant 0 : index
    %c0_130 = arith.constant 0 : index
    %100 = vector.load %arg4[%c8_128, %c0_129, %c0_130] : memref<9x64x27xf32, #tpu.memory_space<vmem>>, vector<1x64x27xf32>
    %101 = vector.shape_cast %100 : vector<1x64x27xf32> to vector<64x27xf32>
    %102 = vector.extract_strided_slice %58 {offsets = [0, 1024], sizes = [27, 2560], strides = [1, 1]} : vector<27x3584xf32> to vector<27x2560xf32>
    %cst_131 = arith.constant dense<0.000000e+00> : vector<64x2560xf32>
    %103 = tpu.matmul %101, %102, %cst_131 {dimension_numbers = #tpu.dot_dimension_numbers<[1], [0], [0], [1], [0, 0, 1, 1], [], []>} : vector<64x27xf32>, vector<27x2560xf32>, vector<64x2560xf32> -> vector<64x2560xf32>
    %104 = arith.addf %99, %103 : vector<64x2560xf32>
    %c0_132 = arith.constant 0 : index
    %c0_133 = arith.constant 0 : index
    %105 = vector.load %arg5[%c0_132, %c0_133] : memref<64x1xf32, #tpu.memory_space<vmem>>, vector<64x1xf32>
    %106 = vector.broadcast %105 : vector<64x1xf32> to vector<64x2560xf32>
    %107 = arith.addf %104, %106 : vector<64x2560xf32>
    %cst_134 = arith.constant 0.000000e+00 : f32
    %108 = vector.broadcast %cst_134 : f32 to vector<64x2560xf32>
    %109 = arith.maximumf %107, %108 : vector<64x2560xf32>
    %c0_135 = arith.constant 0 : index
    %c0_136 = arith.constant 0 : index
    %110 = vector.load %arg6[%c0_135, %c0_136] : memref<32x64xf32, #tpu.memory_space<vmem>>, vector<32x64xf32>
    %cst_137 = arith.constant dense<0.000000e+00> : vector<32x2560xf32>
    %111 = tpu.matmul %110, %109, %cst_137 {dimension_numbers = #tpu.dot_dimension_numbers<[1], [0], [0], [1], [0, 0, 1, 1], [], []>} : vector<32x64xf32>, vector<64x2560xf32>, vector<32x2560xf32> -> vector<32x2560xf32>
    %c0_138 = arith.constant 0 : index
    %c0_139 = arith.constant 0 : index
    %112 = vector.load %arg7[%c0_138, %c0_139] : memref<32x1xf32, #tpu.memory_space<vmem>>, vector<32x1xf32>
    %113 = vector.broadcast %112 : vector<32x1xf32> to vector<32x2560xf32>
    %114 = arith.addf %111, %113 : vector<32x2560xf32>
    %cst_140 = arith.constant 0.000000e+00 : f32
    %115 = vector.broadcast %cst_140 : f32 to vector<32x2560xf32>
    %116 = arith.maximumf %114, %115 : vector<32x2560xf32>
    %117 = tpu.iota {dimensions = array<i32: 1>} : vector<1x2560xi32>
    %c16_i32 = arith.constant 16 : i32
    %118 = arith.muli %arg1, %c16_i32 : i32
    %c2_i32 = arith.constant 2 : i32
    %119 = arith.subi %c2_i32, %118 : i32
    %c128_i32 = arith.constant 128 : i32
    %120 = arith.muli %119, %c128_i32 : i32
    %c16_i32_141 = arith.constant 16 : i32
    %121 = arith.muli %arg1, %c16_i32_141 : i32
    %c18_i32 = arith.constant 18 : i32
    %122 = arith.subi %c18_i32, %121 : i32
    %c128_i32_142 = arith.constant 128 : i32
    %123 = arith.muli %122, %c128_i32_142 : i32
    %124 = tpu.iota {dimensions = array<i32: 1>} : vector<1x128xi32>
    %125 = tpu.concatenate %124, %124, %124, %124, %124, %124, %124, %124, %124, %124, %124, %124, %124, %124, %124, %124, %124, %124, %124, %124 in 1 : vector<1x128xi32>, vector<1x128xi32>, vector<1x128xi32>, vector<1x128xi32>, vector<1x128xi32>, vector<1x128xi32>, vector<1x128xi32>, vector<1x128xi32>, vector<1x128xi32>, vector<1x128xi32>, vector<1x128xi32>, vector<1x128xi32>, vector<1x128xi32>, vector<1x128xi32>, vector<1x128xi32>, vector<1x128xi32>, vector<1x128xi32>, vector<1x128xi32>, vector<1x128xi32>, vector<1x128xi32> -> vector<1x2560xi32>
    %126 = vector.broadcast %120 : i32 to vector<1x2560xi32>
    %127 = arith.cmpi sge, %117, %126 : vector<1x2560xi32>
    %128 = vector.broadcast %123 : i32 to vector<1x2560xi32>
    %129 = arith.cmpi slt, %117, %128 : vector<1x2560xi32>
    %130 = arith.andi %127, %129 : vector<1x2560xi1>
    %c2_i32_143 = arith.constant 2 : i32
    %131 = vector.broadcast %c2_i32_143 : i32 to vector<1x2560xi32>
    %132 = arith.cmpi sge, %125, %131 : vector<1x2560xi32>
    %133 = arith.andi %130, %132 : vector<1x2560xi1>
    %c18_i32_144 = arith.constant 18 : i32
    %134 = vector.broadcast %c18_i32_144 : i32 to vector<1x2560xi32>
    %135 = arith.cmpi slt, %125, %134 : vector<1x2560xi32>
    %136 = arith.andi %133, %135 : vector<1x2560xi1>
    %cst_145 = arith.constant 0.000000e+00 : f32
    %137 = vector.shape_cast %136 : vector<1x2560xi1> to vector<1x2560xi1>
    %138 = vector.broadcast %137 : vector<1x2560xi1> to vector<32x2560xi1>
    %139 = vector.broadcast %cst_145 : f32 to vector<32x2560xf32>
    %140 = arith.select %138, %116, %139 : vector<32x2560xi1>, vector<32x2560xf32>
    %cst_146 = arith.constant 0.000000e+00 : f32
    %141 = vector.broadcast %cst_146 : f32 to vector<32x128xf32>
    %142 = tpu.concatenate %140, %141 in 1 : vector<32x2560xf32>, vector<32x128xf32> -> vector<32x2688xf32>
    %143 = vector.extract_strided_slice %142 {offsets = [0, 0], sizes = [32, 2560], strides = [1, 1]} : vector<32x2688xf32> to vector<32x2560xf32>
    %144 = vector.extract_strided_slice %142 {offsets = [0, 1], sizes = [32, 2560], strides = [1, 1]} : vector<32x2688xf32> to vector<32x2560xf32>
    %145 = vector.extract_strided_slice %142 {offsets = [0, 2], sizes = [32, 2560], strides = [1, 1]} : vector<32x2688xf32> to vector<32x2560xf32>
    %146 = vector.extract_strided_slice %142 {offsets = [0, 3], sizes = [32, 2560], strides = [1, 1]} : vector<32x2688xf32> to vector<32x2560xf32>
    %147 = vector.extract_strided_slice %142 {offsets = [0, 4], sizes = [32, 2560], strides = [1, 1]} : vector<32x2688xf32> to vector<32x2560xf32>
    %148 = tpu.concatenate %143, %144, %145, %146, %147 in 0 : vector<32x2560xf32>, vector<32x2560xf32>, vector<32x2560xf32>, vector<32x2560xf32>, vector<32x2560xf32> -> vector<160x2560xf32>
    %cst_147 = arith.constant 0.000000e+00 : f32
    %149 = vector.broadcast %cst_147 : f32 to vector<3x2048xf32>
    %c0_148 = arith.constant 0 : index
    %c0_149 = arith.constant 0 : index
    %c0_150 = arith.constant 0 : index
    %150 = vector.load %arg8[%c0_148, %c0_149, %c0_150] : memref<5x3x160xf32, #tpu.memory_space<vmem>>, vector<1x3x160xf32>
    %151 = vector.shape_cast %150 : vector<1x3x160xf32> to vector<3x160xf32>
    %152 = vector.extract_strided_slice %148 {offsets = [0, 0], sizes = [160, 2048], strides = [1, 1]} : vector<160x2560xf32> to vector<160x2048xf32>
    %cst_151 = arith.constant dense<0.000000e+00> : vector<3x2048xf32>
    %153 = tpu.matmul %151, %152, %cst_151 {dimension_numbers = #tpu.dot_dimension_numbers<[1], [0], [0], [1], [0, 0, 1, 1], [], []>} : vector<3x160xf32>, vector<160x2048xf32>, vector<3x2048xf32> -> vector<3x2048xf32>
    %154 = arith.addf %149, %153 : vector<3x2048xf32>
    %c1_152 = arith.constant 1 : index
    %c0_153 = arith.constant 0 : index
    %c0_154 = arith.constant 0 : index
    %155 = vector.load %arg8[%c1_152, %c0_153, %c0_154] : memref<5x3x160xf32, #tpu.memory_space<vmem>>, vector<1x3x160xf32>
    %156 = vector.shape_cast %155 : vector<1x3x160xf32> to vector<3x160xf32>
    %157 = vector.extract_strided_slice %148 {offsets = [0, 128], sizes = [160, 2048], strides = [1, 1]} : vector<160x2560xf32> to vector<160x2048xf32>
    %cst_155 = arith.constant dense<0.000000e+00> : vector<3x2048xf32>
    %158 = tpu.matmul %156, %157, %cst_155 {dimension_numbers = #tpu.dot_dimension_numbers<[1], [0], [0], [1], [0, 0, 1, 1], [], []>} : vector<3x160xf32>, vector<160x2048xf32>, vector<3x2048xf32> -> vector<3x2048xf32>
    %159 = arith.addf %154, %158 : vector<3x2048xf32>
    %c2_156 = arith.constant 2 : index
    %c0_157 = arith.constant 0 : index
    %c0_158 = arith.constant 0 : index
    %160 = vector.load %arg8[%c2_156, %c0_157, %c0_158] : memref<5x3x160xf32, #tpu.memory_space<vmem>>, vector<1x3x160xf32>
    %161 = vector.shape_cast %160 : vector<1x3x160xf32> to vector<3x160xf32>
    %162 = vector.extract_strided_slice %148 {offsets = [0, 256], sizes = [160, 2048], strides = [1, 1]} : vector<160x2560xf32> to vector<160x2048xf32>
    %cst_159 = arith.constant dense<0.000000e+00> : vector<3x2048xf32>
    %163 = tpu.matmul %161, %162, %cst_159 {dimension_numbers = #tpu.dot_dimension_numbers<[1], [0], [0], [1], [0, 0, 1, 1], [], []>} : vector<3x160xf32>, vector<160x2048xf32>, vector<3x2048xf32> -> vector<3x2048xf32>
    %164 = arith.addf %159, %163 : vector<3x2048xf32>
    %c3_160 = arith.constant 3 : index
    %c0_161 = arith.constant 0 : index
    %c0_162 = arith.constant 0 : index
    %165 = vector.load %arg8[%c3_160, %c0_161, %c0_162] : memref<5x3x160xf32, #tpu.memory_space<vmem>>, vector<1x3x160xf32>
    %166 = vector.shape_cast %165 : vector<1x3x160xf32> to vector<3x160xf32>
    %167 = vector.extract_strided_slice %148 {offsets = [0, 384], sizes = [160, 2048], strides = [1, 1]} : vector<160x2560xf32> to vector<160x2048xf32>
    %cst_163 = arith.constant dense<0.000000e+00> : vector<3x2048xf32>
    %168 = tpu.matmul %166, %167, %cst_163 {dimension_numbers = #tpu.dot_dimension_numbers<[1], [0], [0], [1], [0, 0, 1, 1], [], []>} : vector<3x160xf32>, vector<160x2048xf32>, vector<3x2048xf32> -> vector<3x2048xf32>
    %169 = arith.addf %164, %168 : vector<3x2048xf32>
    %c4_164 = arith.constant 4 : index
    %c0_165 = arith.constant 0 : index
    %c0_166 = arith.constant 0 : index
    %170 = vector.load %arg8[%c4_164, %c0_165, %c0_166] : memref<5x3x160xf32, #tpu.memory_space<vmem>>, vector<1x3x160xf32>
    %171 = vector.shape_cast %170 : vector<1x3x160xf32> to vector<3x160xf32>
    %172 = vector.extract_strided_slice %148 {offsets = [0, 512], sizes = [160, 2048], strides = [1, 1]} : vector<160x2560xf32> to vector<160x2048xf32>
    %cst_167 = arith.constant dense<0.000000e+00> : vector<3x2048xf32>
    %173 = tpu.matmul %171, %172, %cst_167 {dimension_numbers = #tpu.dot_dimension_numbers<[1], [0], [0], [1], [0, 0, 1, 1], [], []>} : vector<3x160xf32>, vector<160x2048xf32>, vector<3x2048xf32> -> vector<3x2048xf32>
    %174 = arith.addf %169, %173 : vector<3x2048xf32>
    %c0_168 = arith.constant 0 : index
    %c0_169 = arith.constant 0 : index
    %175 = vector.load %arg9[%c0_168, %c0_169] : memref<3x1xf32, #tpu.memory_space<vmem>>, vector<3x1xf32>
    %176 = vector.broadcast %175 : vector<3x1xf32> to vector<3x2048xf32>
    %177 = arith.addf %174, %176 : vector<3x2048xf32>
    %c0_170 = arith.constant 0 : index
    %c0_171 = arith.constant 0 : index
    %c0_172 = arith.constant 0 : index
    %178 = vector.load %arg10[%c0_170, %c0_171, %c0_172] : memref<1x3x2048xf32, #tpu.memory_space<vmem>>, vector<1x3x2048xf32>
    %179 = vector.shape_cast %178 : vector<1x3x2048xf32> to vector<3x2048xf32>
    %180 = vector.shape_cast %177 : vector<3x2048xf32> to vector<1x3x2048xf32>
    tpu.vector_store %arg10[%c0_170, %c0_171, %c0_172], %180 {strides = array<i32>} : memref<1x3x2048xf32, #tpu.memory_space<vmem>>, vector<1x3x2048xf32>,
    return
  }
  func.func @transform_0(%arg0: i32, %arg1: i32) -> (i32, i32, i32, i32) {
    %c0_i32 = arith.constant 0 : i32
    %c0_i32_0 = arith.constant 0 : i32
    %c0_i32_1 = arith.constant 0 : i32
    return %arg0, %arg1, %c0_i32, %c0_i32_0 : i32, i32, i32, i32
  }
  func.func @transform_1(%arg0: i32, %arg1: i32) -> (i32, i32, i32, i32) {
    %c1_i32 = arith.constant 1 : i32
    %0 = arith.addi %arg1, %c1_i32 : i32
    %c1_i32_0 = arith.constant 1 : i32
    %1 = arith.muli %0, %c1_i32_0 : i32
    %c0_i32 = arith.constant 0 : i32
    %c0_i32_1 = arith.constant 0 : i32
    %c0_i32_2 = arith.constant 0 : i32
    return %arg0, %1, %c0_i32, %c0_i32_1 : i32, i32, i32, i32
  }
  func.func @transform_2(%arg0: i32, %arg1: i32) -> (i32, i32, i32) {
    %c0_i32 = arith.constant 0 : i32
    %c0_i32_0 = arith.constant 0 : i32
    %c0_i32_1 = arith.constant 0 : i32
    %c0_i32_2 = arith.constant 0 : i32
    return %c0_i32, %c0_i32_0, %c0_i32_1 : i32, i32, i32
  }
  func.func @transform_3(%arg0: i32, %arg1: i32) -> (i32, i32) {
    %c0_i32 = arith.constant 0 : i32
    %c0_i32_0 = arith.constant 0 : i32
    %c0_i32_1 = arith.constant 0 : i32
    return %c0_i32, %c0_i32_0 : i32, i32
  }
  func.func @transform_4(%arg0: i32, %arg1: i32) -> (i32, i32) {
    %c0_i32 = arith.constant 0 : i32
    %c0_i32_0 = arith.constant 0 : i32
    %c0_i32_1 = arith.constant 0 : i32
    return %c0_i32, %c0_i32_0 : i32, i32
  }
  func.func @transform_5(%arg0: i32, %arg1: i32) -> (i32, i32) {
    %c0_i32 = arith.constant 0 : i32
    %c0_i32_0 = arith.constant 0 : i32
    %c0_i32_1 = arith.constant 0 : i32
    return %c0_i32, %c0_i32_0 : i32, i32
  }
  func.func @transform_6(%arg0: i32, %arg1: i32) -> (i32, i32, i32) {
    %c0_i32 = arith.constant 0 : i32
    %c0_i32_0 = arith.constant 0 : i32
    %c0_i32_1 = arith.constant 0 : i32
    %c0_i32_2 = arith.constant 0 : i32
    return %c0_i32, %c0_i32_0, %c0_i32_1 : i32, i32, i32
  }
  func.func @transform_7(%arg0: i32, %arg1: i32) -> (i32, i32) {
    %c0_i32 = arith.constant 0 : i32
    %c0_i32_0 = arith.constant 0 : i32
    %c0_i32_1 = arith.constant 0 : i32
    return %c0_i32, %c0_i32_0 : i32, i32
  }
  func.func @transform_8(%arg0: i32, %arg1: i32) -> (i32, i32, i32) {
    %c0_i32 = arith.constant 0 : i32
    %c0_i32_0 = arith.constant 0 : i32
    return %arg0, %c0_i32, %arg1 : i32, i32, i32
  }
}

</mosaic_0001>

<bundles_post_ra>
// kernel: srcnn_forward_pallas.1
= control target key start
LH: loop header
LB: loop body
LE: loop exit
PB: predicated region body
PF: predicated region fallthrough
CT: control target
= control target key end

     0   :  { %s33443_s0 = inlined_call_operand.hbm [shape: f32[2,32,27,128], index: 0, kind: input, shape index: {}, may-alias: {0,1}]   ;;  %s33444_s1 = inlined_call_operand.hbm [shape: f32[2,32,27,128], index: 1, kind: input, shape index: {}, may-alias: {0,1}]   ;;  %s33445_s2 = inlined_call_operand.hbm [shape: f32[9,64,27], index: 2, kind: input, shape index: {}]   ;;  %s33446_s3 = inlined_call_operand.hbm [shape: f32[64,1], index: 3, kind: input, shape index: {}]   ;;  %s33447_s4 = inlined_call_operand.hbm [shape: f32[32,64], index: 4, kind: input, shape index: {}]   ;;  %s33448_s5 = inlined_call_operand.hbm [shape: f32[32,1], index: 5, kind: input, shape index: {}]   ;;  %s33449_s6 = inlined_call_operand.hbm [shape: f32[5,3,160], index: 6, kind: input, shape index: {}]   ;;  %s33450_s7 = inlined_call_operand.hbm [shape: f32[3,1], index: 7, kind: input, shape index: {}]   ;;  %s33451_s8 = inlined_call_operand.hbm [shape: f32[2,3,2048], index: 8, kind: output, shape index: {}]  }
   0x1   :  { %33924 = sst [smem:[#allocation202_spill]] %s33445_s2 }
   0x2   :  { %33925 = sst [smem:[#allocation203_spill]] %s33446_s3 }
   0x3   :  { %33926 = sst [smem:[#allocation204_spill]] %s33447_s4 }
   0x4   :  { %33927 = sst [smem:[#allocation205_spill]] %s33448_s5 }
   0x5   :  { %33928 = sst [smem:[#allocation206_spill]] %s33449_s6 }
   0x6   :  { %33929 = sst [smem:[#allocation207_spill]] %s33451_s8 }
   0x7   :  { %13 = vsyncpa [#allocation3], 0 }
   0x8   :  { %15 = vsyncpa [#allocation3 + $0x1], 0 }
   0x9   :  { %16 = vsyncpa [#allocation6], 0 }
   0xa   :  { %18 = vsyncpa [#allocation6 + $0x1], 0 }
   0xb   :  { %19 = vsyncpa [#allocation9], 0 }
   0xc   :  { %20 = vsyncpa [#allocation12], 0 }
   0xd   :  { %21 = vsyncpa [#allocation15], 0 }
   0xe   :  { %22 = vsyncpa [#allocation4], 0 }
   0xf   :  { %24 = vsyncpa [#allocation4 + $0x1], 0  ;;  %s25485_s27 = smov 0   ;;  %s25487_s28 = smov 0  }
  0x10   :  { %s25489_s29 = smov 0   ;;  %s25491_s30 = smov 0  }
  0x11   :  { %s25493_s9 = smov 0   ;;  %s25495_s10 = smov 0  }
  0x12 LB: > { %33930 = sst [smem:[#allocation24_spill]] %s25412_s30  ;;  %s25516_s11 = sadd.s32 4294967295, %s25420_s10   ;;  %s25420_s10 = sphi %s25495_s10, %s30_s10   ;;  %s25416_s9 = sphi %s25493_s9, %s35000_s9   ;;  %s25412_s30 = sphi %s25491_s30, %s34999_s30   ;;  %s25408_s29 = sphi %s25489_s29, %s34998_s29   ;;  %s25404_s28 = sphi %s25487_s28, %s34997_s28   ;;  %s25400_s27 = sphi %s25485_s27, %s34996_s27  }
  0x13   : > { %p18539_p0 = scmp.ge.s32.totalorder %s25420_s10, 1  ;;  %p33453_p1 = scmp.eq.s32.totalorder %s25516_s11, 0 }
  0x14   : > { %p259_p2 = scmp.lt.s32.totalorder %s25420_s10, 3  ;;  %s25422_s13 = smov [#allocation7]  }
  0x15   : > { %s271_s14 = sshll.u32 %s25422_s13, 4  ;;  %s25423_s16 = smov [#allocation8]   ;;  %s25525_s14 = int_to_ptr.vmem [resolvable:$true] %s271_s14 }
  0x16   : > { %p25521_p3 = pnand %p18539_p0, %p259_p2  ;;  %s284_s17 = sshll.u32 %s25423_s16, 4  ;;  %s25536_s17 = int_to_ptr.vmem [resolvable:$true] %s284_s17 }
  0x17   : > { %s25424_s18 = smov [#allocation11]   ;;  %s33933_s2 = sld [smem:[#allocation202_spill]] }
  0x18   : > { %s33931_s12 = scalar_select %p25521_p3, 1, 0 }
  0x19   : > { %p24169_p4 = pneg %p25521_p3  ;;  %s25538_s19 = sshll.u32 %s25424_s18, 4  ;;  %s311_s19 = int_to_ptr.vmem [resolvable:$true] %s25538_s19 }
  0x1b   : > { %p25532_p6 = pnand %p24169_p4, %p33453_p1 }
  0x1d   : > { %s25089_s22 = scalar_lea.hbm %s33933_s2, 9216  ;;  %p25548_p8 = pneg %p25532_p6 }
  0x1e   : > { %p25090_p7 = scmp.ne.s32.totalorder %s33933_s2, %s25089_s22  ;;  %p25096_p11 = scmp.lt.u32.totalorder %s25089_s22, %s33933_s2 }
  0x20   : > { %p25092_p9 = pnand %p25548_p8, %p25090_p7 }
  0x22   : > { %p25093_p10 = pneg %p25092_p9 }
  0x24   : > { %p25098_p12 = pnand %p25096_p11, %p25093_p10 }
  0x26   : > { %25101 = shalt.err (!%p25098_p12)
}
  0x27   : > { %s25102_s16 = scalar_lea.vmem %s25525_s14, 9216  ;;  %p25110_p4 = scmp.lt.s32.totalorder %s25525_s14, %s25525_s14 }
  0x28   : > { %p25103_p13 = scmp.ne.s32.totalorder %s25525_s14, %s25102_s16  ;;  %p25111_p5 = scmp.lt.s32.totalorder %s25102_s16, %s25102_s16 }
  0x2a   : > { %p25105_p0 = pnand %p25103_p13, %p25548_p8  ;;  %p25112_p7 = por %p25111_p5, %p25110_p4 }
  0x2c   : > { %p25106_p2 = pneg %p25105_p0 }
  0x2e   : > { %p25113_p9 = pnand %p25112_p7, %p25106_p2 }
  0x30   : > { %25116 = shalt.err (!%p25113_p9)
}
  0x31   : > { %s33455_s18 = smov 128   ;;  %s33457_s20 = smov 8  }
  0x32   : > { %24172 = dma.hbm_to_vmem [thread:$0]  (!%p25532_p6), %s33933_s2, 9216, %s25525_s14, [#allocation6], %s33455_s18, %s33455_s18, %s33457_s20  }
  0x33   : > { %s33935_s3 = sld [smem:[#allocation203_spill]] }
  0x39   : > { %s25117_s26 = scalar_lea.hbm %s33935_s3, 1024 }
  0x3a   : > { %p25118_p5 = scmp.ne.s32.totalorder %s33935_s3, %s25117_s26  ;;  %p25124_p12 = scmp.lt.u32.totalorder %s25117_s26, %s33935_s3 }
  0x3c   : > { %p25120_p10 = pnand %p25118_p5, %p25548_p8 }
  0x3e   : > { %p25121_p11 = pneg %p25120_p10 }
  0x40   : > { %p25126_p13 = pnand %p25124_p12, %p25121_p11 }
  0x42   : > { %25129 = shalt.err (!%p25126_p13)
}
  0x43   : > { %s25130_s14 = scalar_lea.vmem %s25536_s17, 1024  ;;  %p25138_p7 = scmp.lt.s32.totalorder %s25536_s17, %s25536_s17 }
  0x44   : > { %p25131_p0 = scmp.ne.s32.totalorder %s25536_s17, %s25130_s14  ;;  %p25139_p9 = scmp.lt.s32.totalorder %s25130_s14, %s25130_s14 }
  0x46   : > { %p25133_p2 = pnand %p25131_p0, %p25548_p8  ;;  %p25140_p5 = por %p25139_p9, %p25138_p7 }
  0x48   : > { %p25134_p4 = pneg %p25133_p2 }
  0x4a   : > { %p25141_p10 = pnand %p25140_p5, %p25134_p4 }
  0x4c   : > { %25144 = shalt.err (!%p25141_p10)
}
  0x4d   : > { %24175 = dma.hbm_to_vmem [thread:$0]  (!%p25532_p6), %s33935_s3, 1024, %s25536_s17, [#allocation9], %s33455_s18, %s33455_s18, %s33457_s20  }
  0x4e   : > { %s33936_s5 = sld [smem:[#allocation205_spill]] }
  0x54   : > { %s25145_s23 = scalar_lea.hbm %s33936_s5, 512 }
  0x55   : > { %p25146_p11 = scmp.ne.s32.totalorder %s33936_s5, %s25145_s23  ;;  %p25152_p0 = scmp.lt.u32.totalorder %s25145_s23, %s33936_s5 }
  0x57   : > { %p25148_p12 = pnand %p25146_p11, %p25548_p8 }
  0x59   : > { %p25149_p13 = pneg %p25148_p12 }
  0x5b   : > { %p25154_p2 = pnand %p25152_p0, %p25149_p13 }
  0x5d   : > { %25157 = shalt.err (!%p25154_p2)
}
  0x5e   : > { %s25158_s14 = scalar_lea.vmem %s311_s19, 512  ;;  %p25166_p5 = scmp.lt.s32.totalorder %s311_s19, %s311_s19 }
  0x5f   : > { %p25159_p4 = scmp.ne.s32.totalorder %s311_s19, %s25158_s14  ;;  %p25167_p10 = scmp.lt.s32.totalorder %s25158_s14, %s25158_s14 }
  0x61   : > { %p25161_p7 = pnand %p25159_p4, %p25548_p8  ;;  %p25168_p1 = por %p25167_p10, %p25166_p5 }
  0x63   : > { %p25162_p9 = pneg %p25161_p7 }
  0x65   : > { %p25169_p3 = pnand %p25168_p1, %p25162_p9 }
  0x67   : > { %25172 = shalt.err (!%p25169_p3)
}
  0x68   : > { %24181 = dma.hbm_to_vmem [thread:$0]  (!%p25532_p6), %s33936_s5, 512, %s311_s19, [#allocation12], %s33455_s18, %s33455_s18, %s33457_s20  }
  0x69   : > { %s25427_s30 = smov [#allocation10]   ;;  %s25428_s22 = smov [#allocation13]  }
  0x6a   : > { %s297_s21 = sshll.u32 %s25427_s30, 4  ;;  %s323_s23 = sshll.u32 %s25428_s22, 4  ;;  %s298_s21 = int_to_ptr.vmem [resolvable:$true] %s297_s21  ;;  %s324_s23 = int_to_ptr.vmem [resolvable:$true] %s323_s23 }
  0x6b   : > { %s33937_s4 = sld [smem:[#allocation204_spill]] }
  0x71   : > { %s25173_s13 = scalar_lea.hbm %s33937_s4, 512 }
  0x72   : > { %p25174_p1 = scmp.ne.s32.totalorder %s33937_s4, %s25173_s13  ;;  %p25180_p12 = scmp.lt.u32.totalorder %s25173_s13, %s33937_s4 }
  0x74   : > { %p25176_p3 = pnand %p25174_p1, %p25548_p8 }
  0x76   : > { %p25177_p11 = pneg %p25176_p3 }
  0x78   : > { %p25182_p13 = pnand %p25180_p12, %p25177_p11 }
  0x7a   : > { %25185 = shalt.err (!%p25182_p13)
}
  0x7b   : > { %s25186_s19 = scalar_lea.vmem %s298_s21, 512  ;;  %p25194_p7 = scmp.lt.s32.totalorder %s298_s21, %s298_s21 }
  0x7c   : > { %p25187_p0 = scmp.ne.s32.totalorder %s298_s21, %s25186_s19  ;;  %p25195_p9 = scmp.lt.s32.totalorder %s25186_s19, %s25186_s19 }
  0x7e   : > { %p25189_p2 = pnand %p25187_p0, %p25548_p8  ;;  %p25196_p5 = por %p25195_p9, %p25194_p7 }
  0x80   : > { %p25190_p4 = pneg %p25189_p2 }
  0x82   : > { %p25197_p10 = pnand %p25196_p5, %p25190_p4 }
  0x84   : > { %25200 = shalt.err (!%p25197_p10)
}
  0x85   : > { %24178 = dma.hbm_to_vmem [thread:$0]  (!%p25532_p6), %s33937_s4, 512, %s298_s21, [#allocation9], %s33455_s18, %s33455_s18, %s33457_s20  }
  0x86   : > { %s33938_s6 = sld [smem:[#allocation206_spill]] }
  0x8c   : > { %s25201_s24 = scalar_lea.hbm %s33938_s6, 640 }
  0x8d   : > { %p25202_p1 = scmp.ne.s32.totalorder %s33938_s6, %s25201_s24  ;;  %p25208_p12 = scmp.lt.u32.totalorder %s25201_s24, %s33938_s6 }
  0x8f   : > { %p25204_p3 = pnand %p25202_p1, %p25548_p8 }
  0x91   : > { %p25205_p11 = pneg %p25204_p3 }
  0x93   : > { %p25210_p13 = pnand %p25208_p12, %p25205_p11 }
  0x95   : > { %25213 = shalt.err (!%p25210_p13)
}
  0x96   : > { %s25214_s17 = scalar_lea.vmem %s324_s23, 640  ;;  %p25222_p7 = scmp.lt.s32.totalorder %s324_s23, %s324_s23 }
  0x97   : > { %p25215_p0 = scmp.ne.s32.totalorder %s324_s23, %s25214_s17  ;;  %p25223_p9 = scmp.lt.s32.totalorder %s25214_s17, %s25214_s17 }
  0x99   : > { %p25217_p2 = pnand %p25215_p0, %p25548_p8  ;;  %p25224_p5 = por %p25223_p9, %p25222_p7 }
  0x9b   : > { %p25218_p4 = pneg %p25217_p2 }
  0x9d   : > { %p25225_p10 = pnand %p25224_p5, %p25218_p4 }
  0x9f   : > { %25228 = shalt.err (!%p25225_p10)
}
  0xa0   : > { %24184 = dma.hbm_to_vmem [thread:$0]  (!%p25532_p6), %s33938_s6, 640, %s324_s23, [#allocation12], %s33455_s18, %s33455_s18, %s33457_s20  }
  0xa1   : > { %s25429_s2 = smov [#allocation14]   ;;  %s25229_s24 = scalar_lea.hbm %s33450_s7, 64 }
  0xa2   : > { %s337_s8 = sshll.u32 %s25429_s2, 4  ;;  %p25230_p1 = scmp.ne.s32.totalorder %s33450_s7, %s25229_s24  ;;  %s338_s8 = int_to_ptr.vmem [resolvable:$true] %s337_s8 }
  0xa3   : > { %p25236_p12 = scmp.lt.u32.totalorder %s25229_s24, %s33450_s7 }
  0xa4   : > { %p25232_p3 = pnand %p25230_p1, %p25548_p8 }
  0xa6   : > { %p25233_p11 = pneg %p25232_p3 }
  0xa8   : > { %p25238_p13 = pnand %p25236_p12, %p25233_p11 }
  0xaa   : > { %25241 = shalt.err (!%p25238_p13)
}
  0xab   : > { %s25242_s23 = scalar_lea.vmem %s338_s8, 64  ;;  %p25250_p7 = scmp.lt.s32.totalorder %s338_s8, %s338_s8 }
  0xac   : > { %p25243_p0 = scmp.ne.s32.totalorder %s338_s8, %s25242_s23  ;;  %p25251_p9 = scmp.lt.s32.totalorder %s25242_s23, %s25242_s23 }
  0xae   : > { %p25245_p2 = pnand %p25243_p0, %p25548_p8  ;;  %p25252_p5 = por %p25251_p9, %p25250_p7 }
  0xb0   : > { %p25246_p4 = pneg %p25245_p2 }
  0xb2   : > { %p25253_p10 = pnand %p25252_p5, %p25246_p4 }
  0xb4   : > { %25256 = shalt.err (!%p25253_p10)
}
  0xb5   : > { %24187 = dma.hbm_to_vmem [thread:$0]  (!%p25532_p6), %s33450_s7, 64, %s338_s8, [#allocation15]  }
  0xb6   : > { %s18538_s25 = sadd.s32 4294967294, %s25420_s10   ;;  %s42_s19 = sadd.s32 1, %s25416_s9 }
  0xb7   : > { %p44_p8 = scmp.ge.s32.totalorder %s42_s19, 2  ;;  %s51_s15 = sadd.s32 1, %s25408_s29 }
  0xb8   : > { %p58_p1 = scmp.ne.s32.totalorder %s25408_s29, %s25404_s28  ;;  %p59_p3 = scmp.eq.s32.totalorder %s25420_s10, 0 }
  0xb9   : > { %s35002_s19 = smov (%p44_p8, %s42_s19), 0  ;;  %p64_p12 = scmp.ne.s32.totalorder %s25404_s28, %s25400_s27 }
  0xba   : > { %p25688_p11 = por %p59_p3, %p58_p1  ;;  %s46_s8 = ssub.s32 %s25416_s9, %s35002_s19 }
  0xbb   : > { %p246_p6 = scmp.eq.s32.totalorder %s25516_s11, 1  ;;  %p49_p13 = scmp.eq.s32.totalorder %s46_s8, 0 }
  0xbc   : > { %p33940_p0 = scmp.eq.s32.totalorder %s25516_s11, 0  ;;  %p252_p7 = scmp.eq.s32.totalorder %s18538_s25, 1 }
  0xbd   : > { %p25703_p4 = por %p246_p6, %p58_p1  ;;  %p24205_p5 = scmp.lt.s32.totalorder %s25420_s10, 2 }
  0xbe   : > { %p25699_p2 = por %p33940_p0, %p64_p12  ;;  %p25710_p9 = por %p252_p7, %p64_p12 }
  0xbf   : > { %s33942_s22 = scalar_select %p25703_p4, 1, 0 }
  0xc0   : > { %s25708_s24 = scalar_select %p49_p13, %s25408_s29, %s51_s15  }
  0xc1   : > { %s33943_s26 = scalar_select %p25710_p9, 1, 0 }
  0xc2   : > { %s348_s13 = sand.u32 1, %s25408_s29   ;;  %s19972_s16 = sshll.u32 %s25416_s9, 14 }
  0xc3   : > { %s25717_s14 = sshll.u32 %s348_s13, 9  ;;  %s25722_s21 = scalar_lea.hbm %s33443_s0, %s19972_s16 }
  0xc4   : > { %s352_s25 = scalar_lea.vmem [#allocation2], %s25717_s14  ;;  %p25727_p10 = pnand %p24205_p5, %p25688_p11 }
  0xc5   : > { %s362_s15 = sshll.u32 %s352_s25, 4  ;;  %s25736_s17 = scalar_lea.hbm %s33444_s1, %s19972_s16  ;;  %s25731_s15 = int_to_ptr.vmem [resolvable:$true] %s362_s15 }
  0xc6   : > { %s25738_s20 = scalar_lea.sflag [#allocation3], %s348_s13  ;;  %s25257_s3 = scalar_lea.hbm %s25722_s21, 8192 }
  0xc7   : > { %p25258_p8 = scmp.ne.s32.totalorder %s25722_s21, %s25257_s3  ;;  %p25259_p1 = pneg %p25727_p10 }
  0xc8   : > { %s25262_s4 = scalar_lea.hbm %s33443_s0, 32768  ;;  %p25263_p12 = scmp.lt.u32.totalorder %s25722_s21, %s33443_s0 }
  0xc9   : > { %p25260_p3 = pnand %p25259_p1, %p25258_p8  ;;  %p25264_p6 = scmp.lt.u32.totalorder %s25262_s4, %s25257_s3 }
  0xca   : > { %p25266_p0 = scmp.lt.u32.totalorder %s25257_s3, %s25722_s21 }
  0xcb   : > { %p25261_p11 = pneg %p25260_p3  ;;  %p25265_p13 = por %p25264_p6, %p25263_p12 }
  0xcd   : > { %p25267_p7 = por %p25266_p0, %p25265_p13 }
  0xcf   : > { %p25268_p5 = pnand %p25267_p7, %p25261_p11 }
  0xd1   : > { %25271 = shalt.err (!%p25268_p5)
}
  0xd2   : > { %s25272_s18 = scalar_lea.vmem %s25731_s15, 8192  ;;  %s25430_s13 = smov [#allocation2]  }
  0xd3   : > { %p25273_p8 = scmp.ne.s32.totalorder %s25731_s15, %s25272_s18  ;;  %s25277_s16 = sshll.u32 %s25430_s13, 4  ;;  %s25278_s16 = int_to_ptr.vmem [resolvable:$false] %s25277_s16 }
  0xd4   : > { %s25279_s5 = scalar_lea.vmem %s25278_s16, 16384  ;;  %p25280_p4 = scmp.lt.s32.totalorder %s25731_s15, %s25278_s16 }
  0xd5   : > { %p25275_p3 = pnand %p25273_p8, %p25259_p1  ;;  %p25281_p12 = scmp.lt.s32.totalorder %s25279_s5, %s25272_s18 }
  0xd7   : > { %p25276_p9 = pneg %p25275_p3  ;;  %p25282_p6 = por %p25281_p12, %p25280_p4 }
  0xd9   : > { %p25283_p13 = pnand %p25282_p6, %p25276_p9 }
  0xdb   : > { %25286 = shalt.err (!%p25283_p13)
}
  0xdc   : > { %s33945_s3 = smov 8   ;;  %s33946_s4 = smov 128  }
  0xdd   : > { %24191 = dma.hbm_to_vmem [thread:$0]  (!%p25727_p10), %s25722_s21, 8192, %s25731_s15, %s25738_s20, %s33946_s4, %s33946_s4, %s33945_s3  }
  0xde   : > { %s25770_s6 = scalar_lea.hbm %s25736_s17, 8192  ;;  %s376_s23 = scalar_lea.vmem [#allocation5], %s25717_s14 }
  0xdf   : > { %s387_s2 = sshll.u32 %s376_s23, 4  ;;  %s372_s25 = sand.u32 1, %s25420_s10   ;;  %s25773_s2 = int_to_ptr.vmem [resolvable:$true] %s387_s2 }
  0xe0   : > { %s25776_s18 = scalar_lea.sflag [#allocation6], %s372_s25  ;;  %s25317_s13 = scalar_lea.hbm %s25736_s17, 16384 }
  0xe1   : > { %p25288_p4 = scmp.ne.s32.totalorder %s25770_s6, %s25317_s13  ;;  %s25292_s21 = scalar_lea.hbm %s33444_s1, 32768 }
  0xe2   : > { %p25293_p0 = scmp.lt.u32.totalorder %s25770_s6, %s33444_s1  ;;  %p25294_p7 = scmp.lt.u32.totalorder %s25292_s21, %s25317_s13 }
  0xe3   : > { %p25290_p9 = pnand %p25288_p4, %p25259_p1  ;;  %p25296_p8 = scmp.lt.u32.totalorder %s25317_s13, %s25770_s6 }
  0xe4   : > { %p25295_p5 = por %p25294_p7, %p25293_p0 }
  0xe5   : > { %p25291_p11 = pneg %p25290_p9 }
  0xe6   : > { %p25297_p3 = por %p25296_p8, %p25295_p5 }
  0xe8   : > { %p25298_p12 = pnand %p25297_p3, %p25291_p11 }
  0xea   : > { %25301 = shalt.err (!%p25298_p12)
}
  0xeb   : > { %s25302_s14 = scalar_lea.vmem %s25773_s2, 8192  ;;  %s25431_s17 = smov [#allocation5]  }
  0xec   : > { %p25303_p6 = scmp.ne.s32.totalorder %s25773_s2, %s25302_s14  ;;  %s25307_s23 = sshll.u32 %s25431_s17, 4  ;;  %s25308_s23 = int_to_ptr.vmem [resolvable:$false] %s25307_s23 }
  0xed   : > { %s25309_s25 = scalar_lea.vmem %s25308_s23, 16384  ;;  %p25310_p9 = scmp.lt.s32.totalorder %s25773_s2, %s25308_s23 }
  0xee   : > { %p25305_p13 = pnand %p25303_p6, %p25259_p1  ;;  %p25311_p0 = scmp.lt.s32.totalorder %s25309_s25, %s25302_s14 }
  0xf0   : > { %p25306_p4 = pneg %p25305_p13  ;;  %p25312_p7 = por %p25311_p0, %p25310_p9 }
  0xf2   : > { %p25313_p5 = pnand %p25312_p7, %p25306_p4 }
  0xf4   : > { %25316 = shalt.err (!%p25313_p5)
}
  0xf5   : > { %24194 = dma.hbm_to_vmem [thread:$0]  (!%p25727_p10), %s25770_s6, 8192, %s25773_s2, %s25776_s18, %s33946_s4, %s33946_s4, %s33945_s3  }
  0xf6   : > { %p33947_p1 = scmp.ne.s32.totalorder %s33931_s12, 0 }
  0xf8   : > { %399 = sbr.rel (%p33947_p1) target bundleno = 3327 (0xcff), region = 52 }
  0xff   : > { %s25808_s13 = sand.u32 1, %s25404_s28  }
 0x100   : > { %s18554_s16 = sshll.u32 %s25808_s13, 9  ;;  %s402_s20 = scalar_lea.sflag [#allocation3], %s25808_s13 }
 0x101   : > { %s25812_s21 = scalar_lea.vmem [#allocation2], %s18554_s16 }
 0x102   : > { %25371 = dma.done.wait (%p25699_p2), %s402_s20, 8192  }
 0x103   : > { %25373 = vsyncadd (%p25699_p2), %s402_s20, 4294959104  ;;  %s410_s8 = sand.u32 1, %s25516_s11   ;;  %s25819_s3 = scalar_lea.vmem [#allocation5], %s18554_s16 }
 0x104   : > { %s411_s12 = scalar_lea.sflag [#allocation6], %s410_s8 }
 0x105   : > { %25375 = dma.done.wait (%p25699_p2), %s411_s12, 8192  }
 0x106   : > { %25377 = vsyncadd (%p25699_p2), %s411_s12, 4294959104  ;;  %p33948_p10 = scmp.eq.s32.totalorder %s25516_s11, 0 }
 0x108   : > { %25379 = dma.done.wait (%p33948_p10), [#allocation6], 9216   ;;  %p33949_p11 = pmov %p33948_p10 }
 0x109   : > { %p33950_p8 = pmov %p33948_p10 }
 0x10a   : > { %25381 = vsyncadd (%p33949_p11), [#allocation6], 4294958080 }
 0x10b   : > { %25383 = dma.done.wait (%p33950_p8), [#allocation9], 1536   ;;  %p33951_p3 = pmov %p33950_p8 }
 0x10d   : > { %25385 = vsyncadd (%p33951_p3), [#allocation9], 4294965760  ;;  %p33952_p12 = pmov %p33951_p3 }
 0x10e   : > { %p33953_p6 = pmov %p33951_p3 }
 0x10f   : > { %25387 = dma.done.wait (%p33952_p12), [#allocation12], 1152  }
 0x110   : > { %25389 = vsyncadd (%p33953_p6), [#allocation12], 4294966144  ;;  %p33954_p2 = pmov %p33951_p3 }
 0x112   : > { %25391 = dma.done.wait (%p33954_p2), [#allocation15], 64   ;;  %p33955_p13 = pmov %p33954_p2 }
 0x113   : > { %v33460_v0 = vmov 0.0   ;;  %vm660_vm0 = vcmask 1042432   ;;  %vm25433_vm1 = vmmov 1   ;;  %v18567_v2 = vld [vmem:[%s25812_s21 + $0x40] sm:$0xff]  ;;  %v18568_v3 = vld [vmem:[%s25812_s21 + $0x48] sm:$0xff]  ;;  %v18569_v13 = vld [vmem:[%s25812_s21 + $0x50] sm:$0xff] }
 0x114   : > { %25393 = vsyncadd (%p33955_p13), [#allocation15], 4294967232  ;;  %785 = vmatprep.mubr.f32.mxu0 %v33460_v0  ;;  %898 = vmatprep.mubr.f32.mxu1 %v33460_v0  ;;  %v18575_v4 = vld [vmem:[%s25812_s21 + $0x80] sm:$0xff]  ;;  %v25850_v5 = vpack.c.bf16 %v18568_v3, %v18567_v2  ;;  %v18576_v6 = vld [vmem:[%s25812_s21 + $0x88] sm:$0xff]  ;;  %vm635_vm3 = vcmask 220160   ;;  %vm12686_vm4 = vcmask 523264  }
 0x115   : > { %vm25843_vm2 = vmpackc.low %vm660_vm0, %vm25433_vm1  ;;  %v18563_v7 = vld [vmem:[%s25812_s21 + $0x20] sm:$0xff]  ;;  %v18564_v8 = vld [vmem:[%s25812_s21 + $0x28] sm:$0xff]  ;;  %v25855_v9 = vpack.c.bf16 %v18576_v6, %v18575_v4  ;;  %s25435_s11 = smov 127   ;;  %s25436_s30 = smov 126   ;;  %vm15377_vm12 = vcmask 261120   ;;  %vm14242_vm13 = vcmask 1039360  }
 0x116   : > { %v25857_v10 = vpack.c.bf16 %v18564_v8, %v18563_v7  ;;  %v18571_v11 = vld [vmem:[%s25812_s21 + $0x60] sm:$0xff]  ;;  %v18572_v12 = vld [vmem:[%s25812_s21 + $0x68] sm:$0xff]  ;;  %19976 = vmatprep.subr.bf16.mxu0 %v25850_v5  ;;  %v18570_v15 = vld [vmem:[%s25812_s21 + $0x58] sm:$0x7]  ;;  %s25437_s4 = smov 125   ;;  %s25438_s6 = smov 124  }
 0x117   : > { %v25863_v14 = vpack.c.bf16 %v18572_v12, %v18571_v11  ;;  %v18577_v16 = vld [vmem:[%s25812_s21 + $0x90] sm:$0xff]  ;;  %v18578_v17 = vld [vmem:[%s25812_s21 + $0x98] sm:$0x7]  ;;  %19986 = vmatprep.subr.bf16.mxu1 %v25855_v9  ;;  %v25870_v18 = vpack.c.bf16 %v18570_v15, %v18569_v13  ;;  %v18591_v26 = vld [vmem:[%s25812_s21 + $0x100] sm:$0xff]  ;;  %vm14565_vm14 = vcmask 1031168   ;;  %vm14888_vm15 = vcmask 1022976  }
 0x118   : > { %19978 = vmatpush1.bf16.msra.mxu0 %v25857_v10  ;;  %v25872_v19 = vpack.c.bf16 %v18578_v17, %v18577_v16  ;;  %v18565_v20 = vld [vmem:[%s25812_s21 + $0x30] sm:$0xff]  ;;  %v18566_v21 = vld [vmem:[%s25812_s21 + $0x38] sm:$0x7]  ;;  %v18592_v27 = vld [vmem:[%s25812_s21 + $0x108] sm:$0xff]  ;;  %vm15211_vm0 = vcmask 1014784   ;;  %s18562_s2 = sshll.u32 %s25808_s13, 6 }
 0x119   : > { %v18573_v22 = vld [vmem:[%s25812_s21 + $0x70] sm:$0xff]  ;;  %19988 = vmatpush1.bf16.msra.mxu1 %v25863_v14  ;;  %v25878_v23 = vpack.c.bf16 %v18566_v21, %v18565_v20  ;;  %v18574_v24 = vld [vmem:[%s25812_s21 + $0x78] sm:$0x7]  ;;  %19981 = vmatprep.subr.msk.bf16.mxu0 %vm25843_vm2, %v25870_v18  ;;  %v18587_v28 = vld [vmem:[%s25812_s21 + $0xe0] sm:$0xff]  ;;  %v25892_v29 = vpack.c.bf16 %v18592_v27, %v18591_v26  ;;  %s33379_s18 = scalar_lea.vmem [#allocation16], %s18562_s2  ;;  %s34991_s15 = sld [smem:[#allocation24_spill]] }
 0x11a   : > { %19991 = vmatprep.subr.msk.bf16.mxu1 %vm25843_vm2, %v25872_v19  ;;  %v25887_v25 = vpack.c.bf16 %v18574_v24, %v18573_v22  ;;  %v18588_v30 = vld [vmem:[%s25812_s21 + $0xe8] sm:$0xff]  ;;  %v25898_v31 = vld [vmem:[#allocation7 + $0x40] sm:$0xff]  ;;  %v18593_v35 = vld [vmem:[%s25812_s21 + $0x110] sm:$0xff]  ;;  %s18369_s14 = sshll.u32 %s33379_s18, 4  ;;  %s34992_s25 = sld [smem:[#allocation207_spill]]  ;;  %s33395_s14 = int_to_ptr.vmem [resolvable:$true] %s18369_s14 }
 0x11b   : > { %v18583_v32 = vld [vmem:[%s25812_s21 + $0xc0] sm:$0xff]  ;;  %v25904_v33 = vpack.c.bf16 %v18588_v30, %v18587_v28  ;;  %v18584_v34 = vld [vmem:[%s25812_s21 + $0xc8] sm:$0xff]  ;;  %v18594_v36 = vld [vmem:[%s25812_s21 + $0x118] sm:$0x7]  ;;  %s18353_s20 = scalar_lea.sflag [#allocation4], %s25808_s13  ;;  %p34993_p9 = scmp.ne.s32.totalorder %s33942_s22, 0 }
 0x11c   : > { %19984 = vmatpush1.bf16.msk.msra.mxu0 %vm25843_vm2, %v25878_v23  ;;  %v25910_v37 = vpack.c.bf16 %v18584_v34, %v18583_v32  ;;  %v25912_v38 = vpack.c.bf16 %v18594_v36, %v18593_v35  ;;  %v18579_v39 = vld [vmem:[%s25812_s21 + $0xa0] sm:$0xff]  ;;  %v18580_v40 = vld [vmem:[%s25812_s21 + $0xa8] sm:$0xff]  ;;  %v18589_v41 = vld [vmem:[%s25812_s21 + $0xf0] sm:$0xff]  ;;  %s25439_s8 = smov [#allocation16]  }
 0x11d   : > { %19994 = vmatpush1.bf16.msk.msra.mxu1 %vm25843_vm2, %v25887_v25  ;;  %v18590_v42 = vld [vmem:[%s25812_s21 + $0xf8] sm:$0x7]  ;;  %v25923_v43 = vld [vmem:[#allocation7 + $0x48] sm:$0xff]  ;;  %v18585_v44 = vld [vmem:[%s25812_s21 + $0xd0] sm:$0xff]  ;;  %v25929_v46 = vpack.c.bf16 %v18580_v40, %v18579_v39  ;;  %s25322_s12 = sshll.u32 %s25439_s8, 4  ;;  %s25323_s12 = int_to_ptr.vmem [resolvable:$false] %s25322_s12 }
 0x11e   : > { %20006 = vmatprep.subr.bf16.mxu1 %v25892_v29  ;;  %v18586_v45 = vld [vmem:[%s25812_s21 + $0xd8] sm:$0x7]  ;;  %v18607_v47 = vld [vmem:[%s25812_s21 + $0x180] sm:$0xff]  ;;  %v18608_v48 = vld [vmem:[%s25812_s21 + $0x188] sm:$0xff]  ;;  %19996 = vmatprep.subr.bf16.mxu0 %v25910_v37  ;;  %v25937_v49 = vpack.c.bf16 %v18590_v42, %v18589_v41  ;;  %p25325_p5 = scmp.lt.s32.totalorder %s33395_s14, %s25323_s12 }
 0x11f   : > { %18669 = vmatmul.mubr.msk.f32.vlgmr.msra.gmra.mrb[0].mxu0 %vm635_vm3, %v25898_v31  ;;  %v25939_v50 = vpack.c.bf16 %v18586_v45, %v18585_v44  ;;  %v18581_v51 = vld [vmem:[%s25812_s21 + $0xb0] sm:$0xff]  ;;  %v18582_v52 = vld [vmem:[%s25812_s21 + $0xb8] sm:$0x7]  ;;  %v25945_v53 = vpack.c.bf16 %v18608_v48, %v18607_v47  ;;  %v18599_v54 = vld [vmem:[%s25812_s21 + $0x140] sm:$0xff]  ;;  %s19974_s5 = sshll.u32 %s34991_s15, 10 }
 0x120   : > { %18679 = vmatmul.mubr.msk.f32.vlgmr.msra.gmra.mrb[0].mxu1 %vm635_vm3, %v25898_v31  ;;  %791 = vmatprep.mubr.f32.mxu0 %v33460_v0  ;;  %v18600_v55 = vld [vmem:[%s25812_s21 + $0x148] sm:$0xff]  ;;  %v25952_v56 = vld [vmem:[#allocation7 + $0x50] sm:$0xff]  ;;  %v25956_v57 = vpack.c.bf16 %v18582_v52, %v18581_v51  ;;  %v25972_v59 = vld [vmem:[#allocation7 + $0x58] sm:$0xff]  ;;  %s33393_s16 = scalar_lea.hbm %s34992_s25, %s19974_s5 }
 0x121   : > { %904 = vmatprep.mubr.f32.mxu1 %v33460_v0  ;;  %20008 = vmatpush1.bf16.msra.mxu1 %v25904_v33  ;;  %v25964_v58 = vpack.c.bf16 %v18600_v55, %v18599_v54  ;;  %v25984_v60 = vld [vmem:[#allocation7 + $0x60] sm:$0xff]  ;;  %v25992_v61 = vld [vmem:[#allocation7 + $0x68] sm:$0xff]  ;;  %v26000_v62 = vld [vmem:[#allocation7 + $0x70] sm:$0xff] }
 0x122   : > { %20011 = vmatprep.subr.msk.bf16.mxu1 %vm25843_vm2, %v25912_v38  ;;  %19998 = vmatpush1.bf16.msra.mxu0 %v25929_v46  ;;  %v26008_v63 = vld [vmem:[#allocation7 + $0x78] sm:$0xff]  ;;  %v18603_v2 = vld [vmem:[%s25812_s21 + $0x160] sm:$0xff]  ;;  %v18604_v3 = vld [vmem:[%s25812_s21 + $0x168] sm:$0xff] }
 0x123   : > { %18670 = vmatmul.mubr.msk.f32.gmra.mrb[2].mxu0 %vm635_vm3, %v25923_v43  ;;  %20001 = vmatprep.subr.msk.bf16.mxu0 %vm25843_vm2, %v25939_v50  ;;  %v18609_v4 = vld [vmem:[%s25812_s21 + $0x190] sm:$0xff]  ;;  %v18610_v6 = vld [vmem:[%s25812_s21 + $0x198] sm:$0x7]  ;;  %v18595_v7 = vld [vmem:[%s25812_s21 + $0x120] sm:$0xff]  ;;  %v26025_v13 = vpack.c.bf16 %v18604_v3, %v18603_v2 }
 0x124   : > { %18680 = vmatmul.mubr.msk.f32.gmra.mrb[2].mxu1 %vm635_vm3, %v25923_v43  ;;  %797 = vmatprep.mubr.f32.mxu0 %v33460_v0  ;;  %v18596_v8 = vld [vmem:[%s25812_s21 + $0x128] sm:$0xff]  ;;  %v18601_v11 = vld [vmem:[%s25812_s21 + $0x150] sm:$0xff]  ;;  %v18602_v12 = vld [vmem:[%s25812_s21 + $0x158] sm:$0x7]  ;;  %v26027_v15 = vpack.c.bf16 %v18610_v6, %v18609_v4 }
 0x125   : > { %910 = vmatprep.mubr.f32.mxu1 %v33460_v0  ;;  %20014 = vmatpush1.bf16.msk.msra.mxu1 %vm25843_vm2, %v25937_v49  ;;  %v26029_v16 = vpack.c.bf16 %v18596_v8, %v18595_v7  ;;  %v18605_v17 = vld [vmem:[%s25812_s21 + $0x170] sm:$0xff]  ;;  %v18606_v20 = vld [vmem:[%s25812_s21 + $0x178] sm:$0x7]  ;;  %v26036_v22 = vpack.c.bf16 %v18602_v12, %v18601_v11  ;;  %v559_v26 = vld [vmem:[%s25819_s3] sm:$0xff] }
 0x126   : > { %20026 = vmatprep.subr.bf16.mxu1 %v25945_v53  ;;  %20004 = vmatpush1.bf16.msk.msra.mxu0 %vm25843_vm2, %v25956_v57  ;;  %v18597_v21 = vld [vmem:[%s25812_s21 + $0x130] sm:$0xff]  ;;  %v18598_v24 = vld [vmem:[%s25812_s21 + $0x138] sm:$0x7]  ;;  %v560_v27 = vld [vmem:[%s25819_s3 + $0x8] sm:$0xff]  ;;  %v26048_v32 = vpack.c.bf16 %v18606_v20, %v18605_v17 }
 0x127   : > { %18671 = vmatmul.mubr.msk.f32.gmra.mrb[4].mxu0 %vm635_vm3, %v25952_v56  ;;  %20016 = vmatprep.subr.bf16.mxu0 %v25964_v58  ;;  %v18615_v28 = vld [vmem:[%s25812_s21 + $0x1c0] sm:$0xff]  ;;  %v18616_v30 = vld [vmem:[%s25812_s21 + $0x1c8] sm:$0xff]  ;;  %v26054_v34 = vpack.c.bf16 %v18598_v24, %v18597_v21  ;;  %v26056_v35 = vpack.c.bf16 %v560_v27, %v559_v26  ;;  %v561_v41 = vld [vmem:[%s25819_s3 + $0x10] sm:$0xff] }
 0x128   : > { %18681 = vmatmul.mubr.msk.f32.gmra.mrb[4].mxu1 %vm635_vm3, %v25952_v56  ;;  %803 = vmatprep.mubr.f32.mxu0 %v33460_v0  ;;  %v26063_v36 = vpack.c.bf16 %v18616_v30, %v18615_v28  ;;  %v18619_v39 = vld [vmem:[%s25812_s21 + $0x1e0] sm:$0xff]  ;;  %v18620_v40 = vld [vmem:[%s25812_s21 + $0x1e8] sm:$0xff]  ;;  %v562_v42 = vld [vmem:[%s25819_s3 + $0x18] sm:$0x7] }
 0x129   : > { %916 = vmatprep.mubr.f32.mxu1 %v33460_v0  ;;  %v18611_v44 = vld [vmem:[%s25812_s21 + $0x1a0] sm:$0xff]  ;;  %v18612_v45 = vld [vmem:[%s25812_s21 + $0x1a8] sm:$0xff]  ;;  %v18617_v47 = vld [vmem:[%s25812_s21 + $0x1d0] sm:$0xff]  ;;  %v26121_v51 = vpack.c.bf16 %v18620_v40, %v18619_v39  ;;  %v26123_v52 = vpack.c.bf16 %v562_v42, %v561_v41 }
 0x12a   : > { %v18618_v48 = vld [vmem:[%s25812_s21 + $0x1d8] sm:$0x7]  ;;  %v26125_v54 = vpack.c.bf16 %v18612_v45, %v18611_v44  ;;  %v18621_v55 = vld [vmem:[%s25812_s21 + $0x1f0] sm:$0xff]  ;;  %v18635_v7 = vld [vmem:[%s25819_s3 + $0x80] sm:$0xff] }
 0x12b   : > { %18672 = vmatmul.mubr.msk.f32.gmra.mrb[6].mxu0 %vm635_vm3, %v25972_v59  ;;  %v18622_v2 = vld [vmem:[%s25812_s21 + $0x1f8] sm:$0x7]  ;;  %v18613_v3 = vld [vmem:[%s25812_s21 + $0x1b0] sm:$0xff]  ;;  %v26132_v4 = vpack.c.bf16 %v18618_v48, %v18617_v47  ;;  %v18636_v8 = vld [vmem:[%s25819_s3 + $0x88] sm:$0xff] }
 0x12c   : > { %18682 = vmatmul.mubr.msk.f32.gmra.mrb[6].mxu1 %vm635_vm3, %v25972_v59  ;;  %809 = vmatprep.mubr.f32.mxu0 %v33460_v0  ;;  %v18614_v6 = vld [vmem:[%s25812_s21 + $0x1b8] sm:$0x7]  ;;  %v18627_v11 = vld [vmem:[%s25819_s3 + $0x40] sm:$0xff]  ;;  %v18628_v12 = vld [vmem:[%s25819_s3 + $0x48] sm:$0xff]  ;;  %v26144_v17 = vpack.c.bf16 %v18622_v2, %v18621_v55  ;;  %v26152_v21 = vpack.c.bf16 %v18636_v8, %v18635_v7 }
 0x12d   : > { %922 = vmatprep.mubr.f32.mxu1 %v33460_v0  ;;  %v26150_v20 = vpack.c.bf16 %v18614_v6, %v18613_v3  ;;  %v26159_v24 = vpack.c.bf16 %v18628_v12, %v18627_v11  ;;  %v18631_v26 = vld [vmem:[%s25819_s3 + $0x60] sm:$0xff]  ;;  %v18632_v27 = vld [vmem:[%s25819_s3 + $0x68] sm:$0xff]  ;;  %v18637_v28 = vld [vmem:[%s25819_s3 + $0x90] sm:$0xff] }
 0x12e   : > { %v18638_v30 = vld [vmem:[%s25819_s3 + $0x98] sm:$0x7]  ;;  %v18623_v39 = vld [vmem:[%s25819_s3 + $0x20] sm:$0xff]  ;;  %v18624_v40 = vld [vmem:[%s25819_s3 + $0x28] sm:$0xff]  ;;  %v26217_v44 = vpack.c.bf16 %v18632_v27, %v18631_v26 }
 0x12f   : > { %18673 = vmatmul.mubr.msk.f32.gmra.mrb[8].mxu0 %vm635_vm3, %v25984_v60  ;;  %v18629_v41 = vld [vmem:[%s25819_s3 + $0x50] sm:$0xff]  ;;  %v18630_v42 = vld [vmem:[%s25819_s3 + $0x58] sm:$0x7]  ;;  %v26219_v45 = vpack.c.bf16 %v18638_v30, %v18637_v28  ;;  %v26221_v47 = vpack.c.bf16 %v18624_v40, %v18623_v39  ;;  %v481_v11 = vld [vmem:[%s25812_s21 + $0x8] sm:$0xff] }
 0x130   : > { %18683 = vmatmul.mubr.msk.f32.gmra.mrb[8].mxu1 %vm635_vm3, %v25984_v60  ;;  %815 = vmatprep.mubr.f32.mxu0 %v33460_v0  ;;  %v18633_v48 = vld [vmem:[%s25819_s3 + $0x70] sm:$0xff]  ;;  %v18634_v55 = vld [vmem:[%s25819_s3 + $0x78] sm:$0x7]  ;;  %v26227_v2 = vpack.c.bf16 %v18630_v42, %v18629_v41  ;;  %v26746_v39 = vld [vmem:[#allocation7 + $0xa0] sm:$0xff] }
 0x131   : > { %928 = vmatprep.mubr.f32.mxu1 %v33460_v0  ;;  %v18625_v3 = vld [vmem:[%s25819_s3 + $0x30] sm:$0xff]  ;;  %v18626_v6 = vld [vmem:[%s25819_s3 + $0x38] sm:$0x7]  ;;  %v26236_v7 = vpack.c.bf16 %v18634_v55, %v18633_v48  ;;  %v26754_v40 = vld [vmem:[#allocation7 + $0xa8] sm:$0xff] }
 0x132   : > { %v26242_v8 = vpack.c.bf16 %v18626_v6, %v18625_v3  ;;  %v482_v26 = vld [vmem:[%s25812_s21 + $0x10] sm:$0xff]  ;;  %v483_v27 = vld [vmem:[%s25812_s21 + $0x18] sm:$0x7]  ;;  %v18639_v48 = vld [vmem:[%s25819_s3 + $0xa0] sm:$0xff] }
 0x133   : > { %18674 = vmatmul.mubr.msk.f32.gmra.mrb[10].mxu0 %vm635_vm3, %v25992_v61  ;;  %v20082_v28 = vpack.c.bf16 %v483_v27, %v482_v26  ;;  %v26738_v30 = vld [vmem:[#allocation7 + $0x98] sm:$0xff]  ;;  %v26762_v41 = vld [vmem:[#allocation7 + $0xb0] sm:$0xff]  ;;  %v18640_v55 = vld [vmem:[%s25819_s3 + $0xa8] sm:$0xff] }
 0x134   : > { %18684 = vmatmul.mubr.msk.f32.gmra.mrb[10].mxu1 %vm635_vm3, %v25992_v61  ;;  %821 = vmatprep.mubr.f32.mxu0 %v33460_v0  ;;  %v26770_v42 = vld [vmem:[#allocation7 + $0xb8] sm:$0xff]  ;;  %v26856_v3 = vpack.c.bf16 %v18640_v55, %v18639_v48  ;;  %v18641_v6 = vld [vmem:[%s25819_s3 + $0xb0] sm:$0xff]  ;;  %v27090_v27 = vld [vmem:[#allocation7 + $0xe0] sm:$0xff] }
 0x135   : > { %934 = vmatprep.mubr.f32.mxu1 %v33460_v0  ;;  %v27082_v26 = vld [vmem:[#allocation7 + $0xd8] sm:$0xff]  ;;  %v18649_v55 = vld [vmem:[%s25819_s3 + $0xf0] sm:$0xff] }
 0x137   : > { %18675 = vmatmul.mubr.msk.f32.gmra.mrb[12].mxu0 %vm635_vm3, %v26000_v62 }
 0x138   : > { %18685 = vmatmul.mubr.msk.f32.gmra.mrb[12].mxu1 %vm635_vm3, %v26000_v62  ;;  %827 = vmatprep.mubr.f32.mxu0 %v33460_v0 }
 0x139   : > { %940 = vmatprep.mubr.f32.mxu1 %v33460_v0 }
 0x13b   : > { %18676 = vmatmul.mubr.msk.f32.gmra.mrb[14].mxu0 %vm635_vm3, %v26008_v63 }
 0x13c   : > { %18686 = vmatmul.mubr.msk.f32.gmra.mrb[14].mxu1 %vm635_vm3, %v26008_v63  ;;  %1011 = vmatprep.mubr.f32.mxu0 %v33460_v0 }
 0x13d   : > { %1124 = vmatprep.mubr.f32.mxu1 %v33460_v0 }
 0x13f   : > { %18689 = vmatmul.mubr.msk.f32.vlgmr.msra.gmra.mrb[16].mxu0 %vm635_vm3, %v25898_v31 }
 0x140   : > { %18699 = vmatmul.mubr.msk.f32.vlgmr.msra.gmra.mrb[16].mxu1 %vm635_vm3, %v25898_v31  ;;  %1017 = vmatprep.mubr.f32.mxu0 %v33460_v0 }
 0x141   : > { %1130 = vmatprep.mubr.f32.mxu1 %v33460_v0  ;;  %20028 = vmatpush1.bf16.msra.mxu1 %v26025_v13 }
 0x142   : > { %20031 = vmatprep.subr.msk.bf16.mxu1 %vm25843_vm2, %v26027_v15  ;;  %20018 = vmatpush1.bf16.msra.mxu0 %v26029_v16 }
 0x143   : > { %18690 = vmatmul.mubr.msk.f32.gmra.mrb[18].mxu0 %vm635_vm3, %v25923_v43  ;;  %20021 = vmatprep.subr.msk.bf16.mxu0 %vm25843_vm2, %v26036_v22 }
 0x144   : > { %18700 = vmatmul.mubr.msk.f32.gmra.mrb[18].mxu1 %vm635_vm3, %v25923_v43  ;;  %1023 = vmatprep.mubr.f32.mxu0 %v33460_v0 }
 0x145   : > { %1136 = vmatprep.mubr.f32.mxu1 %v33460_v0  ;;  %20034 = vmatpush1.bf16.msk.msra.mxu1 %vm25843_vm2, %v26048_v32 }
 0x146   : > { %20024 = vmatpush1.bf16.msk.msra.mxu0 %vm25843_vm2, %v26054_v34  ;;  %20046 = vmatprep.subr.bf16.mxu1 %v26056_v35 }
 0x147   : > { %18691 = vmatmul.mubr.msk.f32.gmra.mrb[20].mxu0 %vm635_vm3, %v25952_v56  ;;  %20036 = vmatprep.subr.bf16.mxu0 %v26063_v36 }
 0x148   : > { %18701 = vmatmul.mubr.msk.f32.gmra.mrb[20].mxu1 %vm635_vm3, %v25952_v56  ;;  %1029 = vmatprep.mubr.f32.mxu0 %v33460_v0 }
 0x149   : > { %1142 = vmatprep.mubr.f32.mxu1 %v33460_v0 }
 0x14b   : > { %18692 = vmatmul.mubr.msk.f32.gmra.mrb[22].mxu0 %vm635_vm3, %v25972_v59 }
 0x14c   : > { %18702 = vmatmul.mubr.msk.f32.gmra.mrb[22].mxu1 %vm635_vm3, %v25972_v59  ;;  %1035 = vmatprep.mubr.f32.mxu0 %v33460_v0 }
 0x14d   : > { %1148 = vmatprep.mubr.f32.mxu1 %v33460_v0 }
 0x14f   : > { %18693 = vmatmul.mubr.msk.f32.gmra.mrb[24].mxu0 %vm635_vm3, %v25984_v60 }
 0x150   : > { %18703 = vmatmul.mubr.msk.f32.gmra.mrb[24].mxu1 %vm635_vm3, %v25984_v60  ;;  %1041 = vmatprep.mubr.f32.mxu0 %v33460_v0 }
 0x151   : > { %1154 = vmatprep.mubr.f32.mxu1 %v33460_v0 }
 0x153   : > { %18694 = vmatmul.mubr.msk.f32.gmra.mrb[26].mxu0 %vm635_vm3, %v25992_v61 }
 0x154   : > { %18704 = vmatmul.mubr.msk.f32.gmra.mrb[26].mxu1 %vm635_vm3, %v25992_v61  ;;  %1047 = vmatprep.mubr.f32.mxu0 %v33460_v0 }
 0x155   : > { %1160 = vmatprep.mubr.f32.mxu1 %v33460_v0 }
 0x157   : > { %18695 = vmatmul.mubr.msk.f32.gmra.mrb[28].mxu0 %vm635_vm3, %v26000_v62 }
 0x158   : > { %18705 = vmatmul.mubr.msk.f32.gmra.mrb[28].mxu1 %vm635_vm3, %v26000_v62  ;;  %1053 = vmatprep.mubr.f32.mxu0 %v33460_v0 }
 0x159   : > { %1166 = vmatprep.mubr.f32.mxu1 %v33460_v0 }
 0x15b   : > { %18696 = vmatmul.mubr.msk.f32.gmra.mrb[30].mxu0 %vm635_vm3, %v26008_v63 }
 0x15c   : > { %18706 = vmatmul.mubr.msk.f32.gmra.mrb[30].mxu1 %vm635_vm3, %v26008_v63  ;;  %1237 = vmatprep.mubr.f32.mxu0 %v33460_v0 }
 0x15d   : > { %1350 = vmatprep.mubr.f32.mxu1 %v33460_v0 }
 0x15f   : > { %18709 = vmatmul.mubr.msk.f32.vlgmr.msra.gmra.mrb[32].mxu0 %vm635_vm3, %v25898_v31 }
 0x160   : > { %18719 = vmatmul.mubr.msk.f32.vlgmr.msra.gmra.mrb[32].mxu1 %vm635_vm3, %v25898_v31  ;;  %1243 = vmatprep.mubr.f32.mxu0 %v33460_v0 }
 0x161   : > { %1356 = vmatprep.mubr.f32.mxu1 %v33460_v0  ;;  %20048 = vmatpush1.bf16.msra.mxu1 %v26121_v51 }
 0x162   : > { %20051 = vmatprep.subr.msk.bf16.mxu1 %vm25843_vm2, %v26123_v52  ;;  %20038 = vmatpush1.bf16.msra.mxu0 %v26125_v54 }
 0x163   : > { %18710 = vmatmul.mubr.msk.f32.gmra.mrb[34].mxu0 %vm635_vm3, %v25923_v43  ;;  %20041 = vmatprep.subr.msk.bf16.mxu0 %vm25843_vm2, %v26132_v4 }
 0x164   : > { %18720 = vmatmul.mubr.msk.f32.gmra.mrb[34].mxu1 %vm635_vm3, %v25923_v43  ;;  %1249 = vmatprep.mubr.f32.mxu0 %v33460_v0 }
 0x165   : > { %1362 = vmatprep.mubr.f32.mxu1 %v33460_v0  ;;  %20054 = vmatpush1.bf16.msk.msra.mxu1 %vm25843_vm2, %v26144_v17 }
 0x166   : > { %20044 = vmatpush1.bf16.msk.msra.mxu0 %vm25843_vm2, %v26150_v20  ;;  %20066 = vmatprep.subr.bf16.mxu1 %v26152_v21 }
 0x167   : > { %18711 = vmatmul.mubr.msk.f32.gmra.mrb[36].mxu0 %vm635_vm3, %v25952_v56  ;;  %20056 = vmatprep.subr.bf16.mxu0 %v26159_v24 }
 0x168   : > { %18721 = vmatmul.mubr.msk.f32.gmra.mrb[36].mxu1 %vm635_vm3, %v25952_v56  ;;  %1255 = vmatprep.mubr.f32.mxu0 %v33460_v0 }
 0x169   : > { %1368 = vmatprep.mubr.f32.mxu1 %v33460_v0 }
 0x16b   : > { %18712 = vmatmul.mubr.msk.f32.gmra.mrb[38].mxu0 %vm635_vm3, %v25972_v59 }
 0x16c   : > { %18722 = vmatmul.mubr.msk.f32.gmra.mrb[38].mxu1 %vm635_vm3, %v25972_v59  ;;  %1261 = vmatprep.mubr.f32.mxu0 %v33460_v0 }
 0x16d   : > { %1374 = vmatprep.mubr.f32.mxu1 %v33460_v0 }
 0x16f   : > { %18713 = vmatmul.mubr.msk.f32.gmra.mrb[40].mxu0 %vm635_vm3, %v25984_v60 }
 0x170   : > { %18723 = vmatmul.mubr.msk.f32.gmra.mrb[40].mxu1 %vm635_vm3, %v25984_v60  ;;  %1267 = vmatprep.mubr.f32.mxu0 %v33460_v0 }
 0x171   : > { %1380 = vmatprep.mubr.f32.mxu1 %v33460_v0 }
 0x173   : > { %18714 = vmatmul.mubr.msk.f32.gmra.mrb[42].mxu0 %vm635_vm3, %v25992_v61 }
 0x174   : > { %18724 = vmatmul.mubr.msk.f32.gmra.mrb[42].mxu1 %vm635_vm3, %v25992_v61  ;;  %1273 = vmatprep.mubr.f32.mxu0 %v33460_v0 }
 0x175   : > { %1386 = vmatprep.mubr.f32.mxu1 %v33460_v0 }
 0x177   : > { %18715 = vmatmul.mubr.msk.f32.gmra.mrb[44].mxu0 %vm635_vm3, %v26000_v62 }
 0x178   : > { %18725 = vmatmul.mubr.msk.f32.gmra.mrb[44].mxu1 %vm635_vm3, %v26000_v62  ;;  %1279 = vmatprep.mubr.f32.mxu0 %v33460_v0 }
 0x179   : > { %1392 = vmatprep.mubr.f32.mxu1 %v33460_v0 }
 0x17b   : > { %18716 = vmatmul.mubr.msk.f32.gmra.mrb[46].mxu0 %vm635_vm3, %v26008_v63 }
 0x17c   : > { %18726 = vmatmul.mubr.msk.f32.gmra.mrb[46].mxu1 %vm635_vm3, %v26008_v63  ;;  %1463 = vmatprep.mubr.f32.mxu0 %v33460_v0 }
 0x17d   : > { %1576 = vmatprep.mubr.f32.mxu1 %v33460_v0 }
 0x17f   : > { %18729 = vmatmul.mubr.msk.f32.vlgmr.msra.gmra.mrb[48].mxu0 %vm635_vm3, %v25898_v31 }
 0x180   : > { %18739 = vmatmul.mubr.msk.f32.vlgmr.msra.gmra.mrb[48].mxu1 %vm635_vm3, %v25898_v31  ;;  %1469 = vmatprep.mubr.f32.mxu0 %v33460_v0 }
 0x181   : > { %1582 = vmatprep.mubr.f32.mxu1 %v33460_v0  ;;  %20068 = vmatpush1.bf16.msra.mxu1 %v26217_v44 }
 0x182   : > { %20071 = vmatprep.subr.msk.bf16.mxu1 %vm25843_vm2, %v26219_v45  ;;  %20058 = vmatpush1.bf16.msra.mxu0 %v26221_v47 }
 0x183   : > { %18730 = vmatmul.mubr.msk.f32.gmra.mrb[50].mxu0 %vm635_vm3, %v25923_v43  ;;  %20061 = vmatprep.subr.msk.bf16.mxu0 %vm25843_vm2, %v26227_v2 }
 0x184   : > { %18740 = vmatmul.mubr.msk.f32.gmra.mrb[50].mxu1 %vm635_vm3, %v25923_v43  ;;  %1475 = vmatprep.mubr.f32.mxu0 %v33460_v0 }
 0x185   : > { %1588 = vmatprep.mubr.f32.mxu1 %v33460_v0  ;;  %20074 = vmatpush1.bf16.msk.msra.mxu1 %vm25843_vm2, %v26236_v7 }
 0x186   : > { %20064 = vmatpush1.bf16.msk.msra.mxu0 %vm25843_vm2, %v26242_v8  ;;  %20086 = vmatprep.subr.bf16.mxu1 %v25863_v14 }
 0x187   : > { %18731 = vmatmul.mubr.msk.f32.gmra.mrb[52].mxu0 %vm635_vm3, %v25952_v56  ;;  %20076 = vmatprep.subr.bf16.mxu0 %v25857_v10  ;;  %v480_v10 = vld [vmem:[%s25812_s21] sm:$0xff]  ;;  %s25318_s21 = scalar_lea.vmem %s33395_s14, 1024 }
 0x188   : > { %18741 = vmatmul.mubr.msk.f32.gmra.mrb[52].mxu1 %vm635_vm3, %v25952_v56  ;;  %1481 = vmatprep.mubr.f32.mxu0 %v33460_v0  ;;  %v20077_v12 = vpack.c.bf16 %v481_v11, %v480_v10  ;;  %v18642_v10 = vld [vmem:[%s25819_s3 + $0xb8] sm:$0x7]  ;;  %p25319_p4 = scmp.ne.s32.totalorder %s33395_s14, %s25318_s21 }
 0x189   : > { %1594 = vmatprep.mubr.f32.mxu1 %v33460_v0  ;;  %v26913_v11 = vpack.c.bf16 %v18642_v10, %v18641_v6  ;;  %v18650_v6 = vld [vmem:[%s25819_s3 + $0xf8] sm:$0x7] }
 0x18a   : > { %v27601_v10 = vpack.c.bf16 %v18650_v6, %v18649_v55  ;;  %v18658_v55 = vld [vmem:[%s25819_s3 + $0x138] sm:$0x7]  ;;  %p25320_p0 = pnand %p25319_p4, %p34993_p9 }
 0x18b   : > { %18732 = vmatmul.mubr.msk.f32.gmra.mrb[54].mxu0 %vm635_vm3, %v25972_v59 }
 0x18c   : > { %18742 = vmatmul.mubr.msk.f32.gmra.mrb[54].mxu1 %vm635_vm3, %v25972_v59  ;;  %1487 = vmatprep.mubr.f32.mxu0 %v33460_v0  ;;  %p25321_p7 = pneg %p25320_p0 }
 0x18d   : > { %1600 = vmatprep.mubr.f32.mxu1 %v33460_v0 }
 0x18f   : > { %18733 = vmatmul.mubr.msk.f32.gmra.mrb[56].mxu0 %vm635_vm3, %v25984_v60 }
 0x190   : > { %18743 = vmatmul.mubr.msk.f32.gmra.mrb[56].mxu1 %vm635_vm3, %v25984_v60  ;;  %1493 = vmatprep.mubr.f32.mxu0 %v33460_v0 }
 0x191   : > { %1606 = vmatprep.mubr.f32.mxu1 %v33460_v0 }
 0x193   : > { %18734 = vmatmul.mubr.msk.f32.gmra.mrb[58].mxu0 %vm635_vm3, %v25992_v61 }
 0x194   : > { %18744 = vmatmul.mubr.msk.f32.gmra.mrb[58].mxu1 %vm635_vm3, %v25992_v61  ;;  %1499 = vmatprep.mubr.f32.mxu0 %v33460_v0 }
 0x195   : > { %1612 = vmatprep.mubr.f32.mxu1 %v33460_v0 }
 0x197   : > { %18735 = vmatmul.mubr.msk.f32.gmra.mrb[60].mxu0 %vm635_vm3, %v26000_v62 }
 0x198   : > { %18745 = vmatmul.mubr.msk.f32.gmra.mrb[60].mxu1 %vm635_vm3, %v26000_v62  ;;  %1505 = vmatprep.mubr.f32.mxu0 %v33460_v0 }
 0x199   : > { %1618 = vmatprep.mubr.f32.mxu1 %v33460_v0 }
 0x19b   : > { %18736 = vmatmul.mubr.msk.f32.gmra.mrb[62].mxu0 %vm635_vm3, %v26008_v63 }
 0x19c   : > { %18746 = vmatmul.mubr.msk.f32.gmra.mrb[62].mxu1 %vm635_vm3, %v26008_v63  ;;  %1689 = vmatprep.mubr.f32.mxu0 %v33460_v0 }
 0x19d   : > { %1802 = vmatprep.mubr.f32.mxu1 %v33460_v0 }
 0x19f   : > { %18749 = vmatmul.mubr.msk.f32.vlgmr.msra.gmra.mrb[64].mxu0 %vm635_vm3, %v25898_v31 }
 0x1a0   : > { %18759 = vmatmul.mubr.msk.f32.vlgmr.msra.gmra.mrb[64].mxu1 %vm635_vm3, %v25898_v31  ;;  %1695 = vmatprep.mubr.f32.mxu0 %v33460_v0  ;;  %v26370_v31 = vld [vmem:[#allocation7 + $0x8] sm:$0xff] }
 0x1a1   : > { %1808 = vmatprep.mubr.f32.mxu1 %v33460_v0  ;;  %20088 = vmatpush1.bf16.msra.mxu1 %v25850_v5 }
 0x1a2   : > { %20091 = vmatprep.subr.msk.bf16.mxu1 %vm25843_vm2, %v25887_v25  ;;  %20078 = vmatpush1.bf16.msra.mxu0 %v20077_v12  ;;  %v27066_v12 = vld [vmem:[#allocation7 + $0xd0] sm:$0xff] }
 0x1a3   : > { %18750 = vmatmul.mubr.msk.f32.gmra.mrb[66].mxu0 %vm635_vm3, %v25923_v43  ;;  %20081 = vmatprep.subr.msk.bf16.mxu0 %vm25843_vm2, %v25878_v23  ;;  %v26362_v23 = vld [vmem:[#allocation7] sm:$0xff] }
 0x1a4   : > { %18760 = vmatmul.mubr.msk.f32.gmra.mrb[66].mxu1 %vm635_vm3, %v25923_v43  ;;  %1701 = vmatprep.mubr.f32.mxu0 %v33460_v0  ;;  %v26386_v43 = vld [vmem:[#allocation7 + $0x10] sm:$0xff] }
 0x1a5   : > { %1814 = vmatprep.mubr.f32.mxu1 %v33460_v0  ;;  %20094 = vmatpush1.bf16.msk.msra.mxu1 %vm25843_vm2, %v25870_v18 }
 0x1a6   : > { %20084 = vmatpush1.bf16.msk.msra.mxu0 %vm25843_vm2, %v20082_v28  ;;  %20106 = vmatprep.subr.bf16.mxu1 %v25904_v33  ;;  %v27098_v28 = vld [vmem:[#allocation7 + $0xe8] sm:$0xff] }
 0x1a7   : > { %18751 = vmatmul.mubr.msk.f32.gmra.mrb[68].mxu0 %vm635_vm3, %v25952_v56  ;;  %20096 = vmatprep.subr.bf16.mxu0 %v25929_v46 }
 0x1a8   : > { %18761 = vmatmul.mubr.msk.f32.gmra.mrb[68].mxu1 %vm635_vm3, %v25952_v56  ;;  %1707 = vmatprep.mubr.f32.mxu0 %v33460_v0  ;;  %v26402_v56 = vld [vmem:[#allocation7 + $0x18] sm:$0xff] }
 0x1a9   : > { %1820 = vmatprep.mubr.f32.mxu1 %v33460_v0 }
 0x1ab   : > { %18752 = vmatmul.mubr.msk.f32.gmra.mrb[70].mxu0 %vm635_vm3, %v25972_v59 }
 0x1ac   : > { %18762 = vmatmul.mubr.msk.f32.gmra.mrb[70].mxu1 %vm635_vm3, %v25972_v59  ;;  %1713 = vmatprep.mubr.f32.mxu0 %v33460_v0  ;;  %v26410_v59 = vld [vmem:[#allocation7 + $0x20] sm:$0xff] }
 0x1ad   : > { %1826 = vmatprep.mubr.f32.mxu1 %v33460_v0 }
 0x1af   : > { %18753 = vmatmul.mubr.msk.f32.gmra.mrb[72].mxu0 %vm635_vm3, %v25984_v60 }
 0x1b0   : > { %18763 = vmatmul.mubr.msk.f32.gmra.mrb[72].mxu1 %vm635_vm3, %v25984_v60  ;;  %1719 = vmatprep.mubr.f32.mxu0 %v33460_v0  ;;  %v26418_v60 = vld [vmem:[#allocation7 + $0x28] sm:$0xff] }
 0x1b1   : > { %1832 = vmatprep.mubr.f32.mxu1 %v33460_v0 }
 0x1b3   : > { %18754 = vmatmul.mubr.msk.f32.gmra.mrb[74].mxu0 %vm635_vm3, %v25992_v61 }
 0x1b4   : > { %18764 = vmatmul.mubr.msk.f32.gmra.mrb[74].mxu1 %vm635_vm3, %v25992_v61  ;;  %1725 = vmatprep.mubr.f32.mxu0 %v33460_v0  ;;  %v26426_v61 = vld [vmem:[#allocation7 + $0x30] sm:$0xff] }
 0x1b5   : > { %1838 = vmatprep.mubr.f32.mxu1 %v33460_v0 }
 0x1b7   : > { %18755 = vmatmul.mubr.msk.f32.gmra.mrb[76].mxu0 %vm635_vm3, %v26000_v62 }
 0x1b8   : > { %18765 = vmatmul.mubr.msk.f32.gmra.mrb[76].mxu1 %vm635_vm3, %v26000_v62  ;;  %1731 = vmatprep.mubr.f32.mxu0 %v33460_v0  ;;  %v26434_v62 = vld [vmem:[#allocation7 + $0x38] sm:$0xff] }
 0x1b9   : > { %1844 = vmatprep.mubr.f32.mxu1 %v33460_v0 }
 0x1bb   : > { %18756 = vmatmul.mubr.msk.f32.gmra.mrb[78].mxu0 %vm635_vm3, %v26008_v63 }
 0x1bc   : > { %18766 = vmatmul.mubr.msk.f32.gmra.mrb[78].mxu1 %vm635_vm3, %v26008_v63  ;;  %1942 = vmatprep.mubr.f32.mxu0 %v33460_v0  ;;  %v26722_v63 = vld [vmem:[#allocation7 + $0x90] sm:$0xff] }
 0x1bd   : > { %2055 = vmatprep.mubr.f32.mxu1 %v33460_v0 }
 0x1bf   : > { %18769 = vmatmul.mubr.msk.f32.vlgmr.msra.gmra.mrb[0].mxu0 %vm635_vm3, %v26362_v23 }
 0x1c0   : > { %18779 = vmatmul.mubr.msk.f32.vlgmr.msra.gmra.mrb[0].mxu1 %vm635_vm3, %v26362_v23  ;;  %1948 = vmatprep.mubr.f32.mxu0 %v33460_v0 }
 0x1c1   : > { %2061 = vmatprep.mubr.f32.mxu1 %v33460_v0  ;;  %20108 = vmatpush1.bf16.msra.mxu1 %v25910_v37 }
 0x1c2   : > { %20111 = vmatprep.subr.msk.bf16.mxu1 %vm25843_vm2, %v25937_v49  ;;  %20098 = vmatpush1.bf16.msra.mxu0 %v25855_v9 }
 0x1c3   : > { %18770 = vmatmul.mubr.msk.f32.gmra.mrb[2].mxu0 %vm635_vm3, %v26370_v31  ;;  %20101 = vmatprep.subr.msk.bf16.mxu0 %vm25843_vm2, %v25956_v57 }
 0x1c4   : > { %18780 = vmatmul.mubr.msk.f32.gmra.mrb[2].mxu1 %vm635_vm3, %v26370_v31  ;;  %1954 = vmatprep.mubr.f32.mxu0 %v33460_v0 }
 0x1c5   : > { %2067 = vmatprep.mubr.f32.mxu1 %v33460_v0  ;;  %20114 = vmatpush1.bf16.msk.msra.mxu1 %vm25843_vm2, %v25939_v50 }
 0x1c6   : > { %20104 = vmatpush1.bf16.msk.msra.mxu0 %vm25843_vm2, %v25872_v19  ;;  %20126 = vmatprep.subr.bf16.mxu1 %v26025_v13 }
 0x1c7   : > { %18771 = vmatmul.mubr.msk.f32.gmra.mrb[4].mxu0 %vm635_vm3, %v26386_v43  ;;  %20116 = vmatprep.subr.bf16.mxu0 %v26029_v16 }
 0x1c8   : > { %18781 = vmatmul.mubr.msk.f32.gmra.mrb[4].mxu1 %vm635_vm3, %v26386_v43  ;;  %1960 = vmatprep.mubr.f32.mxu0 %v33460_v0 }
 0x1c9   : > { %2073 = vmatprep.mubr.f32.mxu1 %v33460_v0 }
 0x1cb   : > { %18772 = vmatmul.mubr.msk.f32.gmra.mrb[6].mxu0 %vm635_vm3, %v26402_v56 }
 0x1cc   : > { %18782 = vmatmul.mubr.msk.f32.gmra.mrb[6].mxu1 %vm635_vm3, %v26402_v56  ;;  %1966 = vmatprep.mubr.f32.mxu0 %v33460_v0 }
 0x1cd   : > { %2079 = vmatprep.mubr.f32.mxu1 %v33460_v0 }
 0x1cf   : > { %18773 = vmatmul.mubr.msk.f32.gmra.mrb[8].mxu0 %vm635_vm3, %v26410_v59 }
 0x1d0   : > { %18783 = vmatmul.mubr.msk.f32.gmra.mrb[8].mxu1 %vm635_vm3, %v26410_v59  ;;  %1972 = vmatprep.mubr.f32.mxu0 %v33460_v0 }
 0x1d1   : > { %2085 = vmatprep.mubr.f32.mxu1 %v33460_v0 }
 0x1d3   : > { %18774 = vmatmul.mubr.msk.f32.gmra.mrb[10].mxu0 %vm635_vm3, %v26418_v60 }
 0x1d4   : > { %18784 = vmatmul.mubr.msk.f32.gmra.mrb[10].mxu1 %vm635_vm3, %v26418_v60  ;;  %1978 = vmatprep.mubr.f32.mxu0 %v33460_v0 }
 0x1d5   : > { %2091 = vmatprep.mubr.f32.mxu1 %v33460_v0 }
 0x1d7   : > { %18775 = vmatmul.mubr.msk.f32.gmra.mrb[12].mxu0 %vm635_vm3, %v26426_v61 }
 0x1d8   : > { %18785 = vmatmul.mubr.msk.f32.gmra.mrb[12].mxu1 %vm635_vm3, %v26426_v61  ;;  %1984 = vmatprep.mubr.f32.mxu0 %v33460_v0 }
 0x1d9   : > { %2097 = vmatprep.mubr.f32.mxu1 %v33460_v0 }
 0x1db   : > { %18776 = vmatmul.mubr.msk.f32.gmra.mrb[14].mxu0 %vm635_vm3, %v26434_v62 }
 0x1dc   : > { %18786 = vmatmul.mubr.msk.f32.gmra.mrb[14].mxu1 %vm635_vm3, %v26434_v62  ;;  %2168 = vmatprep.mubr.f32.mxu0 %v33460_v0 }
 0x1dd   : > { %2281 = vmatprep.mubr.f32.mxu1 %v33460_v0 }
 0x1df   : > { %18789 = vmatmul.mubr.msk.f32.vlgmr.msra.gmra.mrb[16].mxu0 %vm635_vm3, %v26362_v23 }
 0x1e0   : > { %18799 = vmatmul.mubr.msk.f32.vlgmr.msra.gmra.mrb[16].mxu1 %vm635_vm3, %v26362_v23  ;;  %2174 = vmatprep.mubr.f32.mxu0 %v33460_v0 }
 0x1e1   : > { %2287 = vmatprep.mubr.f32.mxu1 %v33460_v0  ;;  %20128 = vmatpush1.bf16.msra.mxu1 %v25964_v58 }
 0x1e2   : > { %20131 = vmatprep.subr.msk.bf16.mxu1 %vm25843_vm2, %v26048_v32  ;;  %20118 = vmatpush1.bf16.msra.mxu0 %v25892_v29 }
 0x1e3   : > { %18790 = vmatmul.mubr.msk.f32.gmra.mrb[18].mxu0 %vm635_vm3, %v26370_v31  ;;  %20121 = vmatprep.subr.msk.bf16.mxu0 %vm25843_vm2, %v26054_v34 }
 0x1e4   : > { %18800 = vmatmul.mubr.msk.f32.gmra.mrb[18].mxu1 %vm635_vm3, %v26370_v31  ;;  %2180 = vmatprep.mubr.f32.mxu0 %v33460_v0 }
 0x1e5   : > { %2293 = vmatprep.mubr.f32.mxu1 %v33460_v0  ;;  %20134 = vmatpush1.bf16.msk.msra.mxu1 %vm25843_vm2, %v26036_v22 }
 0x1e6   : > { %20124 = vmatpush1.bf16.msk.msra.mxu0 %vm25843_vm2, %v25912_v38  ;;  %20146 = vmatprep.subr.bf16.mxu1 %v26121_v51 }
 0x1e7   : > { %18791 = vmatmul.mubr.msk.f32.gmra.mrb[20].mxu0 %vm635_vm3, %v26386_v43  ;;  %20136 = vmatprep.subr.bf16.mxu0 %v26125_v54 }
 0x1e8   : > { %18801 = vmatmul.mubr.msk.f32.gmra.mrb[20].mxu1 %vm635_vm3, %v26386_v43  ;;  %2186 = vmatprep.mubr.f32.mxu0 %v33460_v0 }
 0x1e9   : > { %2299 = vmatprep.mubr.f32.mxu1 %v33460_v0 }
 0x1eb   : > { %18792 = vmatmul.mubr.msk.f32.gmra.mrb[22].mxu0 %vm635_vm3, %v26402_v56 }
 0x1ec   : > { %18802 = vmatmul.mubr.msk.f32.gmra.mrb[22].mxu1 %vm635_vm3, %v26402_v56  ;;  %2192 = vmatprep.mubr.f32.mxu0 %v33460_v0 }
 0x1ed   : > { %2305 = vmatprep.mubr.f32.mxu1 %v33460_v0 }
 0x1ef   : > { %18793 = vmatmul.mubr.msk.f32.gmra.mrb[24].mxu0 %vm635_vm3, %v26410_v59 }
 0x1f0   : > { %18803 = vmatmul.mubr.msk.f32.gmra.mrb[24].mxu1 %vm635_vm3, %v26410_v59  ;;  %2198 = vmatprep.mubr.f32.mxu0 %v33460_v0 }
 0x1f1   : > { %2311 = vmatprep.mubr.f32.mxu1 %v33460_v0 }
 0x1f3   : > { %18794 = vmatmul.mubr.msk.f32.gmra.mrb[26].mxu0 %vm635_vm3, %v26418_v60 }
 0x1f4   : > { %18804 = vmatmul.mubr.msk.f32.gmra.mrb[26].mxu1 %vm635_vm3, %v26418_v60  ;;  %2204 = vmatprep.mubr.f32.mxu0 %v33460_v0 }
 0x1f5   : > { %2317 = vmatprep.mubr.f32.mxu1 %v33460_v0 }
 0x1f7   : > { %18795 = vmatmul.mubr.msk.f32.gmra.mrb[28].mxu0 %vm635_vm3, %v26426_v61 }
 0x1f8   : > { %18805 = vmatmul.mubr.msk.f32.gmra.mrb[28].mxu1 %vm635_vm3, %v26426_v61  ;;  %2210 = vmatprep.mubr.f32.mxu0 %v33460_v0 }
 0x1f9   : > { %2323 = vmatprep.mubr.f32.mxu1 %v33460_v0 }
 0x1fb   : > { %18796 = vmatmul.mubr.msk.f32.gmra.mrb[30].mxu0 %vm635_vm3, %v26434_v62 }
 0x1fc   : > { %18806 = vmatmul.mubr.msk.f32.gmra.mrb[30].mxu1 %vm635_vm3, %v26434_v62  ;;  %2394 = vmatprep.mubr.f32.mxu0 %v33460_v0 }
 0x1fd   : > { %2507 = vmatprep.mubr.f32.mxu1 %v33460_v0 }
 0x1ff   : > { %18809 = vmatmul.mubr.msk.f32.vlgmr.msra.gmra.mrb[32].mxu0 %vm635_vm3, %v26362_v23 }
 0x200   : > { %18819 = vmatmul.mubr.msk.f32.vlgmr.msra.gmra.mrb[32].mxu1 %vm635_vm3, %v26362_v23  ;;  %2400 = vmatprep.mubr.f32.mxu0 %v33460_v0 }
 0x201   : > { %2513 = vmatprep.mubr.f32.mxu1 %v33460_v0  ;;  %20148 = vmatpush1.bf16.msra.mxu1 %v26063_v36 }
 0x202   : > { %20151 = vmatprep.subr.msk.bf16.mxu1 %vm25843_vm2, %v26144_v17  ;;  %20138 = vmatpush1.bf16.msra.mxu0 %v25945_v53 }
 0x203   : > { %18810 = vmatmul.mubr.msk.f32.gmra.mrb[34].mxu0 %vm635_vm3, %v26370_v31  ;;  %20141 = vmatprep.subr.msk.bf16.mxu0 %vm25843_vm2, %v26150_v20 }
 0x204   : > { %18820 = vmatmul.mubr.msk.f32.gmra.mrb[34].mxu1 %vm635_vm3, %v26370_v31  ;;  %2406 = vmatprep.mubr.f32.mxu0 %v33460_v0 }
 0x205   : > { %2519 = vmatprep.mubr.f32.mxu1 %v33460_v0  ;;  %20154 = vmatpush1.bf16.msk.msra.mxu1 %vm25843_vm2, %v26132_v4 }
 0x206   : > { %20144 = vmatpush1.bf16.msk.msra.mxu0 %vm25843_vm2, %v26027_v15  ;;  %20166 = vmatprep.subr.bf16.mxu1 %v26217_v44 }
 0x207   : > { %18811 = vmatmul.mubr.msk.f32.gmra.mrb[36].mxu0 %vm635_vm3, %v26386_v43  ;;  %20156 = vmatprep.subr.bf16.mxu0 %v26221_v47 }
 0x208   : > { %18821 = vmatmul.mubr.msk.f32.gmra.mrb[36].mxu1 %vm635_vm3, %v26386_v43  ;;  %2412 = vmatprep.mubr.f32.mxu0 %v33460_v0 }
 0x209   : > { %2525 = vmatprep.mubr.f32.mxu1 %v33460_v0 }
 0x20b   : > { %18812 = vmatmul.mubr.msk.f32.gmra.mrb[38].mxu0 %vm635_vm3, %v26402_v56 }
 0x20c   : > { %18822 = vmatmul.mubr.msk.f32.gmra.mrb[38].mxu1 %vm635_vm3, %v26402_v56  ;;  %2418 = vmatprep.mubr.f32.mxu0 %v33460_v0 }
 0x20d   : > { %2531 = vmatprep.mubr.f32.mxu1 %v33460_v0 }
 0x20f   : > { %18813 = vmatmul.mubr.msk.f32.gmra.mrb[40].mxu0 %vm635_vm3, %v26410_v59 }
 0x210   : > { %18823 = vmatmul.mubr.msk.f32.gmra.mrb[40].mxu1 %vm635_vm3, %v26410_v59  ;;  %2424 = vmatprep.mubr.f32.mxu0 %v33460_v0 }
 0x211   : > { %2537 = vmatprep.mubr.f32.mxu1 %v33460_v0 }
 0x213   : > { %18814 = vmatmul.mubr.msk.f32.gmra.mrb[42].mxu0 %vm635_vm3, %v26418_v60 }
 0x214   : > { %18824 = vmatmul.mubr.msk.f32.gmra.mrb[42].mxu1 %vm635_vm3, %v26418_v60  ;;  %2430 = vmatprep.mubr.f32.mxu0 %v33460_v0 }
 0x215   : > { %2543 = vmatprep.mubr.f32.mxu1 %v33460_v0 }
 0x217   : > { %18815 = vmatmul.mubr.msk.f32.gmra.mrb[44].mxu0 %vm635_vm3, %v26426_v61 }
 0x218   : > { %18825 = vmatmul.mubr.msk.f32.gmra.mrb[44].mxu1 %vm635_vm3, %v26426_v61  ;;  %2436 = vmatprep.mubr.f32.mxu0 %v33460_v0 }
 0x219   : > { %2549 = vmatprep.mubr.f32.mxu1 %v33460_v0 }
 0x21b   : > { %18816 = vmatmul.mubr.msk.f32.gmra.mrb[46].mxu0 %vm635_vm3, %v26434_v62 }
 0x21c   : > { %18826 = vmatmul.mubr.msk.f32.gmra.mrb[46].mxu1 %vm635_vm3, %v26434_v62  ;;  %2620 = vmatprep.mubr.f32.mxu0 %v33460_v0 }
 0x21d   : > { %2733 = vmatprep.mubr.f32.mxu1 %v33460_v0 }
 0x21f   : > { %18829 = vmatmul.mubr.msk.f32.vlgmr.msra.gmra.mrb[48].mxu0 %vm635_vm3, %v26362_v23 }
 0x220   : > { %18839 = vmatmul.mubr.msk.f32.vlgmr.msra.gmra.mrb[48].mxu1 %vm635_vm3, %v26362_v23  ;;  %2626 = vmatprep.mubr.f32.mxu0 %v33460_v0 }
 0x221   : > { %2739 = vmatprep.mubr.f32.mxu1 %v33460_v0  ;;  %20168 = vmatpush1.bf16.msra.mxu1 %v26159_v24 }
 0x222   : > { %20171 = vmatprep.subr.msk.bf16.mxu1 %vm25843_vm2, %v26236_v7  ;;  %20158 = vmatpush1.bf16.msra.mxu0 %v26056_v35 }
 0x223   : > { %18830 = vmatmul.mubr.msk.f32.gmra.mrb[50].mxu0 %vm635_vm3, %v26370_v31  ;;  %20161 = vmatprep.subr.msk.bf16.mxu0 %vm25843_vm2, %v26242_v8 }
 0x224   : > { %18840 = vmatmul.mubr.msk.f32.gmra.mrb[50].mxu1 %vm635_vm3, %v26370_v31  ;;  %2632 = vmatprep.mubr.f32.mxu0 %v33460_v0 }
 0x225   : > { %2745 = vmatprep.mubr.f32.mxu1 %v33460_v0  ;;  %20174 = vmatpush1.bf16.msk.msra.mxu1 %vm25843_vm2, %v26227_v2 }
 0x226   : > { %20164 = vmatpush1.bf16.msk.msra.mxu0 %vm25843_vm2, %v26123_v52  ;;  %20186 = vmatprep.subr.bf16.mxu1 %v25929_v46 }
 0x227   : > { %18831 = vmatmul.mubr.msk.f32.gmra.mrb[52].mxu0 %vm635_vm3, %v26386_v43  ;;  %20176 = vmatprep.subr.bf16.mxu0 %v25863_v14 }
 0x228   : > { %18841 = vmatmul.mubr.msk.f32.gmra.mrb[52].mxu1 %vm635_vm3, %v26386_v43  ;;  %2638 = vmatprep.mubr.f32.mxu0 %v33460_v0 }
 0x229   : > { %2751 = vmatprep.mubr.f32.mxu1 %v33460_v0 }
 0x22b   : > { %18832 = vmatmul.mubr.msk.f32.gmra.mrb[54].mxu0 %vm635_vm3, %v26402_v56 }
 0x22c   : > { %18842 = vmatmul.mubr.msk.f32.gmra.mrb[54].mxu1 %vm635_vm3, %v26402_v56  ;;  %2644 = vmatprep.mubr.f32.mxu0 %v33460_v0 }
 0x22d   : > { %2757 = vmatprep.mubr.f32.mxu1 %v33460_v0 }
 0x22f   : > { %18833 = vmatmul.mubr.msk.f32.gmra.mrb[56].mxu0 %vm635_vm3, %v26410_v59 }
 0x230   : > { %18843 = vmatmul.mubr.msk.f32.gmra.mrb[56].mxu1 %vm635_vm3, %v26410_v59  ;;  %2650 = vmatprep.mubr.f32.mxu0 %v33460_v0 }
 0x231   : > { %2763 = vmatprep.mubr.f32.mxu1 %v33460_v0 }
 0x233   : > { %18834 = vmatmul.mubr.msk.f32.gmra.mrb[58].mxu0 %vm635_vm3, %v26418_v60 }
 0x234   : > { %18844 = vmatmul.mubr.msk.f32.gmra.mrb[58].mxu1 %vm635_vm3, %v26418_v60  ;;  %2656 = vmatprep.mubr.f32.mxu0 %v33460_v0 }
 0x235   : > { %2769 = vmatprep.mubr.f32.mxu1 %v33460_v0 }
 0x237   : > { %18835 = vmatmul.mubr.msk.f32.gmra.mrb[60].mxu0 %vm635_vm3, %v26426_v61 }
 0x238   : > { %18845 = vmatmul.mubr.msk.f32.gmra.mrb[60].mxu1 %vm635_vm3, %v26426_v61  ;;  %2662 = vmatprep.mubr.f32.mxu0 %v33460_v0 }
 0x239   : > { %2775 = vmatprep.mubr.f32.mxu1 %v33460_v0 }
 0x23b   : > { %18836 = vmatmul.mubr.msk.f32.gmra.mrb[62].mxu0 %vm635_vm3, %v26434_v62 }
 0x23c   : > { %18846 = vmatmul.mubr.msk.f32.gmra.mrb[62].mxu1 %vm635_vm3, %v26434_v62  ;;  %2846 = vmatprep.mubr.f32.mxu0 %v33460_v0 }
 0x23d   : > { %2959 = vmatprep.mubr.f32.mxu1 %v33460_v0 }
 0x23f   : > { %18849 = vmatmul.mubr.msk.f32.vlgmr.msra.gmra.mrb[64].mxu0 %vm635_vm3, %v26362_v23 }
 0x240   : > { %18859 = vmatmul.mubr.msk.f32.vlgmr.msra.gmra.mrb[64].mxu1 %vm635_vm3, %v26362_v23  ;;  %2852 = vmatprep.mubr.f32.mxu0 %v33460_v0  ;;  %v27106_v23 = vld [vmem:[#allocation7 + $0xf0] sm:$0xff] }
 0x241   : > { %2965 = vmatprep.mubr.f32.mxu1 %v33460_v0  ;;  %20188 = vmatpush1.bf16.msra.mxu1 %v25855_v9 }
 0x242   : > { %20191 = vmatprep.subr.msk.bf16.mxu1 %vm25843_vm2, %v25956_v57  ;;  %20178 = vmatpush1.bf16.msra.mxu0 %v25850_v5  ;;  %v26698_v5 = vld [vmem:[#allocation7 + $0x80] sm:$0xff] }
 0x243   : > { %18850 = vmatmul.mubr.msk.f32.gmra.mrb[66].mxu0 %vm635_vm3, %v26370_v31  ;;  %20181 = vmatprep.subr.msk.bf16.mxu0 %vm25843_vm2, %v25887_v25 }
 0x244   : > { %18860 = vmatmul.mubr.msk.f32.gmra.mrb[66].mxu1 %vm635_vm3, %v26370_v31  ;;  %2858 = vmatprep.mubr.f32.mxu0 %v33460_v0  ;;  %v27114_v31 = vld [vmem:[#allocation7 + $0xf8] sm:$0xff] }
 0x245   : > { %2971 = vmatprep.mubr.f32.mxu1 %v33460_v0  ;;  %20194 = vmatpush1.bf16.msk.msra.mxu1 %vm25843_vm2, %v25872_v19 }
 0x246   : > { %20184 = vmatpush1.bf16.msk.msra.mxu0 %vm25843_vm2, %v25870_v18  ;;  %20206 = vmatprep.subr.bf16.mxu1 %v26029_v16  ;;  %v26706_v18 = vld [vmem:[#allocation7 + $0x88] sm:$0xff] }
 0x247   : > { %18851 = vmatmul.mubr.msk.f32.gmra.mrb[68].mxu0 %vm635_vm3, %v26386_v43  ;;  %20196 = vmatprep.subr.bf16.mxu0 %v25904_v33 }
 0x248   : > { %18861 = vmatmul.mubr.msk.f32.gmra.mrb[68].mxu1 %vm635_vm3, %v26386_v43  ;;  %2864 = vmatprep.mubr.f32.mxu0 %v33460_v0  ;;  %v18643_v43 = vld [vmem:[%s25819_s3 + $0xc0] sm:$0xff] }
 0x249   : > { %2977 = vmatprep.mubr.f32.mxu1 %v33460_v0 }
 0x24b   : > { %18852 = vmatmul.mubr.msk.f32.gmra.mrb[70].mxu0 %vm635_vm3, %v26402_v56 }
 0x24c   : > { %18862 = vmatmul.mubr.msk.f32.gmra.mrb[70].mxu1 %vm635_vm3, %v26402_v56  ;;  %2870 = vmatprep.mubr.f32.mxu0 %v33460_v0  ;;  %v18644_v56 = vld [vmem:[%s25819_s3 + $0xc8] sm:$0xff] }
 0x24d   : > { %2983 = vmatprep.mubr.f32.mxu1 %v33460_v0 }
 0x24f   : > { %18853 = vmatmul.mubr.msk.f32.gmra.mrb[72].mxu0 %vm635_vm3, %v26410_v59 }
 0x250   : > { %18863 = vmatmul.mubr.msk.f32.gmra.mrb[72].mxu1 %vm635_vm3, %v26410_v59  ;;  %2876 = vmatprep.mubr.f32.mxu0 %v33460_v0  ;;  %v27200_v59 = vpack.c.bf16 %v18644_v56, %v18643_v43  ;;  %v18653_v56 = vld [vmem:[%s25819_s3 + $0x110] sm:$0xff] }
 0x251   : > { %2989 = vmatprep.mubr.f32.mxu1 %v33460_v0 }
 0x253   : > { %18854 = vmatmul.mubr.msk.f32.gmra.mrb[74].mxu0 %vm635_vm3, %v26418_v60 }
 0x254   : > { %18864 = vmatmul.mubr.msk.f32.gmra.mrb[74].mxu1 %vm635_vm3, %v26418_v60  ;;  %2882 = vmatprep.mubr.f32.mxu0 %v33460_v0  ;;  %v18645_v60 = vld [vmem:[%s25819_s3 + $0xd0] sm:$0xff] }
 0x255   : > { %2995 = vmatprep.mubr.f32.mxu1 %v33460_v0 }
 0x257   : > { %18855 = vmatmul.mubr.msk.f32.gmra.mrb[76].mxu0 %vm635_vm3, %v26426_v61 }
 0x258   : > { %18865 = vmatmul.mubr.msk.f32.gmra.mrb[76].mxu1 %vm635_vm3, %v26426_v61  ;;  %2888 = vmatprep.mubr.f32.mxu0 %v33460_v0  ;;  %v18646_v61 = vld [vmem:[%s25819_s3 + $0xd8] sm:$0x7] }
 0x259   : > { %3001 = vmatprep.mubr.f32.mxu1 %v33460_v0 }
 0x25b   : > { %18856 = vmatmul.mubr.msk.f32.gmra.mrb[78].mxu0 %vm635_vm3, %v26434_v62 }
 0x25c   : > { %18866 = vmatmul.mubr.msk.f32.gmra.mrb[78].mxu1 %vm635_vm3, %v26434_v62  ;;  %3108 = vmatprep.mubr.f32.mxu0 %v33460_v0  ;;  %v27257_v62 = vpack.c.bf16 %v18646_v61, %v18645_v60  ;;  %v18654_v60 = vld [vmem:[%s25819_s3 + $0x118] sm:$0x7] }
 0x25d   : > { %3221 = vmatprep.mubr.f32.mxu1 %v33460_v0  ;;  %v27945_v61 = vpack.c.bf16 %v18654_v60, %v18653_v56  ;;  %v18662_v56 = vld [vmem:[%s25819_s3 + $0x158] sm:$0x7] }
 0x25f   : > { %18869 = vmatmul.mubr.msk.f32.vlgmr.msra.gmra.mrb[0].mxu0 %vm635_vm3, %v26698_v5 }
 0x260   : > { %18879 = vmatmul.mubr.msk.f32.vlgmr.msra.gmra.mrb[0].mxu1 %vm635_vm3, %v26698_v5  ;;  %3114 = vmatprep.mubr.f32.mxu0 %v33460_v0 }
 0x261   : > { %3227 = vmatprep.mubr.f32.mxu1 %v33460_v0  ;;  %20208 = vmatpush1.bf16.msra.mxu1 %v25892_v29 }
 0x262   : > { %20211 = vmatprep.subr.msk.bf16.mxu1 %vm25843_vm2, %v26054_v34  ;;  %20198 = vmatpush1.bf16.msra.mxu0 %v25910_v37 }
 0x263   : > { %18870 = vmatmul.mubr.msk.f32.gmra.mrb[2].mxu0 %vm635_vm3, %v26706_v18  ;;  %20201 = vmatprep.subr.msk.bf16.mxu0 %vm25843_vm2, %v25937_v49 }
 0x264   : > { %18880 = vmatmul.mubr.msk.f32.gmra.mrb[2].mxu1 %vm635_vm3, %v26706_v18  ;;  %3120 = vmatprep.mubr.f32.mxu0 %v33460_v0 }
 0x265   : > { %3233 = vmatprep.mubr.f32.mxu1 %v33460_v0  ;;  %20214 = vmatpush1.bf16.msk.msra.mxu1 %vm25843_vm2, %v25912_v38 }
 0x266   : > { %20204 = vmatpush1.bf16.msk.msra.mxu0 %vm25843_vm2, %v25939_v50  ;;  %20226 = vmatprep.subr.bf16.mxu1 %v26125_v54 }
 0x267   : > { %18871 = vmatmul.mubr.msk.f32.gmra.mrb[4].mxu0 %vm635_vm3, %v26722_v63  ;;  %20216 = vmatprep.subr.bf16.mxu0 %v26025_v13 }
 0x268   : > { %18881 = vmatmul.mubr.msk.f32.gmra.mrb[4].mxu1 %vm635_vm3, %v26722_v63  ;;  %3126 = vmatprep.mubr.f32.mxu0 %v33460_v0 }
 0x269   : > { %3239 = vmatprep.mubr.f32.mxu1 %v33460_v0 }
 0x26b   : > { %18872 = vmatmul.mubr.msk.f32.gmra.mrb[6].mxu0 %vm635_vm3, %v26738_v30 }
 0x26c   : > { %18882 = vmatmul.mubr.msk.f32.gmra.mrb[6].mxu1 %vm635_vm3, %v26738_v30  ;;  %3132 = vmatprep.mubr.f32.mxu0 %v33460_v0 }
 0x26d   : > { %3245 = vmatprep.mubr.f32.mxu1 %v33460_v0 }
 0x26f   : > { %18873 = vmatmul.mubr.msk.f32.gmra.mrb[8].mxu0 %vm635_vm3, %v26746_v39 }
 0x270   : > { %18883 = vmatmul.mubr.msk.f32.gmra.mrb[8].mxu1 %vm635_vm3, %v26746_v39  ;;  %3138 = vmatprep.mubr.f32.mxu0 %v33460_v0 }
 0x271   : > { %3251 = vmatprep.mubr.f32.mxu1 %v33460_v0 }
 0x273   : > { %18874 = vmatmul.mubr.msk.f32.gmra.mrb[10].mxu0 %vm635_vm3, %v26754_v40 }
 0x274   : > { %18884 = vmatmul.mubr.msk.f32.gmra.mrb[10].mxu1 %vm635_vm3, %v26754_v40  ;;  %3144 = vmatprep.mubr.f32.mxu0 %v33460_v0 }
 0x275   : > { %3257 = vmatprep.mubr.f32.mxu1 %v33460_v0 }
 0x277   : > { %18875 = vmatmul.mubr.msk.f32.gmra.mrb[12].mxu0 %vm635_vm3, %v26762_v41 }
 0x278   : > { %18885 = vmatmul.mubr.msk.f32.gmra.mrb[12].mxu1 %vm635_vm3, %v26762_v41  ;;  %3150 = vmatprep.mubr.f32.mxu0 %v33460_v0 }
 0x279   : > { %3263 = vmatprep.mubr.f32.mxu1 %v33460_v0 }
 0x27b   : > { %18876 = vmatmul.mubr.msk.f32.gmra.mrb[14].mxu0 %vm635_vm3, %v26770_v42 }
 0x27c   : > { %18886 = vmatmul.mubr.msk.f32.gmra.mrb[14].mxu1 %vm635_vm3, %v26770_v42  ;;  %3334 = vmatprep.mubr.f32.mxu0 %v33460_v0 }
 0x27d   : > { %3447 = vmatprep.mubr.f32.mxu1 %v33460_v0 }
 0x27f   : > { %18889 = vmatmul.mubr.msk.f32.vlgmr.msra.gmra.mrb[16].mxu0 %vm635_vm3, %v26698_v5 }
 0x280   : > { %18899 = vmatmul.mubr.msk.f32.vlgmr.msra.gmra.mrb[16].mxu1 %vm635_vm3, %v26698_v5  ;;  %3340 = vmatprep.mubr.f32.mxu0 %v33460_v0 }
 0x281   : > { %3453 = vmatprep.mubr.f32.mxu1 %v33460_v0  ;;  %20228 = vmatpush1.bf16.msra.mxu1 %v25945_v53 }
 0x282   : > { %20231 = vmatprep.subr.msk.bf16.mxu1 %vm25843_vm2, %v26150_v20  ;;  %20218 = vmatpush1.bf16.msra.mxu0 %v25964_v58 }
 0x283   : > { %18890 = vmatmul.mubr.msk.f32.gmra.mrb[18].mxu0 %vm635_vm3, %v26706_v18  ;;  %20221 = vmatprep.subr.msk.bf16.mxu0 %vm25843_vm2, %v26048_v32 }
 0x284   : > { %18900 = vmatmul.mubr.msk.f32.gmra.mrb[18].mxu1 %vm635_vm3, %v26706_v18  ;;  %3346 = vmatprep.mubr.f32.mxu0 %v33460_v0 }
 0x285   : > { %3459 = vmatprep.mubr.f32.mxu1 %v33460_v0  ;;  %20234 = vmatpush1.bf16.msk.msra.mxu1 %vm25843_vm2, %v26027_v15 }
 0x286   : > { %20224 = vmatpush1.bf16.msk.msra.mxu0 %vm25843_vm2, %v26036_v22  ;;  %20246 = vmatprep.subr.bf16.mxu1 %v26221_v47 }
 0x287   : > { %18891 = vmatmul.mubr.msk.f32.gmra.mrb[20].mxu0 %vm635_vm3, %v26722_v63  ;;  %20236 = vmatprep.subr.bf16.mxu0 %v26121_v51 }
 0x288   : > { %18901 = vmatmul.mubr.msk.f32.gmra.mrb[20].mxu1 %vm635_vm3, %v26722_v63  ;;  %3352 = vmatprep.mubr.f32.mxu0 %v33460_v0 }
 0x289   : > { %3465 = vmatprep.mubr.f32.mxu1 %v33460_v0 }
 0x28b   : > { %18892 = vmatmul.mubr.msk.f32.gmra.mrb[22].mxu0 %vm635_vm3, %v26738_v30 }
 0x28c   : > { %18902 = vmatmul.mubr.msk.f32.gmra.mrb[22].mxu1 %vm635_vm3, %v26738_v30  ;;  %3358 = vmatprep.mubr.f32.mxu0 %v33460_v0 }
 0x28d   : > { %3471 = vmatprep.mubr.f32.mxu1 %v33460_v0 }
 0x28f   : > { %18893 = vmatmul.mubr.msk.f32.gmra.mrb[24].mxu0 %vm635_vm3, %v26746_v39 }
 0x290   : > { %18903 = vmatmul.mubr.msk.f32.gmra.mrb[24].mxu1 %vm635_vm3, %v26746_v39  ;;  %3364 = vmatprep.mubr.f32.mxu0 %v33460_v0 }
 0x291   : > { %3477 = vmatprep.mubr.f32.mxu1 %v33460_v0 }
 0x293   : > { %18894 = vmatmul.mubr.msk.f32.gmra.mrb[26].mxu0 %vm635_vm3, %v26754_v40 }
 0x294   : > { %18904 = vmatmul.mubr.msk.f32.gmra.mrb[26].mxu1 %vm635_vm3, %v26754_v40  ;;  %3370 = vmatprep.mubr.f32.mxu0 %v33460_v0 }
 0x295   : > { %3483 = vmatprep.mubr.f32.mxu1 %v33460_v0 }
 0x297   : > { %18895 = vmatmul.mubr.msk.f32.gmra.mrb[28].mxu0 %vm635_vm3, %v26762_v41 }
 0x298   : > { %18905 = vmatmul.mubr.msk.f32.gmra.mrb[28].mxu1 %vm635_vm3, %v26762_v41  ;;  %3376 = vmatprep.mubr.f32.mxu0 %v33460_v0 }
 0x299   : > { %3489 = vmatprep.mubr.f32.mxu1 %v33460_v0 }
 0x29b   : > { %18896 = vmatmul.mubr.msk.f32.gmra.mrb[30].mxu0 %vm635_vm3, %v26770_v42 }
 0x29c   : > { %18906 = vmatmul.mubr.msk.f32.gmra.mrb[30].mxu1 %vm635_vm3, %v26770_v42  ;;  %3560 = vmatprep.mubr.f32.mxu0 %v33460_v0 }
 0x29d   : > { %3673 = vmatprep.mubr.f32.mxu1 %v33460_v0 }
 0x29f   : > { %18909 = vmatmul.mubr.msk.f32.vlgmr.msra.gmra.mrb[32].mxu0 %vm635_vm3, %v26698_v5 }
 0x2a0   : > { %18919 = vmatmul.mubr.msk.f32.vlgmr.msra.gmra.mrb[32].mxu1 %vm635_vm3, %v26698_v5  ;;  %3566 = vmatprep.mubr.f32.mxu0 %v33460_v0 }
 0x2a1   : > { %3679 = vmatprep.mubr.f32.mxu1 %v33460_v0  ;;  %20248 = vmatpush1.bf16.msra.mxu1 %v26056_v35 }
 0x2a2   : > { %20251 = vmatprep.subr.msk.bf16.mxu1 %vm25843_vm2, %v26242_v8  ;;  %20238 = vmatpush1.bf16.msra.mxu0 %v26063_v36 }
 0x2a3   : > { %18910 = vmatmul.mubr.msk.f32.gmra.mrb[34].mxu0 %vm635_vm3, %v26706_v18  ;;  %20241 = vmatprep.subr.msk.bf16.mxu0 %vm25843_vm2, %v26144_v17 }
 0x2a4   : > { %18920 = vmatmul.mubr.msk.f32.gmra.mrb[34].mxu1 %vm635_vm3, %v26706_v18  ;;  %3572 = vmatprep.mubr.f32.mxu0 %v33460_v0 }
 0x2a5   : > { %3685 = vmatprep.mubr.f32.mxu1 %v33460_v0  ;;  %20254 = vmatpush1.bf16.msk.msra.mxu1 %vm25843_vm2, %v26123_v52 }
 0x2a6   : > { %20244 = vmatpush1.bf16.msk.msra.mxu0 %vm25843_vm2, %v26132_v4  ;;  %20266 = vmatprep.subr.bf16.mxu1 %v26856_v3 }
 0x2a7   : > { %18911 = vmatmul.mubr.msk.f32.gmra.mrb[36].mxu0 %vm635_vm3, %v26722_v63  ;;  %20256 = vmatprep.subr.bf16.mxu0 %v26217_v44 }
 0x2a8   : > { %18921 = vmatmul.mubr.msk.f32.gmra.mrb[36].mxu1 %vm635_vm3, %v26722_v63  ;;  %3578 = vmatprep.mubr.f32.mxu0 %v33460_v0 }
 0x2a9   : > { %3691 = vmatprep.mubr.f32.mxu1 %v33460_v0 }
 0x2ab   : > { %18912 = vmatmul.mubr.msk.f32.gmra.mrb[38].mxu0 %vm635_vm3, %v26738_v30 }
 0x2ac   : > { %18922 = vmatmul.mubr.msk.f32.gmra.mrb[38].mxu1 %vm635_vm3, %v26738_v30  ;;  %3584 = vmatprep.mubr.f32.mxu0 %v33460_v0 }
 0x2ad   : > { %3697 = vmatprep.mubr.f32.mxu1 %v33460_v0 }
 0x2af   : > { %18913 = vmatmul.mubr.msk.f32.gmra.mrb[40].mxu0 %vm635_vm3, %v26746_v39 }
 0x2b0   : > { %18923 = vmatmul.mubr.msk.f32.gmra.mrb[40].mxu1 %vm635_vm3, %v26746_v39  ;;  %3590 = vmatprep.mubr.f32.mxu0 %v33460_v0 }
 0x2b1   : > { %3703 = vmatprep.mubr.f32.mxu1 %v33460_v0 }
 0x2b3   : > { %18914 = vmatmul.mubr.msk.f32.gmra.mrb[42].mxu0 %vm635_vm3, %v26754_v40 }
 0x2b4   : > { %18924 = vmatmul.mubr.msk.f32.gmra.mrb[42].mxu1 %vm635_vm3, %v26754_v40  ;;  %3596 = vmatprep.mubr.f32.mxu0 %v33460_v0 }
 0x2b5   : > { %3709 = vmatprep.mubr.f32.mxu1 %v33460_v0 }
 0x2b7   : > { %18915 = vmatmul.mubr.msk.f32.gmra.mrb[44].mxu0 %vm635_vm3, %v26762_v41 }
 0x2b8   : > { %18925 = vmatmul.mubr.msk.f32.gmra.mrb[44].mxu1 %vm635_vm3, %v26762_v41  ;;  %3602 = vmatprep.mubr.f32.mxu0 %v33460_v0 }
 0x2b9   : > { %3715 = vmatprep.mubr.f32.mxu1 %v33460_v0 }
 0x2bb   : > { %18916 = vmatmul.mubr.msk.f32.gmra.mrb[46].mxu0 %vm635_vm3, %v26770_v42 }
 0x2bc   : > { %18926 = vmatmul.mubr.msk.f32.gmra.mrb[46].mxu1 %vm635_vm3, %v26770_v42  ;;  %3786 = vmatprep.mubr.f32.mxu0 %v33460_v0 }
 0x2bd   : > { %3899 = vmatprep.mubr.f32.mxu1 %v33460_v0 }
 0x2bf   : > { %18929 = vmatmul.mubr.msk.f32.vlgmr.msra.gmra.mrb[48].mxu0 %vm635_vm3, %v26698_v5 }
 0x2c0   : > { %18939 = vmatmul.mubr.msk.f32.vlgmr.msra.gmra.mrb[48].mxu1 %vm635_vm3, %v26698_v5  ;;  %3792 = vmatprep.mubr.f32.mxu0 %v33460_v0 }
 0x2c1   : > { %3905 = vmatprep.mubr.f32.mxu1 %v33460_v0  ;;  %20268 = vmatpush1.bf16.msra.mxu1 %v26152_v21 }
 0x2c2   : > { %20271 = vmatprep.subr.msk.bf16.mxu1 %vm25843_vm2, %v26913_v11  ;;  %20258 = vmatpush1.bf16.msra.mxu0 %v26159_v24 }
 0x2c3   : > { %18930 = vmatmul.mubr.msk.f32.gmra.mrb[50].mxu0 %vm635_vm3, %v26706_v18  ;;  %20261 = vmatprep.subr.msk.bf16.mxu0 %vm25843_vm2, %v26236_v7 }
 0x2c4   : > { %18940 = vmatmul.mubr.msk.f32.gmra.mrb[50].mxu1 %vm635_vm3, %v26706_v18  ;;  %3798 = vmatprep.mubr.f32.mxu0 %v33460_v0 }
 0x2c5   : > { %3911 = vmatprep.mubr.f32.mxu1 %v33460_v0  ;;  %20274 = vmatpush1.bf16.msk.msra.mxu1 %vm25843_vm2, %v26219_v45 }
 0x2c6   : > { %20264 = vmatpush1.bf16.msk.msra.mxu0 %vm25843_vm2, %v26227_v2  ;;  %20286 = vmatprep.subr.bf16.mxu1 %v25910_v37 }
 0x2c7   : > { %18931 = vmatmul.mubr.msk.f32.gmra.mrb[52].mxu0 %vm635_vm3, %v26722_v63  ;;  %20276 = vmatprep.subr.bf16.mxu0 %v25855_v9 }
 0x2c8   : > { %18941 = vmatmul.mubr.msk.f32.gmra.mrb[52].mxu1 %vm635_vm3, %v26722_v63  ;;  %3804 = vmatprep.mubr.f32.mxu0 %v33460_v0 }
 0x2c9   : > { %3917 = vmatprep.mubr.f32.mxu1 %v33460_v0 }
 0x2cb   : > { %18932 = vmatmul.mubr.msk.f32.gmra.mrb[54].mxu0 %vm635_vm3, %v26738_v30 }
 0x2cc   : > { %18942 = vmatmul.mubr.msk.f32.gmra.mrb[54].mxu1 %vm635_vm3, %v26738_v30  ;;  %3810 = vmatprep.mubr.f32.mxu0 %v33460_v0 }
 0x2cd   : > { %3923 = vmatprep.mubr.f32.mxu1 %v33460_v0 }
 0x2cf   : > { %18933 = vmatmul.mubr.msk.f32.gmra.mrb[56].mxu0 %vm635_vm3, %v26746_v39 }
 0x2d0   : > { %18943 = vmatmul.mubr.msk.f32.gmra.mrb[56].mxu1 %vm635_vm3, %v26746_v39  ;;  %3816 = vmatprep.mubr.f32.mxu0 %v33460_v0 }
 0x2d1   : > { %3929 = vmatprep.mubr.f32.mxu1 %v33460_v0 }
 0x2d3   : > { %18934 = vmatmul.mubr.msk.f32.gmra.mrb[58].mxu0 %vm635_vm3, %v26754_v40 }
 0x2d4   : > { %18944 = vmatmul.mubr.msk.f32.gmra.mrb[58].mxu1 %vm635_vm3, %v26754_v40  ;;  %3822 = vmatprep.mubr.f32.mxu0 %v33460_v0 }
 0x2d5   : > { %3935 = vmatprep.mubr.f32.mxu1 %v33460_v0 }
 0x2d7   : > { %18935 = vmatmul.mubr.msk.f32.gmra.mrb[60].mxu0 %vm635_vm3, %v26762_v41 }
 0x2d8   : > { %18945 = vmatmul.mubr.msk.f32.gmra.mrb[60].mxu1 %vm635_vm3, %v26762_v41  ;;  %3828 = vmatprep.mubr.f32.mxu0 %v33460_v0 }
 0x2d9   : > { %3941 = vmatprep.mubr.f32.mxu1 %v33460_v0 }
 0x2db   : > { %18936 = vmatmul.mubr.msk.f32.gmra.mrb[62].mxu0 %vm635_vm3, %v26770_v42 }
 0x2dc   : > { %18946 = vmatmul.mubr.msk.f32.gmra.mrb[62].mxu1 %vm635_vm3, %v26770_v42  ;;  %4012 = vmatprep.mubr.f32.mxu0 %v33460_v0 }
 0x2dd   : > { %4125 = vmatprep.mubr.f32.mxu1 %v33460_v0 }
 0x2df   : > { %18949 = vmatmul.mubr.msk.f32.vlgmr.msra.gmra.mrb[64].mxu0 %vm635_vm3, %v26698_v5 }
 0x2e0   : > { %18959 = vmatmul.mubr.msk.f32.vlgmr.msra.gmra.mrb[64].mxu1 %vm635_vm3, %v26698_v5  ;;  %4018 = vmatprep.mubr.f32.mxu0 %v33460_v0  ;;  %v27410_v5 = vld [vmem:[#allocation7 + $0x110] sm:$0xff] }
 0x2e1   : > { %4131 = vmatprep.mubr.f32.mxu1 %v33460_v0  ;;  %20288 = vmatpush1.bf16.msra.mxu1 %v25929_v46 }
 0x2e2   : > { %20291 = vmatprep.subr.msk.bf16.mxu1 %vm25843_vm2, %v25939_v50  ;;  %20278 = vmatpush1.bf16.msra.mxu0 %v25863_v14  ;;  %v27042_v14 = vld [vmem:[#allocation7 + $0xc0] sm:$0xff] }
 0x2e3   : > { %18950 = vmatmul.mubr.msk.f32.gmra.mrb[66].mxu0 %vm635_vm3, %v26706_v18  ;;  %20281 = vmatprep.subr.msk.bf16.mxu0 %vm25843_vm2, %v25872_v19 }
 0x2e4   : > { %18960 = vmatmul.mubr.msk.f32.gmra.mrb[66].mxu1 %vm635_vm3, %v26706_v18  ;;  %4024 = vmatprep.mubr.f32.mxu0 %v33460_v0  ;;  %v27426_v18 = vld [vmem:[#allocation7 + $0x118] sm:$0xff] }
 0x2e5   : > { %4137 = vmatprep.mubr.f32.mxu1 %v33460_v0  ;;  %20294 = vmatpush1.bf16.msk.msra.mxu1 %vm25843_vm2, %v25956_v57 }
 0x2e6   : > { %20284 = vmatpush1.bf16.msk.msra.mxu0 %vm25843_vm2, %v25887_v25  ;;  %20306 = vmatprep.subr.bf16.mxu1 %v25964_v58  ;;  %v27050_v25 = vld [vmem:[#allocation7 + $0xc8] sm:$0xff] }
 0x2e7   : > { %18951 = vmatmul.mubr.msk.f32.gmra.mrb[68].mxu0 %vm635_vm3, %v26722_v63  ;;  %20296 = vmatprep.subr.bf16.mxu0 %v25892_v29 }
 0x2e8   : > { %18961 = vmatmul.mubr.msk.f32.gmra.mrb[68].mxu1 %vm635_vm3, %v26722_v63  ;;  %4030 = vmatprep.mubr.f32.mxu0 %v33460_v0  ;;  %v27434_v63 = vld [vmem:[#allocation7 + $0x120] sm:$0xff] }
 0x2e9   : > { %4143 = vmatprep.mubr.f32.mxu1 %v33460_v0 }
 0x2eb   : > { %18952 = vmatmul.mubr.msk.f32.gmra.mrb[70].mxu0 %vm635_vm3, %v26738_v30 }
 0x2ec   : > { %18962 = vmatmul.mubr.msk.f32.gmra.mrb[70].mxu1 %vm635_vm3, %v26738_v30  ;;  %4036 = vmatprep.mubr.f32.mxu0 %v33460_v0  ;;  %v27442_v30 = vld [vmem:[#allocation7 + $0x128] sm:$0xff] }
 0x2ed   : > { %4149 = vmatprep.mubr.f32.mxu1 %v33460_v0 }
 0x2ef   : > { %18953 = vmatmul.mubr.msk.f32.gmra.mrb[72].mxu0 %vm635_vm3, %v26746_v39 }
 0x2f0   : > { %18963 = vmatmul.mubr.msk.f32.gmra.mrb[72].mxu1 %vm635_vm3, %v26746_v39  ;;  %4042 = vmatprep.mubr.f32.mxu0 %v33460_v0  ;;  %v27450_v39 = vld [vmem:[#allocation7 + $0x130] sm:$0xff] }
 0x2f1   : > { %4155 = vmatprep.mubr.f32.mxu1 %v33460_v0 }
 0x2f3   : > { %18954 = vmatmul.mubr.msk.f32.gmra.mrb[74].mxu0 %vm635_vm3, %v26754_v40 }
 0x2f4   : > { %18964 = vmatmul.mubr.msk.f32.gmra.mrb[74].mxu1 %vm635_vm3, %v26754_v40  ;;  %4048 = vmatprep.mubr.f32.mxu0 %v33460_v0  ;;  %v27458_v40 = vld [vmem:[#allocation7 + $0x138] sm:$0xff] }
 0x2f5   : > { %4161 = vmatprep.mubr.f32.mxu1 %v33460_v0 }
 0x2f7   : > { %18955 = vmatmul.mubr.msk.f32.gmra.mrb[76].mxu0 %vm635_vm3, %v26762_v41 }
 0x2f8   : > { %18965 = vmatmul.mubr.msk.f32.gmra.mrb[76].mxu1 %vm635_vm3, %v26762_v41  ;;  %4054 = vmatprep.mubr.f32.mxu0 %v33460_v0  ;;  %v18647_v41 = vld [vmem:[%s25819_s3 + $0xe0] sm:$0xff] }
 0x2f9   : > { %4167 = vmatprep.mubr.f32.mxu1 %v33460_v0 }
 0x2fb   : > { %18956 = vmatmul.mubr.msk.f32.gmra.mrb[78].mxu0 %vm635_vm3, %v26770_v42 }
 0x2fc   : > { %18966 = vmatmul.mubr.msk.f32.gmra.mrb[78].mxu1 %vm635_vm3, %v26770_v42  ;;  %4434 = vmatprep.mubr.f32.mxu0 %v33460_v0  ;;  %v18648_v42 = vld [vmem:[%s25819_s3 + $0xe8] sm:$0xff] }
 0x2fd   : > { %4547 = vmatprep.mubr.f32.mxu1 %v33460_v0  ;;  %v27544_v48 = vpack.c.bf16 %v18648_v42, %v18647_v41  ;;  %v18657_v42 = vld [vmem:[%s25819_s3 + $0x130] sm:$0xff] }
 0x2fe   : > { %v28289_v6 = vpack.c.bf16 %v18658_v55, %v18657_v42  ;;  %v12665_v42 = vld [vmem:[#allocation11 + $0x18] sm:$0xff] }
 0x2ff   : > { %18969 = vmatmul.mubr.msk.f32.vlgmr.msra.gmra.mrb[0].mxu0 %vm635_vm3, %v27042_v14 }
 0x300   : > { %18979 = vmatmul.mubr.msk.f32.vlgmr.msra.gmra.mrb[0].mxu1 %vm635_vm3, %v27042_v14  ;;  %4440 = vmatprep.mubr.f32.mxu0 %v33460_v0 }
 0x301   : > { %4553 = vmatprep.mubr.f32.mxu1 %v33460_v0  ;;  %20308 = vmatpush1.bf16.msra.mxu1 %v26029_v16 }
 0x302   : > { %20311 = vmatprep.subr.msk.bf16.mxu1 %vm25843_vm2, %v26036_v22  ;;  %20298 = vmatpush1.bf16.msra.mxu0 %v25904_v33 }
 0x303   : > { %18970 = vmatmul.mubr.msk.f32.gmra.mrb[2].mxu0 %vm635_vm3, %v27050_v25  ;;  %20301 = vmatprep.subr.msk.bf16.mxu0 %vm25843_vm2, %v25912_v38 }
 0x304   : > { %18980 = vmatmul.mubr.msk.f32.gmra.mrb[2].mxu1 %vm635_vm3, %v27050_v25  ;;  %4446 = vmatprep.mubr.f32.mxu0 %v33460_v0 }
 0x305   : > { %4559 = vmatprep.mubr.f32.mxu1 %v33460_v0  ;;  %20314 = vmatpush1.bf16.msk.msra.mxu1 %vm25843_vm2, %v26054_v34 }
 0x306   : > { %20304 = vmatpush1.bf16.msk.msra.mxu0 %vm25843_vm2, %v25937_v49  ;;  %20326 = vmatprep.subr.bf16.mxu1 %v26063_v36 }
 0x307   : > { %18971 = vmatmul.mubr.msk.f32.gmra.mrb[4].mxu0 %vm635_vm3, %v27066_v12  ;;  %20316 = vmatprep.subr.bf16.mxu0 %v25945_v53 }
 0x308   : > { %18981 = vmatmul.mubr.msk.f32.gmra.mrb[4].mxu1 %vm635_vm3, %v27066_v12  ;;  %4452 = vmatprep.mubr.f32.mxu0 %v33460_v0 }
 0x309   : > { %4565 = vmatprep.mubr.f32.mxu1 %v33460_v0 }
 0x30b   : > { %18972 = vmatmul.mubr.msk.f32.gmra.mrb[6].mxu0 %vm635_vm3, %v27082_v26 }
 0x30c   : > { %18982 = vmatmul.mubr.msk.f32.gmra.mrb[6].mxu1 %vm635_vm3, %v27082_v26  ;;  %4458 = vmatprep.mubr.f32.mxu0 %v33460_v0 }
 0x30d   : > { %4571 = vmatprep.mubr.f32.mxu1 %v33460_v0 }
 0x30f   : > { %18973 = vmatmul.mubr.msk.f32.gmra.mrb[8].mxu0 %vm635_vm3, %v27090_v27 }
 0x310   : > { %18983 = vmatmul.mubr.msk.f32.gmra.mrb[8].mxu1 %vm635_vm3, %v27090_v27  ;;  %4464 = vmatprep.mubr.f32.mxu0 %v33460_v0 }
 0x311   : > { %4577 = vmatprep.mubr.f32.mxu1 %v33460_v0 }
 0x313   : > { %18974 = vmatmul.mubr.msk.f32.gmra.mrb[10].mxu0 %vm635_vm3, %v27098_v28 }
 0x314   : > { %18984 = vmatmul.mubr.msk.f32.gmra.mrb[10].mxu1 %vm635_vm3, %v27098_v28  ;;  %4470 = vmatprep.mubr.f32.mxu0 %v33460_v0 }
 0x315   : > { %4583 = vmatprep.mubr.f32.mxu1 %v33460_v0 }
 0x317   : > { %18975 = vmatmul.mubr.msk.f32.gmra.mrb[12].mxu0 %vm635_vm3, %v27106_v23 }
 0x318   : > { %18985 = vmatmul.mubr.msk.f32.gmra.mrb[12].mxu1 %vm635_vm3, %v27106_v23  ;;  %4476 = vmatprep.mubr.f32.mxu0 %v33460_v0 }
 0x319   : > { %4589 = vmatprep.mubr.f32.mxu1 %v33460_v0 }
 0x31b   : > { %18976 = vmatmul.mubr.msk.f32.gmra.mrb[14].mxu0 %vm635_vm3, %v27114_v31 }
 0x31c   : > { %18986 = vmatmul.mubr.msk.f32.gmra.mrb[14].mxu1 %vm635_vm3, %v27114_v31  ;;  %4660 = vmatprep.mubr.f32.mxu0 %v33460_v0 }
 0x31d   : > { %4773 = vmatprep.mubr.f32.mxu1 %v33460_v0 }
 0x31f   : > { %18989 = vmatmul.mubr.msk.f32.vlgmr.msra.gmra.mrb[16].mxu0 %vm635_vm3, %v27042_v14 }
 0x320   : > { %18999 = vmatmul.mubr.msk.f32.vlgmr.msra.gmra.mrb[16].mxu1 %vm635_vm3, %v27042_v14  ;;  %4666 = vmatprep.mubr.f32.mxu0 %v33460_v0 }
 0x321   : > { %4779 = vmatprep.mubr.f32.mxu1 %v33460_v0  ;;  %20328 = vmatpush1.bf16.msra.mxu1 %v26125_v54 }
 0x322   : > { %20331 = vmatprep.subr.msk.bf16.mxu1 %vm25843_vm2, %v26132_v4  ;;  %20318 = vmatpush1.bf16.msra.mxu0 %v26025_v13 }
 0x323   : > { %18990 = vmatmul.mubr.msk.f32.gmra.mrb[18].mxu0 %vm635_vm3, %v27050_v25  ;;  %20321 = vmatprep.subr.msk.bf16.mxu0 %vm25843_vm2, %v26027_v15 }
 0x324   : > { %19000 = vmatmul.mubr.msk.f32.gmra.mrb[18].mxu1 %vm635_vm3, %v27050_v25  ;;  %4672 = vmatprep.mubr.f32.mxu0 %v33460_v0 }
 0x325   : > { %4785 = vmatprep.mubr.f32.mxu1 %v33460_v0  ;;  %20334 = vmatpush1.bf16.msk.msra.mxu1 %vm25843_vm2, %v26150_v20 }
 0x326   : > { %20324 = vmatpush1.bf16.msk.msra.mxu0 %vm25843_vm2, %v26048_v32  ;;  %20346 = vmatprep.subr.bf16.mxu1 %v26159_v24 }
 0x327   : > { %18991 = vmatmul.mubr.msk.f32.gmra.mrb[20].mxu0 %vm635_vm3, %v27066_v12  ;;  %20336 = vmatprep.subr.bf16.mxu0 %v26056_v35 }
 0x328   : > { %19001 = vmatmul.mubr.msk.f32.gmra.mrb[20].mxu1 %vm635_vm3, %v27066_v12  ;;  %4678 = vmatprep.mubr.f32.mxu0 %v33460_v0 }
 0x329   : > { %4791 = vmatprep.mubr.f32.mxu1 %v33460_v0 }
 0x32b   : > { %18992 = vmatmul.mubr.msk.f32.gmra.mrb[22].mxu0 %vm635_vm3, %v27082_v26 }
 0x32c   : > { %19002 = vmatmul.mubr.msk.f32.gmra.mrb[22].mxu1 %vm635_vm3, %v27082_v26  ;;  %4684 = vmatprep.mubr.f32.mxu0 %v33460_v0 }
 0x32d   : > { %4797 = vmatprep.mubr.f32.mxu1 %v33460_v0 }
 0x32f   : > { %18993 = vmatmul.mubr.msk.f32.gmra.mrb[24].mxu0 %vm635_vm3, %v27090_v27 }
 0x330   : > { %19003 = vmatmul.mubr.msk.f32.gmra.mrb[24].mxu1 %vm635_vm3, %v27090_v27  ;;  %4690 = vmatprep.mubr.f32.mxu0 %v33460_v0 }
 0x331   : > { %4803 = vmatprep.mubr.f32.mxu1 %v33460_v0 }
 0x333   : > { %18994 = vmatmul.mubr.msk.f32.gmra.mrb[26].mxu0 %vm635_vm3, %v27098_v28 }
 0x334   : > { %19004 = vmatmul.mubr.msk.f32.gmra.mrb[26].mxu1 %vm635_vm3, %v27098_v28  ;;  %4696 = vmatprep.mubr.f32.mxu0 %v33460_v0 }
 0x335   : > { %4809 = vmatprep.mubr.f32.mxu1 %v33460_v0 }
 0x337   : > { %18995 = vmatmul.mubr.msk.f32.gmra.mrb[28].mxu0 %vm635_vm3, %v27106_v23 }
 0x338   : > { %19005 = vmatmul.mubr.msk.f32.gmra.mrb[28].mxu1 %vm635_vm3, %v27106_v23  ;;  %4702 = vmatprep.mubr.f32.mxu0 %v33460_v0 }
 0x339   : > { %4815 = vmatprep.mubr.f32.mxu1 %v33460_v0 }
 0x33b   : > { %18996 = vmatmul.mubr.msk.f32.gmra.mrb[30].mxu0 %vm635_vm3, %v27114_v31 }
 0x33c   : > { %19006 = vmatmul.mubr.msk.f32.gmra.mrb[30].mxu1 %vm635_vm3, %v27114_v31  ;;  %4886 = vmatprep.mubr.f32.mxu0 %v33460_v0 }
 0x33d   : > { %4999 = vmatprep.mubr.f32.mxu1 %v33460_v0 }
 0x33f   : > { %19009 = vmatmul.mubr.msk.f32.vlgmr.msra.gmra.mrb[32].mxu0 %vm635_vm3, %v27042_v14 }
 0x340   : > { %19019 = vmatmul.mubr.msk.f32.vlgmr.msra.gmra.mrb[32].mxu1 %vm635_vm3, %v27042_v14  ;;  %4892 = vmatprep.mubr.f32.mxu0 %v33460_v0 }
 0x341   : > { %5005 = vmatprep.mubr.f32.mxu1 %v33460_v0  ;;  %20348 = vmatpush1.bf16.msra.mxu1 %v26221_v47 }
 0x342   : > { %20351 = vmatprep.subr.msk.bf16.mxu1 %vm25843_vm2, %v26227_v2  ;;  %20338 = vmatpush1.bf16.msra.mxu0 %v26121_v51 }
 0x343   : > { %19010 = vmatmul.mubr.msk.f32.gmra.mrb[34].mxu0 %vm635_vm3, %v27050_v25  ;;  %20341 = vmatprep.subr.msk.bf16.mxu0 %vm25843_vm2, %v26123_v52 }
 0x344   : > { %19020 = vmatmul.mubr.msk.f32.gmra.mrb[34].mxu1 %vm635_vm3, %v27050_v25  ;;  %4898 = vmatprep.mubr.f32.mxu0 %v33460_v0 }
 0x345   : > { %5011 = vmatprep.mubr.f32.mxu1 %v33460_v0  ;;  %20354 = vmatpush1.bf16.msk.msra.mxu1 %vm25843_vm2, %v26242_v8 }
 0x346   : > { %20344 = vmatpush1.bf16.msk.msra.mxu0 %vm25843_vm2, %v26144_v17  ;;  %20366 = vmatprep.subr.bf16.mxu1 %v27200_v59 }
 0x347   : > { %19011 = vmatmul.mubr.msk.f32.gmra.mrb[36].mxu0 %vm635_vm3, %v27066_v12  ;;  %20356 = vmatprep.subr.bf16.mxu0 %v26152_v21 }
 0x348   : > { %19021 = vmatmul.mubr.msk.f32.gmra.mrb[36].mxu1 %vm635_vm3, %v27066_v12  ;;  %4904 = vmatprep.mubr.f32.mxu0 %v33460_v0 }
 0x349   : > { %5017 = vmatprep.mubr.f32.mxu1 %v33460_v0 }
 0x34b   : > { %19012 = vmatmul.mubr.msk.f32.gmra.mrb[38].mxu0 %vm635_vm3, %v27082_v26 }
 0x34c   : > { %19022 = vmatmul.mubr.msk.f32.gmra.mrb[38].mxu1 %vm635_vm3, %v27082_v26  ;;  %4910 = vmatprep.mubr.f32.mxu0 %v33460_v0 }
 0x34d   : > { %5023 = vmatprep.mubr.f32.mxu1 %v33460_v0 }
 0x34f   : > { %19013 = vmatmul.mubr.msk.f32.gmra.mrb[40].mxu0 %vm635_vm3, %v27090_v27 }
 0x350   : > { %19023 = vmatmul.mubr.msk.f32.gmra.mrb[40].mxu1 %vm635_vm3, %v27090_v27  ;;  %4916 = vmatprep.mubr.f32.mxu0 %v33460_v0 }
 0x351   : > { %5029 = vmatprep.mubr.f32.mxu1 %v33460_v0 }
 0x353   : > { %19014 = vmatmul.mubr.msk.f32.gmra.mrb[42].mxu0 %vm635_vm3, %v27098_v28 }
 0x354   : > { %19024 = vmatmul.mubr.msk.f32.gmra.mrb[42].mxu1 %vm635_vm3, %v27098_v28  ;;  %4922 = vmatprep.mubr.f32.mxu0 %v33460_v0 }
 0x355   : > { %5035 = vmatprep.mubr.f32.mxu1 %v33460_v0 }
 0x357   : > { %19015 = vmatmul.mubr.msk.f32.gmra.mrb[44].mxu0 %vm635_vm3, %v27106_v23 }
 0x358   : > { %19025 = vmatmul.mubr.msk.f32.gmra.mrb[44].mxu1 %vm635_vm3, %v27106_v23  ;;  %4928 = vmatprep.mubr.f32.mxu0 %v33460_v0 }
 0x359   : > { %5041 = vmatprep.mubr.f32.mxu1 %v33460_v0 }
 0x35b   : > { %19016 = vmatmul.mubr.msk.f32.gmra.mrb[46].mxu0 %vm635_vm3, %v27114_v31 }
 0x35c   : > { %19026 = vmatmul.mubr.msk.f32.gmra.mrb[46].mxu1 %vm635_vm3, %v27114_v31  ;;  %5112 = vmatprep.mubr.f32.mxu0 %v33460_v0 }
 0x35d   : > { %5225 = vmatprep.mubr.f32.mxu1 %v33460_v0 }
 0x35f   : > { %19029 = vmatmul.mubr.msk.f32.vlgmr.msra.gmra.mrb[48].mxu0 %vm635_vm3, %v27042_v14 }
 0x360   : > { %19039 = vmatmul.mubr.msk.f32.vlgmr.msra.gmra.mrb[48].mxu1 %vm635_vm3, %v27042_v14  ;;  %5118 = vmatprep.mubr.f32.mxu0 %v33460_v0 }
 0x361   : > { %5231 = vmatprep.mubr.f32.mxu1 %v33460_v0  ;;  %20368 = vmatpush1.bf16.msra.mxu1 %v26856_v3 }
 0x362   : > { %20371 = vmatprep.subr.msk.bf16.mxu1 %vm25843_vm2, %v27257_v62  ;;  %20358 = vmatpush1.bf16.msra.mxu0 %v26217_v44 }
 0x363   : > { %19030 = vmatmul.mubr.msk.f32.gmra.mrb[50].mxu0 %vm635_vm3, %v27050_v25  ;;  %20361 = vmatprep.subr.msk.bf16.mxu0 %vm25843_vm2, %v26219_v45 }
 0x364   : > { %19040 = vmatmul.mubr.msk.f32.gmra.mrb[50].mxu1 %vm635_vm3, %v27050_v25  ;;  %5124 = vmatprep.mubr.f32.mxu0 %v33460_v0 }
 0x365   : > { %5237 = vmatprep.mubr.f32.mxu1 %v33460_v0  ;;  %20374 = vmatpush1.bf16.msk.msra.mxu1 %vm25843_vm2, %v26913_v11 }
 0x366   : > { %20364 = vmatpush1.bf16.msk.msra.mxu0 %vm25843_vm2, %v26236_v7  ;;  %20386 = vmatprep.subr.bf16.mxu1 %v25904_v33 }
 0x367   : > { %19031 = vmatmul.mubr.msk.f32.gmra.mrb[52].mxu0 %vm635_vm3, %v27066_v12  ;;  %20376 = vmatprep.subr.bf16.mxu0 %v25929_v46 }
 0x368   : > { %19041 = vmatmul.mubr.msk.f32.gmra.mrb[52].mxu1 %vm635_vm3, %v27066_v12  ;;  %5130 = vmatprep.mubr.f32.mxu0 %v33460_v0 }
 0x369   : > { %5243 = vmatprep.mubr.f32.mxu1 %v33460_v0 }
 0x36b   : > { %19032 = vmatmul.mubr.msk.f32.gmra.mrb[54].mxu0 %vm635_vm3, %v27082_v26 }
 0x36c   : > { %19042 = vmatmul.mubr.msk.f32.gmra.mrb[54].mxu1 %vm635_vm3, %v27082_v26  ;;  %5136 = vmatprep.mubr.f32.mxu0 %v33460_v0 }
 0x36d   : > { %5249 = vmatprep.mubr.f32.mxu1 %v33460_v0 }
 0x36f   : > { %19033 = vmatmul.mubr.msk.f32.gmra.mrb[56].mxu0 %vm635_vm3, %v27090_v27 }
 0x370   : > { %19043 = vmatmul.mubr.msk.f32.gmra.mrb[56].mxu1 %vm635_vm3, %v27090_v27  ;;  %5142 = vmatprep.mubr.f32.mxu0 %v33460_v0 }
 0x371   : > { %5255 = vmatprep.mubr.f32.mxu1 %v33460_v0 }
 0x373   : > { %19034 = vmatmul.mubr.msk.f32.gmra.mrb[58].mxu0 %vm635_vm3, %v27098_v28 }
 0x374   : > { %19044 = vmatmul.mubr.msk.f32.gmra.mrb[58].mxu1 %vm635_vm3, %v27098_v28  ;;  %5148 = vmatprep.mubr.f32.mxu0 %v33460_v0 }
 0x375   : > { %5261 = vmatprep.mubr.f32.mxu1 %v33460_v0 }
 0x377   : > { %19035 = vmatmul.mubr.msk.f32.gmra.mrb[60].mxu0 %vm635_vm3, %v27106_v23 }
 0x378   : > { %19045 = vmatmul.mubr.msk.f32.gmra.mrb[60].mxu1 %vm635_vm3, %v27106_v23  ;;  %5154 = vmatprep.mubr.f32.mxu0 %v33460_v0 }
 0x379   : > { %5267 = vmatprep.mubr.f32.mxu1 %v33460_v0 }
 0x37b   : > { %19036 = vmatmul.mubr.msk.f32.gmra.mrb[62].mxu0 %vm635_vm3, %v27114_v31 }
 0x37c   : > { %19046 = vmatmul.mubr.msk.f32.gmra.mrb[62].mxu1 %vm635_vm3, %v27114_v31  ;;  %5338 = vmatprep.mubr.f32.mxu0 %v33460_v0 }
 0x37d   : > { %5451 = vmatprep.mubr.f32.mxu1 %v33460_v0 }
 0x37f   : > { %19049 = vmatmul.mubr.msk.f32.vlgmr.msra.gmra.mrb[64].mxu0 %vm635_vm3, %v27042_v14 }
 0x380   : > { %19059 = vmatmul.mubr.msk.f32.vlgmr.msra.gmra.mrb[64].mxu1 %vm635_vm3, %v27042_v14  ;;  %5344 = vmatprep.mubr.f32.mxu0 %v33460_v0  ;;  %v27754_v14 = vld [vmem:[#allocation7 + $0x150] sm:$0xff] }
 0x381   : > { %5457 = vmatprep.mubr.f32.mxu1 %v33460_v0  ;;  %20388 = vmatpush1.bf16.msra.mxu1 %v25910_v37 }
 0x382   : > { %20391 = vmatprep.subr.msk.bf16.mxu1 %vm25843_vm2, %v25937_v49  ;;  %20378 = vmatpush1.bf16.msra.mxu0 %v25855_v9  ;;  %v27386_v9 = vld [vmem:[#allocation7 + $0x100] sm:$0xff] }
 0x383   : > { %19050 = vmatmul.mubr.msk.f32.gmra.mrb[66].mxu0 %vm635_vm3, %v27050_v25  ;;  %20381 = vmatprep.subr.msk.bf16.mxu0 %vm25843_vm2, %v25956_v57 }
 0x384   : > { %19060 = vmatmul.mubr.msk.f32.gmra.mrb[66].mxu1 %vm635_vm3, %v27050_v25  ;;  %5350 = vmatprep.mubr.f32.mxu0 %v33460_v0  ;;  %v27770_v25 = vld [vmem:[#allocation7 + $0x158] sm:$0xff] }
 0x385   : > { %5463 = vmatprep.mubr.f32.mxu1 %v33460_v0  ;;  %20394 = vmatpush1.bf16.msk.msra.mxu1 %vm25843_vm2, %v25939_v50 }
 0x386   : > { %20384 = vmatpush1.bf16.msk.msra.mxu0 %vm25843_vm2, %v25872_v19  ;;  %20406 = vmatprep.subr.bf16.mxu1 %v26025_v13  ;;  %v27394_v19 = vld [vmem:[#allocation7 + $0x108] sm:$0xff] }
 0x387   : > { %19051 = vmatmul.mubr.msk.f32.gmra.mrb[68].mxu0 %vm635_vm3, %v27066_v12  ;;  %20396 = vmatprep.subr.bf16.mxu0 %v26029_v16 }
 0x388   : > { %19061 = vmatmul.mubr.msk.f32.gmra.mrb[68].mxu1 %vm635_vm3, %v27066_v12  ;;  %5356 = vmatprep.mubr.f32.mxu0 %v33460_v0  ;;  %v27778_v12 = vld [vmem:[#allocation7 + $0x160] sm:$0xff] }
 0x389   : > { %5469 = vmatprep.mubr.f32.mxu1 %v33460_v0 }
 0x38b   : > { %19052 = vmatmul.mubr.msk.f32.gmra.mrb[70].mxu0 %vm635_vm3, %v27082_v26 }
 0x38c   : > { %19062 = vmatmul.mubr.msk.f32.gmra.mrb[70].mxu1 %vm635_vm3, %v27082_v26  ;;  %5362 = vmatprep.mubr.f32.mxu0 %v33460_v0  ;;  %v27786_v26 = vld [vmem:[#allocation7 + $0x168] sm:$0xff] }
 0x38d   : > { %5475 = vmatprep.mubr.f32.mxu1 %v33460_v0 }
 0x38f   : > { %19053 = vmatmul.mubr.msk.f32.gmra.mrb[72].mxu0 %vm635_vm3, %v27090_v27 }
 0x390   : > { %19063 = vmatmul.mubr.msk.f32.gmra.mrb[72].mxu1 %vm635_vm3, %v27090_v27  ;;  %5368 = vmatprep.mubr.f32.mxu0 %v33460_v0  ;;  %v27794_v27 = vld [vmem:[#allocation7 + $0x170] sm:$0xff] }
 0x391   : > { %5481 = vmatprep.mubr.f32.mxu1 %v33460_v0 }
 0x393   : > { %19054 = vmatmul.mubr.msk.f32.gmra.mrb[74].mxu0 %vm635_vm3, %v27098_v28 }
 0x394   : > { %19064 = vmatmul.mubr.msk.f32.gmra.mrb[74].mxu1 %vm635_vm3, %v27098_v28  ;;  %5374 = vmatprep.mubr.f32.mxu0 %v33460_v0  ;;  %v27802_v28 = vld [vmem:[#allocation7 + $0x178] sm:$0xff] }
 0x395   : > { %5487 = vmatprep.mubr.f32.mxu1 %v33460_v0 }
 0x397   : > { %19055 = vmatmul.mubr.msk.f32.gmra.mrb[76].mxu0 %vm635_vm3, %v27106_v23 }
 0x398   : > { %19065 = vmatmul.mubr.msk.f32.gmra.mrb[76].mxu1 %vm635_vm3, %v27106_v23  ;;  %5380 = vmatprep.mubr.f32.mxu0 %v33460_v0  ;;  %v18651_v23 = vld [vmem:[%s25819_s3 + $0x100] sm:$0xff] }
 0x399   : > { %5493 = vmatprep.mubr.f32.mxu1 %v33460_v0 }
 0x39b   : > { %19056 = vmatmul.mubr.msk.f32.gmra.mrb[78].mxu0 %vm635_vm3, %v27114_v31 }
 0x39c   : > { %19066 = vmatmul.mubr.msk.f32.gmra.mrb[78].mxu1 %vm635_vm3, %v27114_v31  ;;  %5760 = vmatprep.mubr.f32.mxu0 %v33460_v0  ;;  %v18652_v31 = vld [vmem:[%s25819_s3 + $0x108] sm:$0xff] }
 0x39d   : > { %5873 = vmatprep.mubr.f32.mxu1 %v33460_v0  ;;  %v27888_v43 = vpack.c.bf16 %v18652_v31, %v18651_v23  ;;  %v18661_v31 = vld [vmem:[%s25819_s3 + $0x150] sm:$0xff] }
 0x39e   : > { %v28633_v60 = vpack.c.bf16 %v18662_v56, %v18661_v31 }
 0x39f   : > { %19069 = vmatmul.mubr.msk.f32.vlgmr.msra.gmra.mrb[0].mxu0 %vm635_vm3, %v27386_v9 }
 0x3a0   : > { %19079 = vmatmul.mubr.msk.f32.vlgmr.msra.gmra.mrb[0].mxu1 %vm635_vm3, %v27386_v9  ;;  %5766 = vmatprep.mubr.f32.mxu0 %v33460_v0 }
 0x3a1   : > { %5879 = vmatprep.mubr.f32.mxu1 %v33460_v0  ;;  %20408 = vmatpush1.bf16.msra.mxu1 %v25964_v58 }
 0x3a2   : > { %20411 = vmatprep.subr.msk.bf16.mxu1 %vm25843_vm2, %v26048_v32  ;;  %20398 = vmatpush1.bf16.msra.mxu0 %v25892_v29 }
 0x3a3   : > { %19070 = vmatmul.mubr.msk.f32.gmra.mrb[2].mxu0 %vm635_vm3, %v27394_v19  ;;  %20401 = vmatprep.subr.msk.bf16.mxu0 %vm25843_vm2, %v26054_v34 }
 0x3a4   : > { %19080 = vmatmul.mubr.msk.f32.gmra.mrb[2].mxu1 %vm635_vm3, %v27394_v19  ;;  %5772 = vmatprep.mubr.f32.mxu0 %v33460_v0 }
 0x3a5   : > { %5885 = vmatprep.mubr.f32.mxu1 %v33460_v0  ;;  %20414 = vmatpush1.bf16.msk.msra.mxu1 %vm25843_vm2, %v26036_v22 }
 0x3a6   : > { %20404 = vmatpush1.bf16.msk.msra.mxu0 %vm25843_vm2, %v25912_v38  ;;  %20426 = vmatprep.subr.bf16.mxu1 %v26121_v51 }
 0x3a7   : > { %19071 = vmatmul.mubr.msk.f32.gmra.mrb[4].mxu0 %vm635_vm3, %v27410_v5  ;;  %20416 = vmatprep.subr.bf16.mxu0 %v26125_v54 }
 0x3a8   : > { %19081 = vmatmul.mubr.msk.f32.gmra.mrb[4].mxu1 %vm635_vm3, %v27410_v5  ;;  %5778 = vmatprep.mubr.f32.mxu0 %v33460_v0 }
 0x3a9   : > { %5891 = vmatprep.mubr.f32.mxu1 %v33460_v0 }
 0x3ab   : > { %19072 = vmatmul.mubr.msk.f32.gmra.mrb[6].mxu0 %vm635_vm3, %v27426_v18 }
 0x3ac   : > { %19082 = vmatmul.mubr.msk.f32.gmra.mrb[6].mxu1 %vm635_vm3, %v27426_v18  ;;  %5784 = vmatprep.mubr.f32.mxu0 %v33460_v0 }
 0x3ad   : > { %5897 = vmatprep.mubr.f32.mxu1 %v33460_v0 }
 0x3af   : > { %19073 = vmatmul.mubr.msk.f32.gmra.mrb[8].mxu0 %vm635_vm3, %v27434_v63 }
 0x3b0   : > { %19083 = vmatmul.mubr.msk.f32.gmra.mrb[8].mxu1 %vm635_vm3, %v27434_v63  ;;  %5790 = vmatprep.mubr.f32.mxu0 %v33460_v0 }
 0x3b1   : > { %5903 = vmatprep.mubr.f32.mxu1 %v33460_v0 }
 0x3b3   : > { %19074 = vmatmul.mubr.msk.f32.gmra.mrb[10].mxu0 %vm635_vm3, %v27442_v30 }
 0x3b4   : > { %19084 = vmatmul.mubr.msk.f32.gmra.mrb[10].mxu1 %vm635_vm3, %v27442_v30  ;;  %5796 = vmatprep.mubr.f32.mxu0 %v33460_v0 }
 0x3b5   : > { %5909 = vmatprep.mubr.f32.mxu1 %v33460_v0 }
 0x3b7   : > { %19075 = vmatmul.mubr.msk.f32.gmra.mrb[12].mxu0 %vm635_vm3, %v27450_v39 }
 0x3b8   : > { %19085 = vmatmul.mubr.msk.f32.gmra.mrb[12].mxu1 %vm635_vm3, %v27450_v39  ;;  %5802 = vmatprep.mubr.f32.mxu0 %v33460_v0 }
 0x3b9   : > { %5915 = vmatprep.mubr.f32.mxu1 %v33460_v0 }
 0x3bb   : > { %19076 = vmatmul.mubr.msk.f32.gmra.mrb[14].mxu0 %vm635_vm3, %v27458_v40 }
 0x3bc   : > { %19086 = vmatmul.mubr.msk.f32.gmra.mrb[14].mxu1 %vm635_vm3, %v27458_v40  ;;  %5986 = vmatprep.mubr.f32.mxu0 %v33460_v0 }
 0x3bd   : > { %6099 = vmatprep.mubr.f32.mxu1 %v33460_v0 }
 0x3bf   : > { %19089 = vmatmul.mubr.msk.f32.vlgmr.msra.gmra.mrb[16].mxu0 %vm635_vm3, %v27386_v9 }
 0x3c0   : > { %19099 = vmatmul.mubr.msk.f32.vlgmr.msra.gmra.mrb[16].mxu1 %vm635_vm3, %v27386_v9  ;;  %5992 = vmatprep.mubr.f32.mxu0 %v33460_v0 }
 0x3c1   : > { %6105 = vmatprep.mubr.f32.mxu1 %v33460_v0  ;;  %20428 = vmatpush1.bf16.msra.mxu1 %v26063_v36 }
 0x3c2   : > { %20431 = vmatprep.subr.msk.bf16.mxu1 %vm25843_vm2, %v26144_v17  ;;  %20418 = vmatpush1.bf16.msra.mxu0 %v25945_v53 }
 0x3c3   : > { %19090 = vmatmul.mubr.msk.f32.gmra.mrb[18].mxu0 %vm635_vm3, %v27394_v19  ;;  %20421 = vmatprep.subr.msk.bf16.mxu0 %vm25843_vm2, %v26150_v20 }
 0x3c4   : > { %19100 = vmatmul.mubr.msk.f32.gmra.mrb[18].mxu1 %vm635_vm3, %v27394_v19  ;;  %5998 = vmatprep.mubr.f32.mxu0 %v33460_v0 }
 0x3c5   : > { %6111 = vmatprep.mubr.f32.mxu1 %v33460_v0  ;;  %20434 = vmatpush1.bf16.msk.msra.mxu1 %vm25843_vm2, %v26132_v4 }
 0x3c6   : > { %20424 = vmatpush1.bf16.msk.msra.mxu0 %vm25843_vm2, %v26027_v15  ;;  %20446 = vmatprep.subr.bf16.mxu1 %v26217_v44 }
 0x3c7   : > { %19091 = vmatmul.mubr.msk.f32.gmra.mrb[20].mxu0 %vm635_vm3, %v27410_v5  ;;  %20436 = vmatprep.subr.bf16.mxu0 %v26221_v47 }
 0x3c8   : > { %19101 = vmatmul.mubr.msk.f32.gmra.mrb[20].mxu1 %vm635_vm3, %v27410_v5  ;;  %6004 = vmatprep.mubr.f32.mxu0 %v33460_v0 }
 0x3c9   : > { %6117 = vmatprep.mubr.f32.mxu1 %v33460_v0 }
 0x3cb   : > { %19092 = vmatmul.mubr.msk.f32.gmra.mrb[22].mxu0 %vm635_vm3, %v27426_v18 }
 0x3cc   : > { %19102 = vmatmul.mubr.msk.f32.gmra.mrb[22].mxu1 %vm635_vm3, %v27426_v18  ;;  %6010 = vmatprep.mubr.f32.mxu0 %v33460_v0 }
 0x3cd   : > { %6123 = vmatprep.mubr.f32.mxu1 %v33460_v0 }
 0x3cf   : > { %19093 = vmatmul.mubr.msk.f32.gmra.mrb[24].mxu0 %vm635_vm3, %v27434_v63 }
 0x3d0   : > { %19103 = vmatmul.mubr.msk.f32.gmra.mrb[24].mxu1 %vm635_vm3, %v27434_v63  ;;  %6016 = vmatprep.mubr.f32.mxu0 %v33460_v0 }
 0x3d1   : > { %6129 = vmatprep.mubr.f32.mxu1 %v33460_v0 }
 0x3d3   : > { %19094 = vmatmul.mubr.msk.f32.gmra.mrb[26].mxu0 %vm635_vm3, %v27442_v30 }
 0x3d4   : > { %19104 = vmatmul.mubr.msk.f32.gmra.mrb[26].mxu1 %vm635_vm3, %v27442_v30  ;;  %6022 = vmatprep.mubr.f32.mxu0 %v33460_v0 }
 0x3d5   : > { %6135 = vmatprep.mubr.f32.mxu1 %v33460_v0 }
 0x3d7   : > { %19095 = vmatmul.mubr.msk.f32.gmra.mrb[28].mxu0 %vm635_vm3, %v27450_v39 }
 0x3d8   : > { %19105 = vmatmul.mubr.msk.f32.gmra.mrb[28].mxu1 %vm635_vm3, %v27450_v39  ;;  %6028 = vmatprep.mubr.f32.mxu0 %v33460_v0 }
 0x3d9   : > { %6141 = vmatprep.mubr.f32.mxu1 %v33460_v0 }
 0x3db   : > { %19096 = vmatmul.mubr.msk.f32.gmra.mrb[30].mxu0 %vm635_vm3, %v27458_v40 }
 0x3dc   : > { %19106 = vmatmul.mubr.msk.f32.gmra.mrb[30].mxu1 %vm635_vm3, %v27458_v40  ;;  %6212 = vmatprep.mubr.f32.mxu0 %v33460_v0 }
 0x3dd   : > { %6325 = vmatprep.mubr.f32.mxu1 %v33460_v0 }
 0x3df   : > { %19109 = vmatmul.mubr.msk.f32.vlgmr.msra.gmra.mrb[32].mxu0 %vm635_vm3, %v27386_v9 }
 0x3e0   : > { %19119 = vmatmul.mubr.msk.f32.vlgmr.msra.gmra.mrb[32].mxu1 %vm635_vm3, %v27386_v9  ;;  %6218 = vmatprep.mubr.f32.mxu0 %v33460_v0 }
 0x3e1   : > { %6331 = vmatprep.mubr.f32.mxu1 %v33460_v0  ;;  %20448 = vmatpush1.bf16.msra.mxu1 %v26159_v24 }
 0x3e2   : > { %20451 = vmatprep.subr.msk.bf16.mxu1 %vm25843_vm2, %v26236_v7  ;;  %20438 = vmatpush1.bf16.msra.mxu0 %v26056_v35 }
 0x3e3   : > { %19110 = vmatmul.mubr.msk.f32.gmra.mrb[34].mxu0 %vm635_vm3, %v27394_v19  ;;  %20441 = vmatprep.subr.msk.bf16.mxu0 %vm25843_vm2, %v26242_v8 }
 0x3e4   : > { %19120 = vmatmul.mubr.msk.f32.gmra.mrb[34].mxu1 %vm635_vm3, %v27394_v19  ;;  %6224 = vmatprep.mubr.f32.mxu0 %v33460_v0 }
 0x3e5   : > { %6337 = vmatprep.mubr.f32.mxu1 %v33460_v0  ;;  %20454 = vmatpush1.bf16.msk.msra.mxu1 %vm25843_vm2, %v26227_v2 }
 0x3e6   : > { %20444 = vmatpush1.bf16.msk.msra.mxu0 %vm25843_vm2, %v26123_v52  ;;  %20466 = vmatprep.subr.bf16.mxu1 %v27544_v48 }
 0x3e7   : > { %19111 = vmatmul.mubr.msk.f32.gmra.mrb[36].mxu0 %vm635_vm3, %v27410_v5  ;;  %20456 = vmatprep.subr.bf16.mxu0 %v26856_v3 }
 0x3e8   : > { %19121 = vmatmul.mubr.msk.f32.gmra.mrb[36].mxu1 %vm635_vm3, %v27410_v5  ;;  %6230 = vmatprep.mubr.f32.mxu0 %v33460_v0 }
 0x3e9   : > { %6343 = vmatprep.mubr.f32.mxu1 %v33460_v0 }
 0x3eb   : > { %19112 = vmatmul.mubr.msk.f32.gmra.mrb[38].mxu0 %vm635_vm3, %v27426_v18 }
 0x3ec   : > { %19122 = vmatmul.mubr.msk.f32.gmra.mrb[38].mxu1 %vm635_vm3, %v27426_v18  ;;  %6236 = vmatprep.mubr.f32.mxu0 %v33460_v0 }
 0x3ed   : > { %6349 = vmatprep.mubr.f32.mxu1 %v33460_v0 }
 0x3ef   : > { %19113 = vmatmul.mubr.msk.f32.gmra.mrb[40].mxu0 %vm635_vm3, %v27434_v63 }
 0x3f0   : > { %19123 = vmatmul.mubr.msk.f32.gmra.mrb[40].mxu1 %vm635_vm3, %v27434_v63  ;;  %6242 = vmatprep.mubr.f32.mxu0 %v33460_v0 }
 0x3f1   : > { %6355 = vmatprep.mubr.f32.mxu1 %v33460_v0 }
 0x3f3   : > { %19114 = vmatmul.mubr.msk.f32.gmra.mrb[42].mxu0 %vm635_vm3, %v27442_v30 }
 0x3f4   : > { %19124 = vmatmul.mubr.msk.f32.gmra.mrb[42].mxu1 %vm635_vm3, %v27442_v30  ;;  %6248 = vmatprep.mubr.f32.mxu0 %v33460_v0 }
 0x3f5   : > { %6361 = vmatprep.mubr.f32.mxu1 %v33460_v0 }
 0x3f7   : > { %19115 = vmatmul.mubr.msk.f32.gmra.mrb[44].mxu0 %vm635_vm3, %v27450_v39 }
 0x3f8   : > { %19125 = vmatmul.mubr.msk.f32.gmra.mrb[44].mxu1 %vm635_vm3, %v27450_v39  ;;  %6254 = vmatprep.mubr.f32.mxu0 %v33460_v0 }
 0x3f9   : > { %6367 = vmatprep.mubr.f32.mxu1 %v33460_v0 }
 0x3fb   : > { %19116 = vmatmul.mubr.msk.f32.gmra.mrb[46].mxu0 %vm635_vm3, %v27458_v40 }
 0x3fc   : > { %19126 = vmatmul.mubr.msk.f32.gmra.mrb[46].mxu1 %vm635_vm3, %v27458_v40  ;;  %6438 = vmatprep.mubr.f32.mxu0 %v33460_v0 }
 0x3fd   : > { %6551 = vmatprep.mubr.f32.mxu1 %v33460_v0 }
 0x3ff   : > { %19129 = vmatmul.mubr.msk.f32.vlgmr.msra.gmra.mrb[48].mxu0 %vm635_vm3, %v27386_v9 }
 0x400   : > { %19139 = vmatmul.mubr.msk.f32.vlgmr.msra.gmra.mrb[48].mxu1 %vm635_vm3, %v27386_v9  ;;  %6444 = vmatprep.mubr.f32.mxu0 %v33460_v0 }
 0x401   : > { %6557 = vmatprep.mubr.f32.mxu1 %v33460_v0  ;;  %20468 = vmatpush1.bf16.msra.mxu1 %v27200_v59 }
 0x402   : > { %20471 = vmatprep.subr.msk.bf16.mxu1 %vm25843_vm2, %v27601_v10  ;;  %20458 = vmatpush1.bf16.msra.mxu0 %v26152_v21 }
 0x403   : > { %19130 = vmatmul.mubr.msk.f32.gmra.mrb[50].mxu0 %vm635_vm3, %v27394_v19  ;;  %20461 = vmatprep.subr.msk.bf16.mxu0 %vm25843_vm2, %v26913_v11 }
 0x404   : > { %19140 = vmatmul.mubr.msk.f32.gmra.mrb[50].mxu1 %vm635_vm3, %v27394_v19  ;;  %6450 = vmatprep.mubr.f32.mxu0 %v33460_v0 }
 0x405   : > { %6563 = vmatprep.mubr.f32.mxu1 %v33460_v0  ;;  %20474 = vmatpush1.bf16.msk.msra.mxu1 %vm25843_vm2, %v27257_v62 }
 0x406   : > { %20464 = vmatpush1.bf16.msk.msra.mxu0 %vm25843_vm2, %v26219_v45  ;;  %20486 = vmatprep.subr.bf16.mxu1 %v25892_v29 }
 0x407   : > { %19131 = vmatmul.mubr.msk.f32.gmra.mrb[52].mxu0 %vm635_vm3, %v27410_v5  ;;  %20476 = vmatprep.subr.bf16.mxu0 %v25910_v37 }
 0x408   : > { %19141 = vmatmul.mubr.msk.f32.gmra.mrb[52].mxu1 %vm635_vm3, %v27410_v5  ;;  %6456 = vmatprep.mubr.f32.mxu0 %v33460_v0 }
 0x409   : > { %6569 = vmatprep.mubr.f32.mxu1 %v33460_v0 }
 0x40b   : > { %19132 = vmatmul.mubr.msk.f32.gmra.mrb[54].mxu0 %vm635_vm3, %v27426_v18 }
 0x40c   : > { %19142 = vmatmul.mubr.msk.f32.gmra.mrb[54].mxu1 %vm635_vm3, %v27426_v18  ;;  %6462 = vmatprep.mubr.f32.mxu0 %v33460_v0 }
 0x40d   : > { %6575 = vmatprep.mubr.f32.mxu1 %v33460_v0 }
 0x40f   : > { %19133 = vmatmul.mubr.msk.f32.gmra.mrb[56].mxu0 %vm635_vm3, %v27434_v63 }
 0x410   : > { %19143 = vmatmul.mubr.msk.f32.gmra.mrb[56].mxu1 %vm635_vm3, %v27434_v63  ;;  %6468 = vmatprep.mubr.f32.mxu0 %v33460_v0 }
 0x411   : > { %6581 = vmatprep.mubr.f32.mxu1 %v33460_v0 }
 0x413   : > { %19134 = vmatmul.mubr.msk.f32.gmra.mrb[58].mxu0 %vm635_vm3, %v27442_v30 }
 0x414   : > { %19144 = vmatmul.mubr.msk.f32.gmra.mrb[58].mxu1 %vm635_vm3, %v27442_v30  ;;  %6474 = vmatprep.mubr.f32.mxu0 %v33460_v0 }
 0x415   : > { %6587 = vmatprep.mubr.f32.mxu1 %v33460_v0 }
 0x417   : > { %19135 = vmatmul.mubr.msk.f32.gmra.mrb[60].mxu0 %vm635_vm3, %v27450_v39 }
 0x418   : > { %19145 = vmatmul.mubr.msk.f32.gmra.mrb[60].mxu1 %vm635_vm3, %v27450_v39  ;;  %6480 = vmatprep.mubr.f32.mxu0 %v33460_v0 }
 0x419   : > { %6593 = vmatprep.mubr.f32.mxu1 %v33460_v0 }
 0x41b   : > { %19136 = vmatmul.mubr.msk.f32.gmra.mrb[62].mxu0 %vm635_vm3, %v27458_v40 }
 0x41c   : > { %19146 = vmatmul.mubr.msk.f32.gmra.mrb[62].mxu1 %vm635_vm3, %v27458_v40  ;;  %6664 = vmatprep.mubr.f32.mxu0 %v33460_v0 }
 0x41d   : > { %6777 = vmatprep.mubr.f32.mxu1 %v33460_v0 }
 0x41f   : > { %19149 = vmatmul.mubr.msk.f32.vlgmr.msra.gmra.mrb[64].mxu0 %vm635_vm3, %v27386_v9 }
 0x420   : > { %19159 = vmatmul.mubr.msk.f32.vlgmr.msra.gmra.mrb[64].mxu1 %vm635_vm3, %v27386_v9  ;;  %6670 = vmatprep.mubr.f32.mxu0 %v33460_v0  ;;  %v28098_v9 = vld [vmem:[#allocation7 + $0x190] sm:$0xff] }
 0x421   : > { %6783 = vmatprep.mubr.f32.mxu1 %v33460_v0  ;;  %20488 = vmatpush1.bf16.msra.mxu1 %v25904_v33 }
 0x422   : > { %20491 = vmatprep.subr.msk.bf16.mxu1 %vm25843_vm2, %v25912_v38  ;;  %20478 = vmatpush1.bf16.msra.mxu0 %v25929_v46  ;;  %v27730_v46 = vld [vmem:[#allocation7 + $0x140] sm:$0xff] }
 0x423   : > { %19150 = vmatmul.mubr.msk.f32.gmra.mrb[66].mxu0 %vm635_vm3, %v27394_v19  ;;  %20481 = vmatprep.subr.msk.bf16.mxu0 %vm25843_vm2, %v25939_v50 }
 0x424   : > { %19160 = vmatmul.mubr.msk.f32.gmra.mrb[66].mxu1 %vm635_vm3, %v27394_v19  ;;  %6676 = vmatprep.mubr.f32.mxu0 %v33460_v0  ;;  %v28114_v19 = vld [vmem:[#allocation7 + $0x198] sm:$0xff] }
 0x425   : > { %6789 = vmatprep.mubr.f32.mxu1 %v33460_v0  ;;  %20494 = vmatpush1.bf16.msk.msra.mxu1 %vm25843_vm2, %v25937_v49 }
 0x426   : > { %20484 = vmatpush1.bf16.msk.msra.mxu0 %vm25843_vm2, %v25956_v57  ;;  %20506 = vmatprep.subr.bf16.mxu1 %v25945_v53  ;;  %v27738_v57 = vld [vmem:[#allocation7 + $0x148] sm:$0xff] }
 0x427   : > { %19151 = vmatmul.mubr.msk.f32.gmra.mrb[68].mxu0 %vm635_vm3, %v27410_v5  ;;  %20496 = vmatprep.subr.bf16.mxu0 %v25964_v58 }
 0x428   : > { %19161 = vmatmul.mubr.msk.f32.gmra.mrb[68].mxu1 %vm635_vm3, %v27410_v5  ;;  %6682 = vmatprep.mubr.f32.mxu0 %v33460_v0  ;;  %v28122_v5 = vld [vmem:[#allocation7 + $0x1a0] sm:$0xff] }
 0x429   : > { %6795 = vmatprep.mubr.f32.mxu1 %v33460_v0 }
 0x42b   : > { %19152 = vmatmul.mubr.msk.f32.gmra.mrb[70].mxu0 %vm635_vm3, %v27426_v18 }
 0x42c   : > { %19162 = vmatmul.mubr.msk.f32.gmra.mrb[70].mxu1 %vm635_vm3, %v27426_v18  ;;  %6688 = vmatprep.mubr.f32.mxu0 %v33460_v0  ;;  %v28130_v18 = vld [vmem:[#allocation7 + $0x1a8] sm:$0xff] }
 0x42d   : > { %6801 = vmatprep.mubr.f32.mxu1 %v33460_v0 }
 0x42f   : > { %19153 = vmatmul.mubr.msk.f32.gmra.mrb[72].mxu0 %vm635_vm3, %v27434_v63 }
 0x430   : > { %19163 = vmatmul.mubr.msk.f32.gmra.mrb[72].mxu1 %vm635_vm3, %v27434_v63  ;;  %6694 = vmatprep.mubr.f32.mxu0 %v33460_v0  ;;  %v28138_v63 = vld [vmem:[#allocation7 + $0x1b0] sm:$0xff] }
 0x431   : > { %6807 = vmatprep.mubr.f32.mxu1 %v33460_v0 }
 0x433   : > { %19154 = vmatmul.mubr.msk.f32.gmra.mrb[74].mxu0 %vm635_vm3, %v27442_v30 }
 0x434   : > { %19164 = vmatmul.mubr.msk.f32.gmra.mrb[74].mxu1 %vm635_vm3, %v27442_v30  ;;  %6700 = vmatprep.mubr.f32.mxu0 %v33460_v0  ;;  %v28146_v30 = vld [vmem:[#allocation7 + $0x1b8] sm:$0xff] }
 0x435   : > { %6813 = vmatprep.mubr.f32.mxu1 %v33460_v0 }
 0x437   : > { %19155 = vmatmul.mubr.msk.f32.gmra.mrb[76].mxu0 %vm635_vm3, %v27450_v39 }
 0x438   : > { %19165 = vmatmul.mubr.msk.f32.gmra.mrb[76].mxu1 %vm635_vm3, %v27450_v39  ;;  %6706 = vmatprep.mubr.f32.mxu0 %v33460_v0  ;;  %v18655_v39 = vld [vmem:[%s25819_s3 + $0x120] sm:$0xff] }
 0x439   : > { %6819 = vmatprep.mubr.f32.mxu1 %v33460_v0 }
 0x43b   : > { %19156 = vmatmul.mubr.msk.f32.gmra.mrb[78].mxu0 %vm635_vm3, %v27458_v40 }
 0x43c   : > { %19166 = vmatmul.mubr.msk.f32.gmra.mrb[78].mxu1 %vm635_vm3, %v27458_v40  ;;  %7086 = vmatprep.mubr.f32.mxu0 %v33460_v0  ;;  %v18656_v40 = vld [vmem:[%s25819_s3 + $0x128] sm:$0xff] }
 0x43d   : > { %7199 = vmatprep.mubr.f32.mxu1 %v33460_v0  ;;  %v28232_v41 = vpack.c.bf16 %v18656_v40, %v18655_v39  ;;  %v12663_v39 = vld [vmem:[#allocation11 + $0x8] sm:$0xff]  ;;  %v12664_v40 = vld [vmem:[#allocation11 + $0x10] sm:$0xff] }
 0x43f   : > { %19169 = vmatmul.mubr.msk.f32.vlgmr.msra.gmra.mrb[0].mxu0 %vm635_vm3, %v27730_v46 }
 0x440   : > { %19179 = vmatmul.mubr.msk.f32.vlgmr.msra.gmra.mrb[0].mxu1 %vm635_vm3, %v27730_v46  ;;  %7092 = vmatprep.mubr.f32.mxu0 %v33460_v0 }
 0x441   : > { %7205 = vmatprep.mubr.f32.mxu1 %v33460_v0  ;;  %20508 = vmatpush1.bf16.msra.mxu1 %v26025_v13 }
 0x442   : > { %20511 = vmatprep.subr.msk.bf16.mxu1 %vm25843_vm2, %v26027_v15  ;;  %20498 = vmatpush1.bf16.msra.mxu0 %v26029_v16 }
 0x443   : > { %19170 = vmatmul.mubr.msk.f32.gmra.mrb[2].mxu0 %vm635_vm3, %v27738_v57  ;;  %20501 = vmatprep.subr.msk.bf16.mxu0 %vm25843_vm2, %v26036_v22 }
 0x444   : > { %19180 = vmatmul.mubr.msk.f32.gmra.mrb[2].mxu1 %vm635_vm3, %v27738_v57  ;;  %7098 = vmatprep.mubr.f32.mxu0 %v33460_v0 }
 0x445   : > { %7211 = vmatprep.mubr.f32.mxu1 %v33460_v0  ;;  %20514 = vmatpush1.bf16.msk.msra.mxu1 %vm25843_vm2, %v26048_v32 }
 0x446   : > { %20504 = vmatpush1.bf16.msk.msra.mxu0 %vm25843_vm2, %v26054_v34  ;;  %20526 = vmatprep.subr.bf16.mxu1 %v26056_v35 }
 0x447   : > { %19171 = vmatmul.mubr.msk.f32.gmra.mrb[4].mxu0 %vm635_vm3, %v27754_v14  ;;  %20516 = vmatprep.subr.bf16.mxu0 %v26063_v36 }
 0x448   : > { %19181 = vmatmul.mubr.msk.f32.gmra.mrb[4].mxu1 %vm635_vm3, %v27754_v14  ;;  %7104 = vmatprep.mubr.f32.mxu0 %v33460_v0 }
 0x449   : > { %7217 = vmatprep.mubr.f32.mxu1 %v33460_v0 }
 0x44b   : > { %19172 = vmatmul.mubr.msk.f32.gmra.mrb[6].mxu0 %vm635_vm3, %v27770_v25 }
 0x44c   : > { %19182 = vmatmul.mubr.msk.f32.gmra.mrb[6].mxu1 %vm635_vm3, %v27770_v25  ;;  %7110 = vmatprep.mubr.f32.mxu0 %v33460_v0 }
 0x44d   : > { %7223 = vmatprep.mubr.f32.mxu1 %v33460_v0 }
 0x44f   : > { %19173 = vmatmul.mubr.msk.f32.gmra.mrb[8].mxu0 %vm635_vm3, %v27778_v12 }
 0x450   : > { %19183 = vmatmul.mubr.msk.f32.gmra.mrb[8].mxu1 %vm635_vm3, %v27778_v12  ;;  %7116 = vmatprep.mubr.f32.mxu0 %v33460_v0 }
 0x451   : > { %7229 = vmatprep.mubr.f32.mxu1 %v33460_v0 }
 0x453   : > { %19174 = vmatmul.mubr.msk.f32.gmra.mrb[10].mxu0 %vm635_vm3, %v27786_v26 }
 0x454   : > { %19184 = vmatmul.mubr.msk.f32.gmra.mrb[10].mxu1 %vm635_vm3, %v27786_v26  ;;  %7122 = vmatprep.mubr.f32.mxu0 %v33460_v0 }
 0x455   : > { %7235 = vmatprep.mubr.f32.mxu1 %v33460_v0 }
 0x457   : > { %19175 = vmatmul.mubr.msk.f32.gmra.mrb[12].mxu0 %vm635_vm3, %v27794_v27 }
 0x458   : > { %19185 = vmatmul.mubr.msk.f32.gmra.mrb[12].mxu1 %vm635_vm3, %v27794_v27  ;;  %7128 = vmatprep.mubr.f32.mxu0 %v33460_v0 }
 0x459   : > { %7241 = vmatprep.mubr.f32.mxu1 %v33460_v0 }
 0x45b   : > { %19176 = vmatmul.mubr.msk.f32.gmra.mrb[14].mxu0 %vm635_vm3, %v27802_v28 }
 0x45c   : > { %19186 = vmatmul.mubr.msk.f32.gmra.mrb[14].mxu1 %vm635_vm3, %v27802_v28  ;;  %7312 = vmatprep.mubr.f32.mxu0 %v33460_v0 }
 0x45d   : > { %7425 = vmatprep.mubr.f32.mxu1 %v33460_v0 }
 0x45f   : > { %19189 = vmatmul.mubr.msk.f32.vlgmr.msra.gmra.mrb[16].mxu0 %vm635_vm3, %v27730_v46 }
 0x460   : > { %19199 = vmatmul.mubr.msk.f32.vlgmr.msra.gmra.mrb[16].mxu1 %vm635_vm3, %v27730_v46  ;;  %7318 = vmatprep.mubr.f32.mxu0 %v33460_v0 }
 0x461   : > { %7431 = vmatprep.mubr.f32.mxu1 %v33460_v0  ;;  %20528 = vmatpush1.bf16.msra.mxu1 %v26121_v51 }
 0x462   : > { %20531 = vmatprep.subr.msk.bf16.mxu1 %vm25843_vm2, %v26123_v52  ;;  %20518 = vmatpush1.bf16.msra.mxu0 %v26125_v54 }
 0x463   : > { %19190 = vmatmul.mubr.msk.f32.gmra.mrb[18].mxu0 %vm635_vm3, %v27738_v57  ;;  %20521 = vmatprep.subr.msk.bf16.mxu0 %vm25843_vm2, %v26132_v4 }
 0x464   : > { %19200 = vmatmul.mubr.msk.f32.gmra.mrb[18].mxu1 %vm635_vm3, %v27738_v57  ;;  %7324 = vmatprep.mubr.f32.mxu0 %v33460_v0 }
 0x465   : > { %7437 = vmatprep.mubr.f32.mxu1 %v33460_v0  ;;  %20534 = vmatpush1.bf16.msk.msra.mxu1 %vm25843_vm2, %v26144_v17 }
 0x466   : > { %20524 = vmatpush1.bf16.msk.msra.mxu0 %vm25843_vm2, %v26150_v20  ;;  %20546 = vmatprep.subr.bf16.mxu1 %v26152_v21 }
 0x467   : > { %19191 = vmatmul.mubr.msk.f32.gmra.mrb[20].mxu0 %vm635_vm3, %v27754_v14  ;;  %20536 = vmatprep.subr.bf16.mxu0 %v26159_v24 }
 0x468   : > { %19201 = vmatmul.mubr.msk.f32.gmra.mrb[20].mxu1 %vm635_vm3, %v27754_v14  ;;  %7330 = vmatprep.mubr.f32.mxu0 %v33460_v0 }
 0x469   : > { %7443 = vmatprep.mubr.f32.mxu1 %v33460_v0 }
 0x46b   : > { %19192 = vmatmul.mubr.msk.f32.gmra.mrb[22].mxu0 %vm635_vm3, %v27770_v25 }
 0x46c   : > { %19202 = vmatmul.mubr.msk.f32.gmra.mrb[22].mxu1 %vm635_vm3, %v27770_v25  ;;  %7336 = vmatprep.mubr.f32.mxu0 %v33460_v0 }
 0x46d   : > { %7449 = vmatprep.mubr.f32.mxu1 %v33460_v0 }
 0x46f   : > { %19193 = vmatmul.mubr.msk.f32.gmra.mrb[24].mxu0 %vm635_vm3, %v27778_v12 }
 0x470   : > { %19203 = vmatmul.mubr.msk.f32.gmra.mrb[24].mxu1 %vm635_vm3, %v27778_v12  ;;  %7342 = vmatprep.mubr.f32.mxu0 %v33460_v0 }
 0x471   : > { %7455 = vmatprep.mubr.f32.mxu1 %v33460_v0 }
 0x473   : > { %19194 = vmatmul.mubr.msk.f32.gmra.mrb[26].mxu0 %vm635_vm3, %v27786_v26 }
 0x474   : > { %19204 = vmatmul.mubr.msk.f32.gmra.mrb[26].mxu1 %vm635_vm3, %v27786_v26  ;;  %7348 = vmatprep.mubr.f32.mxu0 %v33460_v0 }
 0x475   : > { %7461 = vmatprep.mubr.f32.mxu1 %v33460_v0 }
 0x477   : > { %19195 = vmatmul.mubr.msk.f32.gmra.mrb[28].mxu0 %vm635_vm3, %v27794_v27 }
 0x478   : > { %19205 = vmatmul.mubr.msk.f32.gmra.mrb[28].mxu1 %vm635_vm3, %v27794_v27  ;;  %7354 = vmatprep.mubr.f32.mxu0 %v33460_v0 }
 0x479   : > { %7467 = vmatprep.mubr.f32.mxu1 %v33460_v0 }
 0x47b   : > { %19196 = vmatmul.mubr.msk.f32.gmra.mrb[30].mxu0 %vm635_vm3, %v27802_v28 }
 0x47c   : > { %19206 = vmatmul.mubr.msk.f32.gmra.mrb[30].mxu1 %vm635_vm3, %v27802_v28  ;;  %7538 = vmatprep.mubr.f32.mxu0 %v33460_v0 }
 0x47d   : > { %7651 = vmatprep.mubr.f32.mxu1 %v33460_v0 }
 0x47f   : > { %19209 = vmatmul.mubr.msk.f32.vlgmr.msra.gmra.mrb[32].mxu0 %vm635_vm3, %v27730_v46 }
 0x480   : > { %19219 = vmatmul.mubr.msk.f32.vlgmr.msra.gmra.mrb[32].mxu1 %vm635_vm3, %v27730_v46  ;;  %7544 = vmatprep.mubr.f32.mxu0 %v33460_v0 }
 0x481   : > { %7657 = vmatprep.mubr.f32.mxu1 %v33460_v0  ;;  %20548 = vmatpush1.bf16.msra.mxu1 %v26217_v44 }
 0x482   : > { %20551 = vmatprep.subr.msk.bf16.mxu1 %vm25843_vm2, %v26219_v45  ;;  %20538 = vmatpush1.bf16.msra.mxu0 %v26221_v47 }
 0x483   : > { %19210 = vmatmul.mubr.msk.f32.gmra.mrb[34].mxu0 %vm635_vm3, %v27738_v57  ;;  %20541 = vmatprep.subr.msk.bf16.mxu0 %vm25843_vm2, %v26227_v2 }
 0x484   : > { %19220 = vmatmul.mubr.msk.f32.gmra.mrb[34].mxu1 %vm635_vm3, %v27738_v57  ;;  %7550 = vmatprep.mubr.f32.mxu0 %v33460_v0 }
 0x485   : > { %7663 = vmatprep.mubr.f32.mxu1 %v33460_v0  ;;  %20554 = vmatpush1.bf16.msk.msra.mxu1 %vm25843_vm2, %v26236_v7 }
 0x486   : > { %20544 = vmatpush1.bf16.msk.msra.mxu0 %vm25843_vm2, %v26242_v8  ;;  %20566 = vmatprep.subr.bf16.mxu1 %v27888_v43 }
 0x487   : > { %19211 = vmatmul.mubr.msk.f32.gmra.mrb[36].mxu0 %vm635_vm3, %v27754_v14  ;;  %20556 = vmatprep.subr.bf16.mxu0 %v27200_v59 }
 0x488   : > { %19221 = vmatmul.mubr.msk.f32.gmra.mrb[36].mxu1 %vm635_vm3, %v27754_v14  ;;  %7556 = vmatprep.mubr.f32.mxu0 %v33460_v0 }
 0x489   : > { %7669 = vmatprep.mubr.f32.mxu1 %v33460_v0 }
 0x48b   : > { %19212 = vmatmul.mubr.msk.f32.gmra.mrb[38].mxu0 %vm635_vm3, %v27770_v25 }
 0x48c   : > { %19222 = vmatmul.mubr.msk.f32.gmra.mrb[38].mxu1 %vm635_vm3, %v27770_v25  ;;  %7562 = vmatprep.mubr.f32.mxu0 %v33460_v0 }
 0x48d   : > { %7675 = vmatprep.mubr.f32.mxu1 %v33460_v0 }
 0x48f   : > { %19213 = vmatmul.mubr.msk.f32.gmra.mrb[40].mxu0 %vm635_vm3, %v27778_v12 }
 0x490   : > { %19223 = vmatmul.mubr.msk.f32.gmra.mrb[40].mxu1 %vm635_vm3, %v27778_v12  ;;  %7568 = vmatprep.mubr.f32.mxu0 %v33460_v0 }
 0x491   : > { %7681 = vmatprep.mubr.f32.mxu1 %v33460_v0 }
 0x493   : > { %19214 = vmatmul.mubr.msk.f32.gmra.mrb[42].mxu0 %vm635_vm3, %v27786_v26 }
 0x494   : > { %19224 = vmatmul.mubr.msk.f32.gmra.mrb[42].mxu1 %vm635_vm3, %v27786_v26  ;;  %7574 = vmatprep.mubr.f32.mxu0 %v33460_v0 }
 0x495   : > { %7687 = vmatprep.mubr.f32.mxu1 %v33460_v0 }
 0x497   : > { %19215 = vmatmul.mubr.msk.f32.gmra.mrb[44].mxu0 %vm635_vm3, %v27794_v27 }
 0x498   : > { %19225 = vmatmul.mubr.msk.f32.gmra.mrb[44].mxu1 %vm635_vm3, %v27794_v27  ;;  %7580 = vmatprep.mubr.f32.mxu0 %v33460_v0 }
 0x499   : > { %7693 = vmatprep.mubr.f32.mxu1 %v33460_v0 }
 0x49b   : > { %19216 = vmatmul.mubr.msk.f32.gmra.mrb[46].mxu0 %vm635_vm3, %v27802_v28 }
 0x49c   : > { %19226 = vmatmul.mubr.msk.f32.gmra.mrb[46].mxu1 %vm635_vm3, %v27802_v28  ;;  %7764 = vmatprep.mubr.f32.mxu0 %v33460_v0 }
 0x49d   : > { %7877 = vmatprep.mubr.f32.mxu1 %v33460_v0 }
 0x49f   : > { %19229 = vmatmul.mubr.msk.f32.vlgmr.msra.gmra.mrb[48].mxu0 %vm635_vm3, %v27730_v46 }
 0x4a0   : > { %19239 = vmatmul.mubr.msk.f32.vlgmr.msra.gmra.mrb[48].mxu1 %vm635_vm3, %v27730_v46  ;;  %7770 = vmatprep.mubr.f32.mxu0 %v33460_v0 }
 0x4a1   : > { %7883 = vmatprep.mubr.f32.mxu1 %v33460_v0  ;;  %20568 = vmatpush1.bf16.msra.mxu1 %v27544_v48 }
 0x4a2   : > { %20571 = vmatprep.subr.msk.bf16.mxu1 %vm25843_vm2, %v27945_v61  ;;  %20558 = vmatpush1.bf16.msra.mxu0 %v26856_v3 }
 0x4a3   : > { %19230 = vmatmul.mubr.msk.f32.gmra.mrb[50].mxu0 %vm635_vm3, %v27738_v57  ;;  %20561 = vmatprep.subr.msk.bf16.mxu0 %vm25843_vm2, %v27257_v62 }
 0x4a4   : > { %19240 = vmatmul.mubr.msk.f32.gmra.mrb[50].mxu1 %vm635_vm3, %v27738_v57  ;;  %7776 = vmatprep.mubr.f32.mxu0 %v33460_v0 }
 0x4a5   : > { %7889 = vmatprep.mubr.f32.mxu1 %v33460_v0  ;;  %20574 = vmatpush1.bf16.msk.msra.mxu1 %vm25843_vm2, %v27601_v10 }
 0x4a6   : > { %20564 = vmatpush1.bf16.msk.msra.mxu0 %vm25843_vm2, %v26913_v11  ;;  %20586 = vmatprep.subr.bf16.mxu1 %v26029_v16 }
 0x4a7   : > { %19231 = vmatmul.mubr.msk.f32.gmra.mrb[52].mxu0 %vm635_vm3, %v27754_v14  ;;  %20576 = vmatprep.subr.bf16.mxu0 %v25904_v33 }
 0x4a8   : > { %19241 = vmatmul.mubr.msk.f32.gmra.mrb[52].mxu1 %vm635_vm3, %v27754_v14  ;;  %7782 = vmatprep.mubr.f32.mxu0 %v33460_v0 }
 0x4a9   : > { %7895 = vmatprep.mubr.f32.mxu1 %v33460_v0 }
 0x4ab   : > { %19232 = vmatmul.mubr.msk.f32.gmra.mrb[54].mxu0 %vm635_vm3, %v27770_v25 }
 0x4ac   : > { %19242 = vmatmul.mubr.msk.f32.gmra.mrb[54].mxu1 %vm635_vm3, %v27770_v25  ;;  %7788 = vmatprep.mubr.f32.mxu0 %v33460_v0 }
 0x4ad   : > { %7901 = vmatprep.mubr.f32.mxu1 %v33460_v0 }
 0x4af   : > { %19233 = vmatmul.mubr.msk.f32.gmra.mrb[56].mxu0 %vm635_vm3, %v27778_v12 }
 0x4b0   : > { %19243 = vmatmul.mubr.msk.f32.gmra.mrb[56].mxu1 %vm635_vm3, %v27778_v12  ;;  %7794 = vmatprep.mubr.f32.mxu0 %v33460_v0 }
 0x4b1   : > { %7907 = vmatprep.mubr.f32.mxu1 %v33460_v0 }
 0x4b3   : > { %19234 = vmatmul.mubr.msk.f32.gmra.mrb[58].mxu0 %vm635_vm3, %v27786_v26 }
 0x4b4   : > { %19244 = vmatmul.mubr.msk.f32.gmra.mrb[58].mxu1 %vm635_vm3, %v27786_v26  ;;  %7800 = vmatprep.mubr.f32.mxu0 %v33460_v0 }
 0x4b5   : > { %7913 = vmatprep.mubr.f32.mxu1 %v33460_v0 }
 0x4b7   : > { %19235 = vmatmul.mubr.msk.f32.gmra.mrb[60].mxu0 %vm635_vm3, %v27794_v27 }
 0x4b8   : > { %19245 = vmatmul.mubr.msk.f32.gmra.mrb[60].mxu1 %vm635_vm3, %v27794_v27  ;;  %7806 = vmatprep.mubr.f32.mxu0 %v33460_v0 }
 0x4b9   : > { %7919 = vmatprep.mubr.f32.mxu1 %v33460_v0 }
 0x4bb   : > { %19236 = vmatmul.mubr.msk.f32.gmra.mrb[62].mxu0 %vm635_vm3, %v27802_v28 }
 0x4bc   : > { %19246 = vmatmul.mubr.msk.f32.gmra.mrb[62].mxu1 %vm635_vm3, %v27802_v28  ;;  %7990 = vmatprep.mubr.f32.mxu0 %v33460_v0 }
 0x4bd   : > { %8103 = vmatprep.mubr.f32.mxu1 %v33460_v0 }
 0x4bf   : > { %19249 = vmatmul.mubr.msk.f32.vlgmr.msra.gmra.mrb[64].mxu0 %vm635_vm3, %v27730_v46 }
 0x4c0   : > { %19259 = vmatmul.mubr.msk.f32.vlgmr.msra.gmra.mrb[64].mxu1 %vm635_vm3, %v27730_v46  ;;  %7996 = vmatprep.mubr.f32.mxu0 %v33460_v0  ;;  %v28442_v46 = vld [vmem:[#allocation7 + $0x1d0] sm:$0xff] }
 0x4c1   : > { %8109 = vmatprep.mubr.f32.mxu1 %v33460_v0  ;;  %20588 = vmatpush1.bf16.msra.mxu1 %v25892_v29 }
 0x4c2   : > { %20591 = vmatprep.subr.msk.bf16.mxu1 %vm25843_vm2, %v26054_v34  ;;  %20578 = vmatpush1.bf16.msra.mxu0 %v25910_v37  ;;  %v28074_v37 = vld [vmem:[#allocation7 + $0x180] sm:$0xff] }
 0x4c3   : > { %19250 = vmatmul.mubr.msk.f32.gmra.mrb[66].mxu0 %vm635_vm3, %v27738_v57  ;;  %20581 = vmatprep.subr.msk.bf16.mxu0 %vm25843_vm2, %v25937_v49 }
 0x4c4   : > { %19260 = vmatmul.mubr.msk.f32.gmra.mrb[66].mxu1 %vm635_vm3, %v27738_v57  ;;  %8002 = vmatprep.mubr.f32.mxu0 %v33460_v0  ;;  %v28458_v57 = vld [vmem:[#allocation7 + $0x1d8] sm:$0xff] }
 0x4c5   : > { %8115 = vmatprep.mubr.f32.mxu1 %v33460_v0  ;;  %20594 = vmatpush1.bf16.msk.msra.mxu1 %vm25843_vm2, %v25912_v38 }
 0x4c6   : > { %20584 = vmatpush1.bf16.msk.msra.mxu0 %vm25843_vm2, %v25939_v50  ;;  %20606 = vmatprep.subr.bf16.mxu1 %v26125_v54  ;;  %v28082_v50 = vld [vmem:[#allocation7 + $0x188] sm:$0xff] }
 0x4c7   : > { %19251 = vmatmul.mubr.msk.f32.gmra.mrb[68].mxu0 %vm635_vm3, %v27754_v14  ;;  %20596 = vmatprep.subr.bf16.mxu0 %v26025_v13 }
 0x4c8   : > { %19261 = vmatmul.mubr.msk.f32.gmra.mrb[68].mxu1 %vm635_vm3, %v27754_v14  ;;  %8008 = vmatprep.mubr.f32.mxu0 %v33460_v0  ;;  %v28466_v14 = vld [vmem:[#allocation7 + $0x1e0] sm:$0xff] }
 0x4c9   : > { %8121 = vmatprep.mubr.f32.mxu1 %v33460_v0 }
 0x4cb   : > { %19252 = vmatmul.mubr.msk.f32.gmra.mrb[70].mxu0 %vm635_vm3, %v27770_v25 }
 0x4cc   : > { %19262 = vmatmul.mubr.msk.f32.gmra.mrb[70].mxu1 %vm635_vm3, %v27770_v25  ;;  %8014 = vmatprep.mubr.f32.mxu0 %v33460_v0  ;;  %v28474_v25 = vld [vmem:[#allocation7 + $0x1e8] sm:$0xff] }
 0x4cd   : > { %8127 = vmatprep.mubr.f32.mxu1 %v33460_v0 }
 0x4cf   : > { %19253 = vmatmul.mubr.msk.f32.gmra.mrb[72].mxu0 %vm635_vm3, %v27778_v12 }
 0x4d0   : > { %19263 = vmatmul.mubr.msk.f32.gmra.mrb[72].mxu1 %vm635_vm3, %v27778_v12  ;;  %8020 = vmatprep.mubr.f32.mxu0 %v33460_v0  ;;  %v28482_v12 = vld [vmem:[#allocation7 + $0x1f0] sm:$0xff] }
 0x4d1   : > { %8133 = vmatprep.mubr.f32.mxu1 %v33460_v0 }
 0x4d3   : > { %19254 = vmatmul.mubr.msk.f32.gmra.mrb[74].mxu0 %vm635_vm3, %v27786_v26 }
 0x4d4   : > { %19264 = vmatmul.mubr.msk.f32.gmra.mrb[74].mxu1 %vm635_vm3, %v27786_v26  ;;  %8026 = vmatprep.mubr.f32.mxu0 %v33460_v0  ;;  %v28490_v26 = vld [vmem:[#allocation7 + $0x1f8] sm:$0xff] }
 0x4d5   : > { %8139 = vmatprep.mubr.f32.mxu1 %v33460_v0 }
 0x4d7   : > { %19255 = vmatmul.mubr.msk.f32.gmra.mrb[76].mxu0 %vm635_vm3, %v27794_v27 }
 0x4d8   : > { %19265 = vmatmul.mubr.msk.f32.gmra.mrb[76].mxu1 %vm635_vm3, %v27794_v27  ;;  %8032 = vmatprep.mubr.f32.mxu0 %v33460_v0  ;;  %v18659_v27 = vld [vmem:[%s25819_s3 + $0x140] sm:$0xff] }
 0x4d9   : > { %8145 = vmatprep.mubr.f32.mxu1 %v33460_v0 }
 0x4db   : > { %19256 = vmatmul.mubr.msk.f32.gmra.mrb[78].mxu0 %vm635_vm3, %v27802_v28 }
 0x4dc   : > { %19266 = vmatmul.mubr.msk.f32.gmra.mrb[78].mxu1 %vm635_vm3, %v27802_v28  ;;  %8412 = vmatprep.mubr.f32.mxu0 %v33460_v0  ;;  %v18660_v28 = vld [vmem:[%s25819_s3 + $0x148] sm:$0xff] }
 0x4dd   : > { %8525 = vmatprep.mubr.f32.mxu1 %v33460_v0  ;;  %v28576_v23 = vpack.c.bf16 %v18660_v28, %v18659_v27 }
 0x4df   : > { %19269 = vmatmul.mubr.msk.f32.vlgmr.msra.gmra.mrb[0].mxu0 %vm635_vm3, %v28074_v37 }
 0x4e0   : > { %19279 = vmatmul.mubr.msk.f32.vlgmr.msra.gmra.mrb[0].mxu1 %vm635_vm3, %v28074_v37  ;;  %8418 = vmatprep.mubr.f32.mxu0 %v33460_v0 }
 0x4e1   : > { %8531 = vmatprep.mubr.f32.mxu1 %v33460_v0  ;;  %20608 = vmatpush1.bf16.msra.mxu1 %v25945_v53 }
 0x4e2   : > { %20611 = vmatprep.subr.msk.bf16.mxu1 %vm25843_vm2, %v26150_v20  ;;  %20598 = vmatpush1.bf16.msra.mxu0 %v25964_v58 }
 0x4e3   : > { %19270 = vmatmul.mubr.msk.f32.gmra.mrb[2].mxu0 %vm635_vm3, %v28082_v50  ;;  %20601 = vmatprep.subr.msk.bf16.mxu0 %vm25843_vm2, %v26048_v32 }
 0x4e4   : > { %19280 = vmatmul.mubr.msk.f32.gmra.mrb[2].mxu1 %vm635_vm3, %v28082_v50  ;;  %8424 = vmatprep.mubr.f32.mxu0 %v33460_v0 }
 0x4e5   : > { %8537 = vmatprep.mubr.f32.mxu1 %v33460_v0  ;;  %20614 = vmatpush1.bf16.msk.msra.mxu1 %vm25843_vm2, %v26027_v15 }
 0x4e6   : > { %20604 = vmatpush1.bf16.msk.msra.mxu0 %vm25843_vm2, %v26036_v22  ;;  %20626 = vmatprep.subr.bf16.mxu1 %v26221_v47 }
 0x4e7   : > { %19271 = vmatmul.mubr.msk.f32.gmra.mrb[4].mxu0 %vm635_vm3, %v28098_v9  ;;  %20616 = vmatprep.subr.bf16.mxu0 %v26121_v51 }
 0x4e8   : > { %19281 = vmatmul.mubr.msk.f32.gmra.mrb[4].mxu1 %vm635_vm3, %v28098_v9  ;;  %8430 = vmatprep.mubr.f32.mxu0 %v33460_v0 }
 0x4e9   : > { %8543 = vmatprep.mubr.f32.mxu1 %v33460_v0 }
 0x4eb   : > { %19272 = vmatmul.mubr.msk.f32.gmra.mrb[6].mxu0 %vm635_vm3, %v28114_v19 }
 0x4ec   : > { %19282 = vmatmul.mubr.msk.f32.gmra.mrb[6].mxu1 %vm635_vm3, %v28114_v19  ;;  %8436 = vmatprep.mubr.f32.mxu0 %v33460_v0 }
 0x4ed   : > { %8549 = vmatprep.mubr.f32.mxu1 %v33460_v0 }
 0x4ef   : > { %19273 = vmatmul.mubr.msk.f32.gmra.mrb[8].mxu0 %vm635_vm3, %v28122_v5 }
 0x4f0   : > { %19283 = vmatmul.mubr.msk.f32.gmra.mrb[8].mxu1 %vm635_vm3, %v28122_v5  ;;  %8442 = vmatprep.mubr.f32.mxu0 %v33460_v0 }
 0x4f1   : > { %8555 = vmatprep.mubr.f32.mxu1 %v33460_v0 }
 0x4f3   : > { %19274 = vmatmul.mubr.msk.f32.gmra.mrb[10].mxu0 %vm635_vm3, %v28130_v18 }
 0x4f4   : > { %19284 = vmatmul.mubr.msk.f32.gmra.mrb[10].mxu1 %vm635_vm3, %v28130_v18  ;;  %8448 = vmatprep.mubr.f32.mxu0 %v33460_v0 }
 0x4f5   : > { %8561 = vmatprep.mubr.f32.mxu1 %v33460_v0 }
 0x4f7   : > { %19275 = vmatmul.mubr.msk.f32.gmra.mrb[12].mxu0 %vm635_vm3, %v28138_v63 }
 0x4f8   : > { %19285 = vmatmul.mubr.msk.f32.gmra.mrb[12].mxu1 %vm635_vm3, %v28138_v63  ;;  %8454 = vmatprep.mubr.f32.mxu0 %v33460_v0 }
 0x4f9   : > { %8567 = vmatprep.mubr.f32.mxu1 %v33460_v0 }
 0x4fb   : > { %19276 = vmatmul.mubr.msk.f32.gmra.mrb[14].mxu0 %vm635_vm3, %v28146_v30 }
 0x4fc   : > { %19286 = vmatmul.mubr.msk.f32.gmra.mrb[14].mxu1 %vm635_vm3, %v28146_v30  ;;  %8638 = vmatprep.mubr.f32.mxu0 %v33460_v0 }
 0x4fd   : > { %8751 = vmatprep.mubr.f32.mxu1 %v33460_v0 }
 0x4ff   : > { %19289 = vmatmul.mubr.msk.f32.vlgmr.msra.gmra.mrb[16].mxu0 %vm635_vm3, %v28074_v37 }
 0x500   : > { %19299 = vmatmul.mubr.msk.f32.vlgmr.msra.gmra.mrb[16].mxu1 %vm635_vm3, %v28074_v37  ;;  %8644 = vmatprep.mubr.f32.mxu0 %v33460_v0 }
 0x501   : > { %8757 = vmatprep.mubr.f32.mxu1 %v33460_v0  ;;  %20628 = vmatpush1.bf16.msra.mxu1 %v26056_v35 }
 0x502   : > { %20631 = vmatprep.subr.msk.bf16.mxu1 %vm25843_vm2, %v26242_v8  ;;  %20618 = vmatpush1.bf16.msra.mxu0 %v26063_v36 }
 0x503   : > { %19290 = vmatmul.mubr.msk.f32.gmra.mrb[18].mxu0 %vm635_vm3, %v28082_v50  ;;  %20621 = vmatprep.subr.msk.bf16.mxu0 %vm25843_vm2, %v26144_v17 }
 0x504   : > { %19300 = vmatmul.mubr.msk.f32.gmra.mrb[18].mxu1 %vm635_vm3, %v28082_v50  ;;  %8650 = vmatprep.mubr.f32.mxu0 %v33460_v0 }
 0x505   : > { %8763 = vmatprep.mubr.f32.mxu1 %v33460_v0  ;;  %20634 = vmatpush1.bf16.msk.msra.mxu1 %vm25843_vm2, %v26123_v52 }
 0x506   : > { %20624 = vmatpush1.bf16.msk.msra.mxu0 %vm25843_vm2, %v26132_v4  ;;  %20646 = vmatprep.subr.bf16.mxu1 %v26856_v3 }
 0x507   : > { %19291 = vmatmul.mubr.msk.f32.gmra.mrb[20].mxu0 %vm635_vm3, %v28098_v9  ;;  %20636 = vmatprep.subr.bf16.mxu0 %v26217_v44 }
 0x508   : > { %19301 = vmatmul.mubr.msk.f32.gmra.mrb[20].mxu1 %vm635_vm3, %v28098_v9  ;;  %8656 = vmatprep.mubr.f32.mxu0 %v33460_v0 }
 0x509   : > { %8769 = vmatprep.mubr.f32.mxu1 %v33460_v0 }
 0x50b   : > { %19292 = vmatmul.mubr.msk.f32.gmra.mrb[22].mxu0 %vm635_vm3, %v28114_v19 }
 0x50c   : > { %19302 = vmatmul.mubr.msk.f32.gmra.mrb[22].mxu1 %vm635_vm3, %v28114_v19  ;;  %8662 = vmatprep.mubr.f32.mxu0 %v33460_v0 }
 0x50d   : > { %8775 = vmatprep.mubr.f32.mxu1 %v33460_v0 }
 0x50f   : > { %19293 = vmatmul.mubr.msk.f32.gmra.mrb[24].mxu0 %vm635_vm3, %v28122_v5 }
 0x510   : > { %19303 = vmatmul.mubr.msk.f32.gmra.mrb[24].mxu1 %vm635_vm3, %v28122_v5  ;;  %8668 = vmatprep.mubr.f32.mxu0 %v33460_v0 }
 0x511   : > { %8781 = vmatprep.mubr.f32.mxu1 %v33460_v0 }
 0x513   : > { %19294 = vmatmul.mubr.msk.f32.gmra.mrb[26].mxu0 %vm635_vm3, %v28130_v18 }
 0x514   : > { %19304 = vmatmul.mubr.msk.f32.gmra.mrb[26].mxu1 %vm635_vm3, %v28130_v18  ;;  %8674 = vmatprep.mubr.f32.mxu0 %v33460_v0 }
 0x515   : > { %8787 = vmatprep.mubr.f32.mxu1 %v33460_v0 }
 0x517   : > { %19295 = vmatmul.mubr.msk.f32.gmra.mrb[28].mxu0 %vm635_vm3, %v28138_v63 }
 0x518   : > { %19305 = vmatmul.mubr.msk.f32.gmra.mrb[28].mxu1 %vm635_vm3, %v28138_v63  ;;  %8680 = vmatprep.mubr.f32.mxu0 %v33460_v0 }
 0x519   : > { %8793 = vmatprep.mubr.f32.mxu1 %v33460_v0 }
 0x51b   : > { %19296 = vmatmul.mubr.msk.f32.gmra.mrb[30].mxu0 %vm635_vm3, %v28146_v30 }
 0x51c   : > { %19306 = vmatmul.mubr.msk.f32.gmra.mrb[30].mxu1 %vm635_vm3, %v28146_v30  ;;  %8864 = vmatprep.mubr.f32.mxu0 %v33460_v0 }
 0x51d   : > { %8977 = vmatprep.mubr.f32.mxu1 %v33460_v0 }
 0x51f   : > { %19309 = vmatmul.mubr.msk.f32.vlgmr.msra.gmra.mrb[32].mxu0 %vm635_vm3, %v28074_v37 }
 0x520   : > { %19319 = vmatmul.mubr.msk.f32.vlgmr.msra.gmra.mrb[32].mxu1 %vm635_vm3, %v28074_v37  ;;  %8870 = vmatprep.mubr.f32.mxu0 %v33460_v0 }
 0x521   : > { %8983 = vmatprep.mubr.f32.mxu1 %v33460_v0  ;;  %20648 = vmatpush1.bf16.msra.mxu1 %v26152_v21 }
 0x522   : > { %20651 = vmatprep.subr.msk.bf16.mxu1 %vm25843_vm2, %v26913_v11  ;;  %20638 = vmatpush1.bf16.msra.mxu0 %v26159_v24 }
 0x523   : > { %19310 = vmatmul.mubr.msk.f32.gmra.mrb[34].mxu0 %vm635_vm3, %v28082_v50  ;;  %20641 = vmatprep.subr.msk.bf16.mxu0 %vm25843_vm2, %v26236_v7 }
 0x524   : > { %19320 = vmatmul.mubr.msk.f32.gmra.mrb[34].mxu1 %vm635_vm3, %v28082_v50  ;;  %8876 = vmatprep.mubr.f32.mxu0 %v33460_v0 }
 0x525   : > { %8989 = vmatprep.mubr.f32.mxu1 %v33460_v0  ;;  %20654 = vmatpush1.bf16.msk.msra.mxu1 %vm25843_vm2, %v26219_v45 }
 0x526   : > { %20644 = vmatpush1.bf16.msk.msra.mxu0 %vm25843_vm2, %v26227_v2  ;;  %20666 = vmatprep.subr.bf16.mxu1 %v28232_v41 }
 0x527   : > { %19311 = vmatmul.mubr.msk.f32.gmra.mrb[36].mxu0 %vm635_vm3, %v28098_v9  ;;  %20656 = vmatprep.subr.bf16.mxu0 %v27544_v48 }
 0x528   : > { %19321 = vmatmul.mubr.msk.f32.gmra.mrb[36].mxu1 %vm635_vm3, %v28098_v9  ;;  %8882 = vmatprep.mubr.f32.mxu0 %v33460_v0 }
 0x529   : > { %8995 = vmatprep.mubr.f32.mxu1 %v33460_v0 }
 0x52b   : > { %19312 = vmatmul.mubr.msk.f32.gmra.mrb[38].mxu0 %vm635_vm3, %v28114_v19 }
 0x52c   : > { %19322 = vmatmul.mubr.msk.f32.gmra.mrb[38].mxu1 %vm635_vm3, %v28114_v19  ;;  %8888 = vmatprep.mubr.f32.mxu0 %v33460_v0 }
 0x52d   : > { %9001 = vmatprep.mubr.f32.mxu1 %v33460_v0 }
 0x52f   : > { %19313 = vmatmul.mubr.msk.f32.gmra.mrb[40].mxu0 %vm635_vm3, %v28122_v5 }
 0x530   : > { %19323 = vmatmul.mubr.msk.f32.gmra.mrb[40].mxu1 %vm635_vm3, %v28122_v5  ;;  %8894 = vmatprep.mubr.f32.mxu0 %v33460_v0 }
 0x531   : > { %9007 = vmatprep.mubr.f32.mxu1 %v33460_v0 }
 0x533   : > { %19314 = vmatmul.mubr.msk.f32.gmra.mrb[42].mxu0 %vm635_vm3, %v28130_v18 }
 0x534   : > { %19324 = vmatmul.mubr.msk.f32.gmra.mrb[42].mxu1 %vm635_vm3, %v28130_v18  ;;  %8900 = vmatprep.mubr.f32.mxu0 %v33460_v0 }
 0x535   : > { %9013 = vmatprep.mubr.f32.mxu1 %v33460_v0 }
 0x537   : > { %19315 = vmatmul.mubr.msk.f32.gmra.mrb[44].mxu0 %vm635_vm3, %v28138_v63 }
 0x538   : > { %19325 = vmatmul.mubr.msk.f32.gmra.mrb[44].mxu1 %vm635_vm3, %v28138_v63  ;;  %8906 = vmatprep.mubr.f32.mxu0 %v33460_v0 }
 0x539   : > { %9019 = vmatprep.mubr.f32.mxu1 %v33460_v0 }
 0x53b   : > { %19316 = vmatmul.mubr.msk.f32.gmra.mrb[46].mxu0 %vm635_vm3, %v28146_v30 }
 0x53c   : > { %19326 = vmatmul.mubr.msk.f32.gmra.mrb[46].mxu1 %vm635_vm3, %v28146_v30  ;;  %9090 = vmatprep.mubr.f32.mxu0 %v33460_v0 }
 0x53d   : > { %9203 = vmatprep.mubr.f32.mxu1 %v33460_v0 }
 0x53f   : > { %19329 = vmatmul.mubr.msk.f32.vlgmr.msra.gmra.mrb[48].mxu0 %vm635_vm3, %v28074_v37 }
 0x540   : > { %19339 = vmatmul.mubr.msk.f32.vlgmr.msra.gmra.mrb[48].mxu1 %vm635_vm3, %v28074_v37  ;;  %9096 = vmatprep.mubr.f32.mxu0 %v33460_v0 }
 0x541   : > { %9209 = vmatprep.mubr.f32.mxu1 %v33460_v0  ;;  %20668 = vmatpush1.bf16.msra.mxu1 %v27888_v43 }
 0x542   : > { %20671 = vmatprep.subr.msk.bf16.mxu1 %vm25843_vm2, %v28289_v6  ;;  %20658 = vmatpush1.bf16.msra.mxu0 %v27200_v59 }
 0x543   : > { %19330 = vmatmul.mubr.msk.f32.gmra.mrb[50].mxu0 %vm635_vm3, %v28082_v50  ;;  %20661 = vmatprep.subr.msk.bf16.mxu0 %vm25843_vm2, %v27601_v10 }
 0x544   : > { %19340 = vmatmul.mubr.msk.f32.gmra.mrb[50].mxu1 %vm635_vm3, %v28082_v50  ;;  %9102 = vmatprep.mubr.f32.mxu0 %v33460_v0 }
 0x545   : > { %9215 = vmatprep.mubr.f32.mxu1 %v33460_v0  ;;  %20674 = vmatpush1.bf16.msk.msra.mxu1 %vm25843_vm2, %v27945_v61 }
 0x546   : > { %20664 = vmatpush1.bf16.msk.msra.mxu0 %vm25843_vm2, %v27257_v62  ;;  %20686 = vmatprep.subr.bf16.mxu1 %v25964_v58 }
 0x547   : > { %19331 = vmatmul.mubr.msk.f32.gmra.mrb[52].mxu0 %vm635_vm3, %v28098_v9  ;;  %20676 = vmatprep.subr.bf16.mxu0 %v25892_v29 }
 0x548   : > { %19341 = vmatmul.mubr.msk.f32.gmra.mrb[52].mxu1 %vm635_vm3, %v28098_v9  ;;  %9108 = vmatprep.mubr.f32.mxu0 %v33460_v0 }
 0x549   : > { %9221 = vmatprep.mubr.f32.mxu1 %v33460_v0 }
 0x54b   : > { %19332 = vmatmul.mubr.msk.f32.gmra.mrb[54].mxu0 %vm635_vm3, %v28114_v19 }
 0x54c   : > { %19342 = vmatmul.mubr.msk.f32.gmra.mrb[54].mxu1 %vm635_vm3, %v28114_v19  ;;  %9114 = vmatprep.mubr.f32.mxu0 %v33460_v0 }
 0x54d   : > { %9227 = vmatprep.mubr.f32.mxu1 %v33460_v0 }
 0x54f   : > { %19333 = vmatmul.mubr.msk.f32.gmra.mrb[56].mxu0 %vm635_vm3, %v28122_v5 }
 0x550   : > { %19343 = vmatmul.mubr.msk.f32.gmra.mrb[56].mxu1 %vm635_vm3, %v28122_v5  ;;  %9120 = vmatprep.mubr.f32.mxu0 %v33460_v0 }
 0x551   : > { %9233 = vmatprep.mubr.f32.mxu1 %v33460_v0 }
 0x553   : > { %19334 = vmatmul.mubr.msk.f32.gmra.mrb[58].mxu0 %vm635_vm3, %v28130_v18 }
 0x554   : > { %19344 = vmatmul.mubr.msk.f32.gmra.mrb[58].mxu1 %vm635_vm3, %v28130_v18  ;;  %9126 = vmatprep.mubr.f32.mxu0 %v33460_v0 }
 0x555   : > { %9239 = vmatprep.mubr.f32.mxu1 %v33460_v0 }
 0x557   : > { %19335 = vmatmul.mubr.msk.f32.gmra.mrb[60].mxu0 %vm635_vm3, %v28138_v63 }
 0x558   : > { %19345 = vmatmul.mubr.msk.f32.gmra.mrb[60].mxu1 %vm635_vm3, %v28138_v63  ;;  %9132 = vmatprep.mubr.f32.mxu0 %v33460_v0 }
 0x559   : > { %9245 = vmatprep.mubr.f32.mxu1 %v33460_v0 }
 0x55b   : > { %19336 = vmatmul.mubr.msk.f32.gmra.mrb[62].mxu0 %vm635_vm3, %v28146_v30 }
 0x55c   : > { %19346 = vmatmul.mubr.msk.f32.gmra.mrb[62].mxu1 %vm635_vm3, %v28146_v30  ;;  %9316 = vmatprep.mubr.f32.mxu0 %v33460_v0 }
 0x55d   : > { %9429 = vmatprep.mubr.f32.mxu1 %v33460_v0 }
 0x55f   : > { %19349 = vmatmul.mubr.msk.f32.vlgmr.msra.gmra.mrb[64].mxu0 %vm635_vm3, %v28074_v37 }
 0x560   : > { %19359 = vmatmul.mubr.msk.f32.vlgmr.msra.gmra.mrb[64].mxu1 %vm635_vm3, %v28074_v37  ;;  %9322 = vmatprep.mubr.f32.mxu0 %v33460_v0  ;;  %v25434_v37 = vmov 0  }
 0x561   : > { %9435 = vmatprep.mubr.f32.mxu1 %v33460_v0  ;;  %20688 = vmatpush1.bf16.msra.mxu1 %v26029_v16 }
 0x562   : > { %20691 = vmatprep.subr.msk.bf16.mxu1 %vm25843_vm2, %v26036_v22  ;;  %20678 = vmatpush1.bf16.msra.mxu0 %v25904_v33  ;;  %v28418_v33 = vld [vmem:[#allocation7 + $0x1c0] sm:$0xff] }
 0x563   : > { %19350 = vmatmul.mubr.msk.f32.gmra.mrb[66].mxu0 %vm635_vm3, %v28082_v50  ;;  %20681 = vmatprep.subr.msk.bf16.mxu0 %vm25843_vm2, %v25912_v38 }
 0x564   : > { %19360 = vmatmul.mubr.msk.f32.gmra.mrb[66].mxu1 %vm635_vm3, %v28082_v50  ;;  %9328 = vmatprep.mubr.f32.mxu0 %v33460_v0  ;;  %v12290_v50 = vld [vmem:[#allocation8] sm:$0xff] }
 0x565   : > { %9441 = vmatprep.mubr.f32.mxu1 %v33460_v0  ;;  %20694 = vmatpush1.bf16.msk.msra.mxu1 %vm25843_vm2, %v26054_v34 }
 0x566   : > { %20684 = vmatpush1.bf16.msk.msra.mxu0 %vm25843_vm2, %v25937_v49  ;;  %20706 = vmatprep.subr.bf16.mxu1 %v26063_v36  ;;  %v28426_v49 = vld [vmem:[#allocation7 + $0x1c8] sm:$0xff] }
 0x567   : > { %19351 = vmatmul.mubr.msk.f32.gmra.mrb[68].mxu0 %vm635_vm3, %v28098_v9  ;;  %20696 = vmatprep.subr.bf16.mxu0 %v25945_v53 }
 0x568   : > { %19361 = vmatmul.mubr.msk.f32.gmra.mrb[68].mxu1 %vm635_vm3, %v28098_v9  ;;  %9334 = vmatprep.mubr.f32.mxu0 %v33460_v0  ;;  %v12292_v9 = vld [vmem:[#allocation8 + $0x10] sm:$0xff] }
 0x569   : > { %9447 = vmatprep.mubr.f32.mxu1 %v33460_v0  ;;  %24276 = vset.pattern.permute.xlu0 %v25434_v37 }
 0x56a   : > { %24277 = vset.pattern.permute.xlu1 %v25434_v37  ;;  %12300 = vperm.xlu0 %24276, %v12290_v50  }
 0x56b   : > { %19352 = vmatmul.mubr.msk.f32.gmra.mrb[70].mxu0 %vm635_vm3, %v28114_v19  ;;  %12310 = vperm.xlu1 %24277, %v12292_v9  }
 0x56c   : > { %19362 = vmatmul.mubr.msk.f32.gmra.mrb[70].mxu1 %vm635_vm3, %v28114_v19  ;;  %9340 = vmatprep.mubr.f32.mxu0 %v33460_v0  ;;  %v12291_v19 = vld [vmem:[#allocation8 + $0x8] sm:$0xff] }
 0x56d   : > { %9453 = vmatprep.mubr.f32.mxu1 %v33460_v0 }
 0x56e   : > { %12305 = vperm.xlu0 %24276, %v12291_v19  }
 0x56f   : > { %19353 = vmatmul.mubr.msk.f32.gmra.mrb[72].mxu0 %vm635_vm3, %v28122_v5 }
 0x570   : > { %19363 = vmatmul.mubr.msk.f32.gmra.mrb[72].mxu1 %vm635_vm3, %v28122_v5  ;;  %9346 = vmatprep.mubr.f32.mxu0 %v33460_v0  ;;  %v12295_v5 = vld [vmem:[#allocation8 + $0x28] sm:$0xff] }
 0x571   : > { %9459 = vmatprep.mubr.f32.mxu1 %v33460_v0 }
 0x573   : > { %19354 = vmatmul.mubr.msk.f32.gmra.mrb[74].mxu0 %vm635_vm3, %v28130_v18 }
 0x574   : > { %19364 = vmatmul.mubr.msk.f32.gmra.mrb[74].mxu1 %vm635_vm3, %v28130_v18  ;;  %9352 = vmatprep.mubr.f32.mxu0 %v33460_v0  ;;  %v12296_v18 = vld [vmem:[#allocation8 + $0x30] sm:$0xff] }
 0x575   : > { %9465 = vmatprep.mubr.f32.mxu1 %v33460_v0 }
 0x577   : > { %19355 = vmatmul.mubr.msk.f32.gmra.mrb[76].mxu0 %vm635_vm3, %v28138_v63 }
 0x578   : > { %19365 = vmatmul.mubr.msk.f32.gmra.mrb[76].mxu1 %vm635_vm3, %v28138_v63  ;;  %9358 = vmatprep.mubr.f32.mxu0 %v33460_v0  ;;  %v12297_v63 = vld [vmem:[#allocation8 + $0x38] sm:$0xff] }
 0x579   : > { %9471 = vmatprep.mubr.f32.mxu1 %v33460_v0 }
 0x57b   : > { %19356 = vmatmul.mubr.msk.f32.gmra.mrb[78].mxu0 %vm635_vm3, %v28146_v30 }
 0x57c   : > { %19366 = vmatmul.mubr.msk.f32.gmra.mrb[78].mxu1 %vm635_vm3, %v28146_v30  ;;  %9738 = vmatprep.mubr.f32.mxu0 %v33460_v0  ;;  %v12662_v30 = vld [vmem:[#allocation11] sm:$0xff] }
 0x57d   : > { %9851 = vmatprep.mubr.f32.mxu1 %v33460_v0 }
 0x57f   : > { %19369 = vmatmul.mubr.msk.f32.vlgmr.msra.gmra.mrb[0].mxu0 %vm635_vm3, %v28418_v33 }
 0x580   : > { %19379 = vmatmul.mubr.msk.f32.vlgmr.msra.gmra.mrb[0].mxu1 %vm635_vm3, %v28418_v33  ;;  %9744 = vmatprep.mubr.f32.mxu0 %v33460_v0 }
 0x581   : > { %9857 = vmatprep.mubr.f32.mxu1 %v33460_v0  ;;  %20708 = vmatpush1.bf16.msra.mxu1 %v26125_v54 }
 0x582   : > { %20711 = vmatprep.subr.msk.bf16.mxu1 %vm25843_vm2, %v26132_v4  ;;  %20698 = vmatpush1.bf16.msra.mxu0 %v26025_v13 }
 0x583   : > { %19370 = vmatmul.mubr.msk.f32.gmra.mrb[2].mxu0 %vm635_vm3, %v28426_v49  ;;  %20701 = vmatprep.subr.msk.bf16.mxu0 %vm25843_vm2, %v26027_v15 }
 0x584   : > { %19380 = vmatmul.mubr.msk.f32.gmra.mrb[2].mxu1 %vm635_vm3, %v28426_v49  ;;  %9750 = vmatprep.mubr.f32.mxu0 %v33460_v0 }
 0x585   : > { %9863 = vmatprep.mubr.f32.mxu1 %v33460_v0  ;;  %20714 = vmatpush1.bf16.msk.msra.mxu1 %vm25843_vm2, %v26150_v20 }
 0x586   : > { %20704 = vmatpush1.bf16.msk.msra.mxu0 %vm25843_vm2, %v26048_v32  ;;  %20726 = vmatprep.subr.bf16.mxu1 %v26159_v24 }
 0x587   : > { %19371 = vmatmul.mubr.msk.f32.gmra.mrb[4].mxu0 %vm635_vm3, %v28442_v46  ;;  %20716 = vmatprep.subr.bf16.mxu0 %v26056_v35 }
 0x588   : > { %19381 = vmatmul.mubr.msk.f32.gmra.mrb[4].mxu1 %vm635_vm3, %v28442_v46  ;;  %9756 = vmatprep.mubr.f32.mxu0 %v33460_v0 }
 0x589   : > { %9869 = vmatprep.mubr.f32.mxu1 %v33460_v0 }
 0x58b   : > { %19372 = vmatmul.mubr.msk.f32.gmra.mrb[6].mxu0 %vm635_vm3, %v28458_v57 }
 0x58c   : > { %19382 = vmatmul.mubr.msk.f32.gmra.mrb[6].mxu1 %vm635_vm3, %v28458_v57  ;;  %9762 = vmatprep.mubr.f32.mxu0 %v33460_v0 }
 0x58d   : > { %9875 = vmatprep.mubr.f32.mxu1 %v33460_v0 }
 0x58f   : > { %19373 = vmatmul.mubr.msk.f32.gmra.mrb[8].mxu0 %vm635_vm3, %v28466_v14 }
 0x590   : > { %19383 = vmatmul.mubr.msk.f32.gmra.mrb[8].mxu1 %vm635_vm3, %v28466_v14  ;;  %9768 = vmatprep.mubr.f32.mxu0 %v33460_v0 }
 0x591   : > { %9881 = vmatprep.mubr.f32.mxu1 %v33460_v0 }
 0x593   : > { %19374 = vmatmul.mubr.msk.f32.gmra.mrb[10].mxu0 %vm635_vm3, %v28474_v25 }
 0x594   : > { %19384 = vmatmul.mubr.msk.f32.gmra.mrb[10].mxu1 %vm635_vm3, %v28474_v25  ;;  %9774 = vmatprep.mubr.f32.mxu0 %v33460_v0 }
 0x595   : > { %9887 = vmatprep.mubr.f32.mxu1 %v33460_v0 }
 0x597   : > { %19375 = vmatmul.mubr.msk.f32.gmra.mrb[12].mxu0 %vm635_vm3, %v28482_v12 }
 0x598   : > { %19385 = vmatmul.mubr.msk.f32.gmra.mrb[12].mxu1 %vm635_vm3, %v28482_v12  ;;  %9780 = vmatprep.mubr.f32.mxu0 %v33460_v0 }
 0x599   : > { %9893 = vmatprep.mubr.f32.mxu1 %v33460_v0 }
 0x59b   : > { %19376 = vmatmul.mubr.msk.f32.gmra.mrb[14].mxu0 %vm635_vm3, %v28490_v26 }
 0x59c   : > { %19386 = vmatmul.mubr.msk.f32.gmra.mrb[14].mxu1 %vm635_vm3, %v28490_v26  ;;  %9964 = vmatprep.mubr.f32.mxu0 %v33460_v0 }
 0x59d   : > { %10077 = vmatprep.mubr.f32.mxu1 %v33460_v0 }
 0x59f   : > { %19389 = vmatmul.mubr.msk.f32.vlgmr.msra.gmra.mrb[16].mxu0 %vm635_vm3, %v28418_v33 }
 0x5a0   : > { %19399 = vmatmul.mubr.msk.f32.vlgmr.msra.gmra.mrb[16].mxu1 %vm635_vm3, %v28418_v33  ;;  %9970 = vmatprep.mubr.f32.mxu0 %v33460_v0 }
 0x5a1   : > { %10083 = vmatprep.mubr.f32.mxu1 %v33460_v0  ;;  %20728 = vmatpush1.bf16.msra.mxu1 %v26221_v47 }
 0x5a2   : > { %20731 = vmatprep.subr.msk.bf16.mxu1 %vm25843_vm2, %v26227_v2  ;;  %20718 = vmatpush1.bf16.msra.mxu0 %v26121_v51 }
 0x5a3   : > { %19390 = vmatmul.mubr.msk.f32.gmra.mrb[18].mxu0 %vm635_vm3, %v28426_v49  ;;  %20721 = vmatprep.subr.msk.bf16.mxu0 %vm25843_vm2, %v26123_v52 }
 0x5a4   : > { %19400 = vmatmul.mubr.msk.f32.gmra.mrb[18].mxu1 %vm635_vm3, %v28426_v49  ;;  %9976 = vmatprep.mubr.f32.mxu0 %v33460_v0 }
 0x5a5   : > { %10089 = vmatprep.mubr.f32.mxu1 %v33460_v0  ;;  %20734 = vmatpush1.bf16.msk.msra.mxu1 %vm25843_vm2, %v26242_v8 }
 0x5a6   : > { %20724 = vmatpush1.bf16.msk.msra.mxu0 %vm25843_vm2, %v26144_v17  ;;  %20746 = vmatprep.subr.bf16.mxu1 %v27200_v59 }
 0x5a7   : > { %19391 = vmatmul.mubr.msk.f32.gmra.mrb[20].mxu0 %vm635_vm3, %v28442_v46  ;;  %20736 = vmatprep.subr.bf16.mxu0 %v26152_v21 }
 0x5a8   : > { %19401 = vmatmul.mubr.msk.f32.gmra.mrb[20].mxu1 %vm635_vm3, %v28442_v46  ;;  %9982 = vmatprep.mubr.f32.mxu0 %v33460_v0 }
 0x5a9   : > { %10095 = vmatprep.mubr.f32.mxu1 %v33460_v0 }
 0x5ab   : > { %19392 = vmatmul.mubr.msk.f32.gmra.mrb[22].mxu0 %vm635_vm3, %v28458_v57 }
 0x5ac   : > { %19402 = vmatmul.mubr.msk.f32.gmra.mrb[22].mxu1 %vm635_vm3, %v28458_v57  ;;  %9988 = vmatprep.mubr.f32.mxu0 %v33460_v0 }
 0x5ad   : > { %10101 = vmatprep.mubr.f32.mxu1 %v33460_v0 }
 0x5af   : > { %19393 = vmatmul.mubr.msk.f32.gmra.mrb[24].mxu0 %vm635_vm3, %v28466_v14 }
 0x5b0   : > { %19403 = vmatmul.mubr.msk.f32.gmra.mrb[24].mxu1 %vm635_vm3, %v28466_v14  ;;  %9994 = vmatprep.mubr.f32.mxu0 %v33460_v0 }
 0x5b1   : > { %10107 = vmatprep.mubr.f32.mxu1 %v33460_v0 }
 0x5b3   : > { %19394 = vmatmul.mubr.msk.f32.gmra.mrb[26].mxu0 %vm635_vm3, %v28474_v25 }
 0x5b4   : > { %19404 = vmatmul.mubr.msk.f32.gmra.mrb[26].mxu1 %vm635_vm3, %v28474_v25  ;;  %10000 = vmatprep.mubr.f32.mxu0 %v33460_v0 }
 0x5b5   : > { %10113 = vmatprep.mubr.f32.mxu1 %v33460_v0 }
 0x5b7   : > { %19395 = vmatmul.mubr.msk.f32.gmra.mrb[28].mxu0 %vm635_vm3, %v28482_v12 }
 0x5b8   : > { %19405 = vmatmul.mubr.msk.f32.gmra.mrb[28].mxu1 %vm635_vm3, %v28482_v12  ;;  %10006 = vmatprep.mubr.f32.mxu0 %v33460_v0 }
 0x5b9   : > { %10119 = vmatprep.mubr.f32.mxu1 %v33460_v0 }
 0x5bb   : > { %19396 = vmatmul.mubr.msk.f32.gmra.mrb[30].mxu0 %vm635_vm3, %v28490_v26 }
 0x5bc   : > { %19406 = vmatmul.mubr.msk.f32.gmra.mrb[30].mxu1 %vm635_vm3, %v28490_v26  ;;  %10190 = vmatprep.mubr.f32.mxu0 %v33460_v0 }
 0x5bd   : > { %10303 = vmatprep.mubr.f32.mxu1 %v33460_v0 }
 0x5bf   : > { %19409 = vmatmul.mubr.msk.f32.vlgmr.msra.gmra.mrb[32].mxu0 %vm635_vm3, %v28418_v33 }
 0x5c0   : > { %19419 = vmatmul.mubr.msk.f32.vlgmr.msra.gmra.mrb[32].mxu1 %vm635_vm3, %v28418_v33  ;;  %10196 = vmatprep.mubr.f32.mxu0 %v33460_v0 }
 0x5c1   : > { %10309 = vmatprep.mubr.f32.mxu1 %v33460_v0  ;;  %20748 = vmatpush1.bf16.msra.mxu1 %v26856_v3 }
 0x5c2   : > { %20751 = vmatprep.subr.msk.bf16.mxu1 %vm25843_vm2, %v27257_v62  ;;  %20738 = vmatpush1.bf16.msra.mxu0 %v26217_v44 }
 0x5c3   : > { %19410 = vmatmul.mubr.msk.f32.gmra.mrb[34].mxu0 %vm635_vm3, %v28426_v49  ;;  %20741 = vmatprep.subr.msk.bf16.mxu0 %vm25843_vm2, %v26219_v45 }
 0x5c4   : > { %19420 = vmatmul.mubr.msk.f32.gmra.mrb[34].mxu1 %vm635_vm3, %v28426_v49  ;;  %10202 = vmatprep.mubr.f32.mxu0 %v33460_v0 }
 0x5c5   : > { %10315 = vmatprep.mubr.f32.mxu1 %v33460_v0  ;;  %20754 = vmatpush1.bf16.msk.msra.mxu1 %vm25843_vm2, %v26913_v11 }
 0x5c6   : > { %20744 = vmatpush1.bf16.msk.msra.mxu0 %vm25843_vm2, %v26236_v7  ;;  %20766 = vmatprep.subr.bf16.mxu1 %v28576_v23 }
 0x5c7   : > { %19411 = vmatmul.mubr.msk.f32.gmra.mrb[36].mxu0 %vm635_vm3, %v28442_v46  ;;  %20756 = vmatprep.subr.bf16.mxu0 %v27888_v43 }
 0x5c8   : > { %19421 = vmatmul.mubr.msk.f32.gmra.mrb[36].mxu1 %vm635_vm3, %v28442_v46  ;;  %10208 = vmatprep.mubr.f32.mxu0 %v33460_v0 }
 0x5c9   : > { %10321 = vmatprep.mubr.f32.mxu1 %v33460_v0 }
 0x5cb   : > { %19412 = vmatmul.mubr.msk.f32.gmra.mrb[38].mxu0 %vm635_vm3, %v28458_v57 }
 0x5cc   : > { %19422 = vmatmul.mubr.msk.f32.gmra.mrb[38].mxu1 %vm635_vm3, %v28458_v57  ;;  %10214 = vmatprep.mubr.f32.mxu0 %v33460_v0 }
 0x5cd   : > { %10327 = vmatprep.mubr.f32.mxu1 %v33460_v0 }
 0x5cf   : > { %19413 = vmatmul.mubr.msk.f32.gmra.mrb[40].mxu0 %vm635_vm3, %v28466_v14 }
 0x5d0   : > { %19423 = vmatmul.mubr.msk.f32.gmra.mrb[40].mxu1 %vm635_vm3, %v28466_v14  ;;  %10220 = vmatprep.mubr.f32.mxu0 %v33460_v0 }
 0x5d1   : > { %10333 = vmatprep.mubr.f32.mxu1 %v33460_v0 }
 0x5d3   : > { %19414 = vmatmul.mubr.msk.f32.gmra.mrb[42].mxu0 %vm635_vm3, %v28474_v25 }
 0x5d4   : > { %19424 = vmatmul.mubr.msk.f32.gmra.mrb[42].mxu1 %vm635_vm3, %v28474_v25  ;;  %10226 = vmatprep.mubr.f32.mxu0 %v33460_v0 }
 0x5d5   : > { %10339 = vmatprep.mubr.f32.mxu1 %v33460_v0 }
 0x5d7   : > { %19415 = vmatmul.mubr.msk.f32.gmra.mrb[44].mxu0 %vm635_vm3, %v28482_v12 }
 0x5d8   : > { %19425 = vmatmul.mubr.msk.f32.gmra.mrb[44].mxu1 %vm635_vm3, %v28482_v12  ;;  %10232 = vmatprep.mubr.f32.mxu0 %v33460_v0 }
 0x5d9   : > { %10345 = vmatprep.mubr.f32.mxu1 %v33460_v0 }
 0x5db   : > { %19416 = vmatmul.mubr.msk.f32.gmra.mrb[46].mxu0 %vm635_vm3, %v28490_v26 }
 0x5dc   : > { %19426 = vmatmul.mubr.msk.f32.gmra.mrb[46].mxu1 %vm635_vm3, %v28490_v26  ;;  %10416 = vmatprep.mubr.f32.mxu0 %v33460_v0 }
 0x5dd   : > { %10529 = vmatprep.mubr.f32.mxu1 %v33460_v0 }
 0x5df   : > { %19429 = vmatmul.mubr.msk.f32.vlgmr.msra.gmra.mrb[48].mxu0 %vm635_vm3, %v28418_v33 }
 0x5e0   : > { %19439 = vmatmul.mubr.msk.f32.vlgmr.msra.gmra.mrb[48].mxu1 %vm635_vm3, %v28418_v33  ;;  %10422 = vmatprep.mubr.f32.mxu0 %v33460_v0 }
 0x5e1   : > { %10535 = vmatprep.mubr.f32.mxu1 %v33460_v0  ;;  %20768 = vmatpush1.bf16.msra.mxu1 %v28232_v41 }
 0x5e2   : > { %20771 = vmatprep.subr.msk.bf16.mxu1 %vm25843_vm2, %v28633_v60  ;;  %20758 = vmatpush1.bf16.msra.mxu0 %v27544_v48 }
 0x5e3   : > { %19430 = vmatmul.mubr.msk.f32.gmra.mrb[50].mxu0 %vm635_vm3, %v28426_v49  ;;  %20761 = vmatprep.subr.msk.bf16.mxu0 %vm25843_vm2, %v27945_v61 }
 0x5e4   : > { %19440 = vmatmul.mubr.msk.f32.gmra.mrb[50].mxu1 %vm635_vm3, %v28426_v49  ;;  %10428 = vmatprep.mubr.f32.mxu0 %v33460_v0 }
 0x5e5   : > { %10541 = vmatprep.mubr.f32.mxu1 %v33460_v0  ;;  %20774 = vmatpush1.bf16.msk.msra.mxu1 %vm25843_vm2, %v28289_v6 }
 0x5e6   : > { %20764 = vmatpush1.bf16.msk.msra.mxu0 %vm25843_vm2, %v27601_v10  ;;  %20786 = vmatprep.subr.bf16.mxu1 %v26025_v13  ;;  %v12293_v13 = vld [vmem:[#allocation8 + $0x18] sm:$0xff] }
 0x5e7   : > { %19431 = vmatmul.mubr.msk.f32.gmra.mrb[52].mxu0 %vm635_vm3, %v28442_v46  ;;  %20776 = vmatprep.subr.bf16.mxu0 %v26029_v16  ;;  %v12294_v16 = vld [vmem:[#allocation8 + $0x20] sm:$0xff] }
 0x5e8   : > { %19441 = vmatmul.mubr.msk.f32.gmra.mrb[52].mxu1 %vm635_vm3, %v28442_v46  ;;  %10434 = vmatprep.mubr.f32.mxu0 %v33460_v0 }
 0x5e9   : > { %10547 = vmatprep.mubr.f32.mxu1 %v33460_v0  ;;  %12315 = vperm.xlu1 %24277, %v12293_v13   ;;  %v29085_v1 = vpop.permute.xlu0 %12300 }
 0x5ea   : > { %12320 = vperm.xlu0 %24276, %v12294_v16  }
 0x5eb   : > { %19432 = vmatmul.mubr.msk.f32.gmra.mrb[54].mxu0 %vm635_vm3, %v28458_v57 }
 0x5ec   : > { %19442 = vmatmul.mubr.msk.f32.gmra.mrb[54].mxu1 %vm635_vm3, %v28458_v57  ;;  %10440 = vmatprep.mubr.f32.mxu0 %v33460_v0 }
 0x5ed   : > { %10553 = vmatprep.mubr.f32.mxu1 %v33460_v0  ;;  %12325 = vperm.xlu1 %24277, %v12295_v5  }
 0x5ee   : > { %12330 = vperm.xlu0 %24276, %v12296_v18  }
 0x5ef   : > { %19433 = vmatmul.mubr.msk.f32.gmra.mrb[56].mxu0 %vm635_vm3, %v28466_v14 }
 0x5f0   : > { %19443 = vmatmul.mubr.msk.f32.gmra.mrb[56].mxu1 %vm635_vm3, %v28466_v14  ;;  %10446 = vmatprep.mubr.f32.mxu0 %v33460_v0 }
 0x5f1   : > { %10559 = vmatprep.mubr.f32.mxu1 %v33460_v0  ;;  %12335 = vperm.xlu1 %24277, %v12297_v63  }
 0x5f2   : > { %12668 = vperm.xlu0 %24276, %v12662_v30  }
 0x5f3   : > { %19434 = vmatmul.mubr.msk.f32.gmra.mrb[58].mxu0 %vm635_vm3, %v28474_v25 }
 0x5f4   : > { %19444 = vmatmul.mubr.msk.f32.gmra.mrb[58].mxu1 %vm635_vm3, %v28474_v25  ;;  %10452 = vmatprep.mubr.f32.mxu0 %v33460_v0 }
 0x5f5   : > { %10565 = vmatprep.mubr.f32.mxu1 %v33460_v0  ;;  %12673 = vperm.xlu1 %24277, %v12663_v39  }
 0x5f6   : > { %12678 = vperm.xlu0 %24276, %v12664_v40  }
 0x5f7   : > { %19435 = vmatmul.mubr.msk.f32.gmra.mrb[60].mxu0 %vm635_vm3, %v28482_v12 }
 0x5f8   : > { %19445 = vmatmul.mubr.msk.f32.gmra.mrb[60].mxu1 %vm635_vm3, %v28482_v12  ;;  %10458 = vmatprep.mubr.f32.mxu0 %v33460_v0 }
 0x5f9   : > { %10571 = vmatprep.mubr.f32.mxu1 %v33460_v0  ;;  %12683 = vperm.xlu1 %24277, %v12665_v42  }
 0x5fb   : > { %19436 = vmatmul.mubr.msk.f32.gmra.mrb[62].mxu0 %vm635_vm3, %v28490_v26 }
 0x5fc   : > { %19446 = vmatmul.mubr.msk.f32.gmra.mrb[62].mxu1 %vm635_vm3, %v28490_v26  ;;  %10642 = vmatprep.mubr.f32.mxu0 %v33460_v0 }
 0x5fd   : > { %10755 = vmatprep.mubr.f32.mxu1 %v33460_v0 }
 0x5ff   : > { %19449 = vmatmul.mubr.msk.f32.vlgmr.msra.gmra.mrb[64].mxu0 %vm635_vm3, %v28418_v33 }
 0x600   : > { %19459 = vmatmul.mubr.msk.f32.vlgmr.msra.gmra.mrb[64].mxu1 %vm635_vm3, %v28418_v33  ;;  %10648 = vmatprep.mubr.f32.mxu0 %v33460_v0 }
 0x601   : > { %10761 = vmatprep.mubr.f32.mxu1 %v33460_v0  ;;  %20788 = vmatpush1.bf16.msra.mxu1 %v25964_v58  ;;  %v28788_v58 = vld [vmem:[#allocation7 + $0x210] sm:$0xff] }
 0x602   : > { %20791 = vmatprep.subr.msk.bf16.mxu1 %vm25843_vm2, %v26048_v32  ;;  %20778 = vmatpush1.bf16.msra.mxu0 %v25892_v29  ;;  %v28764_v29 = vld [vmem:[#allocation7 + $0x200] sm:$0xff]  ;;  %v28828_v32 = vld [vmem:[#allocation7 + $0x230] sm:$0xff] }
 0x603   : > { %19450 = vmatmul.mubr.msk.f32.gmra.mrb[66].mxu0 %vm635_vm3, %v28426_v49  ;;  %20781 = vmatprep.subr.msk.bf16.mxu0 %vm25843_vm2, %v26054_v34  ;;  %v28836_v34 = vld [vmem:[#allocation7 + $0x238] sm:$0xff] }
 0x604   : > { %19460 = vmatmul.mubr.msk.f32.gmra.mrb[66].mxu1 %vm635_vm3, %v28426_v49  ;;  %10654 = vmatprep.mubr.f32.mxu0 %v33460_v0 }
 0x605   : > { %10767 = vmatprep.mubr.f32.mxu1 %v33460_v0  ;;  %20794 = vmatpush1.bf16.msk.msra.mxu1 %vm25843_vm2, %v26036_v22  ;;  %v28820_v22 = vld [vmem:[#allocation7 + $0x228] sm:$0xff] }
 0x606   : > { %20784 = vmatpush1.bf16.msk.msra.mxu0 %vm25843_vm2, %v25912_v38  ;;  %20806 = vmatprep.subr.bf16.mxu1 %v26121_v51  ;;  %v28772_v38 = vld [vmem:[#allocation7 + $0x208] sm:$0xff] }
 0x607   : > { %19451 = vmatmul.mubr.msk.f32.gmra.mrb[68].mxu0 %vm635_vm3, %v28442_v46  ;;  %20796 = vmatprep.subr.bf16.mxu0 %v26125_v54  ;;  %v18666_v54 = vld [vmem:[%s25819_s3 + $0x178] sm:$0x7] }
 0x608   : > { %19461 = vmatmul.mubr.msk.f32.gmra.mrb[68].mxu1 %vm635_vm3, %v28442_v46  ;;  %10660 = vmatprep.mubr.f32.mxu0 %v33460_v0 }
 0x609   : > { %10773 = vmatprep.mubr.f32.mxu1 %v33460_v0 }
 0x60b   : > { %19452 = vmatmul.mubr.msk.f32.gmra.mrb[70].mxu0 %vm635_vm3, %v28458_v57 }
 0x60c   : > { %19462 = vmatmul.mubr.msk.f32.gmra.mrb[70].mxu1 %vm635_vm3, %v28458_v57  ;;  %10666 = vmatprep.mubr.f32.mxu0 %v33460_v0 }
 0x60d   : > { %10779 = vmatprep.mubr.f32.mxu1 %v33460_v0 }
 0x60f   : > { %19453 = vmatmul.mubr.msk.f32.gmra.mrb[72].mxu0 %vm635_vm3, %v28466_v14 }
 0x610   : > { %19463 = vmatmul.mubr.msk.f32.gmra.mrb[72].mxu1 %vm635_vm3, %v28466_v14  ;;  %10672 = vmatprep.mubr.f32.mxu0 %v33460_v0 }
 0x611   : > { %10785 = vmatprep.mubr.f32.mxu1 %v33460_v0 }
 0x613   : > { %19454 = vmatmul.mubr.msk.f32.gmra.mrb[74].mxu0 %vm635_vm3, %v28474_v25 }
 0x614   : > { %19464 = vmatmul.mubr.msk.f32.gmra.mrb[74].mxu1 %vm635_vm3, %v28474_v25  ;;  %10678 = vmatprep.mubr.f32.mxu0 %v33460_v0 }
 0x615   : > { %10791 = vmatprep.mubr.f32.mxu1 %v33460_v0 }
 0x617   : > { %19455 = vmatmul.mubr.msk.f32.gmra.mrb[76].mxu0 %vm635_vm3, %v28482_v12 }
 0x618   : > { %19465 = vmatmul.mubr.msk.f32.gmra.mrb[76].mxu1 %vm635_vm3, %v28482_v12  ;;  %10684 = vmatprep.mubr.f32.mxu0 %v33460_v0 }
 0x619   : > { %10797 = vmatprep.mubr.f32.mxu1 %v33460_v0 }
 0x61b   : > { %19456 = vmatmul.mubr.msk.f32.gmra.mrb[78].mxu0 %vm635_vm3, %v28490_v26 }
 0x61c   : > { %19466 = vmatmul.mubr.msk.f32.gmra.mrb[78].mxu1 %vm635_vm3, %v28490_v26  ;;  %11064 = vmatprep.mubr.f32.mxu0 %v33460_v0 }
 0x61d   : > { %11177 = vmatprep.mubr.f32.mxu1 %v33460_v0 }
 0x61f   : > { %19469 = vmatmul.mubr.msk.f32.vlgmr.msra.gmra.mrb[0].mxu0 %vm635_vm3, %v28764_v29 }
 0x620   : > { %19479 = vmatmul.mubr.msk.f32.vlgmr.msra.gmra.mrb[0].mxu1 %vm635_vm3, %v28764_v29  ;;  %11070 = vmatprep.mubr.f32.mxu0 %v33460_v0 }
 0x621   : > { %11183 = vmatprep.mubr.f32.mxu1 %v33460_v0  ;;  %20798 = vmatpush1.bf16.msra.mxu0 %v25945_v53  ;;  %v28804_v53 = vld [vmem:[#allocation7 + $0x218] sm:$0xff] }
 0x622   : > { %20808 = vmatpush1.bf16.msra.mxu1 %v26063_v36  ;;  %20801 = vmatprep.subr.msk.bf16.mxu0 %vm25843_vm2, %v26150_v20  ;;  %v18664_v36 = vld [vmem:[%s25819_s3 + $0x168] sm:$0xff] }
 0x623   : > { %19470 = vmatmul.mubr.msk.f32.gmra.mrb[2].mxu0 %vm635_vm3, %v28772_v38  ;;  %20811 = vmatprep.subr.msk.bf16.mxu1 %vm25843_vm2, %v26144_v17 }
 0x624   : > { %19480 = vmatmul.mubr.msk.f32.gmra.mrb[2].mxu1 %vm635_vm3, %v28772_v38  ;;  %11076 = vmatprep.mubr.f32.mxu0 %v33460_v0 }
 0x625   : > { %11189 = vmatprep.mubr.f32.mxu1 %v33460_v0  ;;  %20804 = vmatpush1.bf16.msk.msra.mxu0 %vm25843_vm2, %v26027_v15  ;;  %v28812_v15 = vld [vmem:[#allocation7 + $0x220] sm:$0xff] }
 0x626   : > { %20814 = vmatpush1.bf16.msk.msra.mxu1 %vm25843_vm2, %v26132_v4  ;;  %20816 = vmatprep.subr.bf16.mxu0 %v26221_v47 }
 0x627   : > { %19471 = vmatmul.mubr.msk.f32.gmra.mrb[4].mxu0 %vm635_vm3, %v28788_v58  ;;  %20826 = vmatprep.subr.bf16.mxu1 %v26217_v44 }
 0x628   : > { %19481 = vmatmul.mubr.msk.f32.gmra.mrb[4].mxu1 %vm635_vm3, %v28788_v58  ;;  %11082 = vmatprep.mubr.f32.mxu0 %v33460_v0 }
 0x629   : > { %11195 = vmatprep.mubr.f32.mxu1 %v33460_v0 }
 0x62b   : > { %19472 = vmatmul.mubr.msk.f32.gmra.mrb[6].mxu0 %vm635_vm3, %v28804_v53 }
 0x62c   : > { %19482 = vmatmul.mubr.msk.f32.gmra.mrb[6].mxu1 %vm635_vm3, %v28804_v53  ;;  %11088 = vmatprep.mubr.f32.mxu0 %v33460_v0 }
 0x62d   : > { %11201 = vmatprep.mubr.f32.mxu1 %v33460_v0 }
 0x62f   : > { %19473 = vmatmul.mubr.msk.f32.gmra.mrb[8].mxu0 %vm635_vm3, %v28812_v15 }
 0x630   : > { %19483 = vmatmul.mubr.msk.f32.gmra.mrb[8].mxu1 %vm635_vm3, %v28812_v15  ;;  %11094 = vmatprep.mubr.f32.mxu0 %v33460_v0 }
 0x631   : > { %11207 = vmatprep.mubr.f32.mxu1 %v33460_v0 }
 0x633   : > { %19474 = vmatmul.mubr.msk.f32.gmra.mrb[10].mxu0 %vm635_vm3, %v28820_v22 }
 0x634   : > { %19484 = vmatmul.mubr.msk.f32.gmra.mrb[10].mxu1 %vm635_vm3, %v28820_v22  ;;  %11100 = vmatprep.mubr.f32.mxu0 %v33460_v0 }
 0x635   : > { %11213 = vmatprep.mubr.f32.mxu1 %v33460_v0 }
 0x637   : > { %19475 = vmatmul.mubr.msk.f32.gmra.mrb[12].mxu0 %vm635_vm3, %v28828_v32 }
 0x638   : > { %19485 = vmatmul.mubr.msk.f32.gmra.mrb[12].mxu1 %vm635_vm3, %v28828_v32  ;;  %11106 = vmatprep.mubr.f32.mxu0 %v33460_v0 }
 0x639   : > { %11219 = vmatprep.mubr.f32.mxu1 %v33460_v0 }
 0x63b   : > { %19476 = vmatmul.mubr.msk.f32.gmra.mrb[14].mxu0 %vm635_vm3, %v28836_v34 }
 0x63c   : > { %19486 = vmatmul.mubr.msk.f32.gmra.mrb[14].mxu1 %vm635_vm3, %v28836_v34  ;;  %11290 = vmatprep.mubr.f32.mxu0 %v33460_v0 }
 0x63d   : > { %11403 = vmatprep.mubr.f32.mxu1 %v33460_v0 }
 0x63f   : > { %19489 = vmatmul.mubr.msk.f32.vlgmr.msra.gmra.mrb[16].mxu0 %vm635_vm3, %v28764_v29 }
 0x640   : > { %19499 = vmatmul.mubr.msk.f32.vlgmr.msra.gmra.mrb[16].mxu1 %vm635_vm3, %v28764_v29  ;;  %11296 = vmatprep.mubr.f32.mxu0 %v33460_v0 }
 0x641   : > { %11409 = vmatprep.mubr.f32.mxu1 %v33460_v0  ;;  %20818 = vmatpush1.bf16.msra.mxu0 %v26056_v35  ;;  %v18663_v35 = vld [vmem:[%s25819_s3 + $0x160] sm:$0xff] }
 0x642   : > { %20828 = vmatpush1.bf16.msra.mxu1 %v26159_v24  ;;  %20821 = vmatprep.subr.msk.bf16.mxu0 %vm25843_vm2, %v26242_v8  ;;  %v20865_v51 = vpack.c.bf16 %v18664_v36, %v18663_v35 }
 0x643   : > { %19490 = vmatmul.mubr.msk.f32.gmra.mrb[18].mxu0 %vm635_vm3, %v28772_v38  ;;  %20831 = vmatprep.subr.msk.bf16.mxu1 %vm25843_vm2, %v26236_v7 }
 0x644   : > { %19500 = vmatmul.mubr.msk.f32.gmra.mrb[18].mxu1 %vm635_vm3, %v28772_v38  ;;  %11302 = vmatprep.mubr.f32.mxu0 %v33460_v0 }
 0x645   : > { %11415 = vmatprep.mubr.f32.mxu1 %v33460_v0  ;;  %20824 = vmatpush1.bf16.msk.msra.mxu0 %vm25843_vm2, %v26123_v52  ;;  %v18665_v52 = vld [vmem:[%s25819_s3 + $0x170] sm:$0xff]  ;;  %s25324_s3 = scalar_lea.vmem %s25323_s12, 2048 }
 0x646   : > { %20834 = vmatpush1.bf16.msk.msra.mxu1 %vm25843_vm2, %v26227_v2  ;;  %20836 = vmatprep.subr.bf16.mxu0 %v26856_v3  ;;  %v20869_v4 = vpack.c.bf16 %v18666_v54, %v18665_v52  ;;  %p25326_p1 = scmp.lt.s32.totalorder %s25324_s3, %s25318_s21 }
 0x647   : > { %19491 = vmatmul.mubr.msk.f32.gmra.mrb[20].mxu0 %vm635_vm3, %v28788_v58  ;;  %20846 = vmatprep.subr.bf16.mxu1 %v27544_v48 }
 0x648   : > { %19501 = vmatmul.mubr.msk.f32.gmra.mrb[20].mxu1 %vm635_vm3, %v28788_v58  ;;  %11308 = vmatprep.mubr.f32.mxu0 %v33460_v0  ;;  %p25327_p10 = por %p25326_p1, %p25325_p5 }
 0x649   : > { %11421 = vmatprep.mubr.f32.mxu1 %v33460_v0 }
 0x64a   : > { %p25328_p11 = pnand %p25327_p10, %p25321_p7 }
 0x64b   : > { %19492 = vmatmul.mubr.msk.f32.gmra.mrb[22].mxu0 %vm635_vm3, %v28804_v53 }
 0x64c   : > { %19502 = vmatmul.mubr.msk.f32.gmra.mrb[22].mxu1 %vm635_vm3, %v28804_v53  ;;  %11314 = vmatprep.mubr.f32.mxu0 %v33460_v0 }
 0x64d   : > { %11427 = vmatprep.mubr.f32.mxu1 %v33460_v0 }
 0x64f   : > { %19493 = vmatmul.mubr.msk.f32.gmra.mrb[24].mxu0 %vm635_vm3, %v28812_v15 }
 0x650   : > { %19503 = vmatmul.mubr.msk.f32.gmra.mrb[24].mxu1 %vm635_vm3, %v28812_v15  ;;  %11320 = vmatprep.mubr.f32.mxu0 %v33460_v0 }
 0x651   : > { %11433 = vmatprep.mubr.f32.mxu1 %v33460_v0 }
 0x653   : > { %19494 = vmatmul.mubr.msk.f32.gmra.mrb[26].mxu0 %vm635_vm3, %v28820_v22 }
 0x654   : > { %19504 = vmatmul.mubr.msk.f32.gmra.mrb[26].mxu1 %vm635_vm3, %v28820_v22  ;;  %11326 = vmatprep.mubr.f32.mxu0 %v33460_v0 }
 0x655   : > { %11439 = vmatprep.mubr.f32.mxu1 %v33460_v0 }
 0x657   : > { %19495 = vmatmul.mubr.msk.f32.gmra.mrb[28].mxu0 %vm635_vm3, %v28828_v32 }
 0x658   : > { %19505 = vmatmul.mubr.msk.f32.gmra.mrb[28].mxu1 %vm635_vm3, %v28828_v32  ;;  %11332 = vmatprep.mubr.f32.mxu0 %v33460_v0 }
 0x659   : > { %11445 = vmatprep.mubr.f32.mxu1 %v33460_v0 }
 0x65b   : > { %19496 = vmatmul.mubr.msk.f32.gmra.mrb[30].mxu0 %vm635_vm3, %v28836_v34 }
 0x65c   : > { %19506 = vmatmul.mubr.msk.f32.gmra.mrb[30].mxu1 %vm635_vm3, %v28836_v34  ;;  %11516 = vmatprep.mubr.f32.mxu0 %v33460_v0 }
 0x65d   : > { %11629 = vmatprep.mubr.f32.mxu1 %v33460_v0 }
 0x65f   : > { %19509 = vmatmul.mubr.msk.f32.vlgmr.msra.gmra.mrb[32].mxu0 %vm635_vm3, %v28764_v29 }
 0x660   : > { %19519 = vmatmul.mubr.msk.f32.vlgmr.msra.gmra.mrb[32].mxu1 %vm635_vm3, %v28764_v29  ;;  %11522 = vmatprep.mubr.f32.mxu0 %v33460_v0 }
 0x661   : > { %11635 = vmatprep.mubr.f32.mxu1 %v33460_v0  ;;  %20838 = vmatpush1.bf16.msra.mxu0 %v26152_v21 }
 0x662   : > { %20848 = vmatpush1.bf16.msra.mxu1 %v27200_v59  ;;  %20841 = vmatprep.subr.msk.bf16.mxu0 %vm25843_vm2, %v26913_v11 }
 0x663   : > { %19510 = vmatmul.mubr.msk.f32.gmra.mrb[34].mxu0 %vm635_vm3, %v28772_v38  ;;  %20851 = vmatprep.subr.msk.bf16.mxu1 %vm25843_vm2, %v27601_v10 }
 0x664   : > { %19520 = vmatmul.mubr.msk.f32.gmra.mrb[34].mxu1 %vm635_vm3, %v28772_v38  ;;  %11528 = vmatprep.mubr.f32.mxu0 %v33460_v0 }
 0x665   : > { %11641 = vmatprep.mubr.f32.mxu1 %v33460_v0  ;;  %20844 = vmatpush1.bf16.msk.msra.mxu0 %vm25843_vm2, %v26219_v45  ;;  %v29088_v45 = vpop.permute.xlu0 %12305 }
 0x666   : > { %20854 = vmatpush1.bf16.msk.msra.mxu1 %vm25843_vm2, %v27257_v62  ;;  %20856 = vmatprep.subr.bf16.mxu0 %v28232_v41  ;;  %v29094_v62 = vpop.permute.xlu1 %12310 }
 0x667   : > { %19511 = vmatmul.mubr.msk.f32.gmra.mrb[36].mxu0 %vm635_vm3, %v28788_v58  ;;  %20866 = vmatprep.subr.bf16.mxu1 %v20865_v51 }
 0x668   : > { %19521 = vmatmul.mubr.msk.f32.gmra.mrb[36].mxu1 %vm635_vm3, %v28788_v58  ;;  %11534 = vmatprep.mubr.f32.mxu0 %v33460_v0 }
 0x669   : > { %11647 = vmatprep.mubr.f32.mxu1 %v33460_v0  ;;  %v29109_v54 = vpop.permute.xlu0 %12320 }
 0x66a   : > { %v29100_v50 = vpop.permute.xlu1 %12315 }
 0x66b   : > { %19512 = vmatmul.mubr.msk.f32.gmra.mrb[38].mxu0 %vm635_vm3, %v28804_v53 }
 0x66c   : > { %19522 = vmatmul.mubr.msk.f32.gmra.mrb[38].mxu1 %vm635_vm3, %v28804_v53  ;;  %11540 = vmatprep.mubr.f32.mxu0 %v33460_v0 }
 0x66d   : > { %11653 = vmatprep.mubr.f32.mxu1 %v33460_v0 }
 0x66f   : > { %19513 = vmatmul.mubr.msk.f32.gmra.mrb[40].mxu0 %vm635_vm3, %v28812_v15 }
 0x670   : > { %19523 = vmatmul.mubr.msk.f32.gmra.mrb[40].mxu1 %vm635_vm3, %v28812_v15  ;;  %11546 = vmatprep.mubr.f32.mxu0 %v33460_v0 }
 0x671   : > { %11659 = vmatprep.mubr.f32.mxu1 %v33460_v0 }
 0x673   : > { %19514 = vmatmul.mubr.msk.f32.gmra.mrb[42].mxu0 %vm635_vm3, %v28820_v22 }
 0x674   : > { %19524 = vmatmul.mubr.msk.f32.gmra.mrb[42].mxu1 %vm635_vm3, %v28820_v22  ;;  %11552 = vmatprep.mubr.f32.mxu0 %v33460_v0 }
 0x675   : > { %11665 = vmatprep.mubr.f32.mxu1 %v33460_v0 }
 0x677   : > { %19515 = vmatmul.mubr.msk.f32.gmra.mrb[44].mxu0 %vm635_vm3, %v28828_v32 }
 0x678   : > { %19525 = vmatmul.mubr.msk.f32.gmra.mrb[44].mxu1 %vm635_vm3, %v28828_v32  ;;  %11558 = vmatprep.mubr.f32.mxu0 %v33460_v0 }
 0x679   : > { %11671 = vmatprep.mubr.f32.mxu1 %v33460_v0 }
 0x67b   : > { %19516 = vmatmul.mubr.msk.f32.gmra.mrb[46].mxu0 %vm635_vm3, %v28836_v34 }
 0x67c   : > { %19526 = vmatmul.mubr.msk.f32.gmra.mrb[46].mxu1 %vm635_vm3, %v28836_v34  ;;  %11742 = vmatprep.mubr.f32.mxu0 %v33460_v0 }
 0x67d   : > { %11855 = vmatprep.mubr.f32.mxu1 %v33460_v0 }
 0x67f   : > { %19529 = vmatmul.mubr.msk.f32.vlgmr.msra.gmra.mrb[48].mxu0 %vm635_vm3, %v28764_v29 }
 0x680   : > { %19539 = vmatmul.mubr.msk.f32.vlgmr.msra.gmra.mrb[48].mxu1 %vm635_vm3, %v28764_v29  ;;  %11748 = vmatprep.mubr.f32.mxu0 %v33460_v0 }
 0x681   : > { %11861 = vmatprep.mubr.f32.mxu1 %v33460_v0  ;;  %20858 = vmatpush1.bf16.msra.mxu0 %v27888_v43 }
 0x682   : > { %20868 = vmatpush1.bf16.msra.mxu1 %v28576_v23  ;;  %20861 = vmatprep.subr.msk.bf16.mxu0 %vm25843_vm2, %v28289_v6 }
 0x683   : > { %19530 = vmatmul.mubr.msk.f32.gmra.mrb[50].mxu0 %vm635_vm3, %v28772_v38  ;;  %20871 = vmatprep.subr.msk.bf16.mxu1 %vm25843_vm2, %v20869_v4 }
 0x684   : > { %19540 = vmatmul.mubr.msk.f32.gmra.mrb[50].mxu1 %vm635_vm3, %v28772_v38  ;;  %11754 = vmatprep.mubr.f32.mxu0 %v33460_v0 }
 0x685   : > { %11867 = vmatprep.mubr.f32.mxu1 %v33460_v0  ;;  %20864 = vmatpush1.bf16.msk.msra.mxu0 %vm25843_vm2, %v27945_v61 }
 0x686   : > { %20874 = vmatpush1.bf16.msk.msra.mxu1 %vm25843_vm2, %v28633_v60 }
 0x687   : > { %19531 = vmatmul.mubr.msk.f32.gmra.mrb[52].mxu0 %vm635_vm3, %v28788_v58 }
 0x688   : > { %19541 = vmatmul.mubr.msk.f32.gmra.mrb[52].mxu1 %vm635_vm3, %v28788_v58  ;;  %11760 = vmatprep.mubr.f32.mxu0 %v33460_v0 }
 0x689   : > { %11873 = vmatprep.mubr.f32.mxu1 %v33460_v0 }
 0x68b   : > { %19532 = vmatmul.mubr.msk.f32.gmra.mrb[54].mxu0 %vm635_vm3, %v28804_v53 }
 0x68c   : > { %19542 = vmatmul.mubr.msk.f32.gmra.mrb[54].mxu1 %vm635_vm3, %v28804_v53  ;;  %11766 = vmatprep.mubr.f32.mxu0 %v33460_v0 }
 0x68d   : > { %11879 = vmatprep.mubr.f32.mxu1 %v33460_v0 }
 0x68f   : > { %19533 = vmatmul.mubr.msk.f32.gmra.mrb[56].mxu0 %vm635_vm3, %v28812_v15 }
 0x690   : > { %19543 = vmatmul.mubr.msk.f32.gmra.mrb[56].mxu1 %vm635_vm3, %v28812_v15  ;;  %11772 = vmatprep.mubr.f32.mxu0 %v33460_v0 }
 0x691   : > { %11885 = vmatprep.mubr.f32.mxu1 %v33460_v0 }
 0x693   : > { %19534 = vmatmul.mubr.msk.f32.gmra.mrb[58].mxu0 %vm635_vm3, %v28820_v22 }
 0x694   : > { %19544 = vmatmul.mubr.msk.f32.gmra.mrb[58].mxu1 %vm635_vm3, %v28820_v22  ;;  %11778 = vmatprep.mubr.f32.mxu0 %v33460_v0 }
 0x695   : > { %11891 = vmatprep.mubr.f32.mxu1 %v33460_v0 }
 0x697   : > { %19535 = vmatmul.mubr.msk.f32.gmra.mrb[60].mxu0 %vm635_vm3, %v28828_v32 }
 0x698   : > { %19545 = vmatmul.mubr.msk.f32.gmra.mrb[60].mxu1 %vm635_vm3, %v28828_v32  ;;  %11784 = vmatprep.mubr.f32.mxu0 %v33460_v0 }
 0x699   : > { %11897 = vmatprep.mubr.f32.mxu1 %v33460_v0 }
 0x69b   : > { %19536 = vmatmul.mubr.msk.f32.gmra.mrb[62].mxu0 %vm635_vm3, %v28836_v34 }
 0x69c   : > { %19546 = vmatmul.mubr.msk.f32.gmra.mrb[62].mxu1 %vm635_vm3, %v28836_v34  ;;  %11968 = vmatprep.mubr.f32.mxu0 %v33460_v0 }
 0x69d   : > { %12081 = vmatprep.mubr.f32.mxu1 %v33460_v0 }
 0x69f   : > { %19549 = vmatmul.mubr.msk.f32.vlgmr.msra.gmra.mrb[64].mxu0 %vm635_vm3, %v28764_v29 }
 0x6a0   : > { %19559 = vmatmul.mubr.msk.f32.vlgmr.msra.gmra.mrb[64].mxu1 %vm635_vm3, %v28764_v29  ;;  %11974 = vmatprep.mubr.f32.mxu0 %v33460_v0 }
 0x6a1   : > { %12087 = vmatprep.mubr.f32.mxu1 %v33460_v0 }
 0x6a3   : > { %19550 = vmatmul.mubr.msk.f32.gmra.mrb[66].mxu0 %vm635_vm3, %v28772_v38 }
 0x6a4   : > { %19560 = vmatmul.mubr.msk.f32.gmra.mrb[66].mxu1 %vm635_vm3, %v28772_v38  ;;  %11980 = vmatprep.mubr.f32.mxu0 %v33460_v0 }
 0x6a5   : > { %12093 = vmatprep.mubr.f32.mxu1 %v33460_v0 }
 0x6a7   : > { %19551 = vmatmul.mubr.msk.f32.gmra.mrb[68].mxu0 %vm635_vm3, %v28788_v58 }
 0x6a8   : > { %19561 = vmatmul.mubr.msk.f32.gmra.mrb[68].mxu1 %vm635_vm3, %v28788_v58  ;;  %11986 = vmatprep.mubr.f32.mxu0 %v33460_v0 }
 0x6a9   : > { %12099 = vmatprep.mubr.f32.mxu1 %v33460_v0 }
 0x6ab   : > { %19552 = vmatmul.mubr.msk.f32.gmra.mrb[70].mxu0 %vm635_vm3, %v28804_v53 }
 0x6ac   : > { %19562 = vmatmul.mubr.msk.f32.gmra.mrb[70].mxu1 %vm635_vm3, %v28804_v53  ;;  %11992 = vmatprep.mubr.f32.mxu0 %v33460_v0 }
 0x6ad   : > { %12105 = vmatprep.mubr.f32.mxu1 %v33460_v0 }
 0x6af   : > { %19553 = vmatmul.mubr.msk.f32.gmra.mrb[72].mxu0 %vm635_vm3, %v28812_v15 }
 0x6b0   : > { %19563 = vmatmul.mubr.msk.f32.gmra.mrb[72].mxu1 %vm635_vm3, %v28812_v15  ;;  %11998 = vmatprep.mubr.f32.mxu0 %v33460_v0 }
 0x6b1   : > { %12111 = vmatprep.mubr.f32.mxu1 %v33460_v0 }
 0x6b3   : > { %19554 = vmatmul.mubr.msk.f32.gmra.mrb[74].mxu0 %vm635_vm3, %v28820_v22 }
 0x6b4   : > { %19564 = vmatmul.mubr.msk.f32.gmra.mrb[74].mxu1 %vm635_vm3, %v28820_v22  ;;  %12004 = vmatprep.mubr.f32.mxu0 %v33460_v0 }
 0x6b5   : > { %12117 = vmatprep.mubr.f32.mxu1 %v33460_v0 }
 0x6b7   : > { %19555 = vmatmul.mubr.msk.f32.gmra.mrb[76].mxu0 %vm635_vm3, %v28828_v32 }
 0x6b8   : > { %19565 = vmatmul.mubr.msk.f32.gmra.mrb[76].mxu1 %vm635_vm3, %v28828_v32  ;;  %12010 = vmatprep.mubr.f32.mxu0 %v33460_v0 }
 0x6b9   : > { %12123 = vmatprep.mubr.f32.mxu1 %v33460_v0 }
 0x6bb   : > { %19556 = vmatmul.mubr.msk.f32.gmra.mrb[78].mxu0 %vm635_vm3, %v28836_v34 }
 0x6bc   : > { %19566 = vmatmul.mubr.msk.f32.gmra.mrb[78].mxu1 %vm635_vm3, %v28836_v34  ;;  %12763 = vmatprep.mubr.f32.mxu0 %v33460_v0 }
 0x6bd   : > { %12852 = vmatprep.mubr.f32.mxu1 %v33460_v0 }
 0x6f2   : > { %v11066_v17 = vpop.f32.mrb[0].mxu0 }
 0x6f3   : > { %v11179_v20 = vpop.f32.mrb[0].mxu1  ;;  %v11068_v21 = vpop.f32.mrb[1].mxu0  ;;  %v12338_v44 = vadd.f32 %v29085_v1, %v11066_v17 }
 0x6f4   : > { %v11181_v24 = vpop.f32.mrb[1].mxu1  ;;  %v12340_v47 = vadd.f32 %v29085_v1, %v11179_v20  ;;  %v12339_v2 = vadd.f32 %v29085_v1, %v11068_v21 }
 0x6f5   : > { %v12341_v8 = vadd.f32 %v29085_v1, %v11181_v24  ;;  %v12498_v61 = vmax.f32 %v12338_v44, 0.0  ;;  %v29112_v44 = vpop.permute.xlu1 %12325 }
 0x6f6   : > { %v11072_v7 = vpop.f32.mrb[2].mxu0  ;;  %v12500_v6 = vmax.f32 %v12340_v47, 0.0  ;;  %v12499_v33 = vmax.f32 %v12339_v2, 0.0 }
 0x6f7   : > { %v12358_v3 = vadd.f32 %v29088_v45, %v11072_v7  ;;  %v11185_v11 = vpop.f32.mrb[2].mxu1  ;;  %v11074_v59 = vpop.f32.mrb[3].mxu0  ;;  %v12501_v14 = vmax.f32 %v12341_v8, 0.0 }
 0x6f8   : > { %v12360_v48 = vadd.f32 %v29088_v45, %v11185_v11  ;;  %v12359_v10 = vadd.f32 %v29088_v45, %v11074_v59  ;;  %v11187_v43 = vpop.f32.mrb[3].mxu1 }
 0x6f9   : > { %v12518_v41 = vmax.f32 %v12358_v3, 0.0  ;;  %v12361_v55 = vadd.f32 %v29088_v45, %v11187_v43 }
 0x6fa   : > { %v12520_v49 = vmax.f32 %v12360_v48, 0.0  ;;  %v12519_v46 = vmax.f32 %v12359_v10, 0.0  ;;  %v11078_v57 = vpop.f32.mrb[4].mxu0 }
 0x6fb   : > { %v20877_v25 = vpack.c.bf16 %v12518_v41, %v12498_v61  ;;  %v12521_v12 = vmax.f32 %v12361_v55, 0.0  ;;  %v11191_v26 = vpop.f32.mrb[4].mxu1  ;;  %v11080_v27 = vpop.f32.mrb[5].mxu0  ;;  %v12378_v60 = vadd.f32 %v29094_v62, %v11078_v57 }
 0x6fc   : > { %v20893_v28 = vpack.c.bf16 %v12520_v49, %v12500_v6  ;;  %v20875_v23 = vpack.c.bf16 %v12519_v46, %v12499_v33  ;;  %v11193_v31 = vpop.f32.mrb[5].mxu1  ;;  %v12380_v9 = vadd.f32 %v29094_v62, %v11191_v26  ;;  %v12379_v19 = vadd.f32 %v29094_v62, %v11080_v27 }
 0x6fd   : > { %v20891_v56 = vpack.c.bf16 %v12521_v12, %v12501_v14  ;;  %v12381_v16 = vadd.f32 %v29094_v62, %v11193_v31  ;;  %v12538_v42 = vmax.f32 %v12378_v60, 0.0 }
 0x6fe   : > { %v11084_v13 = vpop.f32.mrb[6].mxu0  ;;  %20876 = vmatprep.subr.bf16.mxu0 %v20875_v23  ;;  %v12540_v58 = vmax.f32 %v12380_v9, 0.0  ;;  %v12539_v53 = vmax.f32 %v12379_v19, 0.0  ;;  %v29124_v19 = vpop.permute.xlu1 %12335 }
 0x6ff   : > { %v12398_v5 = vadd.f32 %v29100_v50, %v11084_v13  ;;  %v11197_v18 = vpop.f32.mrb[6].mxu1  ;;  %20892 = vmatprep.subr.bf16.mxu1 %v20891_v56  ;;  %v11086_v63 = vpop.f32.mrb[7].mxu0  ;;  %20878 = vmatpush1.bf16.msra.mxu0 %v20877_v25  ;;  %v12541_v34 = vmax.f32 %v12381_v16, 0.0 }
 0x700   : > { %v12400_v30 = vadd.f32 %v29100_v50, %v11197_v18  ;;  %v12399_v39 = vadd.f32 %v29100_v50, %v11086_v63  ;;  %v11199_v40 = vpop.f32.mrb[7].mxu1  ;;  %20894 = vmatpush1.bf16.msra.mxu1 %v20893_v28  ;;  %v29121_v28 = vpop.permute.xlu0 %12330 }
 0x701   : > { %v12558_v29 = vmax.f32 %v12398_v5, 0.0  ;;  %v12401_v38 = vadd.f32 %v29100_v50, %v11199_v40 }
 0x702   : > { %v12560_v15 = vmax.f32 %v12400_v30, 0.0  ;;  %v12559_v22 = vmax.f32 %v12399_v39, 0.0  ;;  %v11090_v32 = vpop.f32.mrb[8].mxu0 }
 0x703   : > { %v20881_v35 = vpack.c.bf16 %v12558_v29, %v12538_v42  ;;  %v12561_v36 = vmax.f32 %v12401_v38, 0.0  ;;  %v11203_v51 = vpop.f32.mrb[8].mxu1  ;;  %v11092_v52 = vpop.f32.mrb[9].mxu0  ;;  %v12418_v24 = vadd.f32 %v29109_v54, %v11090_v32 }
 0x704   : > { %v20897_v4 = vpack.c.bf16 %v12560_v15, %v12540_v58  ;;  %v20879_v17 = vpack.c.bf16 %v12559_v22, %v12539_v53  ;;  %v11205_v20 = vpop.f32.mrb[9].mxu1  ;;  %v12420_v47 = vadd.f32 %v29109_v54, %v11203_v51  ;;  %v12419_v2 = vadd.f32 %v29109_v54, %v11092_v52 }
 0x705   : > { %v20895_v21 = vpack.c.bf16 %v12561_v36, %v12541_v34  ;;  %v12421_v8 = vadd.f32 %v29109_v54, %v11205_v20  ;;  %v12578_v61 = vmax.f32 %v12418_v24, 0.0 }
 0x706   : > { %v11096_v7 = vpop.f32.mrb[10].mxu0  ;;  %20880 = vmatprep.subr.bf16.mxu0 %v20879_v17  ;;  %v12580_v6 = vmax.f32 %v12420_v47, 0.0  ;;  %v12579_v33 = vmax.f32 %v12419_v2, 0.0 }
 0x707   : > { %v12438_v3 = vadd.f32 %v29112_v44, %v11096_v7  ;;  %v11209_v11 = vpop.f32.mrb[10].mxu1  ;;  %20896 = vmatprep.subr.bf16.mxu1 %v20895_v21  ;;  %v11098_v59 = vpop.f32.mrb[11].mxu0  ;;  %20882 = vmatpush1.bf16.msra.mxu0 %v20881_v35  ;;  %v12581_v14 = vmax.f32 %v12421_v8, 0.0 }
 0x708   : > { %v12440_v48 = vadd.f32 %v29112_v44, %v11209_v11  ;;  %v12439_v10 = vadd.f32 %v29112_v44, %v11098_v59  ;;  %v11211_v43 = vpop.f32.mrb[11].mxu1  ;;  %20898 = vmatpush1.bf16.msra.mxu1 %v20897_v4 }
 0x709   : > { %v12598_v41 = vmax.f32 %v12438_v3, 0.0  ;;  %v12441_v55 = vadd.f32 %v29112_v44, %v11211_v43  ;;  %v29138_v43 = vld [vmem:[#allocation10] sm:$0xff] }
 0x70a   : > { %v12600_v49 = vmax.f32 %v12440_v48, 0.0  ;;  %v12599_v46 = vmax.f32 %v12439_v10, 0.0  ;;  %v11102_v57 = vpop.f32.mrb[12].mxu0 }
 0x70b   : > { %v20885_v25 = vpack.c.bf16 %v12598_v41, %v12578_v61  ;;  %v12601_v12 = vmax.f32 %v12441_v55, 0.0  ;;  %v11215_v26 = vpop.f32.mrb[12].mxu1  ;;  %v11104_v27 = vpop.f32.mrb[13].mxu0  ;;  %v12458_v9 = vadd.f32 %v29121_v28, %v11102_v57 }
 0x70c   : > { %v20901_v23 = vpack.c.bf16 %v12600_v49, %v12580_v6  ;;  %v20883_v31 = vpack.c.bf16 %v12599_v46, %v12579_v33  ;;  %v11217_v56 = vpop.f32.mrb[13].mxu1  ;;  %v12460_v13 = vadd.f32 %v29121_v28, %v11215_v26  ;;  %v12459_v16 = vadd.f32 %v29121_v28, %v11104_v27 }
 0x70d   : > { %v20899_v60 = vpack.c.bf16 %v12601_v12, %v12581_v14  ;;  %v12461_v18 = vadd.f32 %v29121_v28, %v11217_v56  ;;  %v12618_v38 = vmax.f32 %v12458_v9, 0.0 }
 0x70e   : > { %v11108_v5 = vpop.f32.mrb[14].mxu0  ;;  %20884 = vmatprep.subr.bf16.mxu0 %v20883_v31  ;;  %v12620_v15 = vmax.f32 %v12460_v13, 0.0  ;;  %v12619_v22 = vmax.f32 %v12459_v16, 0.0 }
 0x70f   : > { %v12478_v63 = vadd.f32 %v29124_v19, %v11108_v5  ;;  %v11221_v30 = vpop.f32.mrb[14].mxu1  ;;  %20900 = vmatprep.subr.bf16.mxu1 %v20899_v60  ;;  %v11110_v39 = vpop.f32.mrb[15].mxu0  ;;  %20886 = vmatpush1.bf16.msra.mxu0 %v20885_v25  ;;  %v12621_v36 = vmax.f32 %v12461_v18, 0.0  ;;  %v29148_v60 = vld [vmem:[#allocation10 + $0x8] sm:$0xff] }
 0x710   : > { %v12480_v40 = vadd.f32 %v29124_v19, %v11221_v30  ;;  %v12479_v42 = vadd.f32 %v29124_v19, %v11110_v39  ;;  %v11223_v29 = vpop.f32.mrb[15].mxu1  ;;  %20902 = vmatpush1.bf16.msra.mxu1 %v20901_v23 }
 0x711   : > { %v12638_v58 = vmax.f32 %v12478_v63, 0.0  ;;  %v12481_v53 = vadd.f32 %v29124_v19, %v11223_v29 }
 0x712   : > { %v12640_v32 = vmax.f32 %v12480_v40, 0.0  ;;  %v12639_v34 = vmax.f32 %v12479_v42, 0.0  ;;  %v11292_v35 = vpop.f32.mrb[16].mxu0 }
 0x713   : > { %v20889_v51 = vpack.c.bf16 %v12638_v58, %v12618_v38  ;;  %v12641_v52 = vmax.f32 %v12481_v53, 0.0  ;;  %v11405_v4 = vpop.f32.mrb[16].mxu1  ;;  %v11294_v17 = vpop.f32.mrb[17].mxu0  ;;  %v12342_v2 = vadd.f32 %v29085_v1, %v11292_v35  ;;  %v29160_v58 = vld [vmem:[#allocation10 + $0x10] sm:$0xff] }
 0x714   : > { %v20905_v20 = vpack.c.bf16 %v12640_v32, %v12620_v15  ;;  %v20887_v21 = vpack.c.bf16 %v12639_v34, %v12619_v22  ;;  %v11407_v24 = vpop.f32.mrb[17].mxu1  ;;  %v12344_v7 = vadd.f32 %v29085_v1, %v11405_v4  ;;  %v12343_v8 = vadd.f32 %v29085_v1, %v11294_v17 }
 0x715   : > { %v20903_v47 = vpack.c.bf16 %v12641_v52, %v12621_v36  ;;  %v12345_v11 = vadd.f32 %v29085_v1, %v11407_v24  ;;  %v12502_v6 = vmax.f32 %v12342_v2, 0.0 }
 0x716   : > { %v11298_v3 = vpop.f32.mrb[18].mxu0  ;;  %20888 = vmatprep.subr.bf16.mxu0 %v20887_v21  ;;  %v12504_v46 = vmax.f32 %v12344_v7, 0.0  ;;  %v12503_v57 = vmax.f32 %v12343_v8, 0.0  ;;  %v29172_v7 = vld [vmem:[#allocation10 + $0x18] sm:$0xff] }
 0x717   : > { %v12362_v59 = vadd.f32 %v29088_v45, %v11298_v3  ;;  %v11411_v48 = vpop.f32.mrb[18].mxu1  ;;  %20904 = vmatprep.subr.bf16.mxu1 %v20903_v47  ;;  %v11300_v10 = vpop.f32.mrb[19].mxu0  ;;  %20890 = vmatpush1.bf16.msra.mxu0 %v20889_v51  ;;  %v12505_v26 = vmax.f32 %v12345_v11, 0.0 }
 0x718   : > { %v12364_v61 = vadd.f32 %v29088_v45, %v11411_v48  ;;  %v12363_v41 = vadd.f32 %v29088_v45, %v11300_v10  ;;  %v11413_v55 = vpop.f32.mrb[19].mxu1  ;;  %20906 = vmatpush1.bf16.msra.mxu1 %v20905_v20 }
 0x719   : > { %v12522_v33 = vmax.f32 %v12362_v59, 0.0  ;;  %v12365_v49 = vadd.f32 %v29088_v45, %v11413_v55 }
 0x71a   : > { %v12524_v14 = vmax.f32 %v12364_v61, 0.0  ;;  %v12523_v25 = vmax.f32 %v12363_v41, 0.0  ;;  %v11304_v12 = vpop.f32.mrb[20].mxu0  ;;  %19567 = vmatmul.mubr.msk.f32.vlgmr.msra.gmra.mrb[80].mxu0 %vm12686_vm4, %v29138_v43 }
 0x71b   : > { %v20909_v27 = vpack.c.bf16 %v12522_v33, %v12502_v6  ;;  %v12525_v23 = vmax.f32 %v12365_v49, 0.0  ;;  %v11417_v31 = vpop.f32.mrb[20].mxu1  ;;  %19571 = vmatmul.mubr.msk.f32.vlgmr.msra.gmra.mrb[80].mxu1 %vm12686_vm4, %v29138_v43  ;;  %v11306_v56 = vpop.f32.mrb[21].mxu0  ;;  %12769 = vmatprep.mubr.f32.mxu0 %v33460_v0  ;;  %v12382_v18 = vadd.f32 %v29094_v62, %v11304_v12 }
 0x71c   : > { %v20925_v9 = vpack.c.bf16 %v12524_v14, %v12504_v46  ;;  %v20907_v13 = vpack.c.bf16 %v12523_v25, %v12503_v57  ;;  %v11419_v16 = vpop.f32.mrb[21].mxu1  ;;  %12858 = vmatprep.mubr.f32.mxu1 %v33460_v0  ;;  %v12384_v63 = vadd.f32 %v29094_v62, %v11417_v31  ;;  %v12383_v30 = vadd.f32 %v29094_v62, %v11306_v56 }
 0x71d   : > { %v20923_v5 = vpack.c.bf16 %v12525_v23, %v12505_v26  ;;  %v12385_v40 = vadd.f32 %v29094_v62, %v11419_v16  ;;  %v12542_v32 = vmax.f32 %v12382_v18, 0.0 }
 0x71e   : > { %v11310_v39 = vpop.f32.mrb[22].mxu0  ;;  %19568 = vmatmul.mubr.msk.f32.gmra.mrb[82].mxu0 %vm12686_vm4, %v29148_v60  ;;  %20908 = vmatprep.subr.bf16.mxu0 %v20907_v13  ;;  %v12544_v36 = vmax.f32 %v12384_v63, 0.0  ;;  %v12543_v51 = vmax.f32 %v12383_v30, 0.0 }
 0x71f   : > { %v12402_v42 = vadd.f32 %v29100_v50, %v11310_v39  ;;  %v11423_v29 = vpop.f32.mrb[22].mxu1  ;;  %19572 = vmatmul.mubr.msk.f32.gmra.mrb[82].mxu1 %vm12686_vm4, %v29148_v60  ;;  %20924 = vmatprep.subr.bf16.mxu1 %v20923_v5  ;;  %v11312_v38 = vpop.f32.mrb[23].mxu0  ;;  %v12545_v20 = vmax.f32 %v12385_v40, 0.0 }
 0x720   : > { %v12404_v53 = vadd.f32 %v29100_v50, %v11423_v29  ;;  %v12403_v15 = vadd.f32 %v29100_v50, %v11312_v38  ;;  %v11425_v22 = vpop.f32.mrb[23].mxu1  ;;  %20910 = vmatpush1.bf16.msra.mxu0 %v20909_v27  ;;  %20926 = vmatpush1.bf16.msra.mxu1 %v20925_v9 }
 0x721   : > { %v12562_v34 = vmax.f32 %v12402_v42, 0.0  ;;  %v12405_v35 = vadd.f32 %v29100_v50, %v11425_v22  ;;  %12775 = vmatprep.mubr.f32.mxu0 %v33460_v0  ;;  %12864 = vmatprep.mubr.f32.mxu1 %v33460_v0 }
 0x722   : > { %v12564_v52 = vmax.f32 %v12404_v53, 0.0  ;;  %v12563_v4 = vmax.f32 %v12403_v15, 0.0  ;;  %v11316_v17 = vpop.f32.mrb[24].mxu0  ;;  %19569 = vmatmul.mubr.msk.f32.gmra.mrb[84].mxu0 %vm12686_vm4, %v29160_v58 }
 0x723   : > { %v20913_v21 = vpack.c.bf16 %v12562_v34, %v12542_v32  ;;  %v12565_v24 = vmax.f32 %v12405_v35, 0.0  ;;  %v11429_v47 = vpop.f32.mrb[24].mxu1  ;;  %19573 = vmatmul.mubr.msk.f32.gmra.mrb[84].mxu1 %vm12686_vm4, %v29160_v58  ;;  %v11318_v2 = vpop.f32.mrb[25].mxu0  ;;  %12781 = vmatprep.mubr.f32.mxu0 %v33460_v0  ;;  %v12422_v48 = vadd.f32 %v29109_v54, %v11316_v17 }
 0x724   : > { %v20929_v8 = vpack.c.bf16 %v12564_v52, %v12544_v36  ;;  %v20911_v3 = vpack.c.bf16 %v12563_v4, %v12543_v51  ;;  %v11431_v11 = vpop.f32.mrb[25].mxu1  ;;  %12870 = vmatprep.mubr.f32.mxu1 %v33460_v0  ;;  %v12424_v10 = vadd.f32 %v29109_v54, %v11429_v47  ;;  %v12423_v61 = vadd.f32 %v29109_v54, %v11318_v2 }
 0x725   : > { %v20927_v59 = vpack.c.bf16 %v12565_v24, %v12545_v20  ;;  %v12425_v55 = vadd.f32 %v29109_v54, %v11431_v11  ;;  %v12582_v25 = vmax.f32 %v12422_v48, 0.0 }
 0x726   : > { %v11322_v41 = vpop.f32.mrb[26].mxu0  ;;  %19570 = vmatmul.mubr.msk.f32.gmra.mrb[86].mxu0 %vm12686_vm4, %v29172_v7  ;;  %20912 = vmatprep.subr.bf16.mxu0 %v20911_v3  ;;  %v12584_v27 = vmax.f32 %v12424_v10, 0.0  ;;  %v12583_v23 = vmax.f32 %v12423_v61, 0.0 }
 0x727   : > { %v12442_v6 = vadd.f32 %v29112_v44, %v11322_v41  ;;  %v11435_v33 = vpop.f32.mrb[26].mxu1  ;;  %19574 = vmatmul.mubr.msk.f32.gmra.mrb[86].mxu1 %vm12686_vm4, %v29172_v7  ;;  %20928 = vmatprep.subr.bf16.mxu1 %v20927_v59  ;;  %v11324_v49 = vpop.f32.mrb[27].mxu0  ;;  %v12585_v13 = vmax.f32 %v12425_v55, 0.0 }
 0x728   : > { %v12444_v46 = vadd.f32 %v29112_v44, %v11435_v33  ;;  %v12443_v57 = vadd.f32 %v29112_v44, %v11324_v49  ;;  %v11437_v14 = vpop.f32.mrb[27].mxu1  ;;  %20914 = vmatpush1.bf16.msra.mxu0 %v20913_v21  ;;  %20930 = vmatpush1.bf16.msra.mxu1 %v20929_v8 }
 0x729   : > { %v12602_v12 = vmax.f32 %v12442_v6, 0.0  ;;  %v12445_v26 = vadd.f32 %v29112_v44, %v11437_v14  ;;  %12941 = vmatprep.mubr.f32.mxu0 %v33460_v0  ;;  %13030 = vmatprep.mubr.f32.mxu1 %v33460_v0 }
 0x72a   : > { %v12604_v31 = vmax.f32 %v12444_v46, 0.0  ;;  %v12603_v56 = vmax.f32 %v12443_v57, 0.0  ;;  %v11328_v9 = vpop.f32.mrb[28].mxu0 }
 0x72b   : > { %v20917_v16 = vpack.c.bf16 %v12602_v12, %v12582_v25  ;;  %v12605_v5 = vmax.f32 %v12445_v26, 0.0  ;;  %v11441_v18 = vpop.f32.mrb[28].mxu1  ;;  %v11330_v63 = vpop.f32.mrb[29].mxu0  ;;  %v12462_v29 = vadd.f32 %v29121_v28, %v11328_v9 }
 0x72c   : > { %v20933_v30 = vpack.c.bf16 %v12604_v31, %v12584_v27  ;;  %v20915_v39 = vpack.c.bf16 %v12603_v56, %v12583_v23  ;;  %v11443_v40 = vpop.f32.mrb[29].mxu1  ;;  %v12464_v38 = vadd.f32 %v29121_v28, %v11441_v18  ;;  %v12463_v53 = vadd.f32 %v29121_v28, %v11330_v63 }
 0x72d   : > { %v20931_v42 = vpack.c.bf16 %v12605_v5, %v12585_v13  ;;  %v12465_v22 = vadd.f32 %v29121_v28, %v11443_v40  ;;  %v12622_v4 = vmax.f32 %v12462_v29, 0.0 }
 0x72e   : > { %v11334_v15 = vpop.f32.mrb[30].mxu0  ;;  %20916 = vmatprep.subr.bf16.mxu0 %v20915_v39  ;;  %v12624_v21 = vmax.f32 %v12464_v38, 0.0  ;;  %v12623_v24 = vmax.f32 %v12463_v53, 0.0 }
 0x72f   : > { %v12482_v32 = vadd.f32 %v29124_v19, %v11334_v15  ;;  %v11447_v34 = vpop.f32.mrb[30].mxu1  ;;  %20932 = vmatprep.subr.bf16.mxu1 %v20931_v42  ;;  %v11336_v35 = vpop.f32.mrb[31].mxu0  ;;  %20918 = vmatpush1.bf16.msra.mxu0 %v20917_v16  ;;  %v12625_v3 = vmax.f32 %v12465_v22, 0.0 }
 0x730   : > { %v12484_v36 = vadd.f32 %v29124_v19, %v11447_v34  ;;  %v12483_v51 = vadd.f32 %v29124_v19, %v11336_v35  ;;  %v11449_v52 = vpop.f32.mrb[31].mxu1  ;;  %20934 = vmatpush1.bf16.msra.mxu1 %v20933_v30 }
 0x731   : > { %v12642_v17 = vmax.f32 %v12482_v32, 0.0  ;;  %v12485_v20 = vadd.f32 %v29124_v19, %v11449_v52 }
 0x732   : > { %v12644_v47 = vmax.f32 %v12484_v36, 0.0  ;;  %v12643_v2 = vmax.f32 %v12483_v51, 0.0  ;;  %v11518_v8 = vpop.f32.mrb[32].mxu0 }
 0x733   : > { %v20921_v11 = vpack.c.bf16 %v12642_v17, %v12622_v4  ;;  %v12645_v59 = vmax.f32 %v12485_v20, 0.0  ;;  %v11631_v48 = vpop.f32.mrb[32].mxu1  ;;  %v11520_v10 = vpop.f32.mrb[33].mxu0  ;;  %v12346_v33 = vadd.f32 %v29085_v1, %v11518_v8 }
 0x734   : > { %v20937_v61 = vpack.c.bf16 %v12644_v47, %v12624_v21  ;;  %v20919_v41 = vpack.c.bf16 %v12643_v2, %v12623_v24  ;;  %v11633_v55 = vpop.f32.mrb[33].mxu1  ;;  %v12348_v49 = vadd.f32 %v29085_v1, %v11631_v48  ;;  %v12347_v46 = vadd.f32 %v29085_v1, %v11520_v10 }
 0x735   : > { %v20935_v6 = vpack.c.bf16 %v12645_v59, %v12625_v3  ;;  %v12349_v14 = vadd.f32 %v29085_v1, %v11633_v55  ;;  %v12506_v56 = vmax.f32 %v12346_v33, 0.0 }
 0x736   : > { %v11524_v57 = vpop.f32.mrb[34].mxu0  ;;  %20920 = vmatprep.subr.bf16.mxu0 %v20919_v41  ;;  %v12508_v16 = vmax.f32 %v12348_v49, 0.0  ;;  %v12507_v5 = vmax.f32 %v12347_v46, 0.0 }
 0x737   : > { %v12366_v25 = vadd.f32 %v29088_v45, %v11524_v57  ;;  %v11637_v12 = vpop.f32.mrb[34].mxu1  ;;  %20936 = vmatprep.subr.bf16.mxu1 %v20935_v6  ;;  %v11526_v26 = vpop.f32.mrb[35].mxu0  ;;  %20922 = vmatpush1.bf16.msra.mxu0 %v20921_v11  ;;  %v12509_v39 = vmax.f32 %v12349_v14, 0.0 }
 0x738   : > { %v12368_v27 = vadd.f32 %v29088_v45, %v11637_v12  ;;  %v12367_v23 = vadd.f32 %v29088_v45, %v11526_v26  ;;  %v11639_v31 = vpop.f32.mrb[35].mxu1  ;;  %20938 = vmatpush1.bf16.msra.mxu1 %v20937_v61 }
 0x739   : > { %v12526_v9 = vmax.f32 %v12366_v25, 0.0  ;;  %v12369_v13 = vadd.f32 %v29088_v45, %v11639_v31 }
 0x73a   : > { %v12528_v18 = vmax.f32 %v12368_v27, 0.0  ;;  %v12527_v63 = vmax.f32 %v12367_v23, 0.0  ;;  %v11530_v30 = vpop.f32.mrb[36].mxu0  ;;  %19575 = vmatmul.mubr.msk.f32.vlgmr.msra.gmra.mrb[88].mxu0 %vm12686_vm4, %v29138_v43 }
 0x73b   : > { %v20941_v40 = vpack.c.bf16 %v12526_v9, %v12506_v56  ;;  %v12529_v42 = vmax.f32 %v12369_v13, 0.0  ;;  %v11643_v29 = vpop.f32.mrb[36].mxu1  ;;  %19579 = vmatmul.mubr.msk.f32.vlgmr.msra.gmra.mrb[88].mxu1 %vm12686_vm4, %v29138_v43  ;;  %v11532_v38 = vpop.f32.mrb[37].mxu0  ;;  %12947 = vmatprep.mubr.f32.mxu0 %v33460_v0  ;;  %v12386_v34 = vadd.f32 %v29094_v62, %v11530_v30 }
 0x73c   : > { %v20957_v53 = vpack.c.bf16 %v12528_v18, %v12508_v16  ;;  %v20939_v15 = vpack.c.bf16 %v12527_v63, %v12507_v5  ;;  %v11645_v22 = vpop.f32.mrb[37].mxu1  ;;  %13036 = vmatprep.mubr.f32.mxu1 %v33460_v0  ;;  %v12388_v35 = vadd.f32 %v29094_v62, %v11643_v29  ;;  %v12387_v36 = vadd.f32 %v29094_v62, %v11532_v38 }
 0x73d   : > { %v20955_v32 = vpack.c.bf16 %v12529_v42, %v12509_v39  ;;  %v12389_v52 = vadd.f32 %v29094_v62, %v11645_v22  ;;  %v12546_v2 = vmax.f32 %v12386_v34, 0.0 }
 0x73e   : > { %v11536_v51 = vpop.f32.mrb[38].mxu0  ;;  %19576 = vmatmul.mubr.msk.f32.gmra.mrb[90].mxu0 %vm12686_vm4, %v29148_v60  ;;  %20940 = vmatprep.subr.bf16.mxu0 %v20939_v15  ;;  %v12548_v11 = vmax.f32 %v12388_v35, 0.0  ;;  %v12547_v59 = vmax.f32 %v12387_v36, 0.0 }
 0x73f   : > { %v12406_v4 = vadd.f32 %v29100_v50, %v11536_v51  ;;  %v11649_v17 = vpop.f32.mrb[38].mxu1  ;;  %19580 = vmatmul.mubr.msk.f32.gmra.mrb[90].mxu1 %vm12686_vm4, %v29148_v60  ;;  %20956 = vmatprep.subr.bf16.mxu1 %v20955_v32  ;;  %v11538_v20 = vpop.f32.mrb[39].mxu0  ;;  %v12549_v41 = vmax.f32 %v12389_v52, 0.0 }
 0x740   : > { %v12408_v21 = vadd.f32 %v29100_v50, %v11649_v17  ;;  %v12407_v24 = vadd.f32 %v29100_v50, %v11538_v20  ;;  %v11651_v47 = vpop.f32.mrb[39].mxu1  ;;  %20942 = vmatpush1.bf16.msra.mxu0 %v20941_v40  ;;  %20958 = vmatpush1.bf16.msra.mxu1 %v20957_v53 }
 0x741   : > { %v12566_v8 = vmax.f32 %v12406_v4, 0.0  ;;  %v12409_v3 = vadd.f32 %v29100_v50, %v11651_v47  ;;  %12953 = vmatprep.mubr.f32.mxu0 %v33460_v0  ;;  %13042 = vmatprep.mubr.f32.mxu1 %v33460_v0 }
 0x742   : > { %v12568_v48 = vmax.f32 %v12408_v21, 0.0  ;;  %v12567_v10 = vmax.f32 %v12407_v24, 0.0  ;;  %v11542_v61 = vpop.f32.mrb[40].mxu0  ;;  %19577 = vmatmul.mubr.msk.f32.gmra.mrb[92].mxu0 %vm12686_vm4, %v29160_v58 }
 0x743   : > { %v20945_v55 = vpack.c.bf16 %v12566_v8, %v12546_v2  ;;  %v12569_v6 = vmax.f32 %v12409_v3, 0.0  ;;  %v11655_v33 = vpop.f32.mrb[40].mxu1  ;;  %19581 = vmatmul.mubr.msk.f32.gmra.mrb[92].mxu1 %vm12686_vm4, %v29160_v58  ;;  %v11544_v49 = vpop.f32.mrb[41].mxu0  ;;  %12959 = vmatprep.mubr.f32.mxu0 %v33460_v0  ;;  %v12426_v12 = vadd.f32 %v29109_v54, %v11542_v61 }
 0x744   : > { %v20961_v46 = vpack.c.bf16 %v12568_v48, %v12548_v11  ;;  %v20943_v57 = vpack.c.bf16 %v12567_v10, %v12547_v59  ;;  %v11657_v14 = vpop.f32.mrb[41].mxu1  ;;  %13048 = vmatprep.mubr.f32.mxu1 %v33460_v0  ;;  %v12428_v26 = vadd.f32 %v29109_v54, %v11655_v33  ;;  %v12427_v27 = vadd.f32 %v29109_v54, %v11544_v49 }
 0x745   : > { %v20959_v25 = vpack.c.bf16 %v12569_v6, %v12549_v41  ;;  %v12429_v31 = vadd.f32 %v29109_v54, %v11657_v14  ;;  %v12586_v63 = vmax.f32 %v12426_v12, 0.0 }
 0x746   : > { %v11548_v23 = vpop.f32.mrb[42].mxu0  ;;  %19578 = vmatmul.mubr.msk.f32.gmra.mrb[94].mxu0 %vm12686_vm4, %v29172_v7  ;;  %20944 = vmatprep.subr.bf16.mxu0 %v20943_v57  ;;  %v12588_v40 = vmax.f32 %v12428_v26, 0.0  ;;  %v12587_v42 = vmax.f32 %v12427_v27, 0.0 }
 0x747   : > { %v12446_v56 = vadd.f32 %v29112_v44, %v11548_v23  ;;  %v11661_v9 = vpop.f32.mrb[42].mxu1  ;;  %19582 = vmatmul.mubr.msk.f32.gmra.mrb[94].mxu1 %vm12686_vm4, %v29172_v7  ;;  %20960 = vmatprep.subr.bf16.mxu1 %v20959_v25  ;;  %v11550_v13 = vpop.f32.mrb[43].mxu0  ;;  %v12589_v15 = vmax.f32 %v12429_v31, 0.0 }
 0x748   : > { %v12448_v16 = vadd.f32 %v29112_v44, %v11661_v9  ;;  %v12447_v5 = vadd.f32 %v29112_v44, %v11550_v13  ;;  %v11663_v18 = vpop.f32.mrb[43].mxu1  ;;  %20946 = vmatpush1.bf16.msra.mxu0 %v20945_v55  ;;  %20962 = vmatpush1.bf16.msra.mxu1 %v20961_v46 }
 0x749   : > { %v12606_v30 = vmax.f32 %v12446_v56, 0.0  ;;  %v12449_v39 = vadd.f32 %v29112_v44, %v11663_v18  ;;  %13119 = vmatprep.mubr.f32.mxu0 %v33460_v0  ;;  %13208 = vmatprep.mubr.f32.mxu1 %v33460_v0 }
 0x74a   : > { %v12608_v29 = vmax.f32 %v12448_v16, 0.0  ;;  %v12607_v38 = vmax.f32 %v12447_v5, 0.0  ;;  %v11554_v53 = vpop.f32.mrb[44].mxu0 }
 0x74b   : > { %v20949_v22 = vpack.c.bf16 %v12606_v30, %v12586_v63  ;;  %v12609_v32 = vmax.f32 %v12449_v39, 0.0  ;;  %v11667_v34 = vpop.f32.mrb[44].mxu1  ;;  %v11556_v35 = vpop.f32.mrb[45].mxu0  ;;  %v12466_v17 = vadd.f32 %v29121_v28, %v11554_v53 }
 0x74c   : > { %v20965_v36 = vpack.c.bf16 %v12608_v29, %v12588_v40  ;;  %v20947_v51 = vpack.c.bf16 %v12607_v38, %v12587_v42  ;;  %v11669_v52 = vpop.f32.mrb[45].mxu1  ;;  %v12468_v20 = vadd.f32 %v29121_v28, %v11667_v34  ;;  %v12467_v21 = vadd.f32 %v29121_v28, %v11556_v35 }
 0x74d   : > { %v20963_v4 = vpack.c.bf16 %v12609_v32, %v12589_v15  ;;  %v12469_v47 = vadd.f32 %v29121_v28, %v11669_v52  ;;  %v12626_v10 = vmax.f32 %v12466_v17, 0.0 }
 0x74e   : > { %v11560_v24 = vpop.f32.mrb[46].mxu0  ;;  %20948 = vmatprep.subr.bf16.mxu0 %v20947_v51  ;;  %v12628_v55 = vmax.f32 %v12468_v20, 0.0  ;;  %v12627_v6 = vmax.f32 %v12467_v21, 0.0 }
 0x74f   : > { %v12486_v2 = vadd.f32 %v29124_v19, %v11560_v24  ;;  %v11673_v8 = vpop.f32.mrb[46].mxu1  ;;  %20964 = vmatprep.subr.bf16.mxu1 %v20963_v4  ;;  %v11562_v3 = vpop.f32.mrb[47].mxu0  ;;  %20950 = vmatpush1.bf16.msra.mxu0 %v20949_v22  ;;  %v12629_v57 = vmax.f32 %v12469_v47, 0.0 }
 0x750   : > { %v12488_v11 = vadd.f32 %v29124_v19, %v11673_v8  ;;  %v12487_v59 = vadd.f32 %v29124_v19, %v11562_v3  ;;  %v11675_v48 = vpop.f32.mrb[47].mxu1  ;;  %20966 = vmatpush1.bf16.msra.mxu1 %v20965_v36 }
 0x751   : > { %v12646_v61 = vmax.f32 %v12486_v2, 0.0  ;;  %v12489_v41 = vadd.f32 %v29124_v19, %v11675_v48 }
 0x752   : > { %v12648_v33 = vmax.f32 %v12488_v11, 0.0  ;;  %v12647_v49 = vmax.f32 %v12487_v59, 0.0  ;;  %v11744_v46 = vpop.f32.mrb[48].mxu0 }
 0x753   : > { %v20953_v14 = vpack.c.bf16 %v12646_v61, %v12626_v10  ;;  %v12649_v25 = vmax.f32 %v12489_v41, 0.0  ;;  %v11857_v12 = vpop.f32.mrb[48].mxu1  ;;  %v11746_v26 = vpop.f32.mrb[49].mxu0  ;;  %v12350_v9 = vadd.f32 %v29085_v1, %v11744_v46 }
 0x754   : > { %v20969_v27 = vpack.c.bf16 %v12648_v33, %v12628_v55  ;;  %v20951_v23 = vpack.c.bf16 %v12647_v49, %v12627_v6  ;;  %v11859_v31 = vpop.f32.mrb[49].mxu1  ;;  %v12352_v13 = vadd.f32 %v29085_v1, %v11857_v12  ;;  %v12351_v16 = vadd.f32 %v29085_v1, %v11746_v26 }
 0x755   : > { %v20967_v56 = vpack.c.bf16 %v12649_v25, %v12629_v57  ;;  %v12353_v18 = vadd.f32 %v29085_v1, %v11859_v31  ;;  %v12510_v38 = vmax.f32 %v12350_v9, 0.0 }
 0x756   : > { %v11750_v5 = vpop.f32.mrb[50].mxu0  ;;  %20952 = vmatprep.subr.bf16.mxu0 %v20951_v23  ;;  %v12512_v22 = vmax.f32 %v12352_v13, 0.0  ;;  %v12511_v32 = vmax.f32 %v12351_v16, 0.0 }
 0x757   : > { %v12370_v63 = vadd.f32 %v29088_v45, %v11750_v5  ;;  %v11863_v30 = vpop.f32.mrb[50].mxu1  ;;  %20968 = vmatprep.subr.bf16.mxu1 %v20967_v56  ;;  %v11752_v39 = vpop.f32.mrb[51].mxu0  ;;  %20954 = vmatpush1.bf16.msra.mxu0 %v20953_v14  ;;  %v12513_v51 = vmax.f32 %v12353_v18, 0.0 }
 0x758   : > { %v12372_v40 = vadd.f32 %v29088_v45, %v11863_v30  ;;  %v12371_v42 = vadd.f32 %v29088_v45, %v11752_v39  ;;  %v11865_v29 = vpop.f32.mrb[51].mxu1  ;;  %20970 = vmatpush1.bf16.msra.mxu1 %v20969_v27 }
 0x759   : > { %v12530_v53 = vmax.f32 %v12370_v63, 0.0  ;;  %v12373_v15 = vadd.f32 %v29088_v45, %v11865_v29 }
 0x75a   : > { %v12532_v34 = vmax.f32 %v12372_v40, 0.0  ;;  %v12531_v35 = vmax.f32 %v12371_v42, 0.0  ;;  %v11756_v36 = vpop.f32.mrb[52].mxu0  ;;  %19583 = vmatmul.mubr.msk.f32.vlgmr.msra.gmra.mrb[96].mxu0 %vm12686_vm4, %v29138_v43 }
 0x75b   : > { %v20973_v52 = vpack.c.bf16 %v12530_v53, %v12510_v38  ;;  %v12533_v4 = vmax.f32 %v12373_v15, 0.0  ;;  %v11869_v17 = vpop.f32.mrb[52].mxu1  ;;  %19587 = vmatmul.mubr.msk.f32.vlgmr.msra.gmra.mrb[96].mxu1 %vm12686_vm4, %v29138_v43  ;;  %v11758_v20 = vpop.f32.mrb[53].mxu0  ;;  %13125 = vmatprep.mubr.f32.mxu0 %v33460_v0  ;;  %v12390_v8 = vadd.f32 %v29094_v62, %v11756_v36 }
 0x75c   : > { %v20989_v21 = vpack.c.bf16 %v12532_v34, %v12512_v22  ;;  %v20971_v24 = vpack.c.bf16 %v12531_v35, %v12511_v32  ;;  %v11871_v47 = vpop.f32.mrb[53].mxu1  ;;  %13214 = vmatprep.mubr.f32.mxu1 %v33460_v0  ;;  %v12392_v3 = vadd.f32 %v29094_v62, %v11869_v17  ;;  %v12391_v11 = vadd.f32 %v29094_v62, %v11758_v20 }
 0x75d   : > { %v20987_v2 = vpack.c.bf16 %v12533_v4, %v12513_v51  ;;  %v12393_v48 = vadd.f32 %v29094_v62, %v11871_v47  ;;  %v12550_v49 = vmax.f32 %v12390_v8, 0.0 }
 0x75e   : > { %v11762_v59 = vpop.f32.mrb[54].mxu0  ;;  %19584 = vmatmul.mubr.msk.f32.gmra.mrb[98].mxu0 %vm12686_vm4, %v29148_v60  ;;  %20972 = vmatprep.subr.bf16.mxu0 %v20971_v24  ;;  %v12552_v14 = vmax.f32 %v12392_v3, 0.0  ;;  %v12551_v25 = vmax.f32 %v12391_v11, 0.0 }
 0x75f   : > { %v12410_v10 = vadd.f32 %v29100_v50, %v11762_v59  ;;  %v11875_v61 = vpop.f32.mrb[54].mxu1  ;;  %19588 = vmatmul.mubr.msk.f32.gmra.mrb[98].mxu1 %vm12686_vm4, %v29148_v60  ;;  %20988 = vmatprep.subr.bf16.mxu1 %v20987_v2  ;;  %v11764_v41 = vpop.f32.mrb[55].mxu0  ;;  %v12553_v23 = vmax.f32 %v12393_v48, 0.0 }
 0x760   : > { %v12412_v55 = vadd.f32 %v29100_v50, %v11875_v61  ;;  %v12411_v6 = vadd.f32 %v29100_v50, %v11764_v41  ;;  %v11877_v33 = vpop.f32.mrb[55].mxu1  ;;  %20974 = vmatpush1.bf16.msra.mxu0 %v20973_v52  ;;  %20990 = vmatpush1.bf16.msra.mxu1 %v20989_v21 }
 0x761   : > { %v12570_v46 = vmax.f32 %v12410_v10, 0.0  ;;  %v12413_v57 = vadd.f32 %v29100_v50, %v11877_v33  ;;  %13131 = vmatprep.mubr.f32.mxu0 %v33460_v0  ;;  %13220 = vmatprep.mubr.f32.mxu1 %v33460_v0 }
 0x762   : > { %v12572_v12 = vmax.f32 %v12412_v55, 0.0  ;;  %v12571_v26 = vmax.f32 %v12411_v6, 0.0  ;;  %v11768_v27 = vpop.f32.mrb[56].mxu0  ;;  %19585 = vmatmul.mubr.msk.f32.gmra.mrb[100].mxu0 %vm12686_vm4, %v29160_v58 }
 0x763   : > { %v20977_v31 = vpack.c.bf16 %v12570_v46, %v12550_v49  ;;  %v12573_v56 = vmax.f32 %v12413_v57, 0.0  ;;  %v11881_v9 = vpop.f32.mrb[56].mxu1  ;;  %19589 = vmatmul.mubr.msk.f32.gmra.mrb[100].mxu1 %vm12686_vm4, %v29160_v58  ;;  %v11770_v13 = vpop.f32.mrb[57].mxu0  ;;  %13137 = vmatprep.mubr.f32.mxu0 %v33460_v0  ;;  %v12430_v30 = vadd.f32 %v29109_v54, %v11768_v27 }
 0x764   : > { %v20993_v16 = vpack.c.bf16 %v12572_v12, %v12552_v14  ;;  %v20975_v5 = vpack.c.bf16 %v12571_v26, %v12551_v25  ;;  %v11883_v18 = vpop.f32.mrb[57].mxu1  ;;  %13226 = vmatprep.mubr.f32.mxu1 %v33460_v0  ;;  %v12432_v39 = vadd.f32 %v29109_v54, %v11881_v9  ;;  %v12431_v40 = vadd.f32 %v29109_v54, %v11770_v13 }
 0x765   : > { %v20991_v63 = vpack.c.bf16 %v12573_v56, %v12553_v23  ;;  %v12433_v29 = vadd.f32 %v29109_v54, %v11883_v18  ;;  %v12590_v35 = vmax.f32 %v12430_v30, 0.0 }
 0x766   : > { %v11774_v42 = vpop.f32.mrb[58].mxu0  ;;  %19586 = vmatmul.mubr.msk.f32.gmra.mrb[102].mxu0 %vm12686_vm4, %v29172_v7  ;;  %20976 = vmatprep.subr.bf16.mxu0 %v20975_v5  ;;  %v12592_v52 = vmax.f32 %v12432_v39, 0.0  ;;  %v12591_v4 = vmax.f32 %v12431_v40, 0.0 }
 0x767   : > { %v12450_v38 = vadd.f32 %v29112_v44, %v11774_v42  ;;  %v11887_v53 = vpop.f32.mrb[58].mxu1  ;;  %19590 = vmatmul.mubr.msk.f32.gmra.mrb[102].mxu1 %vm12686_vm4, %v29172_v7  ;;  %20992 = vmatprep.subr.bf16.mxu1 %v20991_v63  ;;  %v11776_v15 = vpop.f32.mrb[59].mxu0  ;;  %v12593_v24 = vmax.f32 %v12433_v29, 0.0 }
 0x768   : > { %v12452_v22 = vadd.f32 %v29112_v44, %v11887_v53  ;;  %v12451_v32 = vadd.f32 %v29112_v44, %v11776_v15  ;;  %v11889_v34 = vpop.f32.mrb[59].mxu1  ;;  %20978 = vmatpush1.bf16.msra.mxu0 %v20977_v31  ;;  %20994 = vmatpush1.bf16.msra.mxu1 %v20993_v16 }
 0x769   : > { %v12610_v36 = vmax.f32 %v12450_v38, 0.0  ;;  %v12453_v51 = vadd.f32 %v29112_v44, %v11889_v34  ;;  %13297 = vmatprep.mubr.f32.mxu0 %v33460_v0  ;;  %13386 = vmatprep.mubr.f32.mxu1 %v33460_v0 }
 0x76a   : > { %v12612_v17 = vmax.f32 %v12452_v22, 0.0  ;;  %v12611_v20 = vmax.f32 %v12451_v32, 0.0  ;;  %v11780_v21 = vpop.f32.mrb[60].mxu0 }
 0x76b   : > { %v20981_v47 = vpack.c.bf16 %v12610_v36, %v12590_v35  ;;  %v12613_v2 = vmax.f32 %v12453_v51, 0.0  ;;  %v11893_v8 = vpop.f32.mrb[60].mxu1  ;;  %v11782_v3 = vpop.f32.mrb[61].mxu0  ;;  %v12470_v61 = vadd.f32 %v29121_v28, %v11780_v21 }
 0x76c   : > { %v20997_v11 = vpack.c.bf16 %v12612_v17, %v12592_v52  ;;  %v20979_v59 = vpack.c.bf16 %v12611_v20, %v12591_v4  ;;  %v11895_v48 = vpop.f32.mrb[61].mxu1  ;;  %v12472_v41 = vadd.f32 %v29121_v28, %v11893_v8  ;;  %v12471_v55 = vadd.f32 %v29121_v28, %v11782_v3 }
 0x76d   : > { %v20995_v10 = vpack.c.bf16 %v12613_v2, %v12593_v24  ;;  %v12473_v33 = vadd.f32 %v29121_v28, %v11895_v48  ;;  %v12630_v26 = vmax.f32 %v12470_v61, 0.0 }
 0x76e   : > { %v11786_v6 = vpop.f32.mrb[62].mxu0  ;;  %20980 = vmatprep.subr.bf16.mxu0 %v20979_v59  ;;  %v12632_v31 = vmax.f32 %v12472_v41, 0.0  ;;  %v12631_v56 = vmax.f32 %v12471_v55, 0.0 }
 0x76f   : > { %v12490_v49 = vadd.f32 %v29124_v19, %v11786_v6  ;;  %v11899_v46 = vpop.f32.mrb[62].mxu1  ;;  %20996 = vmatprep.subr.bf16.mxu1 %v20995_v10  ;;  %v11788_v57 = vpop.f32.mrb[63].mxu0  ;;  %20982 = vmatpush1.bf16.msra.mxu0 %v20981_v47  ;;  %v12633_v5 = vmax.f32 %v12473_v33, 0.0 }
 0x770   : > { %v12492_v14 = vadd.f32 %v29124_v19, %v11899_v46  ;;  %v12491_v25 = vadd.f32 %v29124_v19, %v11788_v57  ;;  %v11901_v12 = vpop.f32.mrb[63].mxu1  ;;  %20998 = vmatpush1.bf16.msra.mxu1 %v20997_v11 }
 0x771   : > { %v12650_v27 = vmax.f32 %v12490_v49, 0.0  ;;  %v12493_v23 = vadd.f32 %v29124_v19, %v11901_v12 }
 0x772   : > { %v12652_v9 = vmax.f32 %v12492_v14, 0.0  ;;  %v12651_v13 = vmax.f32 %v12491_v25, 0.0  ;;  %v11970_v16 = vpop.f32.mrb[64].mxu0 }
 0x773   : > { %v20985_v18 = vpack.c.bf16 %v12650_v27, %v12630_v26  ;;  %v12653_v63 = vmax.f32 %v12493_v23, 0.0  ;;  %v12083_v30 = vpop.f32.mrb[64].mxu1  ;;  %v11972_v39 = vpop.f32.mrb[65].mxu0  ;;  %v12354_v53 = vadd.f32 %v29085_v1, %v11970_v16 }
 0x774   : > { %v21001_v40 = vpack.c.bf16 %v12652_v9, %v12632_v31  ;;  %v20983_v42 = vpack.c.bf16 %v12651_v13, %v12631_v56  ;;  %v12085_v29 = vpop.f32.mrb[65].mxu1  ;;  %v12356_v15 = vadd.f32 %v29085_v1, %v12083_v30  ;;  %v12355_v22 = vadd.f32 %v29085_v1, %v11972_v39 }
 0x775   : > { %v20999_v38 = vpack.c.bf16 %v12653_v63, %v12633_v5  ;;  %v12357_v34 = vadd.f32 %v29085_v1, %v12085_v29  ;;  %v12514_v20 = vmax.f32 %v12354_v53, 0.0 }
 0x776   : > { %v11976_v32 = vpop.f32.mrb[66].mxu0  ;;  %20984 = vmatprep.subr.bf16.mxu0 %v20983_v42  ;;  %v12516_v47 = vmax.f32 %v12356_v15, 0.0  ;;  %v12515_v2 = vmax.f32 %v12355_v22, 0.0 }
 0x777   : > { %v12374_v35 = vadd.f32 %v29088_v45, %v11976_v32  ;;  %v12089_v36 = vpop.f32.mrb[66].mxu1  ;;  %21000 = vmatprep.subr.bf16.mxu1 %v20999_v38  ;;  %v11978_v51 = vpop.f32.mrb[67].mxu0  ;;  %20986 = vmatpush1.bf16.msra.mxu0 %v20985_v18  ;;  %v12517_v11 = vmax.f32 %v12357_v34, 0.0 }
 0x778   : > { %v12376_v52 = vadd.f32 %v29088_v45, %v12089_v36  ;;  %v12375_v4 = vadd.f32 %v29088_v45, %v11978_v51  ;;  %v12091_v17 = vpop.f32.mrb[67].mxu1  ;;  %21002 = vmatpush1.bf16.msra.mxu1 %v21001_v40 }
 0x779   : > { %v12534_v21 = vmax.f32 %v12374_v35, 0.0  ;;  %v12377_v24 = vadd.f32 %v29088_v45, %v12091_v17 }
 0x77a   : > { %v12536_v8 = vmax.f32 %v12376_v52, 0.0  ;;  %v12535_v1 = vmax.f32 %v12375_v4, 0.0  ;;  %v11982_v3 = vpop.f32.mrb[68].mxu0  ;;  %19591 = vmatmul.mubr.msk.f32.vlgmr.msra.gmra.mrb[104].mxu0 %vm12686_vm4, %v29138_v43 }
 0x77b   : > { %v21005_v59 = vpack.c.bf16 %v12534_v21, %v12514_v20  ;;  %v12537_v48 = vmax.f32 %v12377_v24, 0.0  ;;  %v12095_v10 = vpop.f32.mrb[68].mxu1  ;;  %19595 = vmatmul.mubr.msk.f32.vlgmr.msra.gmra.mrb[104].mxu1 %vm12686_vm4, %v29138_v43  ;;  %v11984_v61 = vpop.f32.mrb[69].mxu0  ;;  %13303 = vmatprep.mubr.f32.mxu0 %v33460_v0  ;;  %v12394_v33 = vadd.f32 %v29094_v62, %v11982_v3 }
 0x77c   : > { %v21021_v41 = vpack.c.bf16 %v12536_v8, %v12516_v47  ;;  %v21003_v45 = vpack.c.bf16 %v12535_v1, %v12515_v2  ;;  %v12097_v55 = vpop.f32.mrb[69].mxu1  ;;  %13392 = vmatprep.mubr.f32.mxu1 %v33460_v0  ;;  %v12396_v49 = vadd.f32 %v29094_v62, %v12095_v10  ;;  %v12395_v46 = vadd.f32 %v29094_v62, %v11984_v61 }
 0x77d   : > { %v21019_v6 = vpack.c.bf16 %v12537_v48, %v12517_v11  ;;  %v12397_v43 = vadd.f32 %v29094_v62, %v12097_v55  ;;  %v12554_v31 = vmax.f32 %v12394_v33, 0.0 }
 0x77e   : > { %v11988_v57 = vpop.f32.mrb[70].mxu0  ;;  %19592 = vmatmul.mubr.msk.f32.gmra.mrb[106].mxu0 %vm12686_vm4, %v29148_v60  ;;  %21004 = vmatprep.subr.bf16.mxu0 %v21003_v45  ;;  %v12556_v62 = vmax.f32 %v12396_v49, 0.0  ;;  %v12555_v13 = vmax.f32 %v12395_v46, 0.0 }
 0x77f   : > { %v12414_v14 = vadd.f32 %v29100_v50, %v11988_v57  ;;  %v12101_v25 = vpop.f32.mrb[70].mxu1  ;;  %19596 = vmatmul.mubr.msk.f32.gmra.mrb[106].mxu1 %vm12686_vm4, %v29148_v60  ;;  %21020 = vmatprep.subr.bf16.mxu1 %v21019_v6  ;;  %v11990_v12 = vpop.f32.mrb[71].mxu0  ;;  %v12557_v18 = vmax.f32 %v12397_v43, 0.0 }
 0x780   : > { %v12416_v26 = vadd.f32 %v29100_v50, %v12101_v25  ;;  %v12415_v27 = vadd.f32 %v29100_v50, %v11990_v12  ;;  %v12103_v23 = vpop.f32.mrb[71].mxu1  ;;  %21006 = vmatpush1.bf16.msra.mxu0 %v21005_v59  ;;  %21022 = vmatpush1.bf16.msra.mxu1 %v21021_v41 }
 0x781   : > { %v12574_v56 = vmax.f32 %v12414_v14, 0.0  ;;  %v12417_v9 = vadd.f32 %v29100_v50, %v12103_v23  ;;  %13309 = vmatprep.mubr.f32.mxu0 %v33460_v0  ;;  %13398 = vmatprep.mubr.f32.mxu1 %v33460_v0 }
 0x782   : > { %v12576_v60 = vmax.f32 %v12416_v26, 0.0  ;;  %v12575_v16 = vmax.f32 %v12415_v27, 0.0  ;;  %v11994_v5 = vpop.f32.mrb[72].mxu0  ;;  %19593 = vmatmul.mubr.msk.f32.gmra.mrb[108].mxu0 %vm12686_vm4, %v29160_v58 }
 0x783   : > { %v21009_v63 = vpack.c.bf16 %v12574_v56, %v12554_v31  ;;  %v12577_v30 = vmax.f32 %v12417_v9, 0.0  ;;  %v12107_v39 = vpop.f32.mrb[72].mxu1  ;;  %19597 = vmatmul.mubr.msk.f32.gmra.mrb[108].mxu1 %vm12686_vm4, %v29160_v58  ;;  %v11996_v50 = vpop.f32.mrb[73].mxu0  ;;  %13315 = vmatprep.mubr.f32.mxu0 %v33460_v0  ;;  %v12434_v53 = vadd.f32 %v29109_v54, %v11994_v5 }
 0x784   : > { %v21025_v40 = vpack.c.bf16 %v12576_v60, %v12556_v62  ;;  %v21007_v42 = vpack.c.bf16 %v12575_v16, %v12555_v13  ;;  %v12109_v29 = vpop.f32.mrb[73].mxu1  ;;  %13404 = vmatprep.mubr.f32.mxu1 %v33460_v0  ;;  %v12436_v15 = vadd.f32 %v29109_v54, %v12107_v39  ;;  %v12435_v22 = vadd.f32 %v29109_v54, %v11996_v50 }
 0x785   : > { %v21023_v38 = vpack.c.bf16 %v12577_v30, %v12557_v18  ;;  %v12437_v58 = vadd.f32 %v29109_v54, %v12109_v29  ;;  %v12594_v17 = vmax.f32 %v12434_v53, 0.0  ;;  %v25083_v18 = vld [vmem:[#allocation10] sm:$0xff]  ;;  %v25086_v30 = vld [vmem:[#allocation10 + $0x18] sm:$0xff]  ;;  %v13669_v39 = vlaneseq }
 0x786   : > { %v12000_v32 = vpop.f32.mrb[74].mxu0  ;;  %19594 = vmatmul.mubr.msk.f32.gmra.mrb[110].mxu0 %vm12686_vm4, %v29172_v7  ;;  %21008 = vmatprep.subr.bf16.mxu0 %v21007_v42  ;;  %v12596_v54 = vmax.f32 %v12436_v15, 0.0  ;;  %v12595_v24 = vmax.f32 %v12435_v22, 0.0  ;;  %v29385_v15 = vpop.permute.xlu0 %12668 }
 0x787   : > { %v12454_v34 = vadd.f32 %v29112_v44, %v12000_v32  ;;  %v12113_v35 = vpop.f32.mrb[74].mxu1  ;;  %19598 = vmatmul.mubr.msk.f32.gmra.mrb[110].mxu1 %vm12686_vm4, %v29172_v7  ;;  %21024 = vmatprep.subr.bf16.mxu1 %v21023_v38  ;;  %v12002_v36 = vpop.f32.mrb[75].mxu0  ;;  %v12597_v8 = vmax.f32 %v12437_v58, 0.0  ;;  %v13670_v50 = vand.u32 127, %v13669_v39 }
 0x788   : > { %v12456_v51 = vadd.f32 %v29112_v44, %v12113_v35  ;;  %v12455_v52 = vadd.f32 %v29112_v44, %v12002_v36  ;;  %v12115_v4 = vpop.f32.mrb[75].mxu1  ;;  %21010 = vmatpush1.bf16.msra.mxu0 %v21009_v63  ;;  %21026 = vmatpush1.bf16.msra.mxu1 %v21025_v40  ;;  %v25085_v63 = vld [vmem:[#allocation10 + $0x10] sm:$0xff]  ;;  %v13820_v40 = vshrl.u32 %v13669_v39, 7 }
 0x789   : > { %v12614_v20 = vmax.f32 %v12454_v34, 0.0  ;;  %v12457_v21 = vadd.f32 %v29112_v44, %v12115_v4  ;;  %13475 = vmatprep.mubr.f32.mxu0 %v33460_v0  ;;  %13564 = vmatprep.mubr.f32.mxu1 %v33460_v0  ;;  %vm13757_vm5 = vcmp.ge.s32.totalorder %v13670_v50, 2  ;;  %vm13778_vm6 = vcmp.lt.s32.totalorder %v13670_v50, 18 }
 0x78a   : > { %v12616_v7 = vmax.f32 %v12456_v51, 0.0  ;;  %v12615_v47 = vmax.f32 %v12455_v52, 0.0  ;;  %v12006_v2 = vpop.f32.mrb[76].mxu0  ;;  %vm13781_vm7 = vmand %vm13757_vm5, %vm13778_vm6  ;;  %v13821_v42 = vsub.s32 0, %v13820_v40 }
 0x78b   : > { %v21013_v1 = vpack.c.bf16 %v12614_v20, %v12594_v17  ;;  %v12617_v3 = vmax.f32 %v12457_v21, 0.0  ;;  %v12119_v11 = vpop.f32.mrb[76].mxu1  ;;  %v12008_v59 = vpop.f32.mrb[77].mxu0  ;;  %v12474_v44 = vadd.f32 %v29121_v28, %v12006_v2  ;;  %v13801_v29 = vsel %vm13781_vm7, 1, %v25434_v37 }
 0x78c   : > { %v21029_v48 = vpack.c.bf16 %v12616_v7, %v12596_v54  ;;  %v21011_v10 = vpack.c.bf16 %v12615_v47, %v12595_v24  ;;  %v12121_v61 = vpop.f32.mrb[77].mxu1  ;;  %v12476_v45 = vadd.f32 %v29121_v28, %v12119_v11  ;;  %v12475_v55 = vadd.f32 %v29121_v28, %v12008_v59 }
 0x78d   : > { %v21027_v41 = vpack.c.bf16 %v12617_v3, %v12597_v8  ;;  %v12477_v33 = vadd.f32 %v29121_v28, %v12121_v61  ;;  %v12634_v12 = vmax.f32 %v12474_v44, 0.0  ;;  %v29380_v38 = vrot.slane %v13801_v29, %v13821_v42  ;;  %v29405_v61 = vpop.permute.xlu0 %12678 }
 0x78e   : > { %v12012_v6 = vpop.f32.mrb[78].mxu0  ;;  %21012 = vmatprep.subr.bf16.mxu0 %v21011_v10  ;;  %v12636_v23 = vmax.f32 %v12476_v45, 0.0  ;;  %v12635_v31 = vmax.f32 %v12475_v55, 0.0  ;;  %v29383_v53 = vrot.slane %v25434_v37, %v13821_v42  ;;  %v29393_v37 = vpop.permute.xlu1 %12673 }
 0x78f   : > { %v12494_v49 = vadd.f32 %v29124_v19, %v12012_v6  ;;  %v12125_v46 = vpop.f32.mrb[78].mxu1  ;;  %21028 = vmatprep.subr.bf16.mxu1 %v21027_v41  ;;  %v12014_v57 = vpop.f32.mrb[79].mxu0  ;;  %21014 = vmatpush1.bf16.msra.mxu0 %v21013_v1  ;;  %v12637_v9 = vmax.f32 %v12477_v33, 0.0  ;;  %vm13901_vm8 = vcmp.eq.s32.totalorder %v29380_v38, 1 }
 0x790   : > { %v12496_v43 = vadd.f32 %v29124_v19, %v12125_v46  ;;  %v12495_v14 = vadd.f32 %v29124_v19, %v12014_v57  ;;  %v12127_v25 = vpop.f32.mrb[79].mxu1  ;;  %21030 = vmatpush1.bf16.msra.mxu1 %v21029_v48  ;;  %vm13899_vm9 = vcmp.eq.s32.totalorder %v29383_v53, 1  ;;  %vm29421_vm10 = vmpackc.low %vm13901_vm8, %vm13901_vm8 }
 0x791   : > { %v12654_v26 = vmax.f32 %v12494_v49, 0.0  ;;  %v12497_v27 = vadd.f32 %v29124_v19, %v12127_v25  ;;  %v25084_v19 = vld [vmem:[#allocation10 + $0x8] sm:$0xff]  ;;  %vm29436_vm11 = vmpackc.low %vm13899_vm9, %vm13899_vm9 }
 0x792   : > { %v12656_v56 = vmax.f32 %v12496_v43, 0.0  ;;  %v12655_v28 = vmax.f32 %v12495_v14, 0.0 }
 0x793   : > { %v21017_v62 = vpack.c.bf16 %v12654_v26, %v12634_v12  ;;  %v12657_v13 = vmax.f32 %v12497_v27, 0.0 }
 0x794   : > { %v21033_v60 = vpack.c.bf16 %v12656_v56, %v12636_v23  ;;  %v21015_v16 = vpack.c.bf16 %v12655_v28, %v12635_v31  ;;  %v33964_v56 = vmov 0  ;;  %v29440_v28 = vpop.permute.xlu1 %12683 }
 0x795   : > { %v21031_v5 = vpack.c.bf16 %v12657_v13, %v12637_v9  ;;  %v33965_v56 = vsel %vm29436_vm11, 4294967295, %v33964_v56 }
 0x796   : > { %21016 = vmatprep.subr.bf16.mxu0 %v21015_v16  ;;  %33966 = vst [vmem:[#allocation29_spill] sm:$0xff] %v33965_v56 }
 0x797   : > { %21032 = vmatprep.subr.bf16.mxu1 %v21031_v5  ;;  %21018 = vmatpush1.bf16.msra.mxu0 %v21017_v62 }
 0x798   : > { %21034 = vmatpush1.bf16.msra.mxu1 %v21033_v60 }
 0x79a   : > { %19599 = vmatmul.mubr.msk.f32.vlgmr.msra.gmra.mrb[112].mxu0 %vm12686_vm4, %v25083_v18 }
 0x79b   : > { %19603 = vmatmul.mubr.msk.f32.vlgmr.msra.gmra.mrb[112].mxu1 %vm12686_vm4, %v25083_v18  ;;  %13481 = vmatprep.mubr.f32.mxu0 %v33460_v0 }
 0x79c   : > { %13570 = vmatprep.mubr.f32.mxu1 %v33460_v0 }
 0x79e   : > { %19600 = vmatmul.mubr.msk.f32.gmra.mrb[114].mxu0 %vm12686_vm4, %v25084_v19 }
 0x79f   : > { %19604 = vmatmul.mubr.msk.f32.gmra.mrb[114].mxu1 %vm12686_vm4, %v25084_v19  ;;  %13487 = vmatprep.mubr.f32.mxu0 %v33460_v0 }
 0x7a0   : > { %13576 = vmatprep.mubr.f32.mxu1 %v33460_v0 }
 0x7a2   : > { %19601 = vmatmul.mubr.msk.f32.gmra.mrb[116].mxu0 %vm12686_vm4, %v25085_v63 }
 0x7a3   : > { %19605 = vmatmul.mubr.msk.f32.gmra.mrb[116].mxu1 %vm12686_vm4, %v25085_v63  ;;  %13493 = vmatprep.mubr.f32.mxu0 %v33460_v0 }
 0x7a4   : > { %13582 = vmatprep.mubr.f32.mxu1 %v33460_v0 }
 0x7a6   : > { %19602 = vmatmul.mubr.msk.f32.gmra.mrb[118].mxu0 %vm12686_vm4, %v25086_v30 }
 0x7a7   : > { %19606 = vmatmul.mubr.msk.f32.gmra.mrb[118].mxu1 %vm12686_vm4, %v25086_v30 }
 0x7ed   : > { %v12765_v22 = vpop.f32.mrb[80].mxu0 }
 0x7ee   : > { %v12766_v32 = vadd.f32 %v12765_v22, %v29385_v15  ;;  %v12854_v58 = vpop.f32.mrb[80].mxu1  ;;  %v12767_v34 = vpop.f32.mrb[81].mxu0 }
 0x7ef   : > { %v12855_v35 = vadd.f32 %v12854_v58, %v29385_v15  ;;  %v12768_v36 = vadd.f32 %v12767_v34, %v29385_v15  ;;  %v12856_v51 = vpop.f32.mrb[81].mxu1 }
 0x7f0   : > { %v13589_v52 = vmax.f32 %v12766_v32, 0.0  ;;  %v12857_v4 = vadd.f32 %v12856_v51, %v29385_v15 }
 0x7f1   : > { %v13591_v17 = vmax.f32 %v12855_v35, 0.0  ;;  %v12771_v20 = vpop.f32.mrb[82].mxu0  ;;  %v13590_v2 = vmax.f32 %v12768_v36, 0.0 }
 0x7f2   : > { %v13592_v21 = vmax.f32 %v12857_v4, 0.0  ;;  %v12772_v54 = vadd.f32 %v12771_v20, %v29393_v37  ;;  %v12860_v24 = vpop.f32.mrb[82].mxu1  ;;  %v12773_v7 = vpop.f32.mrb[83].mxu0  ;;  %v13919_v11 = vsel %vm13899_vm9, %v13589_v52, 0.0 }
 0x7f3   : > { %v13921_v47 = vsel %vm13901_vm8, %v13591_v17, 0.0  ;;  %v12861_v8 = vadd.f32 %v12860_v24, %v29393_v37  ;;  %v12774_v1 = vadd.f32 %v12773_v7, %v29393_v37  ;;  %v12862_v3 = vpop.f32.mrb[83].mxu1  ;;  %v13920_v26 = vsel %vm13899_vm9, %v13590_v2, 0.0 }
 0x7f4   : > { %v13922_v59 = vsel %vm13901_vm8, %v13592_v21, 0.0  ;;  %v13609_v48 = vmax.f32 %v12772_v54, 0.0  ;;  %v12863_v10 = vadd.f32 %v12862_v3, %v29393_v37 }
 0x7f5   : > { %v13611_v41 = vmax.f32 %v12861_v8, 0.0  ;;  %v13610_v44 = vmax.f32 %v12774_v1, 0.0  ;;  %v12777_v45 = vpop.f32.mrb[84].mxu0  ;;  %v29407_v55 = vpack.i.bf16 %v13922_v59, %v13921_v47 }
 0x7f6   : > { %v13939_v6 = vsel %vm13899_vm9, %v13609_v48, 0.0  ;;  %v29411_v33 = vpack.c.bf16 %v13609_v48, %v13589_v52  ;;  %v13612_v49 = vmax.f32 %v12863_v10, 0.0  ;;  %v12778_v46 = vadd.f32 %v12777_v45, %v29405_v61  ;;  %v12866_v57 = vpop.f32.mrb[84].mxu1  ;;  %v12779_v43 = vpop.f32.mrb[85].mxu0 }
 0x7f7   : > { %v29414_v14 = vpack.i.bf16 %v13939_v6, %v13919_v11  ;;  %v12868_v25 = vpop.f32.mrb[85].mxu1  ;;  %24279 = vrot.lane.b32.xlu0 %v29407_v55, %s25435_s11  ;;  %v13941_v27 = vsel %vm13901_vm8, %v13611_v41, 0.0  ;;  %v29429_v23 = vpack.c.bf16 %v13611_v41, %v13591_v17  ;;  %v29431_v31 = vpack.c.bf16 %v13610_v44, %v13590_v2 }
 0x7f8   : > { %33958 = vst [vmem:[#allocation25_spill] sm:$0xff] %v29411_v33  ;;  %v13940_v9 = vsel %vm13899_vm9, %v13610_v44, 0.0  ;;  %v29444_v62 = vpack.c.bf16 %v13612_v49, %v13592_v21  ;;  %v13629_v13 = vmax.f32 %v12778_v46, 0.0  ;;  %v12867_v60 = vadd.f32 %v12866_v57, %v29405_v61 }
 0x7f9   : > { %33959 = vst [vmem:[#allocation26_spill] sm:$0xff] %v29414_v14  ;;  %33962 = vst [vmem:[#allocation27_spill] sm:$0xff] %v29429_v23  ;;  %v12783_v16 = vpop.f32.mrb[86].mxu0  ;;  %v12869_v5 = vadd.f32 %v12868_v25, %v29405_v61  ;;  %v12780_v18 = vadd.f32 %v12779_v43, %v29405_v61  ;;  %21037 = vmatprep.subr.msk.bf16.mxu0 %vm29421_vm10, %v29429_v23  ;;  %v13942_v39 = vsel %vm13901_vm8, %v13612_v49, 0.0 }
 0x7fa   : > { %33963 = vst [vmem:[#allocation28_spill] sm:$0xff] %v29431_v31  ;;  %33967 = vst [vmem:[#allocation30_spill] sm:$0xff] %v29444_v62  ;;  %v12784_v19 = vadd.f32 %v12783_v16, %v29440_v28  ;;  %v12872_v63 = vpop.f32.mrb[86].mxu1  ;;  %v12785_v30 = vpop.f32.mrb[87].mxu0  ;;  %v13631_v50 = vmax.f32 %v12867_v60, 0.0  ;;  %21040 = vmatpush1.bf16.msk.msra.mxu0 %vm29436_vm11, %v29431_v31  ;;  %v13959_v22 = vsel %vm13899_vm9, %v13629_v13, 0.0  ;;  %v29492_v11 = vpack.i.bf16 %v13942_v39, %v13941_v27 }
 0x7fb   : > { %v12873_v40 = vadd.f32 %v12872_v63, %v29440_v28  ;;  %v12874_v42 = vpop.f32.mrb[87].mxu1  ;;  %24284 = vrot.lane.b32.xlu0 %v29407_v55, %s25436_s30  ;;  %v12786_v29 = vadd.f32 %v12785_v30, %v29440_v28  ;;  %v13632_v32 = vmax.f32 %v12869_v5, 0.0  ;;  %v13630_v35 = vmax.f32 %v12780_v18, 0.0 }
 0x7fc   : > { %v13649_v58 = vmax.f32 %v12784_v19, 0.0  ;;  %v12875_v34 = vadd.f32 %v12874_v42, %v29440_v28  ;;  %v13961_v52 = vsel %vm13901_vm8, %v13631_v50, 0.0  ;;  %v29500_v48 = vpack.i.bf16 %v13940_v9, %v13920_v26 }
 0x7fd   : > { %v13651_v36 = vmax.f32 %v12873_v40, 0.0  ;;  %v13650_v51 = vmax.f32 %v12786_v29, 0.0  ;;  %v13962_v4 = vsel %vm13901_vm8, %v13632_v32, 0.0  ;;  %v13960_v59 = vsel %vm13899_vm9, %v13630_v35, 0.0 }
 0x7fe   : > { %v13979_v17 = vsel %vm13899_vm9, %v13649_v58, 0.0  ;;  %v29471_v20 = vpack.c.bf16 %v13649_v58, %v13629_v13  ;;  %v13652_v7 = vmax.f32 %v12875_v34, 0.0  ;;  %v24338_v8 = vpack.i.bf16 %v13962_v4, %v13961_v52 }
 0x7ff   : > { %v29473_v21 = vpack.i.bf16 %v13979_v17, %v13959_v22  ;;  %24289 = vrot.lane.b32.xlu0 %v29407_v55, %s25437_s4  ;;  %v13981_v54 = vsel %vm13901_vm8, %v13651_v36, 0.0  ;;  %v29479_v24 = vpack.c.bf16 %v13651_v36, %v13631_v50  ;;  %v13980_v47 = vsel %vm13899_vm9, %v13650_v51, 0.0 }
 0x800   : > { %33968 = vst [vmem:[#allocation31_spill] sm:$0xff] %v29471_v20  ;;  %v29483_v2 = vpack.c.bf16 %v13650_v51, %v13630_v35  ;;  %v13982_v1 = vsel %vm13901_vm8, %v13652_v7, 0.0  ;;  %v29487_v3 = vpack.c.bf16 %v13652_v7, %v13632_v32  ;;  %24339 = vrot.lane.b32.xlu1 %v24338_v8, %s25435_s11  ;;  %v29506_v41 = vpack.i.bf16 %v13980_v47, %v13960_v59 }
 0x801   : > { %33969 = vst [vmem:[#allocation32_spill] sm:$0xff] %v29473_v21  ;;  %33970 = vst [vmem:[#allocation33_spill] sm:$0xff] %v29479_v24  ;;  %21043 = vmatprep.subr.msk.bf16.mxu0 %vm29421_vm10, %v29479_v24  ;;  %v29502_v10 = vpack.i.bf16 %v13982_v1, %v13981_v54 }
 0x802   : > { %33971 = vst [vmem:[#allocation34_spill] sm:$0xff] %v29483_v2  ;;  %33972 = vst [vmem:[#allocation35_spill] sm:$0xff] %v29487_v3  ;;  %21046 = vmatpush1.bf16.msk.msra.mxu0 %vm29436_vm11, %v29483_v2 }
 0x803   : > { %24294 = vrot.lane.b32.xlu0 %v29407_v55, %s25438_s6 }
 0x804   : > { %24344 = vrot.lane.b32.xlu1 %v24338_v8, %s25436_s30 }
 0x807   : > { %24299 = vrot.lane.b32.xlu0 %v29492_v11, %s25435_s11 }
 0x808   : > { %24349 = vrot.lane.b32.xlu1 %v24338_v8, %s25437_s4 }
 0x80b   : > { %24304 = vrot.lane.b32.xlu0 %v29500_v48, %s25435_s11 }
 0x80c   : > { %24354 = vrot.lane.b32.xlu1 %v24338_v8, %s25438_s6 }
 0x80d   : > { %v12943_v44 = vpop.f32.mrb[88].mxu0 }
 0x80e   : > { %v12944_v45 = vadd.f32 %v12943_v44, %v29385_v15  ;;  %v13032_v6 = vpop.f32.mrb[88].mxu1  ;;  %v12945_v49 = vpop.f32.mrb[89].mxu0 }
 0x80f   : > { %v13033_v55 = vadd.f32 %v13032_v6, %v29385_v15  ;;  %v13034_v46 = vpop.f32.mrb[89].mxu1  ;;  %v12946_v57 = vadd.f32 %v12945_v49, %v29385_v15  ;;  %24309 = vrot.lane.b32.xlu0 %v29492_v11, %s25436_s30 }
 0x810   : > { %v13593_v43 = vmax.f32 %v12944_v45, 0.0  ;;  %v13035_v25 = vadd.f32 %v13034_v46, %v29385_v15  ;;  %24359 = vrot.lane.b32.xlu1 %v29502_v10, %s25435_s11 }
 0x811   : > { %v13595_v26 = vmax.f32 %v13033_v55, 0.0  ;;  %v13594_v27 = vmax.f32 %v12946_v57, 0.0  ;;  %v12949_v9 = vpop.f32.mrb[90].mxu0 }
 0x812   : > { %v13923_v13 = vsel %vm13901_vm8, %v13593_v43, 0.0  ;;  %v13596_v60 = vmax.f32 %v13035_v25, 0.0  ;;  %v12950_v16 = vadd.f32 %v12949_v9, %v29393_v37  ;;  %v13038_v5 = vpop.f32.mrb[90].mxu1  ;;  %v12951_v18 = vpop.f32.mrb[91].mxu0 }
 0x813   : > { %v13925_v19 = vsel %vm13901_vm8, %v13595_v26, 0.0  ;;  %v13924_v63 = vsel %vm13901_vm8, %v13594_v27, 0.0  ;;  %v13039_v30 = vadd.f32 %v13038_v5, %v29393_v37  ;;  %v12952_v39 = vadd.f32 %v12951_v18, %v29393_v37  ;;  %v13040_v50 = vpop.f32.mrb[91].mxu1  ;;  %24314 = vrot.lane.b32.xlu0 %v29500_v48, %s25436_s30 }
 0x814   : > { %v13926_v40 = vsel %vm13901_vm8, %v13596_v60, 0.0  ;;  %v13613_v42 = vmax.f32 %v12950_v16, 0.0  ;;  %v13041_v29 = vadd.f32 %v13040_v50, %v29393_v37  ;;  %v29537_v22 = vpack.i.bf16 %v13924_v63, %v13923_v13  ;;  %24364 = vrot.lane.b32.xlu1 %v29506_v41, %s25435_s11 }
 0x815   : > { %v13615_v32 = vmax.f32 %v13039_v30, 0.0  ;;  %v13614_v58 = vmax.f32 %v12952_v39, 0.0  ;;  %v12955_v34 = vpop.f32.mrb[92].mxu0  ;;  %v29539_v35 = vpack.i.bf16 %v13926_v40, %v13925_v19 }
 0x816   : > { %v13943_v36 = vsel %vm13901_vm8, %v13613_v42, 0.0  ;;  %v29543_v51 = vpack.c.bf16 %v13613_v42, %v13593_v43  ;;  %v13616_v52 = vmax.f32 %v13041_v29, 0.0  ;;  %v12956_v4 = vadd.f32 %v12955_v34, %v29405_v61  ;;  %v13044_v17 = vpop.f32.mrb[92].mxu1  ;;  %v12957_v54 = vpop.f32.mrb[93].mxu0 }
 0x817   : > { %v13945_v7 = vsel %vm13901_vm8, %v13615_v32, 0.0  ;;  %v29548_v47 = vpack.c.bf16 %v13615_v32, %v13595_v26  ;;  %v13944_v8 = vsel %vm13901_vm8, %v13614_v58, 0.0  ;;  %v29552_v1 = vpack.c.bf16 %v13614_v58, %v13594_v27  ;;  %v13046_v59 = vpop.f32.mrb[93].mxu1  ;;  %24319 = vrot.lane.b32.xlu0 %v29492_v11, %s25437_s4 }
 0x818   : > { %33973 = vst [vmem:[#allocation36_spill] sm:$0xff] %v29543_v51  ;;  %v13946_v44 = vsel %vm13901_vm8, %v13616_v52, 0.0  ;;  %v29558_v45 = vpack.c.bf16 %v13616_v52, %v13596_v60  ;;  %v13633_v6 = vmax.f32 %v12956_v4, 0.0  ;;  %v13045_v49 = vadd.f32 %v13044_v17, %v29405_v61  ;;  %21081 = vmatprep.subr.msk.bf16.mxu1 %vm29421_vm10, %v29543_v51  ;;  %24369 = vrot.lane.b32.xlu1 %v29502_v10, %s25436_s30 }
 0x819   : > { %33974 = vst [vmem:[#allocation37_spill] sm:$0xff] %v29548_v47  ;;  %33975 = vst [vmem:[#allocation38_spill] sm:$0xff] %v29552_v1  ;;  %v12958_v55 = vadd.f32 %v12957_v54, %v29405_v61  ;;  %v13047_v46 = vadd.f32 %v13046_v59, %v29405_v61  ;;  %v12961_v57 = vpop.f32.mrb[94].mxu0  ;;  %21084 = vmatpush1.bf16.msk.msra.mxu1 %vm29421_vm10, %v29444_v62  ;;  %v29591_v34 = vpack.i.bf16 %v13946_v44, %v13945_v7 }
 0x81a   : > { %33976 = vst [vmem:[#allocation39_spill] sm:$0xff] %v29558_v45  ;;  %v13963_v43 = vsel %vm13901_vm8, %v13633_v6, 0.0  ;;  %v13635_v25 = vmax.f32 %v13045_v49, 0.0  ;;  %v12962_v26 = vadd.f32 %v12961_v57, %v29440_v28  ;;  %v13050_v27 = vpop.f32.mrb[94].mxu1  ;;  %v12963_v9 = vpop.f32.mrb[95].mxu0  ;;  %v29615_v7 = vpack.i.bf16 %v13944_v8, %v13943_v36 }
 0x81b   : > { %v13634_v13 = vmax.f32 %v12958_v55, 0.0  ;;  %v13636_v60 = vmax.f32 %v13047_v46, 0.0  ;;  %v13051_v16 = vadd.f32 %v13050_v27, %v29440_v28  ;;  %v12964_v5 = vadd.f32 %v12963_v9, %v29440_v28  ;;  %v13052_v18 = vpop.f32.mrb[95].mxu1  ;;  %24324 = vrot.lane.b32.xlu0 %v29500_v48, %s25437_s4  ;;  %v15374_v36 = vld [vmem:[#allocation13 + $0x8] sm:$0x77] }
 0x81c   : > { %v13965_v19 = vsel %vm13901_vm8, %v13635_v25, 0.0  ;;  %v13653_v63 = vmax.f32 %v12962_v26, 0.0  ;;  %v13053_v30 = vadd.f32 %v13052_v18, %v29440_v28  ;;  %24374 = vrot.lane.b32.xlu1 %v29506_v41, %s25436_s30 }
 0x81d   : > { %v13964_v39 = vsel %vm13901_vm8, %v13634_v13, 0.0  ;;  %v13966_v50 = vsel %vm13901_vm8, %v13636_v60, 0.0  ;;  %v13655_v40 = vmax.f32 %v13051_v16, 0.0  ;;  %v13654_v42 = vmax.f32 %v12964_v5, 0.0 }
 0x81e   : > { %v13983_v29 = vsel %vm13901_vm8, %v13653_v63, 0.0  ;;  %v29589_v32 = vpack.c.bf16 %v13653_v63, %v13633_v6  ;;  %v13656_v58 = vmax.f32 %v13053_v30, 0.0  ;;  %v29617_v44 = vpack.i.bf16 %v13964_v39, %v13963_v43 }
 0x81f   : > { %v13985_v52 = vsel %vm13901_vm8, %v13655_v40, 0.0  ;;  %v29595_v4 = vpack.c.bf16 %v13655_v40, %v13635_v25  ;;  %v13984_v17 = vsel %vm13901_vm8, %v13654_v42, 0.0  ;;  %v29599_v54 = vpack.c.bf16 %v13654_v42, %v13634_v13  ;;  %24329 = vrot.lane.b32.xlu0 %v29492_v11, %s25438_s6 }
 0x820   : > { %33977 = vst [vmem:[#allocation40_spill] sm:$0xff] %v29589_v32  ;;  %v13986_v59 = vsel %vm13901_vm8, %v13656_v58, 0.0  ;;  %v29605_v6 = vpack.c.bf16 %v13656_v58, %v13636_v60  ;;  %21087 = vmatprep.subr.msk.bf16.mxu1 %vm29421_vm10, %v29589_v32  ;;  %24379 = vrot.lane.b32.xlu1 %v29502_v10, %s25437_s4  ;;  %v29621_v49 = vpack.i.bf16 %v13966_v50, %v13965_v19 }
 0x821   : > { %33978 = vst [vmem:[#allocation41_spill] sm:$0xff] %v29595_v4  ;;  %33979 = vst [vmem:[#allocation42_spill] sm:$0xff] %v29599_v54  ;;  %21090 = vmatpush1.bf16.msk.msra.mxu1 %vm29421_vm10, %v29487_v3  ;;  %v29625_v11 = vpack.i.bf16 %v13984_v17, %v13983_v29  ;;  %v29627_v55 = vpack.i.bf16 %v13986_v59, %v13985_v52 }
 0x822   : > { %33980 = vst [vmem:[#allocation43_spill] sm:$0xff] %v29605_v6 }
 0x823   : > { %24334 = vrot.lane.b32.xlu0 %v29500_v48, %s25438_s6  ;;  %v29637_v48 = vcombine.high %v15374_v36, %v15374_v36 }
 0x824   : > { %24384 = vrot.lane.b32.xlu1 %v29506_v41, %s25437_s4 }
 0x825   : > { %33981 = vst [vmem:[#allocation44_spill] sm:$0xff] %v29637_v48  ;;  %19615 = vmatprep.mubr.msk.f32.mxu0 %vm15377_vm12, %v29637_v48  ;;  %19624 = vmatprep.mubr.msk.f32.mxu1 %vm15377_vm12, %v29637_v48 }
 0x827   : > { %24419 = vrot.lane.b32.xlu0 %v29539_v35, %s25435_s11 }
 0x828   : > { %24389 = vrot.lane.b32.xlu1 %v29502_v10, %s25438_s6 }
 0x82b   : > { %24424 = vrot.lane.b32.xlu0 %v29539_v35, %s25436_s30 }
 0x82c   : > { %24394 = vrot.lane.b32.xlu1 %v29506_v41, %s25438_s6 }
 0x82d   : > { %v13121_v8 = vpop.f32.mrb[96].mxu0 }
 0x82e   : > { %v13122_v46 = vadd.f32 %v13121_v8, %v29385_v15  ;;  %v13210_v57 = vpop.f32.mrb[96].mxu1  ;;  %v13123_v43 = vpop.f32.mrb[97].mxu0 }
 0x82f   : > { %v13211_v25 = vadd.f32 %v13210_v57, %v29385_v15  ;;  %v13124_v26 = vadd.f32 %v13123_v43, %v29385_v15  ;;  %v13212_v10 = vpop.f32.mrb[97].mxu1  ;;  %24429 = vrot.lane.b32.xlu0 %v29539_v35, %s25437_s4 }
 0x830   : > { %v13597_v27 = vmax.f32 %v13122_v46, 0.0  ;;  %v13213_v9 = vadd.f32 %v13212_v10, %v29385_v15  ;;  %24399 = vrot.lane.b32.xlu1 %v29537_v22, %s25435_s11 }
 0x831   : > { %v13599_v13 = vmax.f32 %v13211_v25, 0.0  ;;  %v13598_v60 = vmax.f32 %v13124_v26, 0.0  ;;  %v13127_v41 = vpop.f32.mrb[98].mxu0 }
 0x832   : > { %v13927_v16 = vsel %vm13901_vm8, %v13597_v27, 0.0  ;;  %v13600_v5 = vmax.f32 %v13213_v9, 0.0  ;;  %v13128_v18 = vadd.f32 %v13127_v41, %v29393_v37  ;;  %v13216_v19 = vpop.f32.mrb[98].mxu1  ;;  %v13129_v63 = vpop.f32.mrb[99].mxu0 }
 0x833   : > { %v29656_v30 = vsel %vm13901_vm8, %v13599_v13, 0.0  ;;  %v13928_v39 = vsel %vm13901_vm8, %v13598_v60, 0.0  ;;  %v13217_v50 = vadd.f32 %v13216_v19, %v29393_v37  ;;  %v13130_v40 = vadd.f32 %v13129_v63, %v29393_v37  ;;  %v13218_v42 = vpop.f32.mrb[99].mxu1  ;;  %24434 = vrot.lane.b32.xlu0 %v29539_v35, %s25438_s6 }
 0x834   : > { %v29666_v29 = vsel %vm13901_vm8, %v13600_v5, 0.0  ;;  %v13617_v58 = vmax.f32 %v13128_v18, 0.0  ;;  %v13219_v52 = vadd.f32 %v13218_v42, %v29393_v37  ;;  %v29671_v17 = vpack.i.bf16 %v13928_v39, %v13927_v16  ;;  %24404 = vrot.lane.b32.xlu1 %v29537_v22, %s25436_s30 }
 0x835   : > { %v13619_v59 = vmax.f32 %v13217_v50, 0.0  ;;  %v13618_v36 = vmax.f32 %v13130_v40, 0.0  ;;  %v13133_v8 = vpop.f32.mrb[100].mxu0 }
 0x836   : > { %v13947_v46 = vsel %vm13901_vm8, %v13617_v58, 0.0  ;;  %v29675_v57 = vpack.c.bf16 %v13617_v58, %v13597_v27  ;;  %v13620_v43 = vmax.f32 %v13219_v52, 0.0  ;;  %v13134_v25 = vadd.f32 %v13133_v8, %v29405_v61  ;;  %v13222_v26 = vpop.f32.mrb[100].mxu1  ;;  %v13135_v10 = vpop.f32.mrb[101].mxu0 }
 0x837   : > { %v13949_v9 = vsel %vm13901_vm8, %v13619_v59, 0.0  ;;  %v29680_v41 = vpack.c.bf16 %v13619_v59, %v13599_v13  ;;  %v13948_v35 = vsel %vm13901_vm8, %v13618_v36, 0.0  ;;  %v29684_v16 = vpack.c.bf16 %v13618_v36, %v13598_v60  ;;  %v13224_v27 = vpop.f32.mrb[101].mxu1  ;;  %24459 = vrot.lane.b32.xlu0 %v29591_v34, %s25435_s11 }
 0x838   : > { %33982 = vst [vmem:[#allocation45_spill] sm:$0xff] %v29675_v57  ;;  %v13950_v18 = vsel %vm13901_vm8, %v13620_v43, 0.0  ;;  %v29690_v19 = vpack.c.bf16 %v13620_v43, %v13600_v5  ;;  %v13637_v63 = vmax.f32 %v13134_v25, 0.0  ;;  %v13223_v39 = vadd.f32 %v13222_v26, %v29405_v61  ;;  %24409 = vrot.lane.b32.xlu1 %v29537_v22, %s25437_s4 }
 0x839   : > { %33983 = vst [vmem:[#allocation46_spill] sm:$0xff] %v29680_v41  ;;  %33984 = vst [vmem:[#allocation47_spill] sm:$0xff] %v29684_v16  ;;  %v29695_v13 = vpack.i.bf16 %v13950_v18, %v13949_v9  ;;  %v13136_v60 = vadd.f32 %v13135_v10, %v29405_v61  ;;  %v13225_v50 = vadd.f32 %v13224_v27, %v29405_v61  ;;  %v13139_v40 = vpop.f32.mrb[102].mxu0 }
 0x83a   : > { %33985 = vst [vmem:[#allocation48_spill] sm:$0xff] %v29690_v19  ;;  %v13967_v42 = vsel %vm13901_vm8, %v13637_v63, 0.0  ;;  %v13639_v58 = vmax.f32 %v13223_v39, 0.0  ;;  %v13140_v5 = vadd.f32 %v13139_v40, %v29440_v28  ;;  %v13228_v52 = vpop.f32.mrb[102].mxu1  ;;  %v13141_v59 = vpop.f32.mrb[103].mxu0  ;;  %v29702_v36 = vpack.i.bf16 %v13948_v35, %v13947_v46 }
 0x83b   : > { %v13638_v8 = vmax.f32 %v13136_v60, 0.0  ;;  %v13640_v43 = vmax.f32 %v13225_v50, 0.0  ;;  %v13229_v25 = vadd.f32 %v13228_v52, %v29440_v28  ;;  %v13142_v26 = vadd.f32 %v13141_v59, %v29440_v28  ;;  %v13230_v10 = vpop.f32.mrb[103].mxu1  ;;  %24464 = vrot.lane.b32.xlu0 %v29591_v34, %s25436_s30 }
 0x83c   : > { %v13969_v9 = vsel %vm13901_vm8, %v13639_v58, 0.0  ;;  %v13657_v27 = vmax.f32 %v13140_v5, 0.0  ;;  %v13231_v18 = vadd.f32 %v13230_v10, %v29440_v28  ;;  %24414 = vrot.lane.b32.xlu1 %v29537_v22, %s25438_s6  ;;  %v29751_v22 = vpack.i.bf16 %v29666_v29, %v29656_v30 }
 0x83d   : > { %v13968_v46 = vsel %vm13901_vm8, %v13638_v8, 0.0  ;;  %v13970_v35 = vsel %vm13901_vm8, %v13640_v43, 0.0  ;;  %v13659_v39 = vmax.f32 %v13229_v25, 0.0  ;;  %v13658_v60 = vmax.f32 %v13142_v26, 0.0 }
 0x83e   : > { %v29717_v50 = vpack.i.bf16 %v13970_v35, %v13969_v9  ;;  %v13987_v40 = vsel %vm13901_vm8, %v13657_v27, 0.0  ;;  %v29721_v52 = vpack.c.bf16 %v13657_v27, %v13637_v63  ;;  %v13660_v26 = vmax.f32 %v13231_v18, 0.0 }
 0x83f   : > { %v13989_v5 = vsel %vm13901_vm8, %v13659_v39, 0.0  ;;  %v29725_v59 = vpack.c.bf16 %v13659_v39, %v13639_v58  ;;  %v13988_v10 = vsel %vm13901_vm8, %v13658_v60, 0.0  ;;  %v29731_v25 = vpack.c.bf16 %v13658_v60, %v13638_v8  ;;  %24469 = vrot.lane.b32.xlu0 %v29591_v34, %s25437_s4 }
 0x840   : > { %33986 = vst [vmem:[#allocation49_spill] sm:$0xff] %v29721_v52  ;;  %v29735_v9 = vpack.i.bf16 %v13968_v46, %v13967_v42  ;;  %v13990_v63 = vsel %vm13901_vm8, %v13660_v26, 0.0  ;;  %v29739_v27 = vpack.c.bf16 %v13660_v26, %v13640_v43  ;;  %v29741_v58 = vpack.i.bf16 %v13988_v10, %v13987_v40  ;;  %24439 = vrot.lane.b32.xlu1 %v29615_v7, %s25435_s11 }
 0x841   : > { %33987 = vst [vmem:[#allocation50_spill] sm:$0xff] %v29725_v59  ;;  %33988 = vst [vmem:[#allocation51_spill] sm:$0xff] %v29731_v25  ;;  %v29743_v35 = vpack.i.bf16 %v13990_v63, %v13989_v5 }
 0x842   : > { %33989 = vst [vmem:[#allocation52_spill] sm:$0xff] %v29739_v27 }
 0x843   : > { %24474 = vrot.lane.b32.xlu0 %v29591_v34, %s25438_s6 }
 0x844   : > { %24444 = vrot.lane.b32.xlu1 %v29615_v7, %s25436_s30 }
 0x847   : > { %24479 = vrot.lane.b32.xlu0 %v29617_v44, %s25435_s11 }
 0x848   : > { %24449 = vrot.lane.b32.xlu1 %v29615_v7, %s25437_s4 }
 0x84b   : > { %24484 = vrot.lane.b32.xlu0 %v29617_v44, %s25436_s30 }
 0x84c   : > { %24454 = vrot.lane.b32.xlu1 %v29615_v7, %s25438_s6 }
 0x84d   : > { %v13299_v42 = vpop.f32.mrb[104].mxu0 }
 0x84e   : > { %v13300_v8 = vadd.f32 %v13299_v42, %v29385_v15  ;;  %v13388_v34 = vpop.f32.mrb[104].mxu1  ;;  %v13301_v43 = vpop.f32.mrb[105].mxu0 }
 0x84f   : > { %v13389_v30 = vadd.f32 %v13388_v34, %v29385_v15  ;;  %v13302_v29 = vadd.f32 %v13301_v43, %v29385_v15  ;;  %v13390_v18 = vpop.f32.mrb[105].mxu1  ;;  %24489 = vrot.lane.b32.xlu0 %v29617_v44, %s25437_s4 }
 0x850   : > { %v13601_v46 = vmax.f32 %v13300_v8, 0.0  ;;  %v13391_v39 = vadd.f32 %v13390_v18, %v29385_v15  ;;  %24559 = vrot.lane.b32.xlu1 %v29671_v17, %s25435_s11 }
 0x851   : > { %v13603_v60 = vmax.f32 %v13389_v30, 0.0  ;;  %v13602_v40 = vmax.f32 %v13302_v29, 0.0  ;;  %v13305_v5 = vpop.f32.mrb[106].mxu0 }
 0x852   : > { %v13931_v10 = vsel %vm13901_vm8, %v13601_v46, 0.0  ;;  %v13604_v26 = vmax.f32 %v13391_v39, 0.0  ;;  %v13306_v7 = vadd.f32 %v13305_v5, %v29393_v37  ;;  %v13394_v63 = vpop.f32.mrb[106].mxu1  ;;  %v13307_v42 = vpop.f32.mrb[107].mxu0 }
 0x853   : > { %v13933_v34 = vsel %vm13901_vm8, %v13603_v60, 0.0  ;;  %v13932_v8 = vsel %vm13901_vm8, %v13602_v40, 0.0  ;;  %v13395_v43 = vadd.f32 %v13394_v63, %v29393_v37  ;;  %v13308_v30 = vadd.f32 %v13307_v42, %v29393_v37  ;;  %v13396_v29 = vpop.f32.mrb[107].mxu1  ;;  %24494 = vrot.lane.b32.xlu0 %v29617_v44, %s25438_s6 }
 0x854   : > { %v13934_v18 = vsel %vm13901_vm8, %v13604_v26, 0.0  ;;  %v13621_v39 = vmax.f32 %v13306_v7, 0.0  ;;  %v13397_v5 = vadd.f32 %v13396_v29, %v29393_v37  ;;  %v29785_v0 = vpack.i.bf16 %v13932_v8, %v13931_v10  ;;  %24564 = vrot.lane.b32.xlu1 %v29671_v17, %s25436_s30 }
 0x855   : > { %v29787_v32 = vpack.i.bf16 %v13934_v18, %v13933_v34  ;;  %v13311_v51 = vpop.f32.mrb[108].mxu0  ;;  %v13623_v42 = vmax.f32 %v13395_v43, 0.0  ;;  %v13622_v3 = vmax.f32 %v13308_v30, 0.0 }
 0x856   : > { %v13951_v63 = vsel %vm13901_vm8, %v13621_v39, 0.0  ;;  %v29791_v24 = vpack.c.bf16 %v13621_v39, %v13601_v46  ;;  %v13400_v23 = vpop.f32.mrb[108].mxu1  ;;  %v13313_v62 = vpop.f32.mrb[109].mxu0  ;;  %v13624_v7 = vmax.f32 %v13397_v5, 0.0  ;;  %v13312_v44 = vadd.f32 %v13311_v51, %v29405_v61 }
 0x857   : > { %v13401_v10 = vadd.f32 %v13400_v23, %v29405_v61  ;;  %v13314_v34 = vadd.f32 %v13313_v62, %v29405_v61  ;;  %v13402_v8 = vpop.f32.mrb[109].mxu1  ;;  %v13953_v29 = vsel %vm13901_vm8, %v13623_v42, 0.0  ;;  %v29800_v46 = vpack.c.bf16 %v13623_v42, %v13603_v60  ;;  %24499 = vrot.lane.b32.xlu0 %v29621_v49, %s25435_s11 }
 0x858   : > { %33990 = vst [vmem:[#allocation53_spill] sm:$0xff] %v29791_v24  ;;  %v13952_v43 = vsel %vm13901_vm8, %v13622_v3, 0.0  ;;  %v29804_v30 = vpack.c.bf16 %v13622_v3, %v13602_v40  ;;  %v13954_v23 = vsel %vm13901_vm8, %v13624_v7, 0.0  ;;  %v29812_v62 = vpack.c.bf16 %v13624_v7, %v13604_v26  ;;  %24569 = vrot.lane.b32.xlu1 %v29671_v17, %s25437_s4 }
 0x859   : > { %33991 = vst [vmem:[#allocation54_spill] sm:$0xff] %v29800_v46  ;;  %v29808_v18 = vpack.i.bf16 %v13952_v43, %v13951_v63  ;;  %v13641_v51 = vmax.f32 %v13312_v44, 0.0  ;;  %v13317_v39 = vpop.f32.mrb[110].mxu0  ;;  %v29814_v5 = vpack.i.bf16 %v13954_v23, %v13953_v29  ;;  %v13643_v40 = vmax.f32 %v13401_v10, 0.0 }
 0x85a   : > { %33992 = vst [vmem:[#allocation55_spill] sm:$0xff] %v29804_v30  ;;  %33993 = vst [vmem:[#allocation56_spill] sm:$0xff] %v29812_v62  ;;  %v13406_v60 = vpop.f32.mrb[110].mxu1  ;;  %v13319_v42 = vpop.f32.mrb[111].mxu0  ;;  %v13642_v20 = vmax.f32 %v13314_v34, 0.0  ;;  %v13403_v2 = vadd.f32 %v13402_v8, %v29405_v61  ;;  %v13318_v26 = vadd.f32 %v13317_v39, %v29440_v28 }
 0x85b   : > { %v13971_v3 = vsel %vm13901_vm8, %v13641_v51, 0.0  ;;  %v13408_v63 = vpop.f32.mrb[111].mxu1  ;;  %v13407_v7 = vadd.f32 %v13406_v60, %v29440_v28  ;;  %v13320_v44 = vadd.f32 %v13319_v42, %v29440_v28  ;;  %24504 = vrot.lane.b32.xlu0 %v29621_v49, %s25436_s30  ;;  %v13973_v10 = vsel %vm13901_vm8, %v13643_v40, 0.0 }
 0x85c   : > { %v13409_v29 = vadd.f32 %v13408_v63, %v29440_v28  ;;  %v13972_v34 = vsel %vm13901_vm8, %v13642_v20, 0.0  ;;  %v13644_v8 = vmax.f32 %v13403_v2, 0.0  ;;  %v13661_v39 = vmax.f32 %v13318_v26, 0.0  ;;  %24574 = vrot.lane.b32.xlu1 %v29671_v17, %s25438_s6 }
 0x85d   : > { %v29831_v43 = vpack.i.bf16 %v13972_v34, %v13971_v3  ;;  %v13663_v60 = vmax.f32 %v13407_v7, 0.0  ;;  %v13662_v42 = vmax.f32 %v13320_v44, 0.0 }
 0x85e   : > { %v13974_v23 = vsel %vm13901_vm8, %v13644_v8, 0.0  ;;  %v13991_v33 = vsel %vm13901_vm8, %v13661_v39, 0.0  ;;  %v29843_v2 = vpack.c.bf16 %v13661_v39, %v13641_v51  ;;  %v13664_v17 = vmax.f32 %v13409_v29, 0.0 }
 0x85f   : > { %v29837_v63 = vpack.i.bf16 %v13974_v23, %v13973_v10  ;;  %24509 = vrot.lane.b32.xlu0 %v29621_v49, %s25437_s4  ;;  %v13993_v3 = vsel %vm13901_vm8, %v13663_v60, 0.0  ;;  %v29847_v34 = vpack.c.bf16 %v13663_v60, %v13643_v40  ;;  %v13992_v26 = vsel %vm13901_vm8, %v13662_v42, 0.0 }
 0x860   : > { %33994 = vst [vmem:[#allocation57_spill] sm:$0xff] %v29843_v2  ;;  %v29851_v7 = vpack.c.bf16 %v13662_v42, %v13642_v20  ;;  %v29853_v44 = vpack.i.bf16 %v13992_v26, %v13991_v33  ;;  %24599 = vrot.lane.b32.xlu1 %v29702_v36, %s25435_s11  ;;  %v13994_v51 = vsel %vm13901_vm8, %v13664_v17, 0.0  ;;  %v29859_v10 = vpack.c.bf16 %v13664_v17, %v13644_v8 }
 0x861   : > { %33995 = vst [vmem:[#allocation58_spill] sm:$0xff] %v29847_v34  ;;  %v29863_v40 = vpack.i.bf16 %v13994_v51, %v13993_v3 }
 0x862   : > { %33996 = vst [vmem:[#allocation59_spill] sm:$0xff] %v29851_v7  ;;  %33997 = vst [vmem:[#allocation60_spill] sm:$0xff] %v29859_v10 }
 0x863   : > { %24514 = vrot.lane.b32.xlu0 %v29621_v49, %s25438_s6 }
 0x864   : > { %24604 = vrot.lane.b32.xlu1 %v29702_v36, %s25436_s30 }
 0x867   : > { %24519 = vrot.lane.b32.xlu0 %v29625_v11, %s25435_s11 }
 0x868   : > { %24609 = vrot.lane.b32.xlu1 %v29702_v36, %s25437_s4 }
 0x869   : > { %v29869_v33 = vpop.permute.xlu0 %24279 }
 0x86a   : > { %v34016_v53 = vunpack.i.l.bf16 %v29869_v33 }
 0x86b   : > { %24524 = vrot.lane.b32.xlu0 %v29625_v11, %s25436_s30 }
 0x86c   : > { %24614 = vrot.lane.b32.xlu1 %v29702_v36, %s25438_s6 }
 0x86d   : > { %v29875_v20 = vpop.permute.xlu0 %24284  ;;  %v13477_v29 = vpop.f32.mrb[112].mxu0 }
 0x86e   : > { %v13478_v49 = vadd.f32 %v13477_v29, %v29385_v15  ;;  %v13566_v8 = vpop.f32.mrb[112].mxu1  ;;  %v13479_v23 = vpop.f32.mrb[113].mxu0 }
 0x86f   : > { %v13567_v39 = vadd.f32 %v13566_v8, %v29385_v15  ;;  %v13568_v60 = vpop.f32.mrb[113].mxu1  ;;  %v13480_v42 = vadd.f32 %v13479_v23, %v29385_v15  ;;  %24529 = vrot.lane.b32.xlu0 %v29625_v11, %s25437_s4 }
 0x870   : > { %v13605_v3 = vmax.f32 %v13478_v49, 0.0  ;;  %v13569_v8 = vadd.f32 %v13568_v60, %v29385_v15  ;;  %24639 = vrot.lane.b32.xlu1 %v29735_v9, %s25435_s11 }
 0x871   : > { %v13606_v26 = vmax.f32 %v13480_v42, 0.0  ;;  %v29884_v17 = vpop.permute.xlu0 %24289  ;;  %v13483_v51 = vpop.f32.mrb[114].mxu0  ;;  %v13607_v49 = vmax.f32 %v13567_v39, 0.0 }
 0x872   : > { %v13935_v36 = vsel %vm13901_vm8, %v13605_v3, 0.0  ;;  %v13572_v31 = vpop.f32.mrb[114].mxu1  ;;  %v13485_v23 = vpop.f32.mrb[115].mxu0  ;;  %v13484_v10 = vadd.f32 %v13483_v51, %v29393_v37  ;;  %v13608_v30 = vmax.f32 %v13569_v8, 0.0 }
 0x873   : > { %v13936_v42 = vsel %vm13901_vm8, %v13606_v26, 0.0  ;;  %v13573_v29 = vadd.f32 %v13572_v31, %v29393_v37  ;;  %v13574_v62 = vpop.f32.mrb[115].mxu1  ;;  %24534 = vrot.lane.b32.xlu0 %v29625_v11, %s25438_s6  ;;  %v29901_v15 = vpop.permute.xlu1 %24339  ;;  %v13486_v46 = vadd.f32 %v13485_v23, %v29393_v37  ;;  %v33999_v11 = vunpack.i.l.bf16 %v29869_v33 }
 0x874   : > { %v29897_v56 = vpack.i.bf16 %v13936_v42, %v13935_v36  ;;  %v13625_v60 = vmax.f32 %v13484_v10, 0.0  ;;  %v13575_v7 = vadd.f32 %v13574_v62, %v29393_v37  ;;  %v33998_v36 = vunpack.i.h.bf16 %v29869_v33  ;;  %24644 = vrot.lane.b32.xlu1 %v29735_v9, %s25436_s30 }
 0x875   : > { %v13627_v39 = vmax.f32 %v13573_v29, 0.0  ;;  %v13489_v34 = vpop.f32.mrb[116].mxu0  ;;  %v29905_v27 = vpop.permute.xlu0 %24294  ;;  %v13937_v62 = vsel %vm13899_vm9, %v13607_v49, 0.0 }
 0x876   : > { %v29908_v31 = vadd.f32 %v13489_v34, %v29405_v61  ;;  %v13578_v51 = vpop.f32.mrb[116].mxu1  ;;  %v29915_v42 = vsel %vm14242_vm13, %v33999_v11, %v33998_v36  ;;  %v29919_v10 = vpack.c.bf16 %v13625_v60, %v13605_v3  ;;  %v13491_v8 = vpop.f32.mrb[117].mxu0  ;;  %v13628_v11 = vmax.f32 %v13575_v7, 0.0 }
 0x877   : > { %v13957_v37 = vsel %vm13899_vm9, %v13627_v39, 0.0  ;;  %v29923_v29 = vpack.c.bf16 %v13627_v39, %v13607_v49  ;;  %v13580_v34 = vpop.f32.mrb[117].mxu1  ;;  %24539 = vrot.lane.b32.xlu0 %v29627_v55, %s25435_s11  ;;  %v29933_v2 = vpop.permute.xlu1 %24344  ;;  %v13938_v39 = vsel %vm13899_vm9, %v13608_v30, 0.0 }
 0x878   : > { %34000 = vst [vmem:[#allocation61_spill] sm:$0xff] %v29919_v10  ;;  %v29927_v23 = vpack.i.bf16 %v13957_v37, %v13937_v62  ;;  %v13626_v10 = vmax.f32 %v13486_v46, 0.0  ;;  %v13645_v62 = vmax.f32 %v29908_v31, 0.0  ;;  %v13579_v37 = vadd.f32 %v13578_v51, %v29405_v61  ;;  %24649 = vrot.lane.b32.xlu1 %v29735_v9, %s25437_s4 }
 0x879   : > { %34001 = vst [vmem:[#allocation62_spill] sm:$0xff] %v29923_v29  ;;  %v13495_v49 = vpop.f32.mrb[118].mxu0  ;;  %v13955_v29 = vsel %vm13901_vm8, %v13625_v60, 0.0  ;;  %v29941_v19 = vpop.permute.xlu0 %24299  ;;  %v13958_v7 = vsel %vm13899_vm9, %v13628_v11, 0.0  ;;  %v29945_v46 = vpack.c.bf16 %v13628_v11, %v13608_v30 }
 0x87a   : > { %34002 = vst [vmem:[#allocation63_spill] sm:$0xff] %v29927_v23  ;;  %v13584_v36 = vpop.f32.mrb[118].mxu1  ;;  %v13956_v3 = vsel %vm13901_vm8, %v13626_v10, 0.0  ;;  %v29949_v24 = vpack.c.bf16 %v13626_v10, %v13606_v26  ;;  %v13497_v31 = vpop.f32.mrb[119].mxu0  ;;  %v29953_v23 = vpack.i.bf16 %v13958_v7, %v13938_v39  ;;  %v13647_v11 = vmax.f32 %v13579_v37, 0.0 }
 0x87b   : > { %34003 = vst [vmem:[#allocation64_spill] sm:$0xff] %v29945_v46  ;;  %v13586_v60 = vpop.f32.mrb[119].mxu1  ;;  %24544 = vrot.lane.b32.xlu0 %v29627_v55, %s25436_s30  ;;  %v29957_v51 = vpack.i.bf16 %v13956_v3, %v13955_v29  ;;  %v29959_v21 = vpop.permute.xlu1 %24349  ;;  %v13581_v26 = vadd.f32 %v13580_v34, %v29405_v61  ;;  %v13492_v10 = vadd.f32 %v13491_v8, %v29405_v61  ;;  %v13975_v29 = vsel %vm13901_vm8, %v13645_v62, 0.0 }
 0x87c   : > { %34004 = vst [vmem:[#allocation65_spill] sm:$0xff] %v29949_v24  ;;  %34005 = vst [vmem:[#allocation66_spill] sm:$0xff] %v29953_v23  ;;  %24654 = vrot.lane.b32.xlu1 %v29735_v9, %s25438_s6  ;;  %v13496_v61 = vadd.f32 %v13495_v49, %v29440_v28  ;;  %v13585_v8 = vadd.f32 %v13584_v36, %v29440_v28  ;;  %v13587_v39 = vadd.f32 %v13586_v60, %v29440_v28 }
 0x87d   : > { %34006 = vst [vmem:[#allocation67_spill] sm:$0xff] %v29957_v51  ;;  %v29964_v46 = vpop.permute.xlu0 %24304  ;;  %v13648_v3 = vmax.f32 %v13581_v26, 0.0  ;;  %v13646_v37 = vmax.f32 %v13492_v10, 0.0  ;;  %v13498_v7 = vadd.f32 %v13497_v31, %v29440_v28  ;;  %v13977_v9 = vsel %vm13899_vm9, %v13647_v11, 0.0 }
 0x87e   : > { %34007 = vst [vmem:[#allocation68_spill] sm:$0xff] %v29964_v46  ;;  %v24301_v49 = vunpack.i.l.bf16 %v29941_v19  ;;  %v13665_v10 = vmax.f32 %v13496_v61, 0.0  ;;  %v13667_v31 = vmax.f32 %v13585_v8, 0.0  ;;  %v13668_v30 = vmax.f32 %v13587_v39, 0.0 }
 0x87f   : > { %24549 = vrot.lane.b32.xlu0 %v29627_v55, %s25437_s4  ;;  %v29980_v24 = vpop.permute.xlu1 %24354  ;;  %v13976_v26 = vsel %vm13901_vm8, %v13646_v37, 0.0  ;;  %v13978_v28 = vsel %vm13899_vm9, %v13648_v3, 0.0  ;;  %v13666_v23 = vmax.f32 %v13498_v7, 0.0  ;;  %v33496_v25 = vunpack.i.l.bf16 %v29964_v46 }
 0x880   : > { %v29990_v36 = vpack.i.bf16 %v13976_v26, %v13975_v29  ;;  %24679 = vrot.lane.b32.xlu1 %v29741_v58, %s25435_s11  ;;  %v29996_v60 = vpack.c.bf16 %v13665_v10, %v13645_v62  ;;  %v13995_v61 = vsel %vm13901_vm8, %v13665_v10, 0.0  ;;  %v34009_v29 = vunpack.i.h.bf16 %v29964_v46 }
 0x881   : > { %v29988_v34 = vpop.permute.xlu0 %24309  ;;  %v13997_v62 = vsel %vm13899_vm9, %v13667_v31, 0.0  ;;  %v30010_v39 = vpack.c.bf16 %v13667_v31, %v13647_v11  ;;  %v30014_v8 = vpack.c.bf16 %v13668_v30, %v13648_v3  ;;  %v13996_v11 = vsel %vm13901_vm8, %v13666_v23, 0.0 }
 0x882   : > { %34008 = vst [vmem:[#allocation69_spill] sm:$0xff] %v29996_v60  ;;  %v14264_v26 = vsel %vm14242_vm13, %v34009_v29, %v24301_v49  ;;  %v30018_v7 = vpack.i.bf16 %v13997_v62, %v13977_v9  ;;  %v30028_v31 = vpack.c.bf16 %v13666_v23, %v13646_v37  ;;  %v34017_v3 = vunpack.i.h.bf16 %v29941_v19 }
 0x883   : > { %24554 = vrot.lane.b32.xlu0 %v29627_v55, %s25438_s6  ;;  %v30006_v59 = vpop.permute.xlu1 %24359  ;;  %34010 = vst [vmem:[#allocation70_spill] sm:$0xff] %v30010_v39  ;;  %v13998_v55 = vsel %vm13899_vm9, %v13668_v30, 0.0  ;;  %34011 = vst [vmem:[#allocation71_spill] sm:$0xff] %v30014_v8  ;;  %v14244_v30 = vsel %vm14242_vm13, %v33496_v25, %v34016_v53  ;;  %v30040_v62 = vpack.i.bf16 %v13996_v11, %v13995_v61  ;;  %v34022_v25 = vunpack.i.l.bf16 %v29901_v15 }
 0x884   : > { %34013 = vst [vmem:[#allocation73_spill] sm:$0xff] %v30018_v7  ;;  %24684 = vrot.lane.b32.xlu1 %v29741_v58, %s25436_s30  ;;  %v30022_v29 = vpack.i.bf16 %v13998_v55, %v13978_v28  ;;  %34015 = vst [vmem:[#allocation75_spill] sm:$0xff] %v30028_v31  ;;  %v14265_v9 = vsel %vm14242_vm13, %v24301_v49, %v34017_v3  ;;  %v33499_v23 = vunpack.i.h.bf16 %v30006_v59  ;;  %v24361_v37 = vunpack.i.l.bf16 %v30006_v59 }
 0x885   : > { %v30016_v10 = vpop.permute.xlu0 %24314  ;;  %v30045_v38 = vpack.c.bf16 %v14265_v9, %v29915_v42  ;;  %v24311_v49 = vunpack.i.l.bf16 %v29988_v34  ;;  %v30053_v53 = vpack.c.bf16 %v14264_v26, %v14244_v30  ;;  %v34021_v9 = vunpack.i.h.bf16 %v29901_v15 }
 0x886   : > { %34012 = vst [vmem:[#allocation72_spill] sm:$0xff] %v30016_v10  ;;  %34014 = vst [vmem:[#allocation74_spill] sm:$0xff] %v30022_v29  ;;  %v14305_v30 = vsel %vm14242_vm13, %v24361_v37, %v33499_v23  ;;  %v34023_v3 = vmov %v34022_v25  ;;  %v34084_v41 = vunpack.i.h.bf16 %v30006_v59 }
 0x887   : > { %24579 = vrot.lane.b32.xlu0 %v29751_v22, %s25435_s11  ;;  %v30038_v28 = vpop.permute.xlu1 %24364  ;;  %34019 = vst [vmem:[#allocation77_spill] sm:$0xff] %v30045_v38  ;;  %34020 = vst [vmem:[#allocation78_spill] sm:$0xff] %v30053_v53  ;;  %21048 = vmatprep.subr.bf16.mxu0 %v30045_v38  ;;  %v14285_v26 = vsel %vm14242_vm13, %v34022_v25, %v34021_v9  ;;  %v34026_v38 = vunpack.i.h.bf16 %v29875_v20  ;;  %v34032_v25 = vunpack.i.h.bf16 %v30016_v10 }
 0x888   : > { %34018 = vst [vmem:[#allocation76_spill] sm:$0xff] %v30038_v28  ;;  %24689 = vrot.lane.b32.xlu1 %v29741_v58, %s25437_s4  ;;  %v33502_v61 = vunpack.i.h.bf16 %v30038_v28  ;;  %v33505_v11 = vunpack.i.l.bf16 %v30038_v28  ;;  %21050 = vmatpush1.bf16.msra.mxu0 %v30053_v53  ;;  %v30081_v31 = vpack.c.bf16 %v14305_v30, %v14285_v26 }
 0x889   : > { %v30042_v55 = vpop.permute.xlu0 %24319 }
 0x88a   : > { %v14304_v42 = vsel %vm14242_vm13, %v33502_v61, %v24361_v37  ;;  %v14284_v39 = vsel %vm14242_vm13, %v33505_v11, %v34023_v3  ;;  %34024 = vst [vmem:[#allocation79_spill] sm:$0xff] %v30081_v31  ;;  %v34027_v37 = vunpack.i.l.bf16 %v29875_v20  ;;  %v34029_v3 = vunpack.i.l.bf16 %v30016_v10  ;;  %21052 = vmatprep.subr.bf16.mxu0 %v30081_v31  ;;  %v34954_v12 = vld [vmem:[#allocation71_spill] sm:$0xff] }
 0x88b   : > { %24584 = vrot.lane.b32.xlu0 %v29751_v22, %s25436_s30  ;;  %v30070_v8 = vpop.permute.xlu1 %24369  ;;  %v30100_v30 = vpack.c.bf16 %v14304_v42, %v14284_v39  ;;  %v34031_v11 = vunpack.i.h.bf16 %v29988_v34  ;;  %v24321_v53 = vunpack.i.l.bf16 %v30042_v55  ;;  %v34035_v42 = vunpack.i.h.bf16 %v29933_v2 }
 0x88c   : > { %v24371_v23 = vunpack.i.l.bf16 %v30070_v8  ;;  %24694 = vrot.lane.b32.xlu1 %v29741_v58, %s25438_s6  ;;  %v14568_v61 = vsel %vm14565_vm14, %v34027_v37, %v34026_v38  ;;  %v34028_v28 = vmov %v34027_v37  ;;  %v14587_v38 = vsel %vm14565_vm14, %v34032_v25, %v24311_v49 }
 0x88d   : > { %v30084_v9 = vpop.permute.xlu0 %24324  ;;  %v14567_v26 = vsel %vm14565_vm14, %v34029_v3, %v34028_v28  ;;  %34030 = vst [vmem:[#allocation81_spill] sm:$0xff] %v30100_v30  ;;  %v14588_v58 = vsel %vm14565_vm14, %v24311_v49, %v34031_v11  ;;  %21054 = vmatpush1.bf16.msra.mxu0 %v30100_v30  ;;  %v34036_v31 = vunpack.i.l.bf16 %v29933_v2  ;;  %v34037_v25 = vunpack.i.h.bf16 %v30070_v8 }
 0x88e   : > { %34025 = vst [vmem:[#allocation80_spill] sm:$0xff] %v30084_v9  ;;  %v30112_v28 = vpack.c.bf16 %v14588_v58, %v14568_v61  ;;  %v24291_v11 = vunpack.i.l.bf16 %v29884_v17  ;;  %v30144_v30 = vpack.c.bf16 %v14587_v38, %v14567_v26  ;;  %v33524_v46 = vunpack.i.l.bf16 %v30084_v9 }
 0x88f   : > { %24589 = vrot.lane.b32.xlu0 %v29751_v22, %s25437_s4  ;;  %v30114_v3 = vpop.permute.xlu1 %24374  ;;  %v14608_v49 = vsel %vm14565_vm14, %v34036_v31, %v34035_v42  ;;  %v14628_v37 = vsel %vm14565_vm14, %v24371_v23, %v34037_v25 }
 0x890   : > { %34033 = vst [vmem:[#allocation82_spill] sm:$0xff] %v30112_v28  ;;  %34034 = vst [vmem:[#allocation83_spill] sm:$0xff] %v30114_v3  ;;  %21056 = vmatprep.subr.bf16.mxu0 %v30112_v28  ;;  %24719 = vrot.lane.b32.xlu1 %v29785_v0, %s25435_s11  ;;  %v30133_v39 = vpack.c.bf16 %v14628_v37, %v14608_v49  ;;  %v34039_v42 = vunpack.i.l.bf16 %v30114_v3  ;;  %v34040_v10 = vunpack.i.h.bf16 %v30114_v3  ;;  %v24351_v49 = vunpack.i.l.bf16 %v29959_v21 }
 0x891   : > { %v30127_v61 = vpop.permute.xlu0 %24329  ;;  %34041 = vst [vmem:[#allocation85_spill] sm:$0xff] %v30144_v30  ;;  %v33527_v28 = vunpack.i.h.bf16 %v30084_v9  ;;  %21058 = vmatpush1.bf16.msra.mxu0 %v30144_v30 }
 0x892   : > { %34038 = vst [vmem:[#allocation84_spill] sm:$0xff] %v30133_v39  ;;  %v14607_v25 = vsel %vm14565_vm14, %v34039_v42, %v34036_v31  ;;  %v14627_v58 = vsel %vm14565_vm14, %v34040_v10, %v24371_v23  ;;  %21060 = vmatprep.subr.bf16.mxu0 %v30133_v39  ;;  %v34045_v42 = vunpack.i.h.bf16 %v29884_v17  ;;  %v24331_v30 = vunpack.i.l.bf16 %v30127_v61 }
 0x893   : > { %24594 = vrot.lane.b32.xlu0 %v29751_v22, %s25438_s6  ;;  %v30152_v60 = vpop.permute.xlu1 %24379  ;;  %v30157_v23 = vpack.c.bf16 %v14627_v58, %v14607_v25  ;;  %v34043_v22 = vunpack.i.h.bf16 %v30042_v55  ;;  %v14890_v25 = vsel %vm14888_vm15, %v33524_v46, %v24291_v11 }
 0x894   : > { %v33522_v31 = vunpack.i.h.bf16 %v30152_v60  ;;  %v24381_v10 = vunpack.i.l.bf16 %v30152_v60  ;;  %24724 = vrot.lane.b32.xlu1 %v29785_v0, %s25436_s30  ;;  %v14891_v37 = vsel %vm14888_vm15, %v24291_v11, %v34045_v42  ;;  %v34048_v11 = vunpack.i.h.bf16 %v29959_v21 }
 0x895   : > { %34042 = vst [vmem:[#allocation86_spill] sm:$0xff] %v30157_v23  ;;  %v14911_v26 = vsel %vm14888_vm15, %v24321_v53, %v34043_v22  ;;  %v30162_v38 = vpop.permute.xlu0 %24334  ;;  %v14910_v22 = vsel %vm14888_vm15, %v33527_v28, %v24321_v53  ;;  %21062 = vmatpush1.bf16.msra.mxu0 %v30157_v23  ;;  %v34053_v53 = vunpack.i.h.bf16 %v29905_v27 }
 0x896   : > { %34044 = vst [vmem:[#allocation87_spill] sm:$0xff] %v30162_v38  ;;  %v14951_v58 = vsel %vm14888_vm15, %v24381_v10, %v33522_v31  ;;  %v30182_v3 = vpack.c.bf16 %v14911_v26, %v14891_v37  ;;  %v14931_v46 = vsel %vm14888_vm15, %v24351_v49, %v34048_v11  ;;  %v24296_v26 = vunpack.i.l.bf16 %v29905_v27 }
 0x897   : > { %24619 = vrot.lane.b32.xlu0 %v29695_v13, %s25435_s11  ;;  %v30184_v42 = vpop.permute.xlu1 %24384  ;;  %v30199_v37 = vpack.c.bf16 %v14951_v58, %v14931_v46  ;;  %v30208_v39 = vpack.c.bf16 %v14910_v22, %v14890_v25  ;;  %v24356_v46 = vunpack.i.l.bf16 %v29980_v24  ;;  %v34052_v22 = vunpack.i.h.bf16 %v30127_v61 }
 0x898   : > { %34046 = vst [vmem:[#allocation88_spill] sm:$0xff] %v30182_v3  ;;  %34047 = vst [vmem:[#allocation89_spill] sm:$0xff] %v30184_v42  ;;  %v33532_v31 = vunpack.i.h.bf16 %v30184_v42  ;;  %v33531_v29 = vunpack.i.l.bf16 %v30184_v42  ;;  %21064 = vmatprep.subr.bf16.mxu0 %v30182_v3  ;;  %24729 = vrot.lane.b32.xlu1 %v29785_v0, %s25437_s4  ;;  %v33543_v3 = vunpack.i.l.bf16 %v30162_v38  ;;  %v15214_v58 = vsel %vm15211_vm0, %v24296_v26, %v34053_v53 }
 0x899   : > { %v30193_v9 = vpop.permute.xlu0 %24419  ;;  %34049 = vst [vmem:[#allocation90_spill] sm:$0xff] %v30199_v37  ;;  %34050 = vst [vmem:[#allocation91_spill] sm:$0xff] %v30208_v39  ;;  %21066 = vmatpush1.bf16.msra.mxu0 %v30208_v39 }
 0x89a   : > { %v14930_v28 = vsel %vm14888_vm15, %v33531_v29, %v24351_v49  ;;  %v14950_v11 = vsel %vm14888_vm15, %v33532_v31, %v24381_v10  ;;  %v15234_v29 = vsel %vm15211_vm0, %v24331_v30, %v34052_v22  ;;  %21068 = vmatprep.subr.bf16.mxu0 %v30199_v37  ;;  %v34054_v22 = vunpack.i.h.bf16 %v30162_v38 }
 0x89b   : > { %24624 = vrot.lane.b32.xlu0 %v29695_v13, %s25436_s30  ;;  %v30216_v23 = vpop.permute.xlu1 %24389  ;;  %v30221_v25 = vpack.c.bf16 %v14950_v11, %v14930_v28  ;;  %v15213_v11 = vsel %vm15211_vm0, %v33543_v3, %v24296_v26 }
 0x89c   : > { %v33538_v49 = vunpack.i.h.bf16 %v30216_v23  ;;  %v24391_v10 = vunpack.i.l.bf16 %v30216_v23  ;;  %24734 = vrot.lane.b32.xlu1 %v29785_v0, %s25438_s6  ;;  %v15233_v37 = vsel %vm15211_vm0, %v34054_v22, %v24331_v30  ;;  %v30245_v0 = vpack.c.bf16 %v15234_v29, %v15214_v58 }
 0x89d   : > { %34051 = vst [vmem:[#allocation92_spill] sm:$0xff] %v30221_v25  ;;  %v30226_v31 = vpop.permute.xlu0 %24424  ;;  %21070 = vmatpush1.bf16.msra.mxu0 %v30221_v25  ;;  %v30268_v58 = vpack.c.bf16 %v15233_v37, %v15213_v11 }
 0x89e   : > { %v15274_v28 = vsel %vm15211_vm0, %v24391_v10, %v33538_v49  ;;  %34055 = vst [vmem:[#allocation93_spill] sm:$0xff] %v30245_v0  ;;  %v34057_v49 = vunpack.i.h.bf16 %v29980_v24  ;;  %21072 = vmatprep.subr.bf16.mxu0 %v30245_v0 }
 0x89f   : > { %24629 = vrot.lane.b32.xlu0 %v29695_v13, %s25437_s4  ;;  %v30247_v39 = vpop.permute.xlu1 %24394  ;;  %34059 = vst [vmem:[#allocation96_spill] sm:$0xff] %v30268_v58 }
 0x8a0   : > { %34056 = vst [vmem:[#allocation94_spill] sm:$0xff] %v30247_v39  ;;  %v33542_v53 = vunpack.i.h.bf16 %v30247_v39  ;;  %v33541_v42 = vunpack.i.l.bf16 %v30247_v39  ;;  %v15254_v7 = vsel %vm15211_vm0, %v24356_v46, %v34057_v49  ;;  %24754 = vrot.lane.b32.xlu1 %v29808_v18, %s25435_s11 }
 0x8a1   : > { %v30255_v16 = vpop.permute.xlu0 %24429  ;;  %v30260_v29 = vpack.c.bf16 %v15274_v28, %v15254_v7  ;;  %21074 = vmatpush1.bf16.msra.mxu0 %v30268_v58 }
 0x8a2   : > { %v15253_v30 = vsel %vm15211_vm0, %v33541_v42, %v24356_v46  ;;  %v15273_v26 = vsel %vm15211_vm0, %v33542_v53, %v24391_v10  ;;  %v33547_v46 = vunpack.i.h.bf16 %v30193_v9 }
 0x8a3   : > { %34058 = vst [vmem:[#allocation95_spill] sm:$0xff] %v30260_v29  ;;  %24634 = vrot.lane.b32.xlu0 %v29695_v13, %s25438_s6  ;;  %v24400_v49 = vpop.permute.xlu1 %24399  ;;  %v30273_v22 = vpack.c.bf16 %v15273_v26, %v15253_v30  ;;  %21076 = vmatprep.subr.bf16.mxu0 %v30260_v29  ;;  %v24421_v13 = vunpack.i.l.bf16 %v30193_v9  ;;  %v30298_v30 = vld [vmem:[#allocation13 + $0x8] sm:$0x77] }
 0x8a4   : > { %24759 = vrot.lane.b32.xlu1 %v29808_v18, %s25436_s30  ;;  %v24402_v29 = vunpack.i.h.bf16 %v24400_v49  ;;  %v24401_v0 = vunpack.i.l.bf16 %v24400_v49 }
 0x8a5   : > { %34060 = vst [vmem:[#allocation97_spill] sm:$0xff] %v30273_v22  ;;  %v30275_v7 = vpop.permute.xlu0 %24434  ;;  %21078 = vmatpush1.bf16.msra.mxu0 %v30273_v22  ;;  %v14249_v53 = vsel %vm14242_vm13, %v24421_v13, %v33547_v46 }
 0x8a6   : > { %21125 = vmatprep.subr.msk.bf16.mxu0 %vm29421_vm10, %v29548_v47  ;;  %v14247_v22 = vsel %vm14242_vm13, %v24401_v0, %v24402_v29  ;;  %v14248_v49 = vsel %vm14242_vm13, %v24402_v29, %v24421_v13 }
 0x8a7   : > { %24659 = vrot.lane.b32.xlu0 %v29717_v50, %s25435_s11  ;;  %v30282_v37 = vpop.permute.xlu1 %24404 }
 0x8a8   : > { %24764 = vrot.lane.b32.xlu1 %v29808_v18, %s25437_s4  ;;  %15445 = vmatmul.mubr.f32.vlgmr.msra.gmra.mrb[120].mxu0 %v30298_v30 }
 0x8a9   : > { %v30287_v10 = vpop.permute.xlu0 %24459  ;;  %21128 = vmatpush1.bf16.msk.msra.mxu0 %vm29421_vm10, %v29552_v1  ;;  %19633 = vmatprep.mubr.msk.f32.mxu0 %vm15377_vm12, %v29637_v48  ;;  %v34063_v1 = vunpack.i.h.bf16 %v29869_v33  ;;  %v34119_v48 = vunpack.i.h.bf16 %v30152_v60 }
 0x8aa   : > { %v33546_v28 = vunpack.i.h.bf16 %v30287_v10  ;;  %v24461_v11 = vunpack.i.l.bf16 %v30287_v10  ;;  %21131 = vmatprep.subr.msk.bf16.mxu0 %vm29421_vm10, %v29595_v4 }
 0x8ab   : > { %24664 = vrot.lane.b32.xlu0 %v29717_v50, %s25436_s30  ;;  %v30301_v26 = vpop.permute.xlu1 %24409 }
 0x8ac   : > { %v14269_v42 = vsel %vm14242_vm13, %v24461_v11, %v33546_v28  ;;  %24769 = vrot.lane.b32.xlu1 %v29808_v18, %s25438_s6 }
 0x8ad   : > { %v30312_v3 = vpop.permute.xlu0 %24464  ;;  %v30319_v47 = vpack.c.bf16 %v14269_v42, %v14249_v53  ;;  %21134 = vmatpush1.bf16.msk.msra.mxu0 %vm29421_vm10, %v29599_v54  ;;  %v14246_v54 = vsel %vm14242_vm13, %v34063_v1, %v24401_v0  ;;  %v33564_v1 = vunpack.i.l.bf16 %v30282_v37 }
 0x8af   : > { %34061 = vst [vmem:[#allocation98_spill] sm:$0xff] %v30319_v47  ;;  %24669 = vrot.lane.b32.xlu0 %v29717_v50, %s25437_s4  ;;  %v30325_v28 = vpop.permute.xlu1 %24414  ;;  %21136 = vmatprep.subr.bf16.mxu0 %v30319_v47  ;;  %v34064_v47 = vunpack.i.h.bf16 %v29941_v19 }
 0x8b0   : > { %34062 = vst [vmem:[#allocation99_spill] sm:$0xff] %v30325_v28  ;;  %24789 = vrot.lane.b32.xlu1 %v29831_v43, %s25435_s11 }
 0x8b1   : > { %v30330_v46 = vpop.permute.xlu0 %24469 }
 0x8b3   : > { %24674 = vrot.lane.b32.xlu0 %v29717_v50, %s25438_s6  ;;  %v24440_v18 = vpop.permute.xlu1 %24439 }
 0x8b4   : > { %v24442_v42 = vunpack.i.h.bf16 %v24440_v18  ;;  %v24441_v53 = vunpack.i.l.bf16 %v24440_v18  ;;  %24794 = vrot.lane.b32.xlu1 %v29831_v43, %s25436_s30 }
 0x8b5   : > { %v30337_v4 = vpop.permute.xlu0 %24474 }
 0x8b6   : > { %v14266_v50 = vsel %vm14242_vm13, %v34064_v47, %v24441_v53  ;;  %v14267_v58 = vsel %vm14242_vm13, %v24441_v53, %v24442_v42  ;;  %v14268_v18 = vsel %vm14242_vm13, %v24442_v42, %v24461_v11  ;;  %v33568_v11 = vunpack.i.l.bf16 %v30301_v26 }
 0x8b7   : > { %24699 = vrot.lane.b32.xlu0 %v29743_v35, %s25435_s11  ;;  %v30354_v33 = vpack.c.bf16 %v14267_v58, %v14247_v22  ;;  %v30356_v0 = vpack.c.bf16 %v14268_v18, %v14248_v49  ;;  %v30358_v39 = vpop.permute.xlu1 %24444  ;;  %v30360_v29 = vpack.c.bf16 %v14266_v50, %v14246_v54  ;;  %v34068_v58 = vunpack.i.h.bf16 %v29988_v34 }
 0x8b8   : > { %v33569_v19 = vunpack.i.l.bf16 %v30358_v39  ;;  %24799 = vrot.lane.b32.xlu1 %v29831_v43, %s25437_s4  ;;  %v34069_v54 = vunpack.i.h.bf16 %v29875_v20  ;;  %v34071_v20 = vunpack.i.h.bf16 %v30042_v55  ;;  %v34072_v18 = vunpack.i.h.bf16 %v29884_v17 }
 0x8b9   : > { %34065 = vst [vmem:[#allocation100_spill] sm:$0xff] %v30354_v33  ;;  %34066 = vst [vmem:[#allocation101_spill] sm:$0xff] %v30356_v0  ;;  %v30363_v47 = vpop.permute.xlu0 %24479  ;;  %21092 = vmatprep.subr.bf16.mxu1 %v30354_v33  ;;  %21138 = vmatpush1.bf16.msra.mxu0 %v30356_v0  ;;  %v34073_v17 = vunpack.i.h.bf16 %v30127_v61  ;;  %v34079_v33 = vunpack.i.h.bf16 %v30287_v10 }
 0x8ba   : > { %34067 = vst [vmem:[#allocation102_spill] sm:$0xff] %v30360_v29  ;;  %v14589_v22 = vsel %vm14565_vm14, %v34068_v58, %v33569_v19  ;;  %21094 = vmatpush1.bf16.msra.mxu1 %v30360_v29  ;;  %v14569_v13 = vsel %vm14565_vm14, %v34069_v54, %v33564_v1  ;;  %v14892_v58 = vsel %vm14888_vm15, %v34072_v18, %v33568_v11  ;;  %v33567_v54 = vunpack.i.l.bf16 %v30325_v28 }
 0x8bb   : > { %v30381_v42 = vpop.permute.xlu1 %24449  ;;  %24704 = vrot.lane.b32.xlu0 %v29743_v35, %s25436_s30  ;;  %v30388_v49 = vpack.c.bf16 %v14589_v22, %v14569_v13  ;;  %v34078_v11 = vunpack.i.h.bf16 %v30193_v9  ;;  %v33585_v25 = vunpack.i.h.bf16 %v30363_v47  ;;  %v24481_v38 = vunpack.i.l.bf16 %v30363_v47 }
 0x8bc   : > { %v33565_v34 = vunpack.i.l.bf16 %v30381_v42  ;;  %24804 = vrot.lane.b32.xlu1 %v29831_v43, %s25438_s6  ;;  %v34101_v6 = vunpack.i.h.bf16 %v30381_v42 }
 0x8bd   : > { %v30386_v53 = vpop.permute.xlu0 %24484  ;;  %34070 = vst [vmem:[#allocation103_spill] sm:$0xff] %v30388_v49 }
 0x8be   : > { %v14912_v50 = vsel %vm14888_vm15, %v34071_v20, %v33565_v34  ;;  %v34074_v20 = vunpack.i.h.bf16 %v29905_v27 }
 0x8bf   : > { %v30403_v1 = vpop.permute.xlu1 %24454  ;;  %24709 = vrot.lane.b32.xlu0 %v29743_v35, %s25437_s4  ;;  %v30410_v55 = vpack.c.bf16 %v14912_v50, %v14892_v58 }
 0x8c0   : > { %v33566_v43 = vunpack.i.l.bf16 %v30403_v1  ;;  %24824 = vrot.lane.b32.xlu1 %v29853_v44, %s25435_s11  ;;  %v15215_v18 = vsel %vm15211_vm0, %v34074_v20, %v33567_v54 }
 0x8c1   : > { %v30408_v22 = vpop.permute.xlu0 %24489 }
 0x8c2   : > { %v15235_v13 = vsel %vm15211_vm0, %v34073_v17, %v33566_v43 }
 0x8c3   : > { %v30424_v34 = vpop.permute.xlu1 %24559  ;;  %24714 = vrot.lane.b32.xlu0 %v29743_v35, %s25438_s6  ;;  %v30430_v58 = vpack.c.bf16 %v15235_v13, %v15215_v18 }
 0x8c4   : > { %24829 = vrot.lane.b32.xlu1 %v29853_v44, %s25436_s30  ;;  %v33580_v18 = vunpack.i.l.bf16 %v30424_v34 }
 0x8c5   : > { %v30428_v50 = vpop.permute.xlu0 %24494 }
 0x8c6   : > { %v14250_v19 = vsel %vm14242_vm13, %v34078_v11, %v33580_v18 }
 0x8c7   : > { %v30434_v61 = vpop.permute.xlu1 %24564  ;;  %24739 = vrot.lane.b32.xlu0 %v29787_v32, %s25435_s11 }
 0x8c8   : > { %34075 = vst [vmem:[#allocation104_spill] sm:$0xff] %v30434_v61  ;;  %24834 = vrot.lane.b32.xlu1 %v29853_v44, %s25437_s4 }
 0x8c9   : > { %v30438_v27 = vpop.permute.xlu0 %24499 }
 0x8cb   : > { %v30442_v17 = vpop.permute.xlu1 %24569  ;;  %24744 = vrot.lane.b32.xlu0 %v29787_v32, %s25436_s30 }
 0x8cc   : > { %34076 = vst [vmem:[#allocation105_spill] sm:$0xff] %v30442_v17  ;;  %24839 = vrot.lane.b32.xlu1 %v29853_v44, %s25438_s6 }
 0x8cd   : > { %v30446_v35 = vpop.permute.xlu0 %24504 }
 0x8cf   : > { %v30450_v13 = vpop.permute.xlu1 %24574  ;;  %24749 = vrot.lane.b32.xlu0 %v29787_v32, %s25437_s4 }
 0x8d0   : > { %34077 = vst [vmem:[#allocation106_spill] sm:$0xff] %v30450_v13  ;;  %24864 = vrot.lane.b32.xlu1 %v29897_v56, %s25435_s11 }
 0x8d1   : > { %v30454_v20 = vpop.permute.xlu0 %24509 }
 0x8d3   : > { %v30459_v43 = vpop.permute.xlu1 %24599  ;;  %24774 = vrot.lane.b32.xlu0 %v29814_v5, %s25435_s11 }
 0x8d4   : > { %v33581_v54 = vunpack.i.l.bf16 %v30459_v43  ;;  %24869 = vrot.lane.b32.xlu1 %v29897_v56, %s25436_s30 }
 0x8d5   : > { %v30464_v44 = vpop.permute.xlu0 %24514 }
 0x8d6   : > { %v14270_v0 = vsel %vm14242_vm13, %v34079_v33, %v33581_v54  ;;  %v14287_v54 = vsel %vm14242_vm13, %v24481_v38, %v33585_v25 }
 0x8d7   : > { %v30480_v29 = vpack.c.bf16 %v14270_v0, %v14250_v19  ;;  %v30482_v13 = vpop.permute.xlu1 %24604  ;;  %24779 = vrot.lane.b32.xlu0 %v29814_v5, %s25436_s30  ;;  %v34082_v0 = vunpack.i.h.bf16 %v29901_v15  ;;  %v34085_v15 = vunpack.i.h.bf16 %v30358_v39 }
 0x8d8   : > { %34081 = vst [vmem:[#allocation108_spill] sm:$0xff] %v30482_v13  ;;  %24874 = vrot.lane.b32.xlu1 %v29897_v56, %s25437_s4 }
 0x8d9   : > { %34080 = vst [vmem:[#allocation107_spill] sm:$0xff] %v30480_v29  ;;  %v30487_v11 = vpop.permute.xlu0 %24519  ;;  %v14286_v19 = vsel %vm14242_vm13, %v34082_v0, %v24481_v38  ;;  %v34086_v0 = vunpack.i.l.bf16 %v30358_v39 }
 0x8da   : > { %v33586_v10 = vunpack.i.h.bf16 %v30487_v11  ;;  %v24521_v33 = vunpack.i.l.bf16 %v30487_v11 }
 0x8db   : > { %v30500_v9 = vpop.permute.xlu1 %24609  ;;  %24784 = vrot.lane.b32.xlu0 %v29814_v5, %s25437_s4  ;;  %v14590_v18 = vsel %vm14565_vm14, %v34086_v0, %v34085_v15  ;;  %v34095_v0 = vunpack.i.h.bf16 %v30301_v26 }
 0x8dc   : > { %34083 = vst [vmem:[#allocation109_spill] sm:$0xff] %v30500_v9  ;;  %v14306_v17 = vsel %vm14242_vm13, %v34084_v41, %v24521_v33  ;;  %v14307_v14 = vsel %vm14242_vm13, %v24521_v33, %v33586_v10  ;;  %24879 = vrot.lane.b32.xlu1 %v29957_v51, %s25435_s11  ;;  %v34089_v10 = vunpack.i.h.bf16 %v30282_v37  ;;  %v34090_v9 = vunpack.i.l.bf16 %v30282_v37 }
 0x8dd   : > { %v30515_v38 = vpack.c.bf16 %v14307_v14, %v14287_v54  ;;  %v30517_v25 = vpop.permute.xlu0 %24524  ;;  %v30519_v59 = vpack.c.bf16 %v14306_v17, %v14286_v19  ;;  %v24486_v54 = vunpack.i.l.bf16 %v30386_v53 }
 0x8de   : > { %v24526_v33 = vunpack.i.l.bf16 %v30517_v25  ;;  %v14570_v29 = vsel %vm14565_vm14, %v34090_v9, %v34089_v10  ;;  %v34093_v10 = vunpack.i.h.bf16 %v30517_v25  ;;  %v34100_v9 = vunpack.i.l.bf16 %v30312_v3 }
 0x8df   : > { %34087 = vst [vmem:[#allocation110_spill] sm:$0xff] %v30515_v38  ;;  %34088 = vst [vmem:[#allocation111_spill] sm:$0xff] %v30519_v59  ;;  %21096 = vmatprep.subr.bf16.mxu1 %v30515_v38  ;;  %v30534_v19 = vpack.c.bf16 %v14590_v18, %v14570_v29  ;;  %v30536_v15 = vpop.permute.xlu1 %24614  ;;  %24809 = vrot.lane.b32.xlu0 %v29837_v63, %s25435_s11  ;;  %v34094_v18 = vunpack.i.h.bf16 %v30386_v53 }
 0x8e0   : > { %34092 = vst [vmem:[#allocation113_spill] sm:$0xff] %v30536_v15  ;;  %v14630_v14 = vsel %vm14565_vm14, %v24526_v33, %v34093_v10  ;;  %21098 = vmatpush1.bf16.msra.mxu1 %v30519_v59  ;;  %24884 = vrot.lane.b32.xlu1 %v29957_v51, %s25436_s30  ;;  %v34096_v10 = vunpack.i.l.bf16 %v30301_v26  ;;  %v34097_v59 = vunpack.i.h.bf16 %v30070_v8 }
 0x8e1   : > { %34091 = vst [vmem:[#allocation112_spill] sm:$0xff] %v30534_v19  ;;  %v30547_v17 = vpop.permute.xlu0 %24529  ;;  %21100 = vmatprep.subr.bf16.mxu1 %v30534_v19  ;;  %v14610_v41 = vsel %vm14565_vm14, %v24486_v54, %v34094_v18  ;;  %v34099_v18 = vunpack.i.h.bf16 %v30312_v3 }
 0x8e2   : > { %v14893_v38 = vsel %vm14888_vm15, %v34096_v10, %v34095_v0  ;;  %v14629_v15 = vsel %vm14565_vm14, %v34097_v59, %v24526_v33  ;;  %v30565_v61 = vpack.c.bf16 %v14630_v14, %v14610_v41  ;;  %v34102_v0 = vunpack.i.l.bf16 %v30381_v42 }
 0x8e3   : > { %v30567_v19 = vpop.permute.xlu1 %24639  ;;  %24814 = vrot.lane.b32.xlu0 %v29837_v63, %s25436_s30  ;;  %v14592_v29 = vsel %vm14565_vm14, %v34100_v9, %v34099_v18  ;;  %v24531_v41 = vunpack.i.l.bf16 %v30547_v17  ;;  %v34103_v9 = vunpack.i.h.bf16 %v29933_v2  ;;  %v24501_v59 = vunpack.i.l.bf16 %v30438_v27 }
 0x8e4   : > { %34098 = vst [vmem:[#allocation114_spill] sm:$0xff] %v30565_v61  ;;  %v14913_v8 = vsel %vm14888_vm15, %v34102_v0, %v34101_v6  ;;  %21102 = vmatpush1.bf16.msra.mxu1 %v30388_v49  ;;  %24889 = vrot.lane.b32.xlu1 %v29957_v51, %s25437_s4  ;;  %v24491_v6 = vunpack.i.l.bf16 %v30408_v22  ;;  %v34105_v10 = vunpack.i.h.bf16 %v30226_v31  ;;  %v34106_v2 = vunpack.i.l.bf16 %v30226_v31 }
 0x8e5   : > { %v30584_v33 = vpop.permute.xlu0 %24534  ;;  %v14609_v18 = vsel %vm14565_vm14, %v34103_v9, %v24486_v54  ;;  %21104 = vmatprep.subr.bf16.mxu1 %v30565_v61  ;;  %v30605_v9 = vpack.c.bf16 %v14913_v8, %v14893_v38  ;;  %v34111_v38 = vunpack.i.h.bf16 %v30325_v28  ;;  %v34112_v8 = vunpack.i.l.bf16 %v30325_v28 }
 0x8e6   : > { %v30598_v14 = vpack.c.bf16 %v14629_v15, %v14609_v18  ;;  %v14572_v54 = vsel %vm14565_vm14, %v34106_v2, %v34105_v10  ;;  %v34110_v18 = vunpack.i.h.bf16 %v30547_v17  ;;  %v34117_v51 = vunpack.i.h.bf16 %v30363_v47 }
 0x8e7   : > { %34107 = vst [vmem:[#allocation116_spill] sm:$0xff] %v30605_v9  ;;  %v30607_v13 = vpop.permute.xlu1 %24644  ;;  %24819 = vrot.lane.b32.xlu0 %v29837_v63, %s25437_s4  ;;  %v30611_v61 = vpack.c.bf16 %v14592_v29, %v14572_v54  ;;  %v15216_v2 = vsel %vm15211_vm0, %v34112_v8, %v34111_v38  ;;  %v34113_v29 = vunpack.i.h.bf16 %v30403_v1  ;;  %v34114_v54 = vunpack.i.l.bf16 %v30403_v1 }
 0x8e8   : > { %34104 = vst [vmem:[#allocation115_spill] sm:$0xff] %v30598_v14  ;;  %34108 = vst [vmem:[#allocation117_spill] sm:$0xff] %v30607_v13  ;;  %v14953_v49 = vsel %vm14888_vm15, %v24531_v41, %v34110_v18  ;;  %21106 = vmatpush1.bf16.msra.mxu1 %v30598_v14  ;;  %24894 = vrot.lane.b32.xlu1 %v29990_v36, %s25435_s11  ;;  %v34115_v14 = vunpack.i.h.bf16 %v29959_v21  ;;  %v34116_v38 = vunpack.i.h.bf16 %v30408_v22  ;;  %v24536_v60 = vunpack.i.l.bf16 %v30584_v33 }
 0x8e9   : > { %34109 = vst [vmem:[#allocation118_spill] sm:$0xff] %v30611_v61  ;;  %v30619_v10 = vpop.permute.xlu0 %24539  ;;  %v15236_v15 = vsel %vm15211_vm0, %v34114_v54, %v34113_v29  ;;  %21108 = vmatprep.subr.bf16.mxu1 %v30605_v9  ;;  %v14288_v29 = vsel %vm14242_vm13, %v34117_v51, %v24501_v59  ;;  %v34118_v54 = vunpack.i.h.bf16 %v30438_v27  ;;  %v14952_v9 = vsel %vm14888_vm15, %v34119_v48, %v24531_v41 }
 0x8ea   : > { %v24541_v0 = vunpack.i.l.bf16 %v30619_v10  ;;  %v14932_v13 = vsel %vm14888_vm15, %v34115_v14, %v24491_v6  ;;  %v14933_v8 = vsel %vm14888_vm15, %v24491_v6, %v34116_v38  ;;  %v34121_v14 = vunpack.i.h.bf16 %v30487_v11 }
 0x8eb   : > { %v14289_v18 = vsel %vm14242_vm13, %v24501_v59, %v34118_v54  ;;  %v30651_v28 = vpack.c.bf16 %v14953_v49, %v14933_v8  ;;  %v30653_v21 = vpop.permute.xlu1 %24649  ;;  %v34122_v47 = vunpack.i.h.bf16 %v30619_v10  ;;  %24844 = vrot.lane.b32.xlu0 %v29863_v40, %s25435_s11  ;;  %v24506_v38 = vunpack.i.l.bf16 %v30446_v35 }
 0x8ec   : > { %v14308_v6 = vsel %vm14242_vm13, %v34121_v14, %v24541_v0  ;;  %21110 = vmatpush1.bf16.msra.mxu1 %v30410_v55  ;;  %24899 = vrot.lane.b32.xlu1 %v29990_v36, %s25436_s30 }
 0x8ed   : > { %34120 = vst [vmem:[#allocation119_spill] sm:$0xff] %v30651_v28  ;;  %v14309_v51 = vsel %vm14242_vm13, %v24541_v0, %v34122_v47  ;;  %v30667_v49 = vpack.c.bf16 %v14308_v6, %v14288_v29  ;;  %v30670_v11 = vpop.permute.xlu0 %24544  ;;  %21112 = vmatprep.subr.bf16.mxu1 %v30651_v28  ;;  %v34126_v29 = vunpack.i.h.bf16 %v30358_v39  ;;  %v24496_v6 = vunpack.i.l.bf16 %v30428_v50 }
 0x8ee   : > { %v30665_v48 = vpack.c.bf16 %v14309_v51, %v14289_v18  ;;  %v33612_v0 = vunpack.i.h.bf16 %v30670_v11  ;;  %v24546_v8 = vunpack.i.l.bf16 %v30670_v11  ;;  %v34125_v18 = vunpack.i.l.bf16 %v30312_v3 }
 0x8ef   : > { %34124 = vst [vmem:[#allocation121_spill] sm:$0xff] %v30667_v49  ;;  %v30687_v47 = vpack.c.bf16 %v14952_v9, %v14932_v13  ;;  %v30689_v51 = vpack.c.bf16 %v15236_v15, %v15216_v2  ;;  %v30691_v41 = vpop.permute.xlu1 %24654  ;;  %24849 = vrot.lane.b32.xlu0 %v29787_v32, %s25438_s6  ;;  %v34128_v13 = vunpack.i.l.bf16 %v30226_v31  ;;  %v34129_v9 = vunpack.i.h.bf16 %v30282_v37 }
 0x8f0   : > { %34123 = vst [vmem:[#allocation120_spill] sm:$0xff] %v30665_v48  ;;  %v14591_v54 = vsel %vm14565_vm14, %v34126_v29, %v34125_v18  ;;  %21140 = vmatprep.subr.bf16.mxu0 %v30665_v48  ;;  %v14632_v59 = vsel %vm14565_vm14, %v24546_v8, %v33612_v0  ;;  %v24431_v18 = vunpack.i.l.bf16 %v30255_v16  ;;  %v34130_v2 = vunpack.i.h.bf16 %v30584_v33  ;;  %24904 = vrot.lane.b32.xlu1 %v29990_v36, %s25437_s4 }
 0x8f1   : > { %34127 = vst [vmem:[#allocation122_spill] sm:$0xff] %v30689_v51  ;;  %21142 = vmatpush1.bf16.msra.mxu0 %v30667_v49  ;;  %v14571_v15 = vsel %vm14565_vm14, %v34129_v9, %v34128_v13  ;;  %21114 = vmatpush1.bf16.msra.mxu1 %v30687_v47  ;;  %v30710_v0 = vpop.permute.xlu0 %24549  ;;  %v34132_v39 = vunpack.i.h.bf16 %v30446_v35  ;;  %v34133_v37 = vunpack.i.h.bf16 %v30330_v46  ;;  %v34134_v13 = vunpack.i.l.bf16 %v30330_v46 }
 0x8f2   : > { %v15276_v29 = vsel %vm15211_vm0, %v24536_v60, %v34130_v2  ;;  %21144 = vmatprep.subr.bf16.mxu0 %v30611_v61  ;;  %v30713_v32 = vpack.c.bf16 %v14591_v54, %v14571_v15  ;;  %21116 = vmatprep.subr.bf16.mxu1 %v30689_v51  ;;  %v34135_v2 = vunpack.i.h.bf16 %v30428_v50  ;;  %v34137_v28 = vunpack.i.h.bf16 %v30216_v23 }
 0x8f3   : > { %v14612_v14 = vsel %vm14565_vm14, %v24506_v38, %v34132_v39  ;;  %v14915_v9 = vsel %vm14888_vm15, %v34134_v13, %v34133_v37  ;;  %v34139_v51 = vunpack.i.h.bf16 %v30517_v25  ;;  %v30739_v49 = vpop.permute.xlu1 %24679  ;;  %24854 = vrot.lane.b32.xlu0 %v29863_v40, %s25436_s30  ;;  %v33623_v37 = vunpack.i.h.bf16 %v30710_v0 }
 0x8f4   : > { %34131 = vst [vmem:[#allocation123_spill] sm:$0xff] %v30713_v32  ;;  %v15256_v54 = vsel %vm15211_vm0, %v24496_v6, %v34135_v2  ;;  %v30729_v15 = vpack.c.bf16 %v14632_v59, %v14612_v14  ;;  %v15275_v39 = vsel %vm15211_vm0, %v34137_v28, %v24536_v60  ;;  %v34140_v59 = vunpack.i.h.bf16 %v30255_v16  ;;  %24909 = vrot.lane.b32.xlu1 %v30040_v62, %s25435_s11 }
 0x8f5   : > { %v30734_v61 = vpack.c.bf16 %v15276_v29, %v15256_v54  ;;  %v14631_v48 = vsel %vm14565_vm14, %v34139_v51, %v24546_v8  ;;  %21146 = vmatpush1.bf16.msra.mxu0 %v30713_v32  ;;  %v24436_v28 = vunpack.i.l.bf16 %v30275_v7  ;;  %21118 = vmatpush1.bf16.msra.mxu1 %v30430_v58  ;;  %v30750_v25 = vpop.permute.xlu0 %24554  ;;  %v34141_v60 = vunpack.i.h.bf16 %v29980_v24 }
 0x8f6   : > { %34136 = vst [vmem:[#allocation124_spill] sm:$0xff] %v30729_v15  ;;  %v14895_v14 = vsel %vm14888_vm15, %v24431_v18, %v34140_v59  ;;  %21148 = vmatprep.subr.bf16.mxu0 %v30729_v15  ;;  %v34142_v51 = vunpack.i.h.bf16 %v30386_v53  ;;  %v24551_v13 = vunpack.i.l.bf16 %v30710_v0  ;;  %v33624_v54 = vunpack.i.h.bf16 %v30337_v4 }
 0x8f7   : > { %34138 = vst [vmem:[#allocation125_spill] sm:$0xff] %v30734_v61  ;;  %v15255_v8 = vsel %vm15211_vm0, %v34141_v60, %v24496_v6  ;;  %21120 = vmatprep.subr.bf16.mxu1 %v30734_v61  ;;  %v30764_v2 = vpack.c.bf16 %v14915_v9, %v14895_v14  ;;  %v24476_v53 = vunpack.i.l.bf16 %v30337_v4  ;;  %v34147_v59 = vunpack.i.h.bf16 %v30381_v42  ;;  %v30779_v9 = vpop.permute.xlu1 %24684  ;;  %24859 = vrot.lane.b32.xlu0 %v29863_v40, %s25437_s4 }
 0x8f8   : > { %v14611_v29 = vsel %vm14565_vm14, %v34142_v51, %v24506_v38  ;;  %v30769_v6 = vpack.c.bf16 %v15275_v39, %v15255_v8  ;;  %v34146_v38 = vunpack.i.l.bf16 %v30330_v46  ;;  %v33625_v51 = vunpack.i.h.bf16 %v30454_v20  ;;  %24914 = vrot.lane.b32.xlu1 %v29897_v56, %s25438_s6 }
 0x8f9   : > { %34143 = vst [vmem:[#allocation126_spill] sm:$0xff] %v30764_v2  ;;  %v30767_v24 = vpack.c.bf16 %v14631_v48, %v14611_v29  ;;  %v24511_v23 = vunpack.i.l.bf16 %v30454_v20  ;;  %v33626_v48 = vunpack.i.h.bf16 %v30459_v43  ;;  %v30786_v39 = vpop.permute.xlu0 %24579  ;;  %v34148_v42 = vunpack.i.h.bf16 %v30301_v26 }
 0x8fa   : > { %34145 = vst [vmem:[#allocation128_spill] sm:$0xff] %v30769_v6  ;;  %v14914_v60 = vsel %vm14888_vm15, %v34147_v59, %v34146_v38  ;;  %21122 = vmatpush1.bf16.msra.mxu1 %v30769_v6  ;;  %v14955_v8 = vsel %vm14888_vm15, %v24551_v13, %v33623_v37  ;;  %v34150_v26 = vunpack.i.h.bf16 %v30275_v7  ;;  %v15238_v59 = vsel %vm15211_vm0, %v24476_v53, %v33624_v54 }
 0x8fb   : > { %34144 = vst [vmem:[#allocation127_spill] sm:$0xff] %v30767_v24  ;;  %21150 = vmatpush1.bf16.msra.mxu0 %v30767_v24  ;;  %v14894_v14 = vsel %vm14888_vm15, %v34148_v42, %v24431_v18  ;;  %21169 = vmatprep.subr.msk.bf16.mxu1 %vm29421_vm10, %v29675_v57  ;;  %v14935_v56 = vsel %vm14888_vm15, %v24511_v23, %v33625_v51  ;;  %v34153_v54 = vunpack.i.h.bf16 %v30408_v22  ;;  %v34155_v22 = vunpack.i.h.bf16 %v30403_v1  ;;  %v34164_v57 = vld [vmem:[#allocation108_spill] sm:$0xff] }
 0x8fc   : > { %21152 = vmatprep.subr.bf16.mxu0 %v30764_v2  ;;  %v30797_v29 = vpack.c.bf16 %v14914_v60, %v14894_v14  ;;  %v15218_v18 = vsel %vm15211_vm0, %v24436_v28, %v34150_v26  ;;  %v34151_v60 = vunpack.i.h.bf16 %v30547_v17  ;;  %v30815_v14 = vpop.permute.xlu1 %24689  ;;  %24919 = vrot.lane.b32.xlu0 %v29814_v5, %s25438_s6  ;;  %v34152_v26 = vunpack.i.l.bf16 %v30459_v43 }
 0x8fd   : > { %v14934_v38 = vsel %vm14888_vm15, %v34153_v54, %v24511_v23  ;;  %v30827_v51 = vpack.c.bf16 %v14955_v8, %v14935_v56  ;;  %15516 = vmatmul.mubr.f32.vlgmr.msra.gmra.mrb[120].mxu1 %v30298_v30  ;;  %v30831_v17 = vpop.permute.xlu0 %24584  ;;  %24924 = vrot.lane.b32.xlu1 %v30040_v62, %s25436_s30  ;;  %v15237_v23 = vsel %vm15211_vm0, %v34155_v22, %v24476_v53  ;;  %v34156_v54 = vunpack.i.h.bf16 %v30424_v34  ;;  %v34163_v53 = vld [vmem:[#allocation44_spill] sm:$0xff] }
 0x8fe   : > { %34149 = vst [vmem:[#allocation129_spill] sm:$0xff] %v30797_v29  ;;  %v14954_v42 = vsel %vm14888_vm15, %v34151_v60, %v24551_v13  ;;  %v14271_v37 = vsel %vm14242_vm13, %v34152_v26, %v33626_v48  ;;  %v24681_v13 = vunpack.i.l.bf16 %v30739_v49  ;;  %v24556_v26 = vunpack.i.l.bf16 %v30750_v25  ;;  %21172 = vmatpush1.bf16.msk.msra.mxu1 %vm29421_vm10, %v29558_v45  ;;  %19642 = vmatprep.mubr.msk.f32.mxu1 %vm15377_vm12, %v34163_v53 }
 0x8ff   : > { %34154 = vst [vmem:[#allocation130_spill] sm:$0xff] %v30827_v51  ;;  %21154 = vmatpush1.bf16.msra.mxu0 %v30797_v29  ;;  %v34157_v8 = vunpack.i.l.bf16 %v30424_v34  ;;  %v30850_v48 = vpack.c.bf16 %v14954_v42, %v14934_v38  ;;  %21175 = vmatprep.subr.msk.bf16.mxu1 %vm29421_vm10, %v29721_v52  ;;  %v24516_v1 = vunpack.i.l.bf16 %v30464_v44  ;;  %v24641_v22 = vunpack.i.l.bf16 %v30567_v19  ;;  %v34159_v38 = vld [vmem:[#allocation99_spill] sm:$0xff] }
 0x900   : > { %21156 = vmatprep.subr.bf16.mxu0 %v30827_v51  ;;  %v30860_v5 = vpop.permute.xlu1 %24694  ;;  %24934 = vrot.lane.b32.xlu0 %v29837_v63, %s25438_s6  ;;  %v34160_v42 = vunpack.i.h.bf16 %v34159_v38  ;;  %v24606_v61 = vunpack.i.l.bf16 %v34164_v57  ;;  %v34165_v63 = vunpack.i.h.bf16 %v30739_v49  ;;  %v34171_v2 = vunpack.i.h.bf16 %v30464_v44 }
 0x901   : > { %v14251_v56 = vsel %vm14242_vm13, %v34157_v8, %v34156_v54  ;;  %34158 = vst [vmem:[#allocation131_spill] sm:$0xff] %v30850_v48  ;;  %v30867_v8 = vpack.c.bf16 %v15238_v59, %v15218_v18  ;;  %v30872_v60 = vpop.permute.xlu0 %24589  ;;  %v34167_v18 = vld [vmem:[#allocation67_spill] sm:$0xff]  ;;  %v34174_v51 = vunpack.i.h.bf16 %v30619_v10  ;;  %v34206_v29 = vunpack.i.h.bf16 %v30330_v46 }
 0x902   : > { %v15217_v54 = vsel %vm15211_vm0, %v34160_v42, %v24436_v28  ;;  %v30869_v52 = vpack.c.bf16 %v14271_v37, %v14251_v56  ;;  %v14311_v38 = vsel %vm14242_vm13, %v24681_v13, %v34165_v63  ;;  %v34166_v28 = vunpack.i.h.bf16 %v30750_v25  ;;  %24929 = vrot.lane.b32.xlu1 %v34167_v18, %s25438_s6  ;;  %v34168_v59 = vld [vmem:[#allocation43_spill] sm:$0xff]  ;;  %v34170_v42 = vld [vmem:[#allocation104_spill] sm:$0xff] }
 0x903   : > { %34161 = vst [vmem:[#allocation99_spill] sm:$0xff] %v30867_v8  ;;  %21158 = vmatpush1.bf16.msra.mxu0 %v30850_v48  ;;  %21178 = vmatpush1.bf16.msk.msra.mxu1 %vm29421_vm10, %v34168_v59  ;;  %v30889_v56 = vpack.c.bf16 %v15237_v23, %v15217_v54  ;;  %v24566_v63 = vunpack.i.l.bf16 %v34170_v42  ;;  %v34172_v18 = vunpack.i.h.bf16 %v30567_v19  ;;  %v34173_v48 = vunpack.i.h.bf16 %v30584_v33 }
 0x904   : > { %34162 = vst [vmem:[#allocation132_spill] sm:$0xff] %v30869_v52  ;;  %v15278_v37 = vsel %vm15211_vm0, %v24556_v26, %v34166_v28  ;;  %21160 = vmatprep.subr.bf16.mxu0 %v30867_v8  ;;  %21180 = vmatprep.subr.bf16.mxu1 %v30869_v52  ;;  %v15258_v28 = vsel %vm15211_vm0, %v24516_v1, %v34171_v2  ;;  %v30904_v54 = vpop.permute.xlu1 %24719  ;;  %v34177_v33 = vunpack.i.h.bf16 %v34164_v57  ;;  %v34211_v24 = vunpack.i.h.bf16 %v30815_v14 }
 0x905   : > { %34169 = vst [vmem:[#allocation44_spill] sm:$0xff] %v30889_v56  ;;  %v14291_v15 = vsel %vm14242_vm13, %v24641_v22, %v34172_v18  ;;  %v15277_v23 = vsel %vm15211_vm0, %v34173_v48, %v24556_v26  ;;  %24949 = vrot.lane.b32.xlu0 %v29863_v40, %s25438_s6  ;;  %v14310_v52 = vsel %vm14242_vm13, %v34174_v51, %v24681_v13  ;;  %v30916_v18 = vpop.permute.xlu0 %24594  ;;  %v34178_v26 = vunpack.i.h.bf16 %v30428_v50 }
 0x906   : > { %v30911_v8 = vpack.c.bf16 %v14311_v38, %v14291_v15  ;;  %v30913_v2 = vpack.c.bf16 %v15278_v37, %v15258_v28  ;;  %v14594_v48 = vsel %vm14565_vm14, %v24606_v61, %v34177_v33  ;;  %v24686_v51 = vunpack.i.l.bf16 %v30779_v9  ;;  %24939 = vrot.lane.b32.xlu1 %v30040_v62, %s25437_s4  ;;  %v34179_v15 = vld [vmem:[#allocation107_spill] sm:$0xff]  ;;  %v34183_v28 = vld [vmem:[#allocation117_spill] sm:$0xff] }
 0x907   : > { %21162 = vmatpush1.bf16.msra.mxu0 %v30889_v56  ;;  %v15257_v40 = vsel %vm15211_vm0, %v34178_v26, %v24516_v1  ;;  %21182 = vmatpush1.bf16.msra.mxu1 %v34179_v15  ;;  %v34180_v13 = vunpack.i.h.bf16 %v30438_v27  ;;  %v34182_v50 = vunpack.i.h.bf16 %v34170_v42  ;;  %v24646_v26 = vunpack.i.l.bf16 %v34183_v28  ;;  %v34185_v27 = vld [vmem:[#allocation26_spill] sm:$0xff] }
 0x908   : > { %34175 = vst [vmem:[#allocation108_spill] sm:$0xff] %v30911_v8  ;;  %34176 = vst [vmem:[#allocation67_spill] sm:$0xff] %v30913_v2  ;;  %v30932_v37 = vpack.c.bf16 %v15277_v23, %v15257_v40  ;;  %21164 = vmatprep.subr.bf16.mxu0 %v30913_v2  ;;  %21184 = vmatprep.subr.bf16.mxu1 %v30911_v8  ;;  %v30943_v56 = vpop.permute.xlu1 %24724  ;;  %v34195_v8 = vunpack.i.h.bf16 %v30670_v11  ;;  %v24691_v11 = vunpack.i.l.bf16 %v30815_v14  ;;  %v34251_v15 = vunpack.i.h.bf16 %v30567_v19 }
 0x909   : > { %v14290_v38 = vsel %vm14242_vm13, %v34180_v13, %v24641_v22  ;;  %v14574_v1 = vsel %vm14565_vm14, %v24566_v63, %v34182_v50  ;;  %24959 = vrot.lane.b32.xlu0 %v34185_v27, %s25435_s11  ;;  %v34186_v22 = vunpack.i.h.bf16 %v30312_v3  ;;  %v34188_v13 = vld [vmem:[#allocation109_spill] sm:$0xff]  ;;  %v30954_v50 = vpop.permute.xlu0 %24619  ;;  %v34194_v3 = vunpack.i.h.bf16 %v34183_v28 }
 0x90a   : > { %34181 = vst [vmem:[#allocation104_spill] sm:$0xff] %v30932_v37  ;;  %v30941_v10 = vpack.c.bf16 %v14310_v52, %v14290_v38  ;;  %v30950_v40 = vpack.c.bf16 %v14594_v48, %v14574_v1  ;;  %v24611_v52 = vunpack.i.l.bf16 %v34188_v13  ;;  %v34189_v38 = vunpack.i.h.bf16 %v30779_v9  ;;  %24944 = vrot.lane.b32.xlu1 %v29990_v36, %s25438_s6 }
 0x90b   : > { %v14593_v23 = vsel %vm14565_vm14, %v34186_v22, %v24606_v61  ;;  %21166 = vmatpush1.bf16.msra.mxu0 %v30932_v37  ;;  %v24621_v61 = vunpack.i.l.bf16 %v30954_v50  ;;  %v34190_v48 = vunpack.i.h.bf16 %v30226_v31  ;;  %v34191_v22 = vld [vmem:[#allocation105_spill] sm:$0xff]  ;;  %v14614_v37 = vsel %vm14565_vm14, %v24646_v26, %v34194_v3 }
 0x90c   : > { %34184 = vst [vmem:[#allocation117_spill] sm:$0xff] %v30941_v10  ;;  %34187 = vst [vmem:[#allocation26_spill] sm:$0xff] %v30950_v40  ;;  %v14634_v33 = vsel %vm14565_vm14, %v24686_v51, %v34189_v38  ;;  %21186 = vmatpush1.bf16.msra.mxu1 %v30941_v10  ;;  %v24571_v2 = vunpack.i.l.bf16 %v34191_v22  ;;  %v34192_v38 = vld [vmem:[#allocation46_spill] sm:$0xff]  ;;  %v34198_v31 = vunpack.i.h.bf16 %v34188_v13  ;;  %v14957_v46 = vsel %vm14888_vm15, %v24691_v11, %v34211_v24 }
 0x90d   : > { %v14573_v1 = vsel %vm14565_vm14, %v34190_v48, %v24566_v63  ;;  %21188 = vmatprep.subr.bf16.mxu1 %v30950_v40  ;;  %21213 = vmatprep.subr.msk.bf16.mxu0 %vm29421_vm10, %v34192_v38  ;;  %v24581_v63 = vunpack.i.l.bf16 %v30786_v39  ;;  %v30981_v48 = vpop.permute.xlu1 %24729  ;;  %v34197_v40 = vld [vmem:[#allocation47_spill] sm:$0xff]  ;;  %v30994_v3 = vpop.permute.xlu0 %24624  ;;  %v34202_v10 = vld [vmem:[#allocation50_spill] sm:$0xff]  ;;  %v34255_v19 = vunpack.i.h.bf16 %v30872_v60 }
 0x90e   : > { %v30974_v36 = vpack.c.bf16 %v14593_v23, %v14573_v1  ;;  %24969 = vrot.lane.b32.xlu0 %v34185_v27, %s25436_s30  ;;  %15587 = vmatmul.mubr.f32.vlgmr.msra.gmra.mrb[122].mxu0 %v30298_v30  ;;  %v14633_v23 = vsel %vm14565_vm14, %v34195_v8, %v24686_v51  ;;  %v30989_v1 = vpack.c.bf16 %v14634_v33, %v14614_v37  ;;  %v34199_v8 = vunpack.i.h.bf16 %v30954_v50  ;;  %v34216_v24 = vld [vmem:[#allocation106_spill] sm:$0xff] }
 0x90f   : > { %21216 = vmatpush1.bf16.msk.msra.mxu0 %vm29421_vm10, %v34197_v40  ;;  %19651 = vmatprep.mubr.msk.f32.mxu0 %vm15377_vm12, %v34163_v53  ;;  %v14917_v38 = vsel %vm14888_vm15, %v24611_v52, %v34198_v31  ;;  %v34200_v37 = vunpack.i.h.bf16 %v34191_v22  ;;  %v34201_v40 = vunpack.i.h.bf16 %v30446_v35  ;;  %v34205_v35 = vunpack.i.h.bf16 %v30459_v43 }
 0x910   : > { %34193 = vst [vmem:[#allocation109_spill] sm:$0xff] %v30974_v36  ;;  %34196 = vst [vmem:[#allocation105_spill] sm:$0xff] %v30989_v1  ;;  %v14273_v51 = vsel %vm14242_vm13, %v24621_v61, %v34199_v8  ;;  %24954 = vrot.lane.b32.xlu1 %v30040_v62, %s25438_s6  ;;  %21190 = vmatpush1.bf16.msra.mxu1 %v30974_v36  ;;  %v24651_v62 = vunpack.i.l.bf16 %v30653_v21  ;;  %v34204_v36 = vunpack.i.h.bf16 %v30786_v39 }
 0x911   : > { %v14897_v33 = vsel %vm14888_vm15, %v24571_v2, %v34200_v37  ;;  %v14613_v31 = vsel %vm14565_vm14, %v34201_v40, %v24646_v26  ;;  %21192 = vmatprep.subr.bf16.mxu1 %v30989_v1  ;;  %21219 = vmatprep.subr.msk.bf16.mxu0 %vm29421_vm10, %v34202_v10  ;;  %v14272_v26 = vsel %vm14242_vm13, %v34205_v35, %v24621_v61  ;;  %v31029_v40 = vpop.permute.xlu1 %24734  ;;  %v31043_v43 = vpop.permute.xlu0 %24629  ;;  %v34210_v61 = vld [vmem:[#allocation113_spill] sm:$0xff] }
 0x912   : > { %v31021_v8 = vpack.c.bf16 %v14633_v23, %v14613_v31  ;;  %v14253_v37 = vsel %vm14242_vm13, %v24581_v63, %v34204_v36  ;;  %24979 = vrot.lane.b32.xlu0 %v34185_v27, %s25437_s4  ;;  %v14916_v1 = vsel %vm14888_vm15, %v34206_v29, %v24611_v52  ;;  %v31036_v10 = vpack.c.bf16 %v14917_v38, %v14897_v33  ;;  %v34209_v31 = vld [vmem:[#allocation51_spill] sm:$0xff]  ;;  %v34213_v38 = vld [vmem:[#allocation32_spill] sm:$0xff] }
 0x913   : > { %v31038_v23 = vpack.c.bf16 %v14273_v51, %v14253_v37  ;;  %21222 = vmatpush1.bf16.msk.msra.mxu0 %vm29421_vm10, %v34209_v31  ;;  %v24616_v35 = vunpack.i.l.bf16 %v34210_v61  ;;  %v34212_v29 = vunpack.i.h.bf16 %v30424_v34  ;;  %v34214_v51 = vunpack.i.h.bf16 %v30255_v16 }
 0x914   : > { %34203 = vst [vmem:[#allocation133_spill] sm:$0xff] %v31021_v8  ;;  %34207 = vst [vmem:[#allocation134_spill] sm:$0xff] %v31036_v10  ;;  %24964 = vrot.lane.b32.xlu1 %v34213_v38, %s25435_s11  ;;  %21194 = vmatpush1.bf16.msra.mxu1 %v31021_v8  ;;  %v33669_v36 = vunpack.i.h.bf16 %v34216_v24  ;;  %v24576_v34 = vunpack.i.l.bf16 %v34216_v24  ;;  %v34219_v16 = vunpack.i.h.bf16 %v30710_v0  ;;  %v34222_v0 = vunpack.i.h.bf16 %v30454_v20 }
 0x915   : > { %34208 = vst [vmem:[#allocation135_spill] sm:$0xff] %v31038_v23  ;;  %v14252_v52 = vsel %vm14242_vm13, %v34212_v29, %v24581_v63  ;;  %v14896_v33 = vsel %vm14888_vm15, %v34214_v51, %v24571_v2  ;;  %21196 = vmatprep.subr.bf16.mxu1 %v31036_v10  ;;  %21224 = vmatprep.subr.bf16.mxu0 %v31038_v23  ;;  %v34218_v29 = vunpack.i.h.bf16 %v30653_v21  ;;  %v31070_v8 = vpop.permute.xlu1 %24754  ;;  %v34225_v20 = vunpack.i.h.bf16 %v30337_v4  ;;  %v34241_v23 = vld [vmem:[#allocation57_spill] sm:$0xff] }
 0x916   : > { %v31059_v37 = vpack.c.bf16 %v14272_v26, %v14252_v52  ;;  %v31065_v63 = vpack.c.bf16 %v14916_v1, %v14896_v33  ;;  %24989 = vrot.lane.b32.xlu0 %v34185_v27, %s25438_s6  ;;  %v14956_v2 = vsel %vm14888_vm15, %v34219_v16, %v24691_v11  ;;  %v31080_v52 = vpop.permute.xlu0 %24634  ;;  %v34221_v1 = vunpack.i.h.bf16 %v34210_v61  ;;  %v34224_v33 = vld [vmem:[#allocation63_spill] sm:$0xff] }
 0x917   : > { %v14937_v31 = vsel %vm14888_vm15, %v24651_v62, %v34218_v29  ;;  %v24696_v29 = vunpack.i.l.bf16 %v30860_v5  ;;  %v14936_v27 = vsel %vm14888_vm15, %v34222_v0, %v24651_v62  ;;  %v15220_v11 = vsel %vm15211_vm0, %v24576_v34, %v33669_v36 }
 0x918   : > { %34215 = vst [vmem:[#allocation113_spill] sm:$0xff] %v31059_v37  ;;  %34217 = vst [vmem:[#allocation32_spill] sm:$0xff] %v31065_v63  ;;  %v31077_v26 = vpack.c.bf16 %v14957_v46, %v14937_v31  ;;  %21226 = vmatpush1.bf16.msra.mxu0 %v31059_v37  ;;  %v15240_v51 = vsel %vm15211_vm0, %v24616_v35, %v34221_v1  ;;  %24974 = vrot.lane.b32.xlu1 %v34213_v38, %s25436_s30  ;;  %v24656_v46 = vunpack.i.l.bf16 %v30691_v41 }
 0x919   : > { %21198 = vmatpush1.bf16.msra.mxu1 %v31065_v63  ;;  %v31099_v16 = vpack.c.bf16 %v14956_v2, %v14936_v27  ;;  %v31101_v1 = vpop.permute.xlu1 %24759  ;;  %v15239_v62 = vsel %vm15211_vm0, %v34225_v20, %v24616_v35  ;;  %v31108_v0 = vpack.c.bf16 %v15240_v51, %v15220_v11  ;;  %v34227_v36 = vunpack.i.h.bf16 %v30860_v5 }
 0x91a   : > { %34220 = vst [vmem:[#allocation106_spill] sm:$0xff] %v31077_v26  ;;  %21200 = vmatprep.subr.bf16.mxu1 %v31077_v26  ;;  %24999 = vrot.lane.b32.xlu0 %v34224_v33, %s25435_s11  ;;  %v31110_v26 = vpop.permute.xlu0 %24659  ;;  %v34228_v2 = vunpack.i.h.bf16 %v30275_v7  ;;  %v34230_v35 = vunpack.i.h.bf16 %v30691_v41  ;;  %v24626_v10 = vunpack.i.l.bf16 %v30994_v3  ;;  %v34243_v37 = vunpack.i.h.bf16 %v30954_v50 }
 0x91b   : > { %34223 = vst [vmem:[#allocation136_spill] sm:$0xff] %v31099_v16  ;;  %34226 = vst [vmem:[#allocation63_spill] sm:$0xff] %v31108_v0  ;;  %v15280_v31 = vsel %vm15211_vm0, %v24696_v29, %v34227_v36  ;;  %v34231_v36 = vunpack.i.h.bf16 %v30750_v25  ;;  %v24596_v50 = vunpack.i.l.bf16 %v30916_v18  ;;  %v24726_v63 = vunpack.i.l.bf16 %v30943_v56 }
 0x91c   : > { %24984 = vrot.lane.b32.xlu1 %v34213_v38, %s25437_s4  ;;  %v15219_v27 = vsel %vm15211_vm0, %v34228_v2, %v24576_v34  ;;  %v15260_v51 = vsel %vm15211_vm0, %v24656_v46, %v34230_v35  ;;  %v24756_v35 = vunpack.i.l.bf16 %v31070_v8 }
 0x91d   : > { %21202 = vmatpush1.bf16.msra.mxu1 %v31099_v16  ;;  %v31122_v4 = vpack.c.bf16 %v15239_v62, %v15219_v27  ;;  %v31127_v11 = vpop.permute.xlu1 %24764  ;;  %v15279_v20 = vsel %vm15211_vm0, %v34231_v36, %v24696_v29  ;;  %v31134_v7 = vpack.c.bf16 %v15280_v31, %v15260_v51  ;;  %v34233_v62 = vunpack.i.h.bf16 %v30464_v44  ;;  %v34235_v44 = vld [vmem:[#allocation73_spill] sm:$0xff] }
 0x91e   : > { %21204 = vmatprep.subr.bf16.mxu1 %v31108_v0  ;;  %25009 = vrot.lane.b32.xlu0 %v34224_v33, %s25436_s30  ;;  %v31136_v34 = vpop.permute.xlu0 %24664  ;;  %v24586_v31 = vunpack.i.l.bf16 %v30831_v17  ;;  %v34236_v51 = vld [vmem:[#allocation53_spill] sm:$0xff]  ;;  %v34238_v36 = vunpack.i.h.bf16 %v31070_v8  ;;  %v34239_v0 = vld [vmem:[#allocation48_spill] sm:$0xff] }
 0x91f   : > { %34229 = vst [vmem:[#allocation137_spill] sm:$0xff] %v31122_v4  ;;  %34232 = vst [vmem:[#allocation138_spill] sm:$0xff] %v31134_v7  ;;  %v15259_v2 = vsel %vm15211_vm0, %v34233_v62, %v24656_v46  ;;  %v34237_v46 = vunpack.i.h.bf16 %v34170_v42  ;;  %v24661_v42 = vunpack.i.l.bf16 %v31110_v26  ;;  %v24666_v6 = vunpack.i.l.bf16 %v31136_v34 }
 0x920   : > { %24994 = vrot.lane.b32.xlu1 %v34213_v38, %s25438_s6  ;;  %v31145_v27 = vpack.c.bf16 %v15279_v20, %v15259_v2  ;;  %v24721_v20 = vunpack.i.l.bf16 %v30904_v54  ;;  %v24591_v2 = vunpack.i.l.bf16 %v30872_v60 }
 0x921   : > { %21206 = vmatpush1.bf16.msra.mxu1 %v31122_v4  ;;  %v31147_v25 = vpop.permute.xlu1 %24769 }
 0x922   : > { %21208 = vmatprep.subr.bf16.mxu1 %v31134_v7  ;;  %34234 = vst [vmem:[#allocation139_spill] sm:$0xff] %v31145_v27  ;;  %25019 = vrot.lane.b32.xlu0 %v34224_v33, %s25437_s4  ;;  %v31151_v29 = vpop.permute.xlu0 %24669  ;;  %v31176_v7 = vsel %vm14565_vm14, %v34237_v46, %v24586_v31 }
 0x924   : > { %25004 = vrot.lane.b32.xlu1 %v34235_v44, %s25435_s11 }
 0x925   : > { %21210 = vmatpush1.bf16.msra.mxu1 %v31145_v27  ;;  %v31165_v62 = vpop.permute.xlu1 %24789  ;;  %v34244_v27 = vld [vmem:[#allocation66_spill] sm:$0xff] }
 0x926   : > { %21257 = vmatprep.subr.msk.bf16.mxu1 %vm29421_vm10, %v34236_v51  ;;  %25029 = vrot.lane.b32.xlu0 %v34224_v33, %s25438_s6  ;;  %v31171_v38 = vpop.permute.xlu0 %24674  ;;  %v14275_v51 = vsel %vm14242_vm13, %v24756_v35, %v34238_v36  ;;  %v34242_v36 = vunpack.i.h.bf16 %v30904_v54 }
 0x928   : > { %15658 = vmatmul.mubr.f32.vlgmr.msra.gmra.mrb[122].mxu1 %v30298_v30  ;;  %25014 = vrot.lane.b32.xlu1 %v34235_v44, %s25436_s30  ;;  %v34240_v30 = vunpack.i.h.bf16 %v30831_v17 }
 0x929   : > { %21260 = vmatpush1.bf16.msk.msra.mxu1 %vm29421_vm10, %v34239_v0  ;;  %19660 = vmatprep.mubr.msk.f32.mxu1 %vm15377_vm12, %v34163_v53  ;;  %v14255_v0 = vsel %vm14242_vm13, %v24721_v20, %v34242_v36  ;;  %v31205_v46 = vpop.permute.xlu1 %24794 }
 0x92a   : > { %v14576_v33 = vsel %vm14565_vm14, %v24586_v31, %v34240_v30  ;;  %21263 = vmatprep.subr.msk.bf16.mxu1 %vm29421_vm10, %v34241_v23  ;;  %v14274_v31 = vsel %vm14242_vm13, %v34243_v37, %v24756_v35  ;;  %25039 = vrot.lane.b32.xlu0 %v34244_v27, %s25435_s11  ;;  %v34245_v23 = vunpack.i.h.bf16 %v34191_v22  ;;  %v31216_v16 = vpack.c.bf16 %v14275_v51, %v14255_v0  ;;  %v31218_v37 = vpop.permute.xlu0 %24699  ;;  %v34248_v22 = vld [vmem:[#allocation52_spill] sm:$0xff] }
 0x92b   : > { %v34247_v35 = vunpack.i.h.bf16 %v30786_v39  ;;  %v24701_v0 = vunpack.i.l.bf16 %v31218_v37  ;;  %v34249_v51 = vunpack.i.h.bf16 %v30994_v3 }
 0x92c   : > { %v31212_v4 = vsel %vm14888_vm15, %v34245_v23, %v24591_v2  ;;  %34246 = vst [vmem:[#allocation73_spill] sm:$0xff] %v31216_v16  ;;  %25024 = vrot.lane.b32.xlu1 %v34235_v44, %s25437_s4  ;;  %v34252_v23 = vunpack.i.h.bf16 %v31110_v26 }
 0x92d   : > { %v14254_v30 = vsel %vm14242_vm13, %v34247_v35, %v24721_v20  ;;  %21266 = vmatpush1.bf16.msk.msra.mxu1 %vm29421_vm10, %v34248_v22  ;;  %v14596_v36 = vsel %vm14565_vm14, %v24626_v10, %v34249_v51  ;;  %v24631_v35 = vunpack.i.l.bf16 %v31043_v43  ;;  %v14292_v22 = vsel %vm14242_vm13, %v34251_v15, %v24661_v42  ;;  %v31245_v59 = vpop.permute.xlu1 %24799 }
 0x92e   : > { %v31234_v39 = vpack.c.bf16 %v14274_v31, %v14254_v30  ;;  %21268 = vmatprep.subr.bf16.mxu1 %v31216_v16  ;;  %v14293_v32 = vsel %vm14242_vm13, %v24661_v42, %v34252_v23  ;;  %v34253_v51 = vunpack.i.h.bf16 %v30739_v49  ;;  %v34254_v30 = vunpack.i.h.bf16 %v31218_v37  ;;  %25049 = vrot.lane.b32.xlu0 %v34244_v27, %s25436_s30 }
 0x92f   : > { %v14899_v15 = vsel %vm14888_vm15, %v24591_v2, %v34255_v19  ;;  %v33696_v16 = vunpack.i.h.bf16 %v30943_v56  ;;  %v34258_v49 = vunpack.i.h.bf16 %v34216_v24  ;;  %v31278_v2 = vpack.c.bf16 %v14596_v36, %v14576_v33 }
 0x930   : > { %34250 = vst [vmem:[#allocation66_spill] sm:$0xff] %v31234_v39  ;;  %v14312_v31 = vsel %vm14242_vm13, %v34253_v51, %v24701_v0  ;;  %v14313_v20 = vsel %vm14242_vm13, %v24701_v0, %v34254_v30  ;;  %v34259_v0 = vunpack.i.h.bf16 %v34164_v57  ;;  %25034 = vrot.lane.b32.xlu1 %v34235_v44, %s25438_s6  ;;  %v34261_v24 = vunpack.i.h.bf16 %v31043_v43 }
 0x931   : > { %v31259_v42 = vpack.c.bf16 %v14313_v20, %v14293_v32  ;;  %v31261_v23 = vpack.c.bf16 %v14312_v31, %v14292_v22  ;;  %v31266_v51 = vsel %vm15211_vm0, %v34258_v49, %v24596_v50  ;;  %21270 = vmatpush1.bf16.msra.mxu1 %v31234_v39  ;;  %v31276_v32 = vpop.permute.xlu0 %24704  ;;  %34260 = vst [vmem:[#allocation142_spill] sm:$0xff] %v31278_v2  ;;  %v34262_v20 = vunpack.i.h.bf16 %v30831_v17  ;;  %v31298_v49 = vpop.permute.xlu1 %24804 }
 0x932   : > { %v14595_v30 = vsel %vm14565_vm14, %v34259_v0, %v24626_v10  ;;  %v14919_v22 = vsel %vm14888_vm15, %v24631_v35, %v34261_v24  ;;  %v33697_v57 = vunpack.i.h.bf16 %v31276_v32  ;;  %v24706_v10 = vunpack.i.l.bf16 %v31276_v32  ;;  %25059 = vrot.lane.b32.xlu0 %v34244_v27, %s25437_s4 }
 0x933   : > { %34256 = vst [vmem:[#allocation140_spill] sm:$0xff] %v31259_v42  ;;  %34257 = vst [vmem:[#allocation141_spill] sm:$0xff] %v31261_v23  ;;  %21228 = vmatprep.subr.bf16.mxu0 %v31259_v42  ;;  %v31289_v44 = vsel %vm14565_vm14, %v34262_v20, %v24726_v63  ;;  %v34263_v31 = vunpack.i.h.bf16 %v30916_v18  ;;  %v24761_v19 = vunpack.i.l.bf16 %v31101_v1  ;;  %v14578_v17 = vsel %vm14565_vm14, %v24726_v63, %v33696_v16 }
 0x934   : > { %21230 = vmatpush1.bf16.msra.mxu0 %v31261_v23  ;;  %v14636_v24 = vsel %vm14565_vm14, %v24706_v10, %v33697_v57  ;;  %v34265_v20 = vunpack.i.h.bf16 %v34188_v13  ;;  %v31317_v36 = vpack.c.bf16 %v14919_v22, %v14899_v15  ;;  %v34267_v63 = vunpack.i.h.bf16 %v31136_v34 }
 0x935   : > { %v31294_v33 = vsel %vm15211_vm0, %v24596_v50, %v34263_v31  ;;  %v31308_v50 = vpack.c.bf16 %v14595_v30, %v31176_v7  ;;  %21232 = vmatprep.subr.bf16.mxu0 %v31278_v2  ;;  %v34268_v7 = vld [vmem:[#allocation74_spill] sm:$0xff]  ;;  %v31325_v30 = vpop.permute.xlu0 %24709  ;;  %v24791_v0 = vunpack.i.l.bf16 %v31165_v62  ;;  %v34269_v13 = vunpack.i.h.bf16 %v30779_v9  ;;  %v31344_v39 = vpop.permute.xlu1 %24824 }
 0x936   : > { %v14918_v31 = vsel %vm14888_vm15, %v34265_v20, %v24631_v35  ;;  %34266 = vst [vmem:[#allocation144_spill] sm:$0xff] %v31317_v36  ;;  %v14616_v16 = vsel %vm14565_vm14, %v24666_v6, %v34267_v63  ;;  %25044 = vrot.lane.b32.xlu1 %v34268_v7, %s25435_s11  ;;  %v34271_v22 = vunpack.i.h.bf16 %v30994_v3  ;;  %v34272_v63 = vunpack.i.h.bf16 %v31101_v1  ;;  %25069 = vrot.lane.b32.xlu0 %v34244_v27, %s25438_s6 }
 0x937   : > { %34264 = vst [vmem:[#allocation143_spill] sm:$0xff] %v31308_v50  ;;  %v14635_v35 = vsel %vm14565_vm14, %v34269_v13, %v24706_v10  ;;  %v31332_v15 = vpack.c.bf16 %v14636_v24, %v14616_v16  ;;  %v24636_v2 = vunpack.i.l.bf16 %v31080_v52  ;;  %v34273_v57 = vunpack.i.h.bf16 %v34183_v28 }
 0x938   : > { %v14597_v20 = vsel %vm14565_vm14, %v34271_v22, %v24761_v19  ;;  %v14598_v45 = vsel %vm14565_vm14, %v24761_v19, %v34272_v63  ;;  %21234 = vmatpush1.bf16.msra.mxu0 %v31308_v50  ;;  %v33706_v9 = vunpack.i.h.bf16 %v31344_v39  ;;  %v24826_v3 = vunpack.i.l.bf16 %v31344_v39 }
 0x939   : > { %34270 = vst [vmem:[#allocation74_spill] sm:$0xff] %v31332_v15  ;;  %v14615_v42 = vsel %vm14565_vm14, %v34273_v57, %v24666_v6  ;;  %v24711_v10 = vunpack.i.l.bf16 %v31325_v30  ;;  %21236 = vmatprep.subr.bf16.mxu0 %v31332_v15  ;;  %v24671_v57 = vunpack.i.l.bf16 %v31151_v29  ;;  %v31361_v27 = vpop.permute.xlu0 %24714  ;;  %v34275_v24 = vunpack.i.h.bf16 %v31110_v26 }
 0x93a   : > { %v31357_v19 = vpack.c.bf16 %v14635_v35, %v14615_v42  ;;  %25054 = vrot.lane.b32.xlu1 %v34268_v7, %s25436_s30  ;;  %v34276_v22 = vunpack.i.h.bf16 %v31165_v62  ;;  %v34277_v28 = vunpack.i.h.bf16 %v31218_v37  ;;  %v14315_v42 = vsel %vm14242_vm13, %v24826_v3, %v33706_v9 }
 0x93b   : > { %v14294_v13 = vsel %vm14242_vm13, %v34275_v24, %v24791_v0  ;;  %v24766_v35 = vunpack.i.l.bf16 %v31127_v11  ;;  %v31381_v24 = vpop.permute.xlu1 %24829  ;;  %v24796_v37 = vunpack.i.l.bf16 %v31205_v46  ;;  %v31401_v9 = vpack.c.bf16 %v14918_v31, %v31212_v4 }
 0x93c   : > { %34274 = vst [vmem:[#allocation145_spill] sm:$0xff] %v31357_v19  ;;  %v14295_v63 = vsel %vm14242_vm13, %v24791_v0, %v34276_v22  ;;  %v14314_v6 = vsel %vm14242_vm13, %v34277_v28, %v24826_v3  ;;  %v34280_v0 = vmov 0.0   ;;  %21238 = vmatpush1.bf16.msra.mxu0 %v31357_v19  ;;  %v34281_v28 = vunpack.i.h.bf16 %v31325_v30 }
 0x93d   : > { %v31377_v15 = vpack.c.bf16 %v14315_v42, %v14295_v63  ;;  %v31379_v26 = vpack.c.bf16 %v14314_v6, %v14294_v13  ;;  %14120 = vrot.lane.b32.xlu0 %v34280_v0, %s25435_s11  ;;  %v24831_v63 = vunpack.i.l.bf16 %v31381_v24  ;;  %21240 = vmatprep.subr.bf16.mxu0 %v31317_v36  ;;  %v34282_v6 = vunpack.i.l.bf16 %v30981_v48  ;;  %34284 = vst [vmem:[#allocation148_spill] sm:$0xff] %v31401_v9 }
 0x93e   : > { %v14959_v3 = vsel %vm14888_vm15, %v24711_v10, %v34281_v28  ;;  %v34283_v13 = vunpack.i.h.bf16 %v30872_v60  ;;  %v31403_v16 = vpack.c.bf16 %v14598_v45, %v14578_v17  ;;  %25064 = vrot.lane.b32.xlu1 %v34268_v7, %s25437_s4  ;;  %v31408_v28 = vpop.permute.xlu0 %24739  ;;  %v34286_v22 = vunpack.i.h.bf16 %v34210_v61 }
 0x93f   : > { %34278 = vst [vmem:[#allocation146_spill] sm:$0xff] %v31377_v15  ;;  %34279 = vst [vmem:[#allocation147_spill] sm:$0xff] %v31379_v26  ;;  %21272 = vmatprep.subr.bf16.mxu1 %v31377_v15  ;;  %v34287_v60 = vunpack.i.h.bf16 %v31080_v52  ;;  %v34288_v4 = vunpack.i.h.bf16 %v31151_v29  ;;  %v34289_v17 = vunpack.i.h.bf16 %v31381_v24  ;;  %v31425_v61 = vpack.c.bf16 %v14597_v20, %v31289_v44 }
 0x940   : > { %v31398_v42 = vsel %vm14888_vm15, %v34283_v13, %v34282_v6  ;;  %34285 = vst [vmem:[#allocation149_spill] sm:$0xff] %v31403_v16  ;;  %v15241_v36 = vsel %vm15211_vm0, %v34286_v22, %v24636_v2  ;;  %21274 = vmatpush1.bf16.msra.mxu1 %v31379_v26  ;;  %v34291_v22 = vunpack.i.h.bf16 %v30815_v14  ;;  %v34294_v44 = vunpack.i.h.bf16 %v31205_v46  ;;  %21242 = vmatpush1.bf16.msra.mxu0 %v31401_v9 }
 0x941   : > { %v15242_v6 = vsel %vm15211_vm0, %v24636_v2, %v34287_v60  ;;  %v14939_v45 = vsel %vm14888_vm15, %v24671_v57, %v34288_v4  ;;  %v14638_v31 = vsel %vm14565_vm14, %v24831_v63, %v34289_v17  ;;  %34290 = vst [vmem:[#allocation150_spill] sm:$0xff] %v31425_v61  ;;  %v31432_v60 = vpop.permute.xlu1 %24834  ;;  %21276 = vmatprep.subr.bf16.mxu1 %v31403_v16  ;;  %v34293_v4 = vunpack.i.h.bf16 %v31127_v11 }
 0x942   : > { %v14958_v15 = vsel %vm14888_vm15, %v34291_v22, %v24711_v10  ;;  %v31430_v2 = vpack.c.bf16 %v14959_v3, %v14939_v45  ;;  %14766 = vrot.lane.b32.xlu0 %v34280_v0, %s25437_s4  ;;  %v14618_v20 = vsel %vm14565_vm14, %v24796_v37, %v34294_v44  ;;  %v24716_v10 = vunpack.i.l.bf16 %v31361_v27  ;;  %v18290_v3 = vld [vmem:[#allocation14] sm:$0x7]  ;;  %25074 = vrot.lane.b32.xlu1 %v34268_v7, %s25438_s6  ;;  %v31457_v44 = vpop.permute.xlu0 %24744 }
 0x943   : > { %v14921_v17 = vsel %vm14888_vm15, %v24766_v35, %v34293_v4  ;;  %v34295_v45 = vunpack.i.h.bf16 %v30653_v21  ;;  %v34296_v16 = vunpack.i.h.bf16 %v31276_v32  ;;  %v31453_v26 = vpack.c.bf16 %v14638_v31, %v14618_v20 }
 0x944   : > { %34292 = vst [vmem:[#allocation151_spill] sm:$0xff] %v31430_v2  ;;  %21244 = vmatprep.subr.bf16.mxu0 %v31430_v2  ;;  %v24676_v14 = vunpack.i.l.bf16 %v31171_v38  ;;  %21278 = vmatpush1.bf16.msra.mxu1 %v31425_v61  ;;  %v34299_v32 = vunpack.i.h.bf16 %v30981_v48  ;;  %v34302_v31 = vunpack.i.h.bf16 %v31136_v34  ;;  %v31489_v34 = vpack.c.bf16 %v15241_v36, %v31266_v51 }
 0x945   : > { %v14938_v22 = vsel %vm14888_vm15, %v34295_v45, %v24671_v57  ;;  %v14637_v4 = vsel %vm14565_vm14, %v34296_v16, %v24831_v63  ;;  %34297 = vst [vmem:[#allocation152_spill] sm:$0xff] %v31453_v26  ;;  %v24836_v45 = vunpack.i.l.bf16 %v31432_v60  ;;  %v34300_v16 = vunpack.i.l.bf16 %v30981_v48  ;;  %v31477_v20 = vpop.permute.xlu1 %24839  ;;  %21280 = vmatprep.subr.bf16.mxu1 %v31453_v26 }
 0x946   : > { %v31461_v21 = vpack.c.bf16 %v14958_v15, %v14938_v22  ;;  %v31472_v63 = vpack.c.bf16 %v15242_v6, %v31294_v33  ;;  %v14617_v15 = vsel %vm14565_vm14, %v34302_v31, %v24796_v37  ;;  %18293 = vperm.xlu0 %24276, %v18290_v3   ;;  %v33715_v22 = vunpack.i.h.bf16 %v31245_v59  ;;  %34305 = vst [vmem:[#allocation156_spill] sm:$0xff] %v31489_v34 }
 0x947   : > { %v14901_v7 = vsel %vm14888_vm15, %v34300_v16, %v34299_v32  ;;  %v24801_v57 = vunpack.i.l.bf16 %v31245_v59  ;;  %v31482_v13 = vpack.c.bf16 %v14637_v4, %v14617_v15  ;;  %v34304_v32 = vunpack.i.h.bf16 %v31361_v27  ;;  %14443 = vrot.lane.b32.xlu1 %v34280_v0, %s25436_s30  ;;  %v31498_v4 = vpop.permute.xlu0 %24749 }
 0x948   : > { %34298 = vst [vmem:[#allocation153_spill] sm:$0xff] %v31461_v21  ;;  %34301 = vst [vmem:[#allocation154_spill] sm:$0xff] %v31472_v63  ;;  %21246 = vmatpush1.bf16.msra.mxu0 %v31461_v21  ;;  %v34306_v37 = vunpack.i.h.bf16 %v31043_v43  ;;  %v31494_v3 = vpack.c.bf16 %v14921_v17, %v14901_v7  ;;  %v24771_v31 = vunpack.i.l.bf16 %v31147_v25  ;;  %v34308_v51 = vunpack.i.h.bf16 %v31171_v38 }
 0x949   : > { %34303 = vst [vmem:[#allocation155_spill] sm:$0xff] %v31482_v13  ;;  %v15282_v33 = vsel %vm15211_vm0, %v24716_v10, %v34304_v32  ;;  %21248 = vmatprep.subr.bf16.mxu0 %v31472_v63  ;;  %v34309_v43 = vunpack.i.h.bf16 %v31432_v60  ;;  %21282 = vmatpush1.bf16.msra.mxu1 %v31482_v13  ;;  %v24736_v7 = vunpack.i.l.bf16 %v31029_v40  ;;  %v34310_v15 = vunpack.i.h.bf16 %v30860_v5  ;;  %v31518_v16 = vpop.permute.xlu1 %24864 }
 0x94a   : > { %v14920_v6 = vsel %vm14888_vm15, %v34306_v37, %v24766_v35  ;;  %34307 = vst [vmem:[#allocation157_spill] sm:$0xff] %v31494_v3  ;;  %v15262_v36 = vsel %vm15211_vm0, %v24676_v14, %v34308_v51  ;;  %21284 = vmatprep.subr.bf16.mxu1 %v31494_v3  ;;  %34312 = vst [vmem:[#allocation159_spill] sm:$0xff] %v31518_v16  ;;  %v34314_v17 = vunpack.i.h.bf16 %v30691_v41  ;;  %v34330_v3 = vld [vmem:[#allocation55_spill] sm:$0xff] }
 0x94b   : > { %v14961_v35 = vsel %vm14888_vm15, %v24836_v45, %v34309_v43  ;;  %v15281_v32 = vsel %vm15211_vm0, %v34310_v15, %v24716_v10  ;;  %v31515_v37 = vpack.c.bf16 %v15282_v33, %v15262_v36  ;;  %v31521_v51 = vpack.c.bf16 %v14920_v6, %v31398_v42  ;;  %15089 = vrot.lane.b32.xlu1 %v34280_v0, %s25438_s6  ;;  %v31537_v42 = vpop.permute.xlu0 %24774 }
 0x94c   : > { %v14941_v43 = vsel %vm14888_vm15, %v24801_v57, %v33715_v22  ;;  %21250 = vmatpush1.bf16.msra.mxu0 %v31489_v34  ;;  %v15261_v5 = vsel %vm15211_vm0, %v34314_v17, %v24676_v14  ;;  %v34315_v10 = vunpack.i.h.bf16 %v31325_v30  ;;  %v34317_v6 = vunpack.i.h.bf16 %v31147_v25 }
 0x94d   : > { %34311 = vst [vmem:[#allocation158_spill] sm:$0xff] %v31515_v37  ;;  %34313 = vst [vmem:[#allocation160_spill] sm:$0xff] %v31521_v51  ;;  %v31533_v36 = vpack.c.bf16 %v14961_v35, %v14941_v43  ;;  %21252 = vmatprep.subr.bf16.mxu0 %v31515_v37  ;;  %v31543_v41 = vpack.c.bf16 %v15281_v32, %v15261_v5  ;;  %v33716_v14 = vunpack.i.h.bf16 %v31477_v20  ;;  %v24841_v30 = vunpack.i.l.bf16 %v31477_v20  ;;  %v31556_v32 = vpop.permute.xlu1 %24869  ;;  %v34325_v43 = vld [vmem:[#allocation54_spill] sm:$0xff] }
 0x94e   : > { %v14960_v33 = vsel %vm14888_vm15, %v34315_v10, %v24836_v45  ;;  %v15244_v15 = vsel %vm15211_vm0, %v24771_v31, %v34317_v6  ;;  %21286 = vmatpush1.bf16.msra.mxu1 %v31521_v51  ;;  %v34319_v45 = vunpack.i.h.bf16 %v31029_v40  ;;  %v34320_v35 = vunpack.i.h.bf16 %v31151_v29  ;;  %34321 = vst [vmem:[#allocation163_spill] sm:$0xff] %v31556_v32 }
 0x94f   : > { %34316 = vst [vmem:[#allocation161_spill] sm:$0xff] %v31533_v36  ;;  %34318 = vst [vmem:[#allocation162_spill] sm:$0xff] %v31543_v41  ;;  %21288 = vmatprep.subr.bf16.mxu1 %v31533_v36  ;;  %v24806_v5 = vunpack.i.l.bf16 %v31298_v49  ;;  %v24777_v6 = vunpack.i.h.bf16 %v31537_v42  ;;  %v24776_v22 = vunpack.i.l.bf16 %v31537_v42  ;;  %v34323_v29 = vunpack.i.h.bf16 %v31080_v52 }
 0x950   : > { %v15224_v0 = vsel %vm15211_vm0, %v24736_v7, %v34319_v45  ;;  %v14940_v17 = vsel %vm14888_vm15, %v34320_v35, %v24801_v57  ;;  %21254 = vmatpush1.bf16.msra.mxu0 %v31543_v41  ;;  %v31569_v35 = vpop.permute.xlu0 %24779  ;;  %v15284_v42 = vsel %vm15211_vm0, %v24841_v30, %v33716_v14  ;;  %v34326_v52 = vunpack.i.h.bf16 %v30916_v18 }
 0x951   : > { %v31559_v10 = vpack.c.bf16 %v14960_v33, %v14940_v17  ;;  %v15243_v57 = vsel %vm15211_vm0, %v34323_v29, %v24771_v31  ;;  %v31567_v45 = vpack.c.bf16 %v15244_v15, %v15224_v0  ;;  %21301 = vmatprep.subr.msk.bf16.mxu0 %vm29421_vm10, %v34325_v43  ;;  %v24742_v33 = vunpack.i.h.bf16 %v31408_v28  ;;  %v31584_v15 = vpop.permute.xlu1 %24874  ;;  %v31586_v0 = vld [vmem:[#allocation13 + $0x8] sm:$0x77] }
 0x952   : > { %v24741_v17 = vunpack.i.l.bf16 %v31408_v28  ;;  %v15223_v31 = vsel %vm15211_vm0, %v34326_v52, %v24736_v7  ;;  %34327 = vst [vmem:[#allocation166_spill] sm:$0xff] %v31584_v15  ;;  %v34329_v28 = vunpack.i.h.bf16 %v31298_v49  ;;  %v14277_v36 = vsel %vm14242_vm13, %v24776_v22, %v24777_v6  ;;  %v34348_v43 = vld [vmem:[#allocation60_spill] sm:$0xff] }
 0x953   : > { %34322 = vst [vmem:[#allocation164_spill] sm:$0xff] %v31559_v10  ;;  %34324 = vst [vmem:[#allocation165_spill] sm:$0xff] %v31567_v45  ;;  %21290 = vmatpush1.bf16.msra.mxu1 %v31559_v10  ;;  %15729 = vmatmul.mubr.f32.vlgmr.msra.gmra.mrb[124].mxu0 %v31586_v0  ;;  %v31589_v29 = vpack.c.bf16 %v15243_v57, %v15223_v31  ;;  %v34331_v18 = vunpack.i.h.bf16 %v31361_v27  ;;  %v34333_v31 = vld [vmem:[#allocation58_spill] sm:$0xff]  ;;  %v34335_v27 = vunpack.i.h.bf16 %v31070_v8  ;;  %v34353_v37 = vunpack.i.h.bf16 %v31165_v62 }
 0x954   : > { %21292 = vmatprep.subr.bf16.mxu1 %v31567_v45  ;;  %v15264_v14 = vsel %vm15211_vm0, %v24806_v5, %v34329_v28  ;;  %21304 = vmatpush1.bf16.msk.msra.mxu0 %vm29421_vm10, %v34330_v3  ;;  %v31605_v57 = vpop.permute.xlu0 %24784  ;;  %v14257_v28 = vsel %vm14242_vm13, %v24741_v17, %v24742_v33  ;;  %v34334_v45 = vunpack.i.h.bf16 %v31171_v38  ;;  %v34340_v38 = vunpack.i.h.bf16 %v30904_v54 }
 0x955   : > { %34328 = vst [vmem:[#allocation167_spill] sm:$0xff] %v31589_v29  ;;  %19669 = vmatprep.mubr.msk.f32.mxu0 %vm15377_vm12, %v34163_v53  ;;  %v15283_v7 = vsel %vm15211_vm0, %v34331_v18, %v24841_v30  ;;  %v31603_v52 = vpack.c.bf16 %v15284_v42, %v15264_v14  ;;  %21307 = vmatprep.subr.msk.bf16.mxu0 %vm29421_vm10, %v34333_v31  ;;  %v31621_v42 = vpop.permute.xlu1 %24879  ;;  %v34339_v31 = vld [vmem:[#allocation59_spill] sm:$0xff]  ;;  %v33732_v54 = vunpack.i.h.bf16 %v31518_v16 }
 0x956   : > { %v15263_v26 = vsel %vm15211_vm0, %v34334_v45, %v24806_v5  ;;  %v14276_v30 = vsel %vm14242_vm13, %v34335_v27, %v24776_v22  ;;  %v31618_v14 = vpack.c.bf16 %v14277_v36, %v14257_v28  ;;  %34337 = vst [vmem:[#allocation170_spill] sm:$0xff] %v31621_v42  ;;  %v14256_v5 = vsel %vm14242_vm13, %v34340_v38, %v24741_v17  ;;  %v34345_v38 = vld [vmem:[#allocation69_spill] sm:$0xff] }
 0x957   : > { %34332 = vst [vmem:[#allocation168_spill] sm:$0xff] %v31603_v52  ;;  %21294 = vmatpush1.bf16.msra.mxu1 %v31589_v29  ;;  %v31623_v18 = vpack.c.bf16 %v15283_v7, %v15263_v26  ;;  %v31634_v8 = vpack.c.bf16 %v14276_v30, %v14256_v5  ;;  %v33726_v22 = vunpack.i.h.bf16 %v31621_v42  ;;  %v24881_v36 = vunpack.i.l.bf16 %v31621_v42  ;;  %v34342_v26 = vld [vmem:[#allocation61_spill] sm:$0xff]  ;;  %v34344_v30 = vld [vmem:[#allocation56_spill] sm:$0xff] }
 0x958   : > { %34336 = vst [vmem:[#allocation169_spill] sm:$0xff] %v31618_v14  ;;  %21296 = vmatprep.subr.bf16.mxu1 %v31603_v52  ;;  %21310 = vmatpush1.bf16.msk.msra.mxu0 %vm29421_vm10, %v34339_v31  ;;  %v31631_v45 = vpop.permute.xlu0 %24809  ;;  %v24866_v17 = vunpack.i.l.bf16 %v31518_v16  ;;  %v24746_v42 = vunpack.i.l.bf16 %v31457_v44  ;;  %v24781_v16 = vunpack.i.l.bf16 %v31569_v35 }
 0x959   : > { %34338 = vst [vmem:[#allocation171_spill] sm:$0xff] %v31623_v18  ;;  %21312 = vmatprep.subr.bf16.mxu0 %v31618_v14  ;;  %34341 = vst [vmem:[#allocation172_spill] sm:$0xff] %v31634_v8  ;;  %v31642_v7 = vpop.permute.xlu1 %24884  ;;  %v14279_v27 = vsel %vm14242_vm13, %v24881_v36, %v33726_v22  ;;  %v14278_v22 = vsel %vm14242_vm13, %v24777_v6, %v24881_v36  ;;  %v24812_v6 = vunpack.i.h.bf16 %v31631_v45  ;;  %v24811_v36 = vunpack.i.l.bf16 %v31631_v45 }
 0x95a   : > { %34343 = vst [vmem:[#allocation173_spill] sm:$0xff] %v31642_v7  ;;  %v34351_v45 = vunpack.i.h.bf16 %v31101_v1  ;;  %v34354_v1 = vunpack.i.h.bf16 %v31344_v39 }
 0x95b   : > { %21298 = vmatpush1.bf16.msra.mxu1 %v31623_v18 }
 0x95c   : > { %21345 = vmatprep.subr.msk.bf16.mxu1 %vm29421_vm10, %v34342_v26  ;;  %21314 = vmatpush1.bf16.msra.mxu0 %v31634_v8  ;;  %v31648_v28 = vpop.permute.xlu0 %24814  ;;  %v14259_v26 = vsel %vm14242_vm13, %v24866_v17, %v33732_v54  ;;  %v24786_v8 = vunpack.i.l.bf16 %v31605_v57 }
 0x95d   : > { %v31661_v5 = vpop.permute.xlu1 %24889  ;;  %v31668_v52 = vpack.c.bf16 %v14279_v27, %v14259_v26  ;;  %v24747_v26 = vunpack.i.h.bf16 %v31457_v44  ;;  %v34350_v27 = vunpack.i.h.bf16 %v30943_v56  ;;  %v14599_v44 = vsel %vm14565_vm14, %v34351_v45, %v24781_v16 }
 0x95e   : > { %15800 = vmatmul.mubr.f32.vlgmr.msra.gmra.mrb[124].mxu1 %v31586_v0  ;;  %34346 = vst [vmem:[#allocation174_spill] sm:$0xff] %v31661_v5  ;;  %v34352_v56 = vunpack.i.h.bf16 %v31569_v35  ;;  %v33764_v2 = vunpack.i.h.bf16 %v31661_v5 }
 0x95f   : > { %21348 = vmatpush1.bf16.msk.msra.mxu1 %vm29421_vm10, %v34344_v30  ;;  %19678 = vmatprep.mubr.msk.f32.mxu1 %vm15377_vm12, %v34163_v53  ;;  %34347 = vst [vmem:[#allocation175_spill] sm:$0xff] %v31668_v52  ;;  %v14258_v53 = vsel %vm14242_vm13, %v24742_v33, %v24866_v17  ;;  %v14579_v33 = vsel %vm14565_vm14, %v34350_v27, %v24746_v42 }
 0x960   : > { %21351 = vmatprep.subr.msk.bf16.mxu1 %vm29421_vm10, %v34345_v38  ;;  %v31670_v14 = vpop.permute.xlu0 %24819  ;;  %v31681_v54 = vpack.c.bf16 %v14278_v22, %v14258_v53  ;;  %v24751_v38 = vunpack.i.l.bf16 %v31498_v4  ;;  %v24871_v22 = vunpack.i.l.bf16 %v31556_v32  ;;  %v14600_v27 = vsel %vm14565_vm14, %v24781_v16, %v34352_v56 }
 0x961   : > { %v31678_v30 = vpop.permute.xlu1 %24894  ;;  %v33749_v16 = vunpack.i.h.bf16 %v31584_v15  ;;  %v14580_v62 = vsel %vm14565_vm14, %v24746_v42, %v24747_v26  ;;  %v34359_v56 = vunpack.i.h.bf16 %v31605_v57 }
 0x962   : > { %34349 = vst [vmem:[#allocation176_spill] sm:$0xff] %v31681_v54 }
 0x963   : > { %21354 = vmatpush1.bf16.msk.msra.mxu1 %vm29421_vm10, %v34348_v43 }
 0x964   : > { %21356 = vmatprep.subr.bf16.mxu1 %v31668_v52  ;;  %v24845_v43 = vpop.permute.xlu0 %24844 }
 0x965   : > { %v24847_v53 = vunpack.i.h.bf16 %v24845_v43  ;;  %v24846_v52 = vunpack.i.l.bf16 %v24845_v43  ;;  %v31702_v18 = vpop.permute.xlu1 %24899  ;;  %v14297_v43 = vsel %vm14242_vm13, %v24811_v36, %v24812_v6 }
 0x967   : > { %21358 = vmatpush1.bf16.msra.mxu1 %v31681_v54  ;;  %v14296_v54 = vsel %vm14242_vm13, %v34353_v37, %v24811_v36  ;;  %v14316_v45 = vsel %vm14242_vm13, %v34354_v1, %v24846_v52  ;;  %v14317_v63 = vsel %vm14242_vm13, %v24846_v52, %v24847_v53  ;;  %v34357_v37 = vunpack.i.h.bf16 %v30981_v48 }
 0x968   : > { %v31714_v17 = vpack.c.bf16 %v14317_v63, %v14297_v43  ;;  %v31716_v31 = vpack.c.bf16 %v14316_v45, %v14296_v54  ;;  %v31718_v29 = vpop.permute.xlu0 %24849  ;;  %v24886_v52 = vunpack.i.l.bf16 %v31642_v7  ;;  %v31726_v1 = vpack.c.bf16 %v14600_v27, %v14580_v62 }
 0x969   : > { %v14902_v39 = vsel %vm14888_vm15, %v34357_v37, %v24751_v38  ;;  %v14923_v63 = vsel %vm14888_vm15, %v24786_v8, %v34359_v56  ;;  %v24816_v43 = vunpack.i.l.bf16 %v31648_v28  ;;  %v31733_v45 = vpop.permute.xlu1 %24904  ;;  %v34360_v48 = vunpack.i.h.bf16 %v31498_v4 }
 0x96a   : > { %34355 = vst [vmem:[#allocation177_spill] sm:$0xff] %v31714_v17  ;;  %34356 = vst [vmem:[#allocation178_spill] sm:$0xff] %v31716_v31  ;;  %21316 = vmatprep.subr.bf16.mxu0 %v31714_v17  ;;  %v14581_v37 = vsel %vm14565_vm14, %v24747_v26, %v24871_v22  ;;  %v34361_v27 = vunpack.i.h.bf16 %v31556_v32  ;;  %v31743_v36 = vpack.c.bf16 %v14599_v44, %v14579_v33  ;;  %v34363_v56 = vunpack.i.l.bf16 %v31584_v15 }
 0x96b   : > { %34358 = vst [vmem:[#allocation179_spill] sm:$0xff] %v31726_v1  ;;  %v14903_v42 = vsel %vm14888_vm15, %v24751_v38, %v34360_v48  ;;  %21318 = vmatpush1.bf16.msra.mxu0 %v31716_v31  ;;  %v34364_v17 = vunpack.i.h.bf16 %v31127_v11  ;;  %v24896_v48 = vunpack.i.l.bf16 %v31678_v30  ;;  %v34366_v44 = vunpack.i.h.bf16 %v31642_v7 }
 0x96c   : > { %v14582_v62 = vsel %vm14565_vm14, %v24871_v22, %v34361_v27  ;;  %34362 = vst [vmem:[#allocation180_spill] sm:$0xff] %v31743_v36  ;;  %v31751_v54 = vsel %vm14888_vm15, %v34363_v56, %v33749_v16  ;;  %v31758_v22 = vpop.permute.xlu0 %24854  ;;  %21320 = vmatprep.subr.bf16.mxu0 %v31726_v1  ;;  %v31761_v33 = vpack.c.bf16 %v14923_v63, %v14903_v42  ;;  %v34368_v16 = vunpack.i.h.bf16 %v31648_v28 }
 0x96d   : > { %v14922_v38 = vsel %vm14888_vm15, %v34364_v17, %v24786_v8  ;;  %v14602_v27 = vsel %vm14565_vm14, %v24886_v52, %v34366_v44  ;;  %v24856_v11 = vunpack.i.l.bf16 %v31758_v22  ;;  %v34367_v8 = vunpack.i.h.bf16 %v31205_v46  ;;  %v31776_v42 = vpop.permute.xlu1 %24909 }
 0x96e   : > { %34365 = vst [vmem:[#allocation181_spill] sm:$0xff] %v31761_v33  ;;  %v14620_v26 = vsel %vm14565_vm14, %v24816_v43, %v34368_v16  ;;  %v24821_v63 = vunpack.i.l.bf16 %v31670_v14  ;;  %v34369_v44 = vunpack.i.h.bf16 %v31381_v24  ;;  %v34370_v7 = vunpack.i.h.bf16 %v31758_v22 }
 0x96f   : > { %v14619_v17 = vsel %vm14565_vm14, %v34367_v8, %v24816_v43  ;;  %v33760_v8 = vunpack.i.h.bf16 %v31776_v42  ;;  %v24911_v1 = vunpack.i.l.bf16 %v31776_v42  ;;  %21322 = vmatpush1.bf16.msra.mxu0 %v31743_v36  ;;  %v14298_v16 = vsel %vm14242_vm13, %v24812_v6, %v24896_v48 }
 0x970   : > { %v14639_v56 = vsel %vm14565_vm14, %v34369_v44, %v24856_v11  ;;  %v14640_v46 = vsel %vm14565_vm14, %v24856_v11, %v34370_v7  ;;  %v34371_v43 = vunpack.i.h.bf16 %v31678_v30  ;;  %v31795_v44 = vpop.permute.xlu0 %24859 }
 0x971   : > { %v31791_v31 = vpack.c.bf16 %v14640_v46, %v14620_v26  ;;  %v31793_v24 = vpack.c.bf16 %v14639_v56, %v14619_v17  ;;  %v14318_v7 = vsel %vm14242_vm13, %v24847_v53, %v24911_v1  ;;  %v14319_v11 = vsel %vm14242_vm13, %v24911_v1, %v33760_v8  ;;  %v31809_v17 = vpop.permute.xlu1 %24914 }
 0x972   : > { %v14299_v32 = vsel %vm14242_vm13, %v24896_v48, %v34371_v43  ;;  %v33761_v36 = vunpack.i.h.bf16 %v31795_v44  ;;  %v24861_v6 = vunpack.i.l.bf16 %v31795_v44  ;;  %v24891_v48 = vunpack.i.l.bf16 %v31661_v5 }
 0x973   : > { %34372 = vst [vmem:[#allocation182_spill] sm:$0xff] %v31791_v31  ;;  %34373 = vst [vmem:[#allocation183_spill] sm:$0xff] %v31793_v24  ;;  %v31805_v26 = vpack.c.bf16 %v14319_v11, %v14299_v32  ;;  %v31807_v56 = vpack.c.bf16 %v14318_v7, %v14298_v16  ;;  %21324 = vmatprep.subr.bf16.mxu0 %v31791_v31  ;;  %v31812_v53 = vpack.c.bf16 %v14922_v38, %v14902_v39 }
 0x974   : > { %v34377_v1 = vunpack.i.h.bf16 %v31569_v35  ;;  %v31817_v43 = vpack.c.bf16 %v14602_v27, %v14582_v62  ;;  %v14963_v8 = vsel %vm14888_vm15, %v24861_v6, %v33761_v36  ;;  %21326 = vmatpush1.bf16.msra.mxu0 %v31793_v24  ;;  %v24901_v16 = vunpack.i.l.bf16 %v31702_v18  ;;  %v31828_v35 = vpop.permute.xlu0 %24919 }
 0x975   : > { %34374 = vst [vmem:[#allocation184_spill] sm:$0xff] %v31805_v26  ;;  %34375 = vst [vmem:[#allocation185_spill] sm:$0xff] %v31807_v56  ;;  %v24851_v39 = vunpack.i.l.bf16 %v31718_v29  ;;  %21360 = vmatprep.subr.bf16.mxu1 %v31805_v26  ;;  %21328 = vmatprep.subr.bf16.mxu0 %v31761_v33  ;;  %v34380_v38 = vunpack.i.h.bf16 %v31432_v60  ;;  %v33765_v11 = vunpack.i.h.bf16 %v31828_v35  ;;  %v34382_v7 = vunpack.i.h.bf16 %v31605_v57  ;;  %v31850_v60 = vpop.permute.xlu1 %24924 }
 0x976   : > { %34376 = vst [vmem:[#allocation186_spill] sm:$0xff] %v31812_v53  ;;  %v14601_v46 = vsel %vm14565_vm14, %v34377_v1, %v24886_v52  ;;  %34378 = vst [vmem:[#allocation187_spill] sm:$0xff] %v31817_v43  ;;  %v34379_v52 = vunpack.i.h.bf16 %v31670_v14  ;;  %21362 = vmatpush1.bf16.msra.mxu1 %v31807_v56  ;;  %v24921_v1 = vunpack.i.l.bf16 %v31828_v35  ;;  %v34408_v5 = vunpack.i.h.bf16 %v31795_v44 }
 0x977   : > { %v14962_v27 = vsel %vm14888_vm15, %v34380_v38, %v24861_v6  ;;  %v31840_v36 = vpack.c.bf16 %v14601_v46, %v14581_v37  ;;  %v14924_v32 = vsel %vm14888_vm15, %v34382_v7, %v24891_v48  ;;  %21364 = vmatprep.subr.bf16.mxu1 %v31817_v43  ;;  %v34384_v6 = vunpack.i.h.bf16 %v31245_v59 }
 0x978   : > { %v14943_v62 = vsel %vm14888_vm15, %v24821_v63, %v34379_v52  ;;  %v14925_v52 = vsel %vm14888_vm15, %v24891_v48, %v33764_v2  ;;  %v15246_v57 = vsel %vm15211_vm0, %v24921_v1, %v33765_v11  ;;  %v24926_v46 = vunpack.i.l.bf16 %v31850_v60  ;;  %21330 = vmatpush1.bf16.msra.mxu0 %v31812_v53  ;;  %v31873_v2 = vpop.permute.xlu0 %24934 }
 0x979   : > { %34381 = vst [vmem:[#allocation188_spill] sm:$0xff] %v31840_v36  ;;  %v31848_v26 = vpack.c.bf16 %v14963_v8, %v14943_v62  ;;  %v14942_v38 = vsel %vm14888_vm15, %v34384_v6, %v24821_v63  ;;  %v34385_v8 = vunpack.i.h.bf16 %v31648_v28  ;;  %v34386_v7 = vunpack.i.h.bf16 %v31702_v18 }
 0x97a   : > { %v34387_v63 = vunpack.i.h.bf16 %v31718_v29  ;;  %v31871_v6 = vpack.c.bf16 %v14962_v27, %v14942_v38  ;;  %v34389_v11 = vunpack.i.h.bf16 %v31147_v25  ;;  %21366 = vmatpush1.bf16.msra.mxu1 %v31840_v36  ;;  %v33766_v25 = vunpack.i.h.bf16 %v31873_v2 }
 0x97b   : > { %34383 = vst [vmem:[#allocation189_spill] sm:$0xff] %v31848_v26  ;;  %v14621_v48 = vsel %vm14565_vm14, %v34385_v8, %v24901_v16  ;;  %v14622_v59 = vsel %vm14565_vm14, %v24901_v16, %v34386_v7  ;;  %21332 = vmatprep.subr.bf16.mxu0 %v31848_v26  ;;  %v34391_v8 = vunpack.i.h.bf16 %v31758_v22  ;;  %v34392_v7 = vunpack.i.h.bf16 %v31850_v60  ;;  %v34429_v26 = vld [vmem:[#allocation31_spill] sm:$0xff] }
 0x97c   : > { %v15226_v62 = vsel %vm15211_vm0, %v24851_v39, %v34387_v63  ;;  %34388 = vst [vmem:[#allocation190_spill] sm:$0xff] %v31871_v6  ;;  %v15245_v28 = vsel %vm15211_vm0, %v34389_v11, %v24921_v1  ;;  %v24936_v11 = vunpack.i.l.bf16 %v31873_v2  ;;  %v31894_v1 = vpop.permute.xlu1 %24929  ;;  %v34395_v22 = vunpack.i.l.bf16 %v31584_v15  ;;  %21334 = vmatpush1.bf16.msra.mxu0 %v31871_v6  ;;  %v34424_v15 = vld [vmem:[#allocation68_spill] sm:$0xff] }
 0x97d   : > { %v31879_v37 = vpack.c.bf16 %v15246_v57, %v15226_v62  ;;  %v14641_v16 = vsel %vm14565_vm14, %v34391_v8, %v24926_v46  ;;  %v14642_v63 = vsel %vm14565_vm14, %v24926_v46, %v34392_v7  ;;  %v34396_v57 = vunpack.i.h.bf16 %v31498_v4  ;;  %v24950_v4 = vpop.permute.xlu0 %24949 }
 0x97e   : > { %v31888_v27 = vpack.c.bf16 %v14642_v63, %v14622_v59  ;;  %v31890_v38 = vpack.c.bf16 %v14641_v16, %v14621_v48  ;;  %v31902_v46 = vpack.c.bf16 %v14925_v52, %v31751_v54  ;;  %v34398_v59 = vunpack.i.h.bf16 %v31029_v40 }
 0x97f   : > { %34390 = vst [vmem:[#allocation191_spill] sm:$0xff] %v31879_v37  ;;  %v14904_v62 = vsel %vm14888_vm15, %v34396_v57, %v34395_v22  ;;  %v24906_v7 = vunpack.i.l.bf16 %v31733_v45  ;;  %21336 = vmatprep.subr.bf16.mxu0 %v31879_v37  ;;  %v24931_v40 = vunpack.i.l.bf16 %v31894_v1  ;;  %v24916_v22 = vunpack.i.l.bf16 %v31809_v17 }
 0x980   : > { %34393 = vst [vmem:[#allocation192_spill] sm:$0xff] %v31888_v27  ;;  %34394 = vst [vmem:[#allocation193_spill] sm:$0xff] %v31890_v38  ;;  %v15225_v48 = vsel %vm15211_vm0, %v34398_v59, %v24851_v39  ;;  %v31908_v8 = vpack.c.bf16 %v14924_v32, %v14904_v62  ;;  %21368 = vmatprep.subr.bf16.mxu1 %v31888_v27  ;;  %v24952_v39 = vunpack.i.h.bf16 %v24950_v4  ;;  %v24951_v32 = vunpack.i.l.bf16 %v24950_v4  ;;  %v31927_v59 = vpop.permute.xlu1 %24939 }
 0x981   : > { %34397 = vst [vmem:[#allocation194_spill] sm:$0xff] %v31902_v46  ;;  %v31912_v63 = vpack.c.bf16 %v15245_v28, %v15225_v48  ;;  %21370 = vmatpush1.bf16.msra.mxu1 %v31890_v38  ;;  %v34401_v28 = vunpack.i.h.bf16 %v31298_v49  ;;  %v15266_v62 = vsel %vm15211_vm0, %v24936_v11, %v33766_v25  ;;  %v34402_v48 = vunpack.i.h.bf16 %v31477_v20  ;;  %v31944_v20 = vld [vmem:[#allocation13] sm:$0x77] }
 0x982   : > { %34399 = vst [vmem:[#allocation195_spill] sm:$0xff] %v31908_v8  ;;  %21372 = vmatprep.subr.bf16.mxu1 %v31902_v46  ;;  %v15286_v52 = vsel %vm15211_vm0, %v24951_v32, %v24952_v39  ;;  %v24941_v49 = vunpack.i.l.bf16 %v31927_v59  ;;  %v24960_v46 = vpop.permute.xlu0 %24959  ;;  %v34407_v54 = vunpack.i.h.bf16 %v31894_v1  ;;  %v34425_v43 = vunpack.i.h.bf16 %v34424_v15 }
 0x983   : > { %34400 = vst [vmem:[#allocation196_spill] sm:$0xff] %v31912_v63  ;;  %v15265_v57 = vsel %vm15211_vm0, %v34401_v28, %v24936_v11  ;;  %v15285_v4 = vsel %vm15211_vm0, %v34402_v48, %v24951_v32  ;;  %21338 = vmatpush1.bf16.msra.mxu0 %v31912_v63  ;;  %v34403_v28 = vunpack.i.h.bf16 %v31670_v14  ;;  %v31940_v25 = vpack.c.bf16 %v15286_v52, %v15266_v62 }
 0x984   : > { %v31942_v16 = vpack.c.bf16 %v15285_v4, %v15265_v57  ;;  %v34406_v48 = vunpack.i.h.bf16 %v31733_v45  ;;  %v15248_v27 = vsel %vm15211_vm0, %v24931_v40, %v34407_v54  ;;  %v14964_v14 = vsel %vm14888_vm15, %v34408_v5, %v24941_v49 }
 0x985   : > { %v14944_v11 = vsel %vm14888_vm15, %v34403_v28, %v24906_v7  ;;  %34404 = vst [vmem:[#allocation197_spill] sm:$0xff] %v31940_v25  ;;  %v34409_v52 = vunpack.i.h.bf16 %v31927_v59  ;;  %21374 = vmatpush1.bf16.msra.mxu1 %v31908_v8  ;;  %v31963_v28 = vpop.permute.xlu1 %24944  ;;  %21340 = vmatprep.subr.bf16.mxu0 %v31940_v25  ;;  %v31972_v5 = vcombine.high %v31944_v20, %v31944_v20  ;;  %v34413_v54 = vunpack.i.h.bf16 %v31828_v35 }
 0x986   : > { %34405 = vst [vmem:[#allocation198_spill] sm:$0xff] %v31942_v16  ;;  %v14945_v32 = vsel %vm14888_vm15, %v24906_v7, %v34406_v48  ;;  %v31961_v4 = vpack.c.bf16 %v14964_v14, %v14944_v11  ;;  %v34412_v7 = vunpack.i.h.bf16 %v31809_v17  ;;  %v24970_v48 = vpop.permute.xlu0 %24969 }
 0x987   : > { %v14965_v57 = vsel %vm14888_vm15, %v24941_v49, %v34409_v52  ;;  %21342 = vmatpush1.bf16.msra.mxu0 %v31942_v16  ;;  %v15247_v49 = vsel %vm15211_vm0, %v34413_v54, %v24931_v40  ;;  %v24962_v40 = vunpack.i.h.bf16 %v24960_v46 }
 0x988   : > { %v31959_v62 = vpack.c.bf16 %v14965_v57, %v14945_v32  ;;  %34411 = vst [vmem:[#allocation200_spill] sm:$0xff] %v31961_v4  ;;  %v15228_v44 = vsel %vm15211_vm0, %v24916_v22, %v34412_v7  ;;  %v34415_v32 = vld [vmem:[#allocation28_spill] sm:$0xff]  ;;  %v24946_v57 = vunpack.i.l.bf16 %v31963_v28  ;;  %v34417_v7 = vunpack.i.h.bf16 %v31718_v29 }
 0x989   : > { %v31977_v11 = vpack.c.bf16 %v15248_v27, %v15228_v44  ;;  %21389 = vmatprep.subr.msk.bf16.mxu0 %vm29436_vm11, %v34415_v32  ;;  %v24961_v27 = vunpack.i.l.bf16 %v24960_v46  ;;  %v31989_v44 = vpop.permute.xlu1 %24954  ;;  %v34420_v46 = vld [vmem:[#allocation34_spill] sm:$0xff] }
 0x98a   : > { %34410 = vst [vmem:[#allocation199_spill] sm:$0xff] %v31959_v62  ;;  %21376 = vmatprep.subr.bf16.mxu1 %v31959_v62  ;;  %v15227_v35 = vsel %vm15211_vm0, %v34417_v7, %v24916_v22  ;;  %15871 = vmatmul.mubr.f32.vlgmr.msra.gmra.mrb[126].mxu0 %v31586_v0  ;;  %v24956_v52 = vunpack.i.l.bf16 %v31989_v44  ;;  %v34419_v62 = vld [vmem:[#allocation25_spill] sm:$0xff]  ;;  %v24980_v29 = vpop.permute.xlu0 %24979  ;;  %v34421_v22 = vunpack.i.h.bf16 %v31873_v2  ;;  %v34422_v7 = vunpack.i.h.bf16 %v31963_v28 }
 0x98b   : > { %34414 = vst [vmem:[#allocation201_spill] sm:$0xff] %v31977_v11  ;;  %21378 = vmatpush1.bf16.msra.mxu1 %v31961_v4  ;;  %v31993_v54 = vpack.c.bf16 %v15247_v49, %v15227_v35  ;;  %21392 = vmatpush1.bf16.msk.msra.mxu0 %vm29436_vm11, %v34419_v62  ;;  %v34423_v62 = vunpack.i.h.bf16 %v31989_v44  ;;  %v34426_v2 = vunpack.i.l.bf16 %v34424_v15 }
 0x98c   : > { %21380 = vmatprep.subr.bf16.mxu1 %v31977_v11  ;;  %19687 = vmatprep.mubr.msk.f32.mxu0 %vm15377_vm12, %v31972_v5  ;;  %v15267_v49 = vsel %vm15211_vm0, %v34421_v22, %v24946_v57  ;;  %v15268_v35 = vsel %vm15211_vm0, %v24946_v57, %v34422_v7  ;;  %v15287_v32 = vsel %vm15211_vm0, %v24952_v39, %v24956_v52 }
 0x98d   : > { %34418 = vst [vmem:[#allocation28_spill] sm:$0xff] %v31993_v54  ;;  %21395 = vmatprep.subr.msk.bf16.mxu0 %vm29436_vm11, %v34420_v46  ;;  %v15288_v11 = vsel %vm15211_vm0, %v24956_v52, %v34423_v62  ;;  %v14263_v46 = vsel %vm14242_vm13, %v24962_v40, %v34425_v43  ;;  %v14243_v22 = vsel %vm14242_vm13, %v24961_v27, %v34426_v2  ;;  %v24965_v57 = vpop.permute.xlu1 %24964  ;;  %v34430_v43 = vld [vmem:[#allocation78_spill] sm:$0xff]  ;;  %v24971_v40 = vunpack.i.l.bf16 %v24970_v48  ;;  %v34431_v27 = vld [vmem:[#allocation76_spill] sm:$0xff] }
 0x98e   : > { %v32022_v25 = vpack.c.bf16 %v15288_v11, %v15268_v35  ;;  %v32024_v37 = vpack.c.bf16 %v15287_v32, %v15267_v49  ;;  %v24967_v39 = vunpack.i.h.bf16 %v24965_v57  ;;  %v24966_v7 = vunpack.i.l.bf16 %v24965_v57  ;;  %v32030_v52 = vpop.permute.xlu0 %24989  ;;  %v34434_v2 = vld [vmem:[#allocation30_spill] sm:$0xff]  ;;  %v34437_v57 = vld [vmem:[#allocation27_spill] sm:$0xff] }
 0x98f   : > { %21382 = vmatpush1.bf16.msra.mxu1 %v31993_v54  ;;  %21398 = vmatpush1.bf16.msk.msra.mxu0 %vm29436_vm11, %v34429_v26  ;;  %v21401_v15 = vpack.c.bf16 %v14263_v46, %v14243_v22  ;;  %v24972_v11 = vunpack.i.h.bf16 %v24970_v48  ;;  %v34432_v32 = vunpack.i.h.bf16 %v34431_v27  ;;  %v34433_v35 = vunpack.i.l.bf16 %v34431_v27  ;;  %v34436_v22 = vld [vmem:[#allocation81_spill] sm:$0xff] }
 0x990   : > { %34427 = vst [vmem:[#allocation25_spill] sm:$0xff] %v32022_v25  ;;  %34428 = vst [vmem:[#allocation34_spill] sm:$0xff] %v32024_v37  ;;  %21384 = vmatprep.subr.bf16.mxu1 %v32022_v25  ;;  %21400 = vmatprep.subr.bf16.mxu0 %v34430_v43  ;;  %v24982_v25 = vunpack.i.h.bf16 %v24980_v29 }
 0x991   : > { %v14303_v49 = vsel %vm14242_vm13, %v24967_v39, %v34432_v32  ;;  %v14283_v62 = vsel %vm14242_vm13, %v24966_v7, %v34433_v35  ;;  %v24975_v26 = vpop.permute.xlu1 %24974  ;;  %v34438_v39 = vld [vmem:[#allocation72_spill] sm:$0xff] }
 0x992   : > { %v32044_v46 = vpop.permute.xlu0 %24999  ;;  %v21405_v48 = vpack.c.bf16 %v14303_v49, %v14283_v62  ;;  %v34439_v7 = vunpack.i.h.bf16 %v34438_v39  ;;  %v24977_v27 = vunpack.i.h.bf16 %v24975_v26  ;;  %v24976_v32 = vunpack.i.l.bf16 %v24975_v26  ;;  %v34443_v62 = vld [vmem:[#allocation85_spill] sm:$0xff] }
 0x993   : > { %21386 = vmatpush1.bf16.msra.mxu1 %v32024_v37  ;;  %21402 = vmatpush1.bf16.msra.mxu0 %v21401_v15  ;;  %34435 = vst [vmem:[#allocation68_spill] sm:$0xff] %v32044_v46  ;;  %v34440_v15 = vunpack.i.l.bf16 %v34438_v39  ;;  %v24981_v37 = vunpack.i.l.bf16 %v24980_v29 }
 0x994   : > { %21433 = vmatprep.subr.msk.bf16.mxu1 %vm29421_vm10, %v34434_v2  ;;  %21404 = vmatprep.subr.bf16.mxu0 %v34436_v22  ;;  %v14586_v43 = vsel %vm14565_vm14, %v24972_v11, %v34439_v7  ;;  %v34441_v22 = vld [vmem:[#allocation35_spill] sm:$0xff]  ;;  %v34444_v11 = vld [vmem:[#allocation33_spill] sm:$0xff] }
 0x995   : > { %v24985_v35 = vpop.permute.xlu1 %24984  ;;  %v34462_v2 = vld [vmem:[#allocation79_spill] sm:$0xff] }
 0x996   : > { %15942 = vmatmul.mubr.f32.vlgmr.msra.gmra.mrb[126].mxu1 %v31586_v0  ;;  %v14566_v0 = vsel %vm14565_vm14, %v24971_v40, %v34440_v15  ;;  %v32061_v49 = vpop.permute.xlu0 %25009  ;;  %v34445_v40 = vld [vmem:[#allocation83_spill] sm:$0xff]  ;;  %v24987_v29 = vunpack.i.h.bf16 %v24985_v35 }
 0x997   : > { %21436 = vmatpush1.bf16.msk.msra.mxu1 %vm29421_vm10, %v34437_v57  ;;  %19696 = vmatprep.mubr.msk.f32.mxu1 %vm15377_vm12, %v31972_v5  ;;  %34442 = vst [vmem:[#allocation31_spill] sm:$0xff] %v32061_v49  ;;  %v21409_v14 = vpack.c.bf16 %v14586_v43, %v14566_v0  ;;  %v34446_v39 = vunpack.i.h.bf16 %v34445_v40  ;;  %v34447_v7 = vunpack.i.l.bf16 %v34445_v40  ;;  %v24992_v43 = vunpack.i.h.bf16 %v32030_v52  ;;  %v34451_v57 = vld [vmem:[#allocation80_spill] sm:$0xff] }
 0x998   : > { %21439 = vmatprep.subr.msk.bf16.mxu1 %vm29421_vm10, %v34441_v22  ;;  %21406 = vmatpush1.bf16.msra.mxu0 %v21405_v48  ;;  %v34448_v22 = vld [vmem:[#allocation102_spill] sm:$0xff]  ;;  %v24986_v0 = vunpack.i.l.bf16 %v24985_v35  ;;  %v34452_v54 = vunpack.i.h.bf16 %v34451_v57  ;;  %v34453_v40 = vunpack.i.l.bf16 %v34451_v57  ;;  %v34455_v35 = vld [vmem:[#allocation111_spill] sm:$0xff] }
 0x999   : > { %21408 = vmatprep.subr.bf16.mxu0 %v34443_v62  ;;  %v14626_v26 = vsel %vm14565_vm14, %v24977_v27, %v34446_v39  ;;  %v14606_v15 = vsel %vm14565_vm14, %v24976_v32, %v34447_v7  ;;  %v32073_v48 = vpop.permute.xlu1 %24994  ;;  %v34454_v7 = vld [vmem:[#allocation77_spill] sm:$0xff] }
 0x99a   : > { %v32077_v62 = vpop.permute.xlu0 %25019  ;;  %v14909_v27 = vsel %vm14888_vm15, %v24982_v25, %v34452_v54  ;;  %v14889_v32 = vsel %vm14888_vm15, %v24981_v37, %v34453_v40  ;;  %v21413_v39 = vpack.c.bf16 %v14626_v26, %v14606_v15  ;;  %v34456_v25 = vld [vmem:[#allocation87_spill] sm:$0xff]  ;;  %v34458_v37 = vld [vmem:[#allocation89_spill] sm:$0xff] }
 0x99b   : > { %21442 = vmatpush1.bf16.msk.msra.mxu1 %vm29421_vm10, %v34444_v11  ;;  %34449 = vst [vmem:[#allocation78_spill] sm:$0xff] %v32077_v62  ;;  %v34450_v11 = vld [vmem:[#allocation86_spill] sm:$0xff]  ;;  %v21417_v4 = vpack.c.bf16 %v14909_v27, %v14889_v32  ;;  %v34457_v54 = vunpack.i.h.bf16 %v34456_v25  ;;  %v34459_v26 = vunpack.i.h.bf16 %v34458_v37  ;;  %v34467_v32 = vld [vmem:[#allocation103_spill] sm:$0xff] }
 0x99c   : > { %21444 = vmatprep.subr.bf16.mxu1 %v34448_v22  ;;  %21410 = vmatpush1.bf16.msra.mxu0 %v21409_v14  ;;  %v24991_v14 = vunpack.i.l.bf16 %v32030_v52  ;;  %v34460_v52 = vunpack.i.l.bf16 %v34458_v37 }
 0x99d   : > { %21412 = vmatprep.subr.bf16.mxu0 %v34450_v11  ;;  %v32088_v22 = vpop.permute.xlu1 %25004  ;;  %v15232_v57 = vsel %vm15211_vm0, %v24992_v43, %v34457_v54  ;;  %v14949_v15 = vsel %vm14888_vm15, %v24987_v29, %v34459_v26  ;;  %v34463_v43 = vunpack.i.h.bf16 %v31678_v30 }
 0x99e   : > { %v33794_v11 = vunpack.i.l.bf16 %v32088_v22  ;;  %v14929_v40 = vsel %vm14888_vm15, %v24986_v0, %v34460_v52  ;;  %v34465_v0 = vunpack.i.h.bf16 %v31776_v42 }
 0x99f   : > { %21446 = vmatpush1.bf16.msra.mxu1 %v34454_v7  ;;  %v32102_v7 = vpop.permute.xlu0 %25029  ;;  %v21421_v26 = vpack.c.bf16 %v14949_v15, %v14929_v40  ;;  %v34478_v40 = vunpack.i.h.bf16 %v31850_v60  ;;  %v34482_v60 = vunpack.i.l.bf16 %v32044_v46 }
 0x9a0   : > { %21448 = vmatprep.subr.bf16.mxu1 %v34455_v35  ;;  %21414 = vmatpush1.bf16.msra.mxu0 %v21413_v39  ;;  %v34461_v35 = vld [vmem:[#allocation91_spill] sm:$0xff]  ;;  %v14300_v29 = vsel %vm14242_vm13, %v34463_v43, %v33794_v11  ;;  %v34464_v39 = vunpack.i.h.bf16 %v32088_v22 }
 0x9a1   : > { %21416 = vmatprep.subr.bf16.mxu0 %v34461_v35  ;;  %v34466_v35 = vunpack.i.l.bf16 %v34456_v25  ;;  %v32123_v27 = vpop.permute.xlu1 %25014  ;;  %v34470_v25 = vunpack.i.h.bf16 %v31809_v17  ;;  %v34475_v17 = vld [vmem:[#allocation82_spill] sm:$0xff] }
 0x9a2   : > { %v14320_v54 = vsel %vm14242_vm13, %v34465_v0, %v34464_v39  ;;  %v33795_v42 = vunpack.i.l.bf16 %v32123_v27  ;;  %v34469_v39 = vunpack.i.l.bf16 %v32102_v7  ;;  %v34471_v0 = vunpack.i.h.bf16 %v32102_v7 }
 0x9a3   : > { %21450 = vmatpush1.bf16.msra.mxu1 %v34462_v2  ;;  %v15212_v37 = vsel %vm15211_vm0, %v24991_v14, %v34466_v35  ;;  %v32126_v30 = vpack.c.bf16 %v14320_v54, %v14300_v29  ;;  %v34472_v35 = vunpack.i.h.bf16 %v31894_v1  ;;  %v24997_v29 = vunpack.i.h.bf16 %v32073_v48  ;;  %v32142_v52 = vpop.permute.xlu0 %25039 }
 0x9a4   : > { %21452 = vmatprep.subr.bf16.mxu1 %v34467_v32  ;;  %21418 = vmatpush1.bf16.msra.mxu0 %v21417_v4  ;;  %v15229_v14 = vsel %vm15211_vm0, %v34470_v25, %v34469_v39  ;;  %v24996_v54 = vunpack.i.l.bf16 %v32073_v48  ;;  %v34473_v4 = vld [vmem:[#allocation92_spill] sm:$0xff]  ;;  %v34476_v1 = vunpack.i.h.bf16 %v31702_v18  ;;  %v34477_v48 = vunpack.i.h.bf16 %v32123_v27 }
 0x9a5   : > { %34468 = vst [vmem:[#allocation76_spill] sm:$0xff] %v32126_v30  ;;  %v15249_v11 = vsel %vm15211_vm0, %v34472_v35, %v34471_v0  ;;  %21420 = vmatprep.subr.bf16.mxu0 %v34473_v4  ;;  %v32161_v35 = vpop.permute.xlu1 %25024  ;;  %v34479_v4 = vld [vmem:[#allocation115_spill] sm:$0xff]  ;;  %v34521_v30 = vunpack.i.l.bf16 %v32123_v27 }
 0x9a6   : > { %v32145_v43 = vpack.c.bf16 %v15249_v11, %v15229_v14  ;;  %v14623_v15 = vsel %vm14565_vm14, %v34476_v1, %v33795_v42  ;;  %v14643_v0 = vsel %vm14565_vm14, %v34478_v40, %v34477_v48  ;;  %v21425_v11 = vpack.c.bf16 %v15232_v57, %v15212_v37 }
 0x9a7   : > { %21454 = vmatpush1.bf16.msra.mxu1 %v34475_v17  ;;  %v32164_v39 = vpack.c.bf16 %v14643_v0, %v14623_v15  ;;  %v34481_v1 = vunpack.i.l.bf16 %v32142_v52  ;;  %v34483_v57 = vunpack.i.h.bf16 %v32142_v52  ;;  %v34484_v37 = vunpack.i.h.bf16 %v32044_v46  ;;  %v34485_v0 = vld [vmem:[#allocation94_spill] sm:$0xff]  ;;  %v32185_v18 = vpop.permute.xlu0 %25049 }
 0x9a8   : > { %34474 = vst [vmem:[#allocation81_spill] sm:$0xff] %v32145_v43  ;;  %21456 = vmatprep.subr.bf16.mxu1 %v34479_v4  ;;  %21422 = vmatpush1.bf16.msra.mxu0 %v21421_v26  ;;  %v34486_v42 = vunpack.i.h.bf16 %v34485_v0  ;;  %v34487_v26 = vunpack.i.l.bf16 %v34485_v0  ;;  %v34488_v43 = vld [vmem:[#allocation96_spill] sm:$0xff]  ;;  %v34491_v15 = vunpack.i.l.bf16 %v32161_v35  ;;  %v34494_v0 = vunpack.i.h.bf16 %v31927_v59 }
 0x9a9   : > { %34480 = vst [vmem:[#allocation72_spill] sm:$0xff] %v32164_v39  ;;  %v14261_v48 = vsel %vm14242_vm13, %v34482_v60, %v34481_v1  ;;  %v14281_v40 = vsel %vm14242_vm13, %v34484_v37, %v34483_v57  ;;  %21424 = vmatprep.subr.bf16.mxu0 %v34488_v43  ;;  %v34490_v60 = vld [vmem:[#allocation84_spill] sm:$0xff]  ;;  %v33799_v37 = vunpack.i.l.bf16 %v32185_v18  ;;  %v34497_v59 = vunpack.i.h.bf16 %v32185_v18  ;;  %v34499_v57 = vld [vmem:[#allocation97_spill] sm:$0xff] }
 0x9aa   : > { %v15272_v14 = vsel %vm15211_vm0, %v24997_v29, %v34486_v42  ;;  %v15252_v25 = vsel %vm15211_vm0, %v24996_v54, %v34487_v26  ;;  %v32188_v1 = vpack.c.bf16 %v14281_v40, %v14261_v48  ;;  %v34492_v42 = vunpack.i.h.bf16 %v31733_v45  ;;  %v32203_v48 = vpop.permute.xlu1 %25034 }
 0x9ab   : > { %21458 = vmatpush1.bf16.msra.mxu1 %v34490_v60  ;;  %v34493_v54 = vunpack.i.h.bf16 %v32161_v35  ;;  %v34496_v45 = vunpack.i.l.bf16 %v32061_v49  ;;  %v25060_v26 = vpop.permute.xlu0 %25059  ;;  %v34503_v39 = vunpack.i.h.bf16 %v31963_v28 }
 0x9ac   : > { %34489 = vst [vmem:[#allocation85_spill] sm:$0xff] %v32188_v1  ;;  %v14946_v29 = vsel %vm14888_vm15, %v34492_v42, %v34491_v15  ;;  %21460 = vmatprep.subr.bf16.mxu1 %v30410_v55  ;;  %21426 = vmatpush1.bf16.msra.mxu0 %v21425_v11  ;;  %v34498_v42 = vunpack.i.h.bf16 %v32061_v49  ;;  %v34501_v1 = vld [vmem:[#allocation88_spill] sm:$0xff] }
 0x9ad   : > { %v14966_v43 = vsel %vm14888_vm15, %v34494_v0, %v34493_v54  ;;  %v14584_v15 = vsel %vm14565_vm14, %v34496_v45, %v33799_v37  ;;  %v21429_v0 = vpack.c.bf16 %v15272_v14, %v15252_v25  ;;  %21428 = vmatprep.subr.bf16.mxu0 %v34499_v57  ;;  %v25061_v45 = vunpack.i.l.bf16 %v25060_v26 }
 0x9ae   : > { %v32206_v40 = vpack.c.bf16 %v14966_v43, %v14946_v29  ;;  %v14604_v54 = vsel %vm14565_vm14, %v34498_v42, %v34497_v59  ;;  %v33801_v43 = vunpack.i.l.bf16 %v32077_v62  ;;  %v34502_v37 = vunpack.i.l.bf16 %v32203_v48  ;;  %v25045_v29 = vpop.permute.xlu1 %25044 }
 0x9af   : > { %v32223_v11 = vpack.c.bf16 %v14604_v54, %v14584_v15  ;;  %21462 = vmatpush1.bf16.msra.mxu1 %v34501_v1  ;;  %v34504_v25 = vunpack.i.h.bf16 %v32203_v48  ;;  %v34505_v14 = vunpack.i.h.bf16 %v31989_v44  ;;  %v25047_v15 = vunpack.i.h.bf16 %v25045_v29  ;;  %v34508_v44 = vld [vmem:[#allocation38_spill] sm:$0xff] }
 0x9b0   : > { %34495 = vst [vmem:[#allocation83_spill] sm:$0xff] %v32206_v40  ;;  %v25062_v40 = vunpack.i.h.bf16 %v25060_v26  ;;  %v15269_v59 = vsel %vm15211_vm0, %v34503_v39, %v34502_v37  ;;  %21464 = vmatprep.subr.bf16.mxu1 %v30687_v47  ;;  %v25046_v54 = vunpack.i.l.bf16 %v25045_v29  ;;  %21430 = vmatpush1.bf16.msra.mxu0 %v21429_v0  ;;  %v14907_v28 = vsel %vm14888_vm15, %v33801_v43, %v25061_v45  ;;  %v32245_v26 = vpop.permute.xlu0 %25069  ;;  %v34514_v0 = vld [vmem:[#allocation36_spill] sm:$0xff] }
 0x9b1   : > { %34500 = vst [vmem:[#allocation86_spill] sm:$0xff] %v32223_v11  ;;  %v15289_v42 = vsel %vm15211_vm0, %v34505_v14, %v34504_v25  ;;  %v34507_v39 = vunpack.i.h.bf16 %v32077_v62  ;;  %21477 = vmatprep.subr.msk.bf16.mxu0 %vm29421_vm10, %v34508_v44  ;;  %v33811_v29 = vunpack.i.l.bf16 %v32245_v26  ;;  %v34511_v14 = vunpack.i.l.bf16 %v32088_v22  ;;  %v34520_v62 = vld [vmem:[#allocation93_spill] sm:$0xff] }
 0x9b2   : > { %v32237_v57 = vpack.c.bf16 %v15289_v42, %v15269_v59  ;;  %v34510_v59 = vld [vmem:[#allocation90_spill] sm:$0xff]  ;;  %v25055_v11 = vpop.permute.xlu1 %25054 }
 0x9b3   : > { %v14927_v37 = vsel %vm14888_vm15, %v34507_v39, %v25062_v40  ;;  %21466 = vmatpush1.bf16.msra.mxu1 %v34510_v59  ;;  %v14301_v42 = vsel %vm14242_vm13, %v34511_v14, %v25046_v54  ;;  %v34512_v39 = vunpack.i.h.bf16 %v32088_v22  ;;  %16017 = vmatmul.mubr.f32.vlgmr.msra.gmra.mrb[120].mxu0 %v31944_v20  ;;  %v34515_v22 = vunpack.i.l.bf16 %v32102_v7 }
 0x9b4   : > { %34506 = vst [vmem:[#allocation80_spill] sm:$0xff] %v32237_v57  ;;  %v32250_v25 = vpack.c.bf16 %v14927_v37, %v14907_v28  ;;  %21468 = vmatprep.subr.bf16.mxu1 %v30430_v58  ;;  %v25057_v37 = vunpack.i.h.bf16 %v25055_v11  ;;  %21480 = vmatpush1.bf16.msk.msra.mxu0 %vm29421_vm10, %v34514_v0 }
 0x9b5   : > { %v14321_v43 = vsel %vm14242_vm13, %v34512_v39, %v25047_v15  ;;  %19705 = vmatprep.mubr.msk.f32.mxu0 %vm15377_vm12, %v31972_v5  ;;  %v15230_v14 = vsel %vm15211_vm0, %v34515_v22, %v33811_v29  ;;  %v34516_v39 = vunpack.i.h.bf16 %v32245_v26  ;;  %v34522_v22 = vunpack.i.h.bf16 %v32123_v27 }
 0x9b6   : > { %34509 = vst [vmem:[#allocation87_spill] sm:$0xff] %v32250_v25  ;;  %v32263_v28 = vpack.c.bf16 %v14321_v43, %v14301_v42  ;;  %v25056_v25 = vunpack.i.l.bf16 %v25055_v11  ;;  %v34517_v43 = vunpack.i.h.bf16 %v32102_v7  ;;  %v14121_v11 = vpop.permute.xlu0 %14120  ;;  %v34523_v7 = vunpack.i.l.bf16 %v32142_v52 }
 0x9b7   : > { %21470 = vmatpush1.bf16.msra.mxu1 %v34520_v62  ;;  %v14644_v29 = vsel %vm14565_vm14, %v34522_v22, %v25057_v37  ;;  %v32311_v22 = vsel %vm14242_vm13, %v25047_v15, %v14121_v11  ;;  %v34535_v15 = vunpack.i.h.bf16 %v32161_v35 }
 0x9b8   : > { %34513 = vst [vmem:[#allocation89_spill] sm:$0xff] %v32263_v28  ;;  %v15250_v42 = vsel %vm15211_vm0, %v34517_v43, %v34516_v39  ;;  %v34518_v28 = vld [vmem:[#allocation42_spill] sm:$0xff]  ;;  %v14624_v49 = vsel %vm14565_vm14, %v34521_v30, %v25056_v25  ;;  %v32295_v39 = vsel %vm14242_vm13, %v34523_v7, %v14121_v11  ;;  %v34525_v43 = vunpack.i.h.bf16 %v32142_v52  ;;  %34530 = vst [vmem:[#allocation115_spill] sm:$0xff] %v32311_v22  ;;  %v34531_v52 = vld [vmem:[#allocation40_spill] sm:$0xff] }
 0x9b9   : > { %21483 = vmatprep.subr.msk.bf16.mxu0 %vm29421_vm10, %v34518_v28  ;;  %v32283_v57 = vpack.c.bf16 %v15250_v42, %v15230_v14  ;;  %34524 = vst [vmem:[#allocation79_spill] sm:$0xff] %v32295_v39  ;;  %v25065_v42 = vpop.permute.xlu1 %25064  ;;  %v32303_v46 = vpack.c.bf16 %v14644_v29, %v14624_v49  ;;  %v32308_v30 = vsel %vm14242_vm13, %v25046_v54, %v14121_v11  ;;  %v34532_v29 = vld [vmem:[#allocation101_spill] sm:$0xff]  ;;  %v34534_v54 = vunpack.i.l.bf16 %v32161_v35 }
 0x9ba   : > { %v32300_v14 = vsel %vm14242_vm13, %v34525_v43, %v14121_v11  ;;  %34529 = vst [vmem:[#allocation82_spill] sm:$0xff] %v32308_v30  ;;  %v25067_v7 = vunpack.i.h.bf16 %v25065_v42  ;;  %v25066_v62 = vunpack.i.l.bf16 %v25065_v42  ;;  %21486 = vmatpush1.bf16.msk.msra.mxu0 %vm29421_vm10, %v34531_v52  ;;  %v14767_v49 = vpop.permute.xlu0 %14766  ;;  %v34538_v30 = vld [vmem:[#allocation39_spill] sm:$0xff] }
 0x9bb   : > { %34519 = vst [vmem:[#allocation91_spill] sm:$0xff] %v32283_v57  ;;  %34526 = vst [vmem:[#allocation103_spill] sm:$0xff] %v32300_v14  ;;  %v34527_v57 = vld [vmem:[#allocation128_spill] sm:$0xff]  ;;  %21488 = vmatprep.subr.bf16.mxu0 %v34532_v29  ;;  %v32327_v42 = vsel %vm14888_vm15, %v25061_v45, %v14767_v49  ;;  %v32330_v39 = vsel %vm14888_vm15, %v25062_v40, %v14767_v49 }
 0x9bc   : > { %21472 = vmatprep.subr.bf16.mxu1 %v34527_v57  ;;  %34528 = vst [vmem:[#allocation92_spill] sm:$0xff] %v32303_v46  ;;  %v34533_v46 = vld [vmem:[#allocation95_spill] sm:$0xff]  ;;  %v14947_v27 = vsel %vm14888_vm15, %v34534_v54, %v25066_v62  ;;  %v14967_v11 = vsel %vm14888_vm15, %v34535_v15, %v25067_v7  ;;  %34536 = vst [vmem:[#allocation94_spill] sm:$0xff] %v32327_v42  ;;  %v32340_v35 = vsel %vm14888_vm15, %v25066_v62, %v14767_v49  ;;  %v34542_v40 = vld [vmem:[#allocation100_spill] sm:$0xff] }
 0x9bd   : > { %21474 = vmatpush1.bf16.msra.mxu1 %v34533_v46  ;;  %34537 = vst [vmem:[#allocation96_spill] sm:$0xff] %v32330_v39  ;;  %v25075_v43 = vpop.permute.xlu1 %25074  ;;  %v32335_v22 = vpack.c.bf16 %v14967_v11, %v14947_v27  ;;  %34540 = vst [vmem:[#allocation97_spill] sm:$0xff] %v32340_v35  ;;  %v32343_v15 = vsel %vm14888_vm15, %v25067_v7, %v14767_v49  ;;  %v34543_v27 = vld [vmem:[#allocation121_spill] sm:$0xff]  ;;  %v34545_v62 = vunpack.i.l.bf16 %v32203_v48  ;;  %v34547_v54 = vld [vmem:[#allocation43_spill] sm:$0xff]  ;;  %v34550_v42 = vunpack.i.l.bf16 %v32185_v18 }
 0x9be   : > { %21521 = vmatprep.subr.msk.bf16.mxu1 %vm29421_vm10, %v34538_v30  ;;  %34541 = vst [vmem:[#allocation88_spill] sm:$0xff] %v32343_v15  ;;  %v25077_v45 = vunpack.i.h.bf16 %v25075_v43  ;;  %v25076_v14 = vunpack.i.l.bf16 %v25075_v43  ;;  %21490 = vmatpush1.bf16.msra.mxu0 %v34542_v40  ;;  %v34544_v11 = vld [vmem:[#allocation37_spill] sm:$0xff]  ;;  %v34546_v43 = vunpack.i.h.bf16 %v32203_v48  ;;  %v34549_v15 = vld [vmem:[#allocation110_spill] sm:$0xff] }
 0x9bf   : > { %34539 = vst [vmem:[#allocation84_spill] sm:$0xff] %v32335_v22  ;;  %21492 = vmatprep.subr.bf16.mxu0 %v34543_v27 }
 0x9c0   : > { %16088 = vmatmul.mubr.f32.vlgmr.msra.gmra.mrb[120].mxu1 %v31944_v20  ;;  %v15270_v7 = vsel %vm15211_vm0, %v34545_v62, %v25076_v14  ;;  %v15290_v49 = vsel %vm15211_vm0, %v34546_v43, %v25077_v45  ;;  %v34552_v62 = vunpack.i.h.bf16 %v32185_v18 }
 0x9c1   : > { %21524 = vmatpush1.bf16.msk.msra.mxu1 %vm29421_vm10, %v34544_v11  ;;  %19714 = vmatprep.mubr.msk.f32.mxu1 %vm15377_vm12, %v31972_v5  ;;  %v14444_v46 = vpop.permute.xlu1 %14443  ;;  %v32364_v35 = vpack.c.bf16 %v15290_v49, %v15270_v7  ;;  %v34556_v7 = vld [vmem:[#allocation123_spill] sm:$0xff]  ;;  %v34585_v11 = vld [vmem:[#allocation125_spill] sm:$0xff] }
 0x9c2   : > { %21527 = vmatprep.subr.msk.bf16.mxu1 %vm29421_vm10, %v34547_v54  ;;  %21494 = vmatpush1.bf16.msra.mxu0 %v34549_v15  ;;  %v32370_v39 = vsel %vm14565_vm14, %v34550_v42, %v14444_v46  ;;  %v32375_v48 = vsel %vm14565_vm14, %v34552_v62, %v14444_v46  ;;  %v32378_v43 = vsel %vm14565_vm14, %v25056_v25, %v14444_v46  ;;  %v34558_v62 = vld [vmem:[#allocation107_spill] sm:$0xff]  ;;  %v34559_v25 = vunpack.i.l.bf16 %v32245_v26 }
 0x9c3   : > { %34548 = vst [vmem:[#allocation38_spill] sm:$0xff] %v32364_v35  ;;  %34551 = vst [vmem:[#allocation90_spill] sm:$0xff] %v32370_v39  ;;  %v32381_v22 = vsel %vm14565_vm14, %v25057_v37, %v14444_v46  ;;  %21496 = vmatprep.subr.bf16.mxu0 %v34556_v7  ;;  %v34557_v35 = vld [vmem:[#allocation41_spill] sm:$0xff]  ;;  %v34561_v37 = vunpack.i.h.bf16 %v32245_v26  ;;  %v34567_v26 = vld [vmem:[#allocation98_spill] sm:$0xff] }
 0x9c4   : > { %34553 = vst [vmem:[#allocation42_spill] sm:$0xff] %v32375_v48  ;;  %34554 = vst [vmem:[#allocation40_spill] sm:$0xff] %v32378_v43  ;;  %v34565_v43 = vld [vmem:[#allocation112_spill] sm:$0xff]  ;;  %v34569_v48 = vld [vmem:[#allocation114_spill] sm:$0xff] }
 0x9c5   : > { %34555 = vst [vmem:[#allocation101_spill] sm:$0xff] %v32381_v22  ;;  %21530 = vmatpush1.bf16.msk.msra.mxu1 %vm29421_vm10, %v34557_v35  ;;  %v15090_v18 = vpop.permute.xlu1 %15089  ;;  %v34566_v22 = vld [vmem:[#allocation127_spill] sm:$0xff]  ;;  %v34575_v39 = vld [vmem:[#allocation118_spill] sm:$0xff] }
 0x9c6   : > { %21532 = vmatprep.subr.bf16.mxu1 %v34558_v62  ;;  %v32395_v46 = vsel %vm15211_vm0, %v34559_v25, %v15090_v18  ;;  %v32400_v54 = vsel %vm15211_vm0, %v34561_v37, %v15090_v18  ;;  %v32403_v49 = vsel %vm15211_vm0, %v25076_v14, %v15090_v18  ;;  %v32406_v42 = vsel %vm15211_vm0, %v25077_v45, %v15090_v18  ;;  %v34568_v37 = vld [vmem:[#allocation117_spill] sm:$0xff]  ;;  %v34571_v45 = vld [vmem:[#allocation120_spill] sm:$0xff]  ;;  %v34574_v35 = vld [vmem:[#allocation131_spill] sm:$0xff] }
 0x9c7   : > { %34560 = vst [vmem:[#allocation100_spill] sm:$0xff] %v32395_v46  ;;  %34562 = vst [vmem:[#allocation121_spill] sm:$0xff] %v32400_v54  ;;  %21498 = vmatpush1.bf16.msra.mxu0 %v34565_v43  ;;  %v34570_v14 = vld [vmem:[#allocation129_spill] sm:$0xff]  ;;  %v34573_v62 = vld [vmem:[#allocation116_spill] sm:$0xff] }
 0x9c8   : > { %34563 = vst [vmem:[#allocation110_spill] sm:$0xff] %v32403_v49  ;;  %34564 = vst [vmem:[#allocation123_spill] sm:$0xff] %v32406_v42  ;;  %21500 = vmatprep.subr.bf16.mxu0 %v34566_v22  ;;  %v34572_v18 = vld [vmem:[#allocation109_spill] sm:$0xff]  ;;  %v34577_v25 = vld [vmem:[#allocation119_spill] sm:$0xff] }
 0x9c9   : > { %21534 = vmatpush1.bf16.msra.mxu1 %v34567_v26  ;;  %v34576_v46 = vld [vmem:[#allocation133_spill] sm:$0xff]  ;;  %v34578_v49 = vld [vmem:[#allocation44_spill] sm:$0xff] }
 0x9ca   : > { %21536 = vmatprep.subr.bf16.mxu1 %v34568_v37  ;;  %v34579_v42 = vld [vmem:[#allocation124_spill] sm:$0xff]  ;;  %v34581_v37 = vld [vmem:[#allocation122_spill] sm:$0xff] }
 0x9cb   : > { %21502 = vmatpush1.bf16.msra.mxu0 %v34569_v48  ;;  %v34580_v54 = vld [vmem:[#allocation32_spill] sm:$0xff] }
 0x9cc   : > { %21504 = vmatprep.subr.bf16.mxu0 %v34570_v14  ;;  %v34584_v26 = vld [vmem:[#allocation136_spill] sm:$0xff] }
 0x9cd   : > { %21538 = vmatpush1.bf16.msra.mxu1 %v34571_v45  ;;  %v34582_v45 = vld [vmem:[#allocation104_spill] sm:$0xff] }
 0x9ce   : > { %21540 = vmatprep.subr.bf16.mxu1 %v34572_v18  ;;  %v34583_v18 = vld [vmem:[#allocation126_spill] sm:$0xff] }
 0x9cf   : > { %21506 = vmatpush1.bf16.msra.mxu0 %v34573_v62 }
 0x9d0   : > { %21508 = vmatprep.subr.bf16.mxu0 %v34574_v35 }
 0x9d1   : > { %21542 = vmatpush1.bf16.msra.mxu1 %v34575_v39  ;;  %v34586_v39 = vld [vmem:[#allocation47_spill] sm:$0xff] }
 0x9d2   : > { %21544 = vmatprep.subr.bf16.mxu1 %v34576_v46  ;;  %v34587_v46 = vld [vmem:[#allocation130_spill] sm:$0xff] }
 0x9d3   : > { %21510 = vmatpush1.bf16.msra.mxu0 %v34577_v25 }
 0x9d4   : > { %21512 = vmatprep.subr.bf16.mxu0 %v34578_v49  ;;  %v34588_v49 = vld [vmem:[#allocation137_spill] sm:$0xff] }
 0x9d5   : > { %21546 = vmatpush1.bf16.msra.mxu1 %v34579_v42  ;;  %v34592_v42 = vld [vmem:[#allocation139_spill] sm:$0xff] }
 0x9d6   : > { %21548 = vmatprep.subr.bf16.mxu1 %v34580_v54  ;;  %v34589_v54 = vld [vmem:[#allocation45_spill] sm:$0xff] }
 0x9d7   : > { %21514 = vmatpush1.bf16.msra.mxu0 %v34581_v37 }
 0x9d8   : > { %21516 = vmatprep.subr.bf16.mxu0 %v34582_v45 }
 0x9d9   : > { %21550 = vmatpush1.bf16.msra.mxu1 %v34583_v18  ;;  %v34591_v18 = vld [vmem:[#allocation99_spill] sm:$0xff] }
 0x9da   : > { %21552 = vmatprep.subr.bf16.mxu1 %v34584_v26  ;;  %v34590_v26 = vld [vmem:[#allocation51_spill] sm:$0xff] }
 0x9db   : > { %21518 = vmatpush1.bf16.msra.mxu0 %v34585_v11  ;;  %v34597_v11 = vld [vmem:[#allocation132_spill] sm:$0xff] }
 0x9dc   : > { %21565 = vmatprep.subr.msk.bf16.mxu0 %vm29421_vm10, %v34586_v39  ;;  %v34595_v39 = vld [vmem:[#allocation67_spill] sm:$0xff] }
 0x9dd   : > { %21554 = vmatpush1.bf16.msra.mxu1 %v34587_v46  ;;  %v34593_v46 = vld [vmem:[#allocation49_spill] sm:$0xff] }
 0x9de   : > { %21556 = vmatprep.subr.bf16.mxu1 %v34588_v49  ;;  %16159 = vmatmul.mubr.f32.vlgmr.msra.gmra.mrb[122].mxu0 %v31944_v20  ;;  %v34594_v49 = vld [vmem:[#allocation113_spill] sm:$0xff] }
 0x9df   : > { %21568 = vmatpush1.bf16.msk.msra.mxu0 %vm29421_vm10, %v34589_v54  ;;  %19723 = vmatprep.mubr.msk.f32.mxu0 %vm15377_vm12, %v31972_v5  ;;  %v34596_v54 = vld [vmem:[#allocation48_spill] sm:$0xff] }
 0x9e0   : > { %21571 = vmatprep.subr.msk.bf16.mxu0 %vm29421_vm10, %v34590_v26 }
 0x9e1   : > { %21558 = vmatpush1.bf16.msra.mxu1 %v34591_v18  ;;  %v34598_v18 = vld [vmem:[#allocation46_spill] sm:$0xff] }
 0x9e2   : > { %21560 = vmatprep.subr.bf16.mxu1 %v34592_v42  ;;  %v34599_v42 = vld [vmem:[#allocation52_spill] sm:$0xff] }
 0x9e3   : > { %21574 = vmatpush1.bf16.msk.msra.mxu0 %vm29421_vm10, %v34593_v46  ;;  %v34606_v46 = vld [vmem:[#allocation105_spill] sm:$0xff] }
 0x9e4   : > { %21576 = vmatprep.subr.bf16.mxu0 %v34594_v49  ;;  %v34605_v49 = vld [vmem:[#allocation147_spill] sm:$0xff] }
 0x9e5   : > { %21562 = vmatpush1.bf16.msra.mxu1 %v34595_v39  ;;  %v34600_v39 = vld [vmem:[#allocation108_spill] sm:$0xff] }
 0x9e6   : > { %21609 = vmatprep.subr.msk.bf16.mxu1 %vm29421_vm10, %v34596_v54  ;;  %v34601_v54 = vld [vmem:[#allocation50_spill] sm:$0xff] }
 0x9e7   : > { %21578 = vmatpush1.bf16.msra.mxu0 %v34597_v11  ;;  %v34603_v11 = vld [vmem:[#allocation26_spill] sm:$0xff] }
 0x9e8   : > { %16230 = vmatmul.mubr.f32.vlgmr.msra.gmra.mrb[122].mxu1 %v31944_v20  ;;  %21580 = vmatprep.subr.bf16.mxu0 %v31261_v23  ;;  %v34602_v23 = vld [vmem:[#allocation66_spill] sm:$0xff] }
 0x9e9   : > { %21612 = vmatpush1.bf16.msk.msra.mxu1 %vm29421_vm10, %v34598_v18  ;;  %19732 = vmatprep.mubr.msk.f32.mxu1 %vm15377_vm12, %v31972_v5  ;;  %v34604_v18 = vld [vmem:[#allocation135_spill] sm:$0xff] }
 0x9ea   : > { %21615 = vmatprep.subr.msk.bf16.mxu1 %vm29421_vm10, %v34599_v42  ;;  %v34607_v42 = vld [vmem:[#allocation140_spill] sm:$0xff] }
 0x9eb   : > { %21582 = vmatpush1.bf16.msra.mxu0 %v34600_v39 }
 0x9ec   : > { %21584 = vmatprep.subr.bf16.mxu0 %v31308_v50  ;;  %v34608_v50 = vld [vmem:[#allocation134_spill] sm:$0xff] }
 0x9ed   : > { %21618 = vmatpush1.bf16.msk.msra.mxu1 %vm29421_vm10, %v34601_v54  ;;  %v34610_v54 = vld [vmem:[#allocation106_spill] sm:$0xff] }
 0x9ee   : > { %21620 = vmatprep.subr.bf16.mxu1 %v34602_v23  ;;  %v34609_v23 = vld [vmem:[#allocation142_spill] sm:$0xff] }
 0x9ef   : > { %21586 = vmatpush1.bf16.msra.mxu0 %v34603_v11 }
 0x9f0   : > { %21588 = vmatprep.subr.bf16.mxu0 %v31357_v19 }
 0x9f1   : > { %21622 = vmatpush1.bf16.msra.mxu1 %v34604_v18  ;;  %v34612_v18 = vld [vmem:[#allocation63_spill] sm:$0xff] }
 0x9f2   : > { %21624 = vmatprep.subr.bf16.mxu1 %v34605_v49  ;;  %v34611_v49 = vld [vmem:[#allocation74_spill] sm:$0xff] }
 0x9f3   : > { %21590 = vmatpush1.bf16.msra.mxu0 %v34606_v46 }
 0x9f4   : > { %21592 = vmatprep.subr.bf16.mxu0 %v31401_v9 }
 0x9f5   : > { %21626 = vmatpush1.bf16.msra.mxu1 %v34607_v42  ;;  %v34614_v42 = vld [vmem:[#allocation138_spill] sm:$0xff] }
 0x9f6   : > { %21628 = vmatprep.subr.bf16.mxu1 %v31425_v61  ;;  %v34613_v61 = vld [vmem:[#allocation144_spill] sm:$0xff] }
 0x9f7   : > { %21594 = vmatpush1.bf16.msra.mxu0 %v34608_v50 }
 0x9f8   : > { %21596 = vmatprep.subr.bf16.mxu0 %v31461_v21 }
 0x9f9   : > { %21630 = vmatpush1.bf16.msra.mxu1 %v34609_v23  ;;  %v34616_v23 = vld [vmem:[#allocation167_spill] sm:$0xff] }
 0x9fa   : > { %21632 = vmatprep.subr.bf16.mxu1 %v31482_v13  ;;  %v34615_v13 = vld [vmem:[#allocation151_spill] sm:$0xff] }
 0x9fb   : > { %21598 = vmatpush1.bf16.msra.mxu0 %v34610_v54 }
 0x9fc   : > { %21600 = vmatprep.subr.bf16.mxu0 %v31489_v34 }
 0x9fd   : > { %21634 = vmatpush1.bf16.msra.mxu1 %v34611_v49  ;;  %v34620_v49 = vld [vmem:[#allocation171_spill] sm:$0xff] }
 0x9fe   : > { %21636 = vmatprep.subr.bf16.mxu1 %v31521_v51  ;;  %v34617_v51 = vld [vmem:[#allocation53_spill] sm:$0xff] }
 0x9ff   : > { %21602 = vmatpush1.bf16.msra.mxu0 %v34612_v18 }
 0xa00   : > { %21604 = vmatprep.subr.bf16.mxu0 %v31543_v41 }
 0xa01   : > { %21638 = vmatpush1.bf16.msra.mxu1 %v34613_v61  ;;  %v34619_v61 = vld [vmem:[#allocation154_spill] sm:$0xff] }
 0xa02   : > { %21640 = vmatprep.subr.bf16.mxu1 %v31559_v10  ;;  %v34618_v10 = vld [vmem:[#allocation59_spill] sm:$0xff] }
 0xa03   : > { %21606 = vmatpush1.bf16.msra.mxu0 %v34614_v42  ;;  %v34625_v42 = vld [vmem:[#allocation73_spill] sm:$0xff] }
 0xa04   : > { %21653 = vmatprep.subr.msk.bf16.mxu0 %vm29421_vm10, %v34330_v3  ;;  %v34623_v3 = vld [vmem:[#allocation158_spill] sm:$0xff] }
 0xa05   : > { %21642 = vmatpush1.bf16.msra.mxu1 %v34615_v13  ;;  %v34621_v13 = vld [vmem:[#allocation57_spill] sm:$0xff] }
 0xa06   : > { %21644 = vmatprep.subr.bf16.mxu1 %v34616_v23  ;;  %16301 = vmatmul.mubr.f32.vlgmr.msra.gmra.mrb[124].mxu0 %v31944_v20  ;;  %v34622_v23 = vld [vmem:[#allocation172_spill] sm:$0xff] }
 0xa07   : > { %21656 = vmatpush1.bf16.msk.msra.mxu0 %vm29421_vm10, %v34617_v51  ;;  %19741 = vmatprep.mubr.msk.f32.mxu0 %vm15377_vm12, %v31972_v5  ;;  %v34624_v51 = vld [vmem:[#allocation56_spill] sm:$0xff] }
 0xa08   : > { %21659 = vmatprep.subr.msk.bf16.mxu0 %vm29421_vm10, %v34618_v10  ;;  %v34626_v10 = vld [vmem:[#allocation178_spill] sm:$0xff] }
 0xa09   : > { %21646 = vmatpush1.bf16.msra.mxu1 %v34619_v61  ;;  %v34627_v61 = vld [vmem:[#allocation54_spill] sm:$0xff] }
 0xa0a   : > { %21648 = vmatprep.subr.bf16.mxu1 %v34620_v49  ;;  %v34628_v49 = vld [vmem:[#allocation60_spill] sm:$0xff] }
 0xa0b   : > { %21662 = vmatpush1.bf16.msk.msra.mxu0 %vm29421_vm10, %v34621_v13 }
 0xa0c   : > { %21664 = vmatprep.subr.bf16.mxu0 %v34622_v23  ;;  %v34633_v23 = vld [vmem:[#allocation149_spill] sm:$0xff] }
 0xa0d   : > { %21650 = vmatpush1.bf16.msra.mxu1 %v34623_v3  ;;  %v34629_v3 = vld [vmem:[#allocation146_spill] sm:$0xff] }
 0xa0e   : > { %21697 = vmatprep.subr.msk.bf16.mxu1 %vm29421_vm10, %v34624_v51  ;;  %v34630_v51 = vld [vmem:[#allocation180_spill] sm:$0xff] }
 0xa0f   : > { %21666 = vmatpush1.bf16.msra.mxu0 %v34625_v42  ;;  %v34631_v42 = vld [vmem:[#allocation58_spill] sm:$0xff] }
 0xa10   : > { %16372 = vmatmul.mubr.f32.vlgmr.msra.gmra.mrb[124].mxu1 %v31944_v20  ;;  %21668 = vmatprep.subr.bf16.mxu0 %v34626_v10  ;;  %v34632_v10 = vld [vmem:[#allocation176_spill] sm:$0xff] }
 0xa11   : > { %21700 = vmatpush1.bf16.msk.msra.mxu1 %vm29421_vm10, %v34627_v61  ;;  %19750 = vmatprep.mubr.msk.f32.mxu1 %vm15377_vm12, %v31972_v5  ;;  %v34634_v61 = vld [vmem:[#allocation169_spill] sm:$0xff]  ;;  %v34635_v5 = vld [vmem:[#allocation152_spill] sm:$0xff] }
 0xa12   : > { %21703 = vmatprep.subr.msk.bf16.mxu1 %vm29421_vm10, %v34628_v49  ;;  %v34636_v49 = vld [vmem:[#allocation177_spill] sm:$0xff] }
 0xa13   : > { %21670 = vmatpush1.bf16.msra.mxu0 %v34629_v3 }
 0xa14   : > { %21672 = vmatprep.subr.bf16.mxu0 %v34630_v51  ;;  %v34637_v51 = vld [vmem:[#allocation157_spill] sm:$0xff] }
 0xa15   : > { %21706 = vmatpush1.bf16.msk.msra.mxu1 %vm29421_vm10, %v34631_v42  ;;  %v34639_v42 = vld [vmem:[#allocation161_spill] sm:$0xff] }
 0xa16   : > { %21708 = vmatprep.subr.bf16.mxu1 %v34632_v10  ;;  %v34638_v10 = vld [vmem:[#allocation179_spill] sm:$0xff] }
 0xa17   : > { %21674 = vmatpush1.bf16.msra.mxu0 %v34633_v23 }
 0xa18   : > { %21676 = vmatprep.subr.bf16.mxu0 %v31793_v24 }
 0xa19   : > { %21710 = vmatpush1.bf16.msra.mxu1 %v34634_v61  ;;  %v34643_v61 = vld [vmem:[#allocation30_spill] sm:$0xff] }
 0xa1a   : > { %21712 = vmatprep.subr.bf16.mxu1 %v31807_v56  ;;  %v34640_v56 = vld [vmem:[#allocation165_spill] sm:$0xff] }
 0xa1b   : > { %21678 = vmatpush1.bf16.msra.mxu0 %v34635_v5 }
 0xa1c   : > { %21680 = vmatprep.subr.bf16.mxu0 %v31812_v53 }
 0xa1d   : > { %21714 = vmatpush1.bf16.msra.mxu1 %v34636_v49  ;;  %v34641_v49 = vld [vmem:[#allocation200_spill] sm:$0xff] }
 0xa1e   : > { %21716 = vmatprep.subr.bf16.mxu1 %v31840_v36  ;;  %v32554_v36 = vld [vmem:[#allocation13 + $0x10] sm:$0x77] }
 0xa1f   : > { %21682 = vmatpush1.bf16.msra.mxu0 %v34637_v51 }
 0xa20   : > { %21684 = vmatprep.subr.bf16.mxu0 %v31871_v6 }
 0xa21   : > { %21718 = vmatpush1.bf16.msra.mxu1 %v34638_v10  ;;  %v34642_v10 = vld [vmem:[#allocation168_spill] sm:$0xff] }
 0xa22   : > { %21720 = vmatprep.subr.bf16.mxu1 %v31890_v38  ;;  %v32561_v38 = vcombine.high %v32554_v36, %v32554_v36 }
 0xa23   : > { %21686 = vmatpush1.bf16.msra.mxu0 %v34639_v42 }
 0xa24   : > { %21688 = vmatprep.subr.bf16.mxu0 %v31912_v63 }
 0xa25   : > { %21722 = vmatpush1.bf16.msra.mxu1 %v31791_v31  ;;  %v34645_v31 = vld [vmem:[#allocation28_spill] sm:$0xff] }
 0xa26   : > { %21724 = vmatprep.subr.bf16.mxu1 %v31908_v8  ;;  %v34644_v8 = vld [vmem:[#allocation189_spill] sm:$0xff] }
 0xa27   : > { %21690 = vmatpush1.bf16.msra.mxu0 %v34640_v56 }
 0xa28   : > { %21692 = vmatprep.subr.bf16.mxu0 %v31942_v16  ;;  %v34646_v16 = vld [vmem:[#allocation27_spill] sm:$0xff] }
 0xa29   : > { %21726 = vmatpush1.bf16.msra.mxu1 %v31761_v33  ;;  %v34648_v33 = vld [vmem:[#allocation191_spill] sm:$0xff] }
 0xa2a   : > { %21728 = vmatprep.subr.bf16.mxu1 %v34641_v49  ;;  %v34647_v49 = vld [vmem:[#allocation35_spill] sm:$0xff] }
 0xa2b   : > { %21694 = vmatpush1.bf16.msra.mxu0 %v34642_v10  ;;  %v34652_v10 = vld [vmem:[#allocation197_spill] sm:$0xff] }
 0xa2c   : > { %21741 = vmatprep.subr.msk.bf16.mxu0 %vm29421_vm10, %v34643_v61  ;;  %v34649_v61 = vld [vmem:[#allocation34_spill] sm:$0xff] }
 0xa2d   : > { %21730 = vmatpush1.bf16.msra.mxu1 %v34644_v8  ;;  %v34650_v8 = vld [vmem:[#allocation33_spill] sm:$0xff] }
 0xa2e   : > { %21732 = vmatprep.subr.bf16.mxu1 %v34645_v31  ;;  %16443 = vmatmul.mubr.f32.vlgmr.msra.gmra.mrb[126].mxu0 %v31944_v20  ;;  %v34651_v31 = vld [vmem:[#allocation102_spill] sm:$0xff] }
 0xa2f   : > { %21744 = vmatpush1.bf16.msk.msra.mxu0 %vm29421_vm10, %v34646_v16  ;;  %19759 = vmatprep.mubr.msk.f32.mxu0 %vm15377_vm12, %v32561_v38  ;;  %v34653_v16 = vld [vmem:[#allocation77_spill] sm:$0xff] }
 0xa30   : > { %21747 = vmatprep.subr.msk.bf16.mxu0 %vm29421_vm10, %v34647_v49  ;;  %v34654_v49 = vld [vmem:[#allocation111_spill] sm:$0xff] }
 0xa31   : > { %21734 = vmatpush1.bf16.msra.mxu1 %v34648_v33 }
 0xa32   : > { %21736 = vmatprep.subr.bf16.mxu1 %v34649_v61 }
 0xa33   : > { %21750 = vmatpush1.bf16.msk.msra.mxu0 %vm29421_vm10, %v34650_v8  ;;  %v34655_v8 = vld [vmem:[#allocation93_spill] sm:$0xff] }
 0xa34   : > { %21752 = vmatprep.subr.bf16.mxu0 %v34651_v31 }
 0xa35   : > { %21738 = vmatpush1.bf16.msra.mxu1 %v34652_v10 }
 0xa36   : > { %21785 = vmatprep.subr.msk.bf16.mxu1 %vm29421_vm10, %v34508_v44 }
 0xa37   : > { %21754 = vmatpush1.bf16.msra.mxu0 %v34653_v16  ;;  %v34662_v16 = vld [vmem:[#allocation125_spill] sm:$0xff] }
 0xa38   : > { %16514 = vmatmul.mubr.f32.vlgmr.msra.gmra.mrb[126].mxu1 %v31944_v20  ;;  %21756 = vmatprep.subr.bf16.mxu0 %v34654_v49  ;;  %v34656_v20 = vld [vmem:[#allocation95_spill] sm:$0xff] }
 0xa39   : > { %21788 = vmatpush1.bf16.msk.msra.mxu1 %vm29421_vm10, %v34514_v0  ;;  %19768 = vmatprep.mubr.msk.f32.mxu1 %vm15377_vm12, %v32561_v38 }
 0xa3a   : > { %21791 = vmatprep.subr.msk.bf16.mxu1 %vm29421_vm10, %v34518_v28 }
 0xa3b   : > { %21758 = vmatpush1.bf16.msra.mxu0 %v34462_v2  ;;  %v34657_v2 = vld [vmem:[#allocation44_spill] sm:$0xff] }
 0xa3c   : > { %21760 = vmatprep.subr.bf16.mxu0 %v34467_v32 }
 0xa3d   : > { %21794 = vmatpush1.bf16.msk.msra.mxu1 %vm29421_vm10, %v34531_v52 }
 0xa3e   : > { %21796 = vmatprep.subr.bf16.mxu1 %v34532_v29 }
 0xa3f   : > { %21762 = vmatpush1.bf16.msra.mxu0 %v34475_v17  ;;  %v34658_v17 = vld [vmem:[#allocation37_spill] sm:$0xff] }
 0xa40   : > { %21764 = vmatprep.subr.bf16.mxu0 %v34479_v4 }
 0xa41   : > { %21798 = vmatpush1.bf16.msra.mxu1 %v34542_v40 }
 0xa42   : > { %21800 = vmatprep.subr.bf16.mxu1 %v34543_v27 }
 0xa43   : > { %21766 = vmatpush1.bf16.msra.mxu0 %v34490_v60  ;;  %v34660_v60 = vld [vmem:[#allocation41_spill] sm:$0xff] }
 0xa44   : > { %21768 = vmatprep.subr.bf16.mxu0 %v30410_v55 }
 0xa45   : > { %21802 = vmatpush1.bf16.msra.mxu1 %v34549_v15 }
 0xa46   : > { %21804 = vmatprep.subr.bf16.mxu1 %v34556_v7 }
 0xa47   : > { %21770 = vmatpush1.bf16.msra.mxu0 %v34501_v1  ;;  %v34659_v1 = vld [vmem:[#allocation43_spill] sm:$0xff] }
 0xa48   : > { %21772 = vmatprep.subr.bf16.mxu0 %v30687_v47 }
 0xa49   : > { %21806 = vmatpush1.bf16.msra.mxu1 %v34565_v43 }
 0xa4a   : > { %21808 = vmatprep.subr.bf16.mxu1 %v34566_v22 }
 0xa4b   : > { %21774 = vmatpush1.bf16.msra.mxu0 %v34510_v59  ;;  %v34661_v59 = vld [vmem:[#allocation107_spill] sm:$0xff] }
 0xa4c   : > { %21776 = vmatprep.subr.bf16.mxu0 %v30430_v58 }
 0xa4d   : > { %21810 = vmatpush1.bf16.msra.mxu1 %v34569_v48 }
 0xa4e   : > { %21812 = vmatprep.subr.bf16.mxu1 %v34570_v14  ;;  %v34675_v14 = vld [vmem:[#allocation124_spill] sm:$0xff] }
 0xa4f   : > { %21778 = vmatpush1.bf16.msra.mxu0 %v34655_v8  ;;  %v34663_v8 = vld [vmem:[#allocation47_spill] sm:$0xff] }
 0xa50   : > { %21780 = vmatprep.subr.bf16.mxu0 %v34527_v57  ;;  %v34674_v57 = vld [vmem:[#allocation141_spill] sm:$0xff] }
 0xa51   : > { %21814 = vmatpush1.bf16.msra.mxu1 %v34573_v62 }
 0xa52   : > { %21816 = vmatprep.subr.bf16.mxu1 %v34574_v35  ;;  %v34672_v35 = vld [vmem:[#allocation133_spill] sm:$0xff] }
 0xa53   : > { %21782 = vmatpush1.bf16.msra.mxu0 %v34656_v20  ;;  %v34664_v20 = vld [vmem:[#allocation98_spill] sm:$0xff] }
 0xa54   : > { %21829 = vmatprep.subr.msk.bf16.mxu0 %vm29421_vm10, %v34538_v30  ;;  %v34671_v30 = vld [vmem:[#allocation118_spill] sm:$0xff] }
 0xa55   : > { %21818 = vmatpush1.bf16.msra.mxu1 %v34577_v25 }
 0xa56   : > { %21820 = vmatprep.subr.bf16.mxu1 %v34657_v2  ;;  %16591 = vmatmul.mubr.f32.vlgmr.msra.gmra.mrb[120].mxu0 %v32554_v36  ;;  %v34666_v2 = vld [vmem:[#allocation45_spill] sm:$0xff] }
 0xa57   : > { %21832 = vmatpush1.bf16.msk.msra.mxu0 %vm29421_vm10, %v34658_v17  ;;  %19777 = vmatprep.mubr.msk.f32.mxu0 %vm15377_vm12, %v32561_v38 }
 0xa58   : > { %21835 = vmatprep.subr.msk.bf16.mxu0 %vm29421_vm10, %v34659_v1  ;;  %v34665_v1 = vld [vmem:[#allocation117_spill] sm:$0xff] }
 0xa59   : > { %21822 = vmatpush1.bf16.msra.mxu1 %v34581_v37 }
 0xa5a   : > { %21824 = vmatprep.subr.bf16.mxu1 %v34582_v45  ;;  %v34669_v45 = vld [vmem:[#allocation49_spill] sm:$0xff] }
 0xa5b   : > { %21838 = vmatpush1.bf16.msk.msra.mxu0 %vm29421_vm10, %v34660_v60 }
 0xa5c   : > { %21840 = vmatprep.subr.bf16.mxu0 %v34661_v59  ;;  %v34667_v59 = vld [vmem:[#allocation120_spill] sm:$0xff] }
 0xa5d   : > { %21826 = vmatpush1.bf16.msra.mxu1 %v34662_v16  ;;  %v34678_v16 = vld [vmem:[#allocation126_spill] sm:$0xff] }
 0xa5e   : > { %21873 = vmatprep.subr.msk.bf16.mxu1 %vm29421_vm10, %v34663_v8  ;;  %v34668_v8 = vld [vmem:[#allocation109_spill] sm:$0xff] }
 0xa5f   : > { %21842 = vmatpush1.bf16.msra.mxu0 %v34664_v20 }
 0xa60   : > { %16662 = vmatmul.mubr.f32.vlgmr.msra.gmra.mrb[120].mxu1 %v32554_v36  ;;  %21844 = vmatprep.subr.bf16.mxu0 %v34665_v1  ;;  %v34670_v1 = vld [vmem:[#allocation113_spill] sm:$0xff] }
 0xa61   : > { %21876 = vmatpush1.bf16.msk.msra.mxu1 %vm29421_vm10, %v34666_v2  ;;  %19786 = vmatprep.mubr.msk.f32.mxu1 %vm15377_vm12, %v32561_v38  ;;  %v34673_v2 = vld [vmem:[#allocation132_spill] sm:$0xff] }
 0xa62   : > { %21879 = vmatprep.subr.msk.bf16.mxu1 %vm29421_vm10, %v34590_v26  ;;  %v34676_v26 = vld [vmem:[#allocation32_spill] sm:$0xff] }
 0xa63   : > { %21846 = vmatpush1.bf16.msra.mxu0 %v34667_v59 }
 0xa64   : > { %21848 = vmatprep.subr.bf16.mxu0 %v34668_v8  ;;  %v34677_v8 = vld [vmem:[#allocation143_spill] sm:$0xff] }
 0xa65   : > { %21882 = vmatpush1.bf16.msk.msra.mxu1 %vm29421_vm10, %v34669_v45  ;;  %v34679_v45 = vld [vmem:[#allocation136_spill] sm:$0xff] }
 0xa66   : > { %21884 = vmatprep.subr.bf16.mxu1 %v34670_v1  ;;  %v34681_v1 = vld [vmem:[#allocation137_spill] sm:$0xff] }
 0xa67   : > { %21850 = vmatpush1.bf16.msra.mxu0 %v34671_v30 }
 0xa68   : > { %21852 = vmatprep.subr.bf16.mxu0 %v34672_v35  ;;  %v34680_v35 = vld [vmem:[#allocation130_spill] sm:$0xff] }
 0xa69   : > { %21886 = vmatpush1.bf16.msra.mxu1 %v34673_v2 }
 0xa6a   : > { %21888 = vmatprep.subr.bf16.mxu1 %v34674_v57  ;;  %v34683_v57 = vld [vmem:[#allocation139_spill] sm:$0xff] }
 0xa6b   : > { %21854 = vmatpush1.bf16.msra.mxu0 %v34675_v14 }
 0xa6c   : > { %21856 = vmatprep.subr.bf16.mxu0 %v34676_v26  ;;  %v34682_v26 = vld [vmem:[#allocation99_spill] sm:$0xff] }
 0xa6d   : > { %21890 = vmatpush1.bf16.msra.mxu1 %v34600_v39 }
 0xa6e   : > { %21892 = vmatprep.subr.bf16.mxu1 %v34677_v8  ;;  %v34685_v8 = vld [vmem:[#allocation48_spill] sm:$0xff] }
 0xa6f   : > { %21858 = vmatpush1.bf16.msra.mxu0 %v34678_v16 }
 0xa70   : > { %21860 = vmatprep.subr.bf16.mxu0 %v34679_v45  ;;  %v34684_v45 = vld [vmem:[#allocation67_spill] sm:$0xff] }
 0xa71   : > { %21894 = vmatpush1.bf16.msra.mxu1 %v34603_v11 }
 0xa72   : > { %21896 = vmatprep.subr.bf16.mxu1 %v31357_v19  ;;  %v34692_v19 = vld [vmem:[#allocation135_spill] sm:$0xff] }
 0xa73   : > { %21862 = vmatpush1.bf16.msra.mxu0 %v34680_v35 }
 0xa74   : > { %21864 = vmatprep.subr.bf16.mxu0 %v34681_v1  ;;  %v34691_v1 = vld [vmem:[#allocation55_spill] sm:$0xff] }
 0xa75   : > { %21898 = vmatpush1.bf16.msra.mxu1 %v34606_v46  ;;  %v34703_v46 = vld [vmem:[#allocation74_spill] sm:$0xff] }
 0xa76   : > { %21900 = vmatprep.subr.bf16.mxu1 %v31401_v9  ;;  %v34686_v9 = vld [vmem:[#allocation46_spill] sm:$0xff] }
 0xa77   : > { %21866 = vmatpush1.bf16.msra.mxu0 %v34682_v26 }
 0xa78   : > { %21868 = vmatprep.subr.bf16.mxu0 %v34683_v57  ;;  %v34690_v57 = vld [vmem:[#allocation138_spill] sm:$0xff] }
 0xa79   : > { %21902 = vmatpush1.bf16.msra.mxu1 %v34608_v50  ;;  %v34702_v50 = vld [vmem:[#allocation178_spill] sm:$0xff] }
 0xa7a   : > { %21904 = vmatprep.subr.bf16.mxu1 %v31461_v21  ;;  %v34687_v21 = vld [vmem:[#allocation52_spill] sm:$0xff] }
 0xa7b   : > { %21870 = vmatpush1.bf16.msra.mxu0 %v34684_v45 }
 0xa7c   : > { %21917 = vmatprep.subr.msk.bf16.mxu0 %vm29421_vm10, %v34685_v8  ;;  %v34688_v8 = vld [vmem:[#allocation50_spill] sm:$0xff] }
 0xa7d   : > { %21906 = vmatpush1.bf16.msra.mxu1 %v34610_v54  ;;  %v34701_v54 = vld [vmem:[#allocation73_spill] sm:$0xff] }
 0xa7e   : > { %21908 = vmatprep.subr.bf16.mxu1 %v31489_v34  ;;  %16733 = vmatmul.mubr.f32.vlgmr.msra.gmra.mrb[122].mxu0 %v32554_v36  ;;  %v34689_v34 = vld [vmem:[#allocation66_spill] sm:$0xff] }
 0xa7f   : > { %21920 = vmatpush1.bf16.msk.msra.mxu0 %vm29421_vm10, %v34686_v9  ;;  %19795 = vmatprep.mubr.msk.f32.mxu0 %vm15377_vm12, %v32561_v38 }
 0xa80   : > { %21923 = vmatprep.subr.msk.bf16.mxu0 %vm29421_vm10, %v34687_v21  ;;  %v34693_v21 = vld [vmem:[#allocation147_spill] sm:$0xff] }
 0xa81   : > { %21910 = vmatpush1.bf16.msra.mxu1 %v34612_v18  ;;  %v34694_v18 = vld [vmem:[#allocation53_spill] sm:$0xff] }
 0xa82   : > { %21912 = vmatprep.subr.bf16.mxu1 %v31543_v41  ;;  %v34696_v41 = vld [vmem:[#allocation140_spill] sm:$0xff] }
 0xa83   : > { %21926 = vmatpush1.bf16.msk.msra.mxu0 %vm29421_vm10, %v34688_v8 }
 0xa84   : > { %21928 = vmatprep.subr.bf16.mxu0 %v34689_v34  ;;  %v34695_v34 = vld [vmem:[#allocation59_spill] sm:$0xff] }
 0xa85   : > { %21914 = vmatpush1.bf16.msra.mxu1 %v34690_v57  ;;  %v34699_v57 = vld [vmem:[#allocation142_spill] sm:$0xff] }
 0xa86   : > { %21961 = vmatprep.subr.msk.bf16.mxu1 %vm29421_vm10, %v34691_v1  ;;  %v34697_v1 = vld [vmem:[#allocation150_spill] sm:$0xff] }
 0xa87   : > { %21930 = vmatpush1.bf16.msra.mxu0 %v34692_v19 }
 0xa88   : > { %16804 = vmatmul.mubr.f32.vlgmr.msra.gmra.mrb[122].mxu1 %v32554_v36  ;;  %21932 = vmatprep.subr.bf16.mxu0 %v34693_v21  ;;  %v34698_v21 = vld [vmem:[#allocation172_spill] sm:$0xff] }
 0xa89   : > { %21964 = vmatpush1.bf16.msk.msra.mxu1 %vm29421_vm10, %v34694_v18  ;;  %19804 = vmatprep.mubr.msk.f32.mxu1 %vm15377_vm12, %v32561_v38  ;;  %v34700_v18 = vld [vmem:[#allocation155_spill] sm:$0xff] }
 0xa8a   : > { %21967 = vmatprep.subr.msk.bf16.mxu1 %vm29421_vm10, %v34695_v34  ;;  %v34704_v34 = vld [vmem:[#allocation160_spill] sm:$0xff] }
 0xa8b   : > { %21934 = vmatpush1.bf16.msra.mxu0 %v34696_v41  ;;  %v34706_v41 = vld [vmem:[#allocation144_spill] sm:$0xff] }
 0xa8c   : > { %21936 = vmatprep.subr.bf16.mxu0 %v34697_v1  ;;  %v34705_v1 = vld [vmem:[#allocation180_spill] sm:$0xff] }
 0xa8d   : > { %21970 = vmatpush1.bf16.msk.msra.mxu1 %vm29421_vm10, %v34621_v13  ;;  %v34707_v13 = vld [vmem:[#allocation164_spill] sm:$0xff] }
 0xa8e   : > { %21972 = vmatprep.subr.bf16.mxu1 %v34698_v21  ;;  %v34709_v21 = vld [vmem:[#allocation167_spill] sm:$0xff] }
 0xa8f   : > { %21938 = vmatpush1.bf16.msra.mxu0 %v34699_v57 }
 0xa90   : > { %21940 = vmatprep.subr.bf16.mxu0 %v34700_v18  ;;  %v34708_v18 = vld [vmem:[#allocation151_spill] sm:$0xff] }
 0xa91   : > { %21974 = vmatpush1.bf16.msra.mxu1 %v34701_v54 }
 0xa92   : > { %21976 = vmatprep.subr.bf16.mxu1 %v34702_v50  ;;  %v34711_v50 = vld [vmem:[#allocation171_spill] sm:$0xff] }
 0xa93   : > { %21942 = vmatpush1.bf16.msra.mxu0 %v34703_v46 }
 0xa94   : > { %21944 = vmatprep.subr.bf16.mxu0 %v34704_v34  ;;  %v34710_v34 = vld [vmem:[#allocation154_spill] sm:$0xff] }
 0xa95   : > { %21978 = vmatpush1.bf16.msra.mxu1 %v34629_v3  ;;  %v34733_v3 = vld [vmem:[#allocation188_spill] sm:$0xff] }
 0xa96   : > { %21980 = vmatprep.subr.bf16.mxu1 %v34705_v1  ;;  %v34713_v1 = vld [vmem:[#allocation56_spill] sm:$0xff] }
 0xa97   : > { %21946 = vmatpush1.bf16.msra.mxu0 %v34706_v41 }
 0xa98   : > { %21948 = vmatprep.subr.bf16.mxu0 %v34707_v13  ;;  %v34712_v13 = vld [vmem:[#allocation158_spill] sm:$0xff] }
 0xa99   : > { %21982 = vmatpush1.bf16.msra.mxu1 %v34633_v23 }
 0xa9a   : > { %21984 = vmatprep.subr.bf16.mxu1 %v31793_v24  ;;  %v34720_v24 = vld [vmem:[#allocation65_spill] sm:$0xff] }
 0xa9b   : > { %21950 = vmatpush1.bf16.msra.mxu0 %v34708_v18 }
 0xa9c   : > { %21952 = vmatprep.subr.bf16.mxu0 %v34709_v21  ;;  %v34719_v21 = vld [vmem:[#allocation168_spill] sm:$0xff] }
 0xa9d   : > { %21986 = vmatpush1.bf16.msra.mxu1 %v34635_v5  ;;  %v34726_v5 = vld [vmem:[#allocation159_spill] sm:$0xff] }
 0xa9e   : > { %21988 = vmatprep.subr.bf16.mxu1 %v31812_v53  ;;  %v34714_v53 = vld [vmem:[#allocation54_spill] sm:$0xff] }
 0xa9f   : > { %21954 = vmatpush1.bf16.msra.mxu0 %v34710_v34 }
 0xaa0   : > { %21956 = vmatprep.subr.bf16.mxu0 %v34711_v50  ;;  %v34717_v50 = vld [vmem:[#allocation58_spill] sm:$0xff] }
 0xaa1   : > { %21990 = vmatpush1.bf16.msra.mxu1 %v34637_v51 }
 0xaa2   : > { %21992 = vmatprep.subr.bf16.mxu1 %v31871_v6  ;;  %v34715_v6 = vld [vmem:[#allocation60_spill] sm:$0xff] }
 0xaa3   : > { %21958 = vmatpush1.bf16.msra.mxu0 %v34712_v13 }
 0xaa4   : > { %22005 = vmatprep.subr.msk.bf16.mxu0 %vm29421_vm10, %v34713_v1  ;;  %v34716_v1 = vld [vmem:[#allocation198_spill] sm:$0xff] }
 0xaa5   : > { %21994 = vmatpush1.bf16.msra.mxu1 %v34639_v42  ;;  %v34721_v42 = vld [vmem:[#allocation169_spill] sm:$0xff] }
 0xaa6   : > { %21996 = vmatprep.subr.bf16.mxu1 %v31912_v63  ;;  %16875 = vmatmul.mubr.f32.vlgmr.msra.gmra.mrb[124].mxu0 %v32554_v36  ;;  %v34718_v63 = vld [vmem:[#allocation176_spill] sm:$0xff] }
 0xaa7   : > { %22008 = vmatpush1.bf16.msk.msra.mxu0 %vm29421_vm10, %v34714_v53  ;;  %19813 = vmatprep.mubr.msk.f32.mxu0 %vm15377_vm12, %v32561_v38  ;;  %v34746_v53 = vld [vmem:[#allocation76_spill] sm:$0xff] }
 0xaa8   : > { %22011 = vmatprep.subr.msk.bf16.mxu0 %vm29421_vm10, %v34715_v6  ;;  %v34722_v6 = vld [vmem:[#allocation185_spill] sm:$0xff] }
 0xaa9   : > { %21998 = vmatpush1.bf16.msra.mxu1 %v34640_v56  ;;  %v34723_v56 = vld [vmem:[#allocation61_spill] sm:$0xff] }
 0xaaa   : > { %22000 = vmatprep.subr.bf16.mxu1 %v34716_v1  ;;  %v34724_v1 = vld [vmem:[#allocation68_spill] sm:$0xff] }
 0xaab   : > { %22014 = vmatpush1.bf16.msk.msra.mxu0 %vm29421_vm10, %v34717_v50  ;;  %v34725_v51 = vunpack.i.l.bf16 %v34724_v1  ;;  %v34728_v23 = vunpack.i.h.bf16 %v34724_v1  ;;  %v34729_v50 = vld [vmem:[#allocation170_spill] sm:$0xff]  ;;  %v34741_v1 = vld [vmem:[#allocation163_spill] sm:$0xff] }
 0xaac   : > { %22016 = vmatprep.subr.bf16.mxu0 %v34718_v63  ;;  %v34727_v63 = vunpack.i.h.bf16 %v34726_v5 }
 0xaad   : > { %22002 = vmatpush1.bf16.msra.mxu1 %v34719_v21 }
 0xaae   : > { %22049 = vmatprep.subr.msk.bf16.mxu1 %vm29421_vm10, %v34720_v24  ;;  %v14260_v21 = vsel %vm14242_vm13, %v34727_v63, %v34725_v51  ;;  %v34730_v24 = vunpack.i.h.bf16 %v34729_v50  ;;  %v34735_v51 = vld [vmem:[#allocation69_spill] sm:$0xff] }
 0xaaf   : > { %22018 = vmatpush1.bf16.msra.mxu0 %v34721_v42  ;;  %v34737_v50 = vld [vmem:[#allocation193_spill] sm:$0xff] }
 0xab0   : > { %16946 = vmatmul.mubr.f32.vlgmr.msra.gmra.mrb[124].mxu1 %v32554_v36  ;;  %22020 = vmatprep.subr.bf16.mxu0 %v34722_v6  ;;  %v14280_v42 = vsel %vm14242_vm13, %v34730_v24, %v34728_v23  ;;  %v34731_v6 = vld [vmem:[#allocation75_spill] sm:$0xff] }
 0xab1   : > { %22052 = vmatpush1.bf16.msk.msra.mxu1 %vm29421_vm10, %v34723_v56  ;;  %19822 = vmatprep.mubr.msk.f32.mxu1 %vm15377_vm12, %v32561_v38  ;;  %v34732_v56 = vld [vmem:[#allocation177_spill] sm:$0xff]  ;;  %v32796_v5 = vpack.c.bf16 %v14280_v42, %v14260_v21  ;;  %v34736_v23 = vld [vmem:[#allocation179_spill] sm:$0xff] }
 0xab2   : > { %22055 = vmatprep.subr.msk.bf16.mxu1 %vm29421_vm10, %v34731_v6  ;;  %v34738_v24 = vld [vmem:[#allocation175_spill] sm:$0xff]  ;;  %v34742_v6 = vunpack.i.h.bf16 %v34741_v1  ;;  %v34744_v42 = vld [vmem:[#allocation173_spill] sm:$0xff] }
 0xab3   : > { %22022 = vmatpush1.bf16.msra.mxu0 %v34732_v56  ;;  %34734 = vst [vmem:[#allocation112_spill] sm:$0xff] %v32796_v5  ;;  %v34739_v38 = vld [vmem:[#allocation31_spill] sm:$0xff]  ;;  %v34745_v56 = vunpack.i.h.bf16 %v34744_v42  ;;  %v34751_v1 = vld [vmem:[#allocation181_spill] sm:$0xff] }
 0xab4   : > { %22024 = vmatprep.subr.bf16.mxu0 %v34733_v3  ;;  %v34740_v63 = vunpack.i.l.bf16 %v34739_v38  ;;  %v34743_v21 = vunpack.i.h.bf16 %v34739_v38  ;;  %v34753_v38 = vld [vmem:[#allocation187_spill] sm:$0xff] }
 0xab5   : > { %22058 = vmatpush1.bf16.msk.msra.mxu1 %vm29421_vm10, %v34735_v51 }
 0xab6   : > { %22060 = vmatprep.subr.bf16.mxu1 %v32796_v5  ;;  %v14583_v3 = vsel %vm14565_vm14, %v34742_v6, %v34740_v63  ;;  %v14603_v51 = vsel %vm14565_vm14, %v34745_v56, %v34743_v21  ;;  %v34747_v5 = vld [vmem:[#allocation182_spill] sm:$0xff]  ;;  %v34752_v6 = vld [vmem:[#allocation200_spill] sm:$0xff] }
 0xab7   : > { %22026 = vmatpush1.bf16.msra.mxu0 %v34736_v23  ;;  %v34748_v23 = vld [vmem:[#allocation195_spill] sm:$0xff]  ;;  %v34754_v63 = vld [vmem:[#allocation78_spill] sm:$0xff] }
 0xab8   : > { %22028 = vmatprep.subr.bf16.mxu0 %v34737_v50  ;;  %v32818_v50 = vpack.c.bf16 %v14603_v51, %v14583_v3  ;;  %v34755_v56 = vunpack.i.l.bf16 %v34754_v63  ;;  %v34756_v21 = vld [vmem:[#allocation166_spill] sm:$0xff] }
 0xab9   : > { %22062 = vmatpush1.bf16.msra.mxu1 %v34738_v24  ;;  %v34750_v24 = vld [vmem:[#allocation184_spill] sm:$0xff]  ;;  %v34757_v42 = vunpack.i.h.bf16 %v34756_v21  ;;  %v34759_v3 = vld [vmem:[#allocation174_spill] sm:$0xff]  ;;  %v34768_v21 = vld [vmem:[#allocation81_spill] sm:$0xff] }
 0xaba   : > { %22064 = vmatprep.subr.bf16.mxu1 %v34746_v53  ;;  %34749 = vst [vmem:[#allocation127_spill] sm:$0xff] %v32818_v50  ;;  %v34760_v51 = vunpack.i.h.bf16 %v34759_v3  ;;  %v34770_v3 = vld [vmem:[#allocation201_spill] sm:$0xff] }
 0xabb   : > { %22030 = vmatpush1.bf16.msra.mxu0 %v34747_v5  ;;  %v14906_v53 = vsel %vm14888_vm15, %v34757_v42, %v34755_v56  ;;  %v34761_v5 = vld [vmem:[#allocation72_spill] sm:$0xff]  ;;  %v34765_v56 = vld [vmem:[#allocation194_spill] sm:$0xff] }
 0xabc   : > { %22032 = vmatprep.subr.bf16.mxu0 %v34748_v23  ;;  %v34758_v23 = vunpack.i.h.bf16 %v34754_v63  ;;  %v32844_v63 = vld [vmem:[#allocation13 + $0x18] sm:$0x77] }
 0xabd   : > { %22066 = vmatpush1.bf16.msra.mxu1 %v34750_v24  ;;  %v34769_v42 = vld [vmem:[#allocation30_spill] sm:$0xff] }
 0xabe   : > { %22068 = vmatprep.subr.bf16.mxu1 %v32818_v50  ;;  %v14926_v24 = vsel %vm14888_vm15, %v34760_v51, %v34758_v23  ;;  %v34762_v50 = vld [vmem:[#allocation189_spill] sm:$0xff]  ;;  %v34766_v23 = vld [vmem:[#allocation83_spill] sm:$0xff]  ;;  %v34771_v51 = vld [vmem:[#allocation80_spill] sm:$0xff] }
 0xabf   : > { %22034 = vmatpush1.bf16.msra.mxu0 %v34751_v1  ;;  %v34763_v1 = vld [vmem:[#allocation28_spill] sm:$0xff] }
 0xac0   : > { %22036 = vmatprep.subr.bf16.mxu0 %v34752_v6  ;;  %v32838_v6 = vpack.c.bf16 %v14926_v24, %v14906_v53  ;;  %v32851_v53 = vcombine.high %v32844_v63, %v32844_v63  ;;  %v34767_v24 = vld [vmem:[#allocation199_spill] sm:$0xff] }
 0xac1   : > { %22070 = vmatpush1.bf16.msra.mxu1 %v34753_v38  ;;  %v34764_v38 = vld [vmem:[#allocation192_spill] sm:$0xff] }
 0xac2   : > { %22072 = vmatprep.subr.bf16.mxu1 %v34761_v5 }
 0xac3   : > { %22038 = vmatpush1.bf16.msra.mxu0 %v34762_v50 }
 0xac4   : > { %22040 = vmatprep.subr.bf16.mxu0 %v34763_v1 }
 0xac5   : > { %22074 = vmatpush1.bf16.msra.mxu1 %v34764_v38 }
 0xac6   : > { %22076 = vmatprep.subr.bf16.mxu1 %v32838_v6 }
 0xac7   : > { %22042 = vmatpush1.bf16.msra.mxu0 %v34648_v33 }
 0xac8   : > { %22044 = vmatprep.subr.bf16.mxu0 %v34649_v61 }
 0xac9   : > { %22078 = vmatpush1.bf16.msra.mxu1 %v34765_v56 }
 0xaca   : > { %22080 = vmatprep.subr.bf16.mxu1 %v34766_v23 }
 0xacb   : > { %22046 = vmatpush1.bf16.msra.mxu0 %v34652_v10 }
 0xacc   : > { %22093 = vmatprep.subr.msk.bf16.mxu0 %vm29421_vm10, %v34514_v0  ;;  %v34772_v0 = vld [vmem:[#allocation35_spill] sm:$0xff] }
 0xacd   : > { %22082 = vmatpush1.bf16.msra.mxu1 %v34767_v24 }
 0xace   : > { %22084 = vmatprep.subr.bf16.mxu1 %v34768_v21  ;;  %17017 = vmatmul.mubr.f32.vlgmr.msra.gmra.mrb[126].mxu0 %v32554_v36  ;;  %v34773_v21 = vld [vmem:[#allocation25_spill] sm:$0xff] }
 0xacf   : > { %22096 = vmatpush1.bf16.msk.msra.mxu0 %vm29421_vm10, %v34769_v42  ;;  %19831 = vmatprep.mubr.msk.f32.mxu0 %vm15377_vm12, %v32851_v53  ;;  %v34783_v42 = vld [vmem:[#allocation104_spill] sm:$0xff] }
 0xad0   : > { %22099 = vmatprep.subr.msk.bf16.mxu0 %vm29421_vm10, %v34531_v52 }
 0xad1   : > { %22086 = vmatpush1.bf16.msra.mxu1 %v34770_v3 }
 0xad2   : > { %22088 = vmatprep.subr.bf16.mxu1 %v34771_v51 }
 0xad3   : > { %22102 = vmatpush1.bf16.msk.msra.mxu0 %vm29421_vm10, %v34772_v0  ;;  %v34781_v0 = vld [vmem:[#allocation44_spill] sm:$0xff] }
 0xad4   : > { %22104 = vmatprep.subr.bf16.mxu0 %v34542_v40 }
 0xad5   : > { %22090 = vmatpush1.bf16.msra.mxu1 %v34773_v21 }
 0xad6   : > { %22137 = vmatprep.subr.msk.bf16.mxu1 %vm29421_vm10, %v34658_v17 }
 0xad7   : > { %22106 = vmatpush1.bf16.msra.mxu0 %v34651_v31  ;;  %v34774_v31 = vld [vmem:[#allocation125_spill] sm:$0xff] }
 0xad8   : > { %17088 = vmatmul.mubr.f32.vlgmr.msra.gmra.mrb[126].mxu1 %v32554_v36  ;;  %22108 = vmatprep.subr.bf16.mxu0 %v34549_v15  ;;  %v34775_v36 = vld [vmem:[#allocation129_spill] sm:$0xff] }
 0xad9   : > { %22140 = vmatpush1.bf16.msk.msra.mxu1 %vm29421_vm10, %v34508_v44  ;;  %19840 = vmatprep.mubr.msk.f32.mxu1 %vm15377_vm12, %v32851_v53 }
 0xada   : > { %22143 = vmatprep.subr.msk.bf16.mxu1 %vm29421_vm10, %v34660_v60 }
 0xadb   : > { %22110 = vmatpush1.bf16.msra.mxu0 %v34654_v49  ;;  %v34782_v49 = vld [vmem:[#allocation43_spill] sm:$0xff] }
 0xadc   : > { %22112 = vmatprep.subr.bf16.mxu0 %v34565_v43 }
 0xadd   : > { %22146 = vmatpush1.bf16.msk.msra.mxu1 %vm29421_vm10, %v34518_v28 }
 0xade   : > { %22148 = vmatprep.subr.bf16.mxu1 %v34664_v20 }
 0xadf   : > { %22114 = vmatpush1.bf16.msra.mxu0 %v34467_v32  ;;  %v34777_v32 = vld [vmem:[#allocation45_spill] sm:$0xff] }
 0xae0   : > { %22116 = vmatprep.subr.bf16.mxu0 %v34569_v48 }
 0xae1   : > { %22150 = vmatpush1.bf16.msra.mxu1 %v34532_v29 }
 0xae2   : > { %22152 = vmatprep.subr.bf16.mxu1 %v34667_v59 }
 0xae3   : > { %22118 = vmatpush1.bf16.msra.mxu0 %v34479_v4  ;;  %v34779_v4 = vld [vmem:[#allocation39_spill] sm:$0xff] }
 0xae4   : > { %22120 = vmatprep.subr.bf16.mxu0 %v34573_v62 }
 0xae5   : > { %22154 = vmatpush1.bf16.msra.mxu1 %v34543_v27 }
 0xae6   : > { %22156 = vmatprep.subr.bf16.mxu1 %v34671_v30 }
 0xae7   : > { %22122 = vmatpush1.bf16.msra.mxu0 %v30410_v55  ;;  %v34776_v55 = vld [vmem:[#allocation128_spill] sm:$0xff] }
 0xae8   : > { %22124 = vmatprep.subr.bf16.mxu0 %v34577_v25 }
 0xae9   : > { %22158 = vmatpush1.bf16.msra.mxu1 %v34556_v7 }
 0xaea   : > { %22160 = vmatprep.subr.bf16.mxu1 %v34675_v14 }
 0xaeb   : > { %22126 = vmatpush1.bf16.msra.mxu0 %v30687_v47  ;;  %v34778_v47 = vld [vmem:[#allocation131_spill] sm:$0xff] }
 0xaec   : > { %22128 = vmatprep.subr.bf16.mxu0 %v34581_v37 }
 0xaed   : > { %22162 = vmatpush1.bf16.msra.mxu1 %v34566_v22 }
 0xaee   : > { %22164 = vmatprep.subr.bf16.mxu1 %v34678_v16 }
 0xaef   : > { %22130 = vmatpush1.bf16.msra.mxu0 %v30430_v58  ;;  %v34780_v58 = vld [vmem:[#allocation49_spill] sm:$0xff] }
 0xaf0   : > { %22132 = vmatprep.subr.bf16.mxu0 %v34774_v31 }
 0xaf1   : > { %22166 = vmatpush1.bf16.msra.mxu1 %v34775_v36 }
 0xaf2   : > { %22168 = vmatprep.subr.bf16.mxu1 %v34680_v35  ;;  %v34792_v35 = vld [vmem:[#allocation133_spill] sm:$0xff] }
 0xaf3   : > { %22134 = vmatpush1.bf16.msra.mxu0 %v34776_v55  ;;  %v34784_v55 = vld [vmem:[#allocation107_spill] sm:$0xff] }
 0xaf4   : > { %22181 = vmatprep.subr.msk.bf16.mxu0 %vm29421_vm10, %v34777_v32  ;;  %v34791_v32 = vld [vmem:[#allocation140_spill] sm:$0xff] }
 0xaf5   : > { %22170 = vmatpush1.bf16.msra.mxu1 %v34778_v47 }
 0xaf6   : > { %22172 = vmatprep.subr.bf16.mxu1 %v34682_v26  ;;  %17181 = vmatmul.mubr.f32.vlgmr.msra.gmra.mrb[120].mxu0 %v32844_v63  ;;  %v34790_v26 = vld [vmem:[#allocation113_spill] sm:$0xff] }
 0xaf7   : > { %22184 = vmatpush1.bf16.msk.msra.mxu0 %vm29421_vm10, %v34779_v4  ;;  %19849 = vmatprep.mubr.msk.f32.mxu0 %vm15377_vm12, %v32851_v53 }
 0xaf8   : > { %22187 = vmatprep.subr.msk.bf16.mxu0 %vm29421_vm10, %v34780_v58  ;;  %v34785_v58 = vld [vmem:[#allocation47_spill] sm:$0xff] }
 0xaf9   : > { %22174 = vmatpush1.bf16.msra.mxu1 %v34781_v0 }
 0xafa   : > { %22176 = vmatprep.subr.bf16.mxu1 %v34684_v45  ;;  %v34789_v45 = vld [vmem:[#allocation105_spill] sm:$0xff] }
 0xafb   : > { %22190 = vmatpush1.bf16.msk.msra.mxu0 %vm29421_vm10, %v34782_v49 }
 0xafc   : > { %22192 = vmatprep.subr.bf16.mxu0 %v34673_v2  ;;  %v34786_v2 = vld [vmem:[#allocation117_spill] sm:$0xff] }
 0xafd   : > { %22178 = vmatpush1.bf16.msra.mxu1 %v34783_v42 }
 0xafe   : > { %22225 = vmatprep.subr.msk.bf16.mxu1 %vm29421_vm10, %v34686_v9  ;;  %v34787_v9 = vld [vmem:[#allocation51_spill] sm:$0xff] }
 0xaff   : > { %22194 = vmatpush1.bf16.msra.mxu0 %v34784_v55 }
 0xb00   : > { %17252 = vmatmul.mubr.f32.vlgmr.msra.gmra.mrb[120].mxu1 %v32844_v63  ;;  %22196 = vmatprep.subr.bf16.mxu0 %v34600_v39  ;;  %v34788_v39 = vld [vmem:[#allocation109_spill] sm:$0xff] }
 0xb01   : > { %22228 = vmatpush1.bf16.msk.msra.mxu1 %vm29421_vm10, %v34785_v58  ;;  %19858 = vmatprep.mubr.msk.f32.mxu1 %vm15377_vm12, %v32851_v53  ;;  %v34794_v58 = vld [vmem:[#allocation141_spill] sm:$0xff] }
 0xb02   : > { %22231 = vmatprep.subr.msk.bf16.mxu1 %vm29421_vm10, %v34688_v8  ;;  %v34793_v8 = vld [vmem:[#allocation134_spill] sm:$0xff] }
 0xb03   : > { %22198 = vmatpush1.bf16.msra.mxu0 %v34786_v2 }
 0xb04   : > { %22200 = vmatprep.subr.bf16.mxu0 %v34603_v11  ;;  %v34795_v11 = vld [vmem:[#allocation32_spill] sm:$0xff] }
 0xb05   : > { %22234 = vmatpush1.bf16.msk.msra.mxu1 %vm29421_vm10, %v34787_v9  ;;  %v34796_v9 = vld [vmem:[#allocation106_spill] sm:$0xff] }
 0xb06   : > { %22236 = vmatprep.subr.bf16.mxu1 %v34692_v19  ;;  %v34797_v19 = vld [vmem:[#allocation143_spill] sm:$0xff] }
 0xb07   : > { %22202 = vmatpush1.bf16.msra.mxu0 %v34788_v39 }
 0xb08   : > { %22204 = vmatprep.subr.bf16.mxu0 %v34789_v45  ;;  %v34798_v45 = vld [vmem:[#allocation136_spill] sm:$0xff] }
 0xb09   : > { %22238 = vmatpush1.bf16.msra.mxu1 %v34790_v26  ;;  %v34799_v26 = vld [vmem:[#allocation63_spill] sm:$0xff] }
 0xb0a   : > { %22240 = vmatprep.subr.bf16.mxu1 %v34791_v32  ;;  %v34800_v32 = vld [vmem:[#allocation145_spill] sm:$0xff] }
 0xb0b   : > { %22206 = vmatpush1.bf16.msra.mxu0 %v34792_v35 }
 0xb0c   : > { %22208 = vmatprep.subr.bf16.mxu0 %v34793_v8  ;;  %v34801_v8 = vld [vmem:[#allocation137_spill] sm:$0xff] }
 0xb0d   : > { %22242 = vmatpush1.bf16.msra.mxu1 %v34794_v58  ;;  %v34802_v58 = vld [vmem:[#allocation138_spill] sm:$0xff] }
 0xb0e   : > { %22244 = vmatprep.subr.bf16.mxu1 %v34699_v57  ;;  %v34803_v57 = vld [vmem:[#allocation148_spill] sm:$0xff] }
 0xb0f   : > { %22210 = vmatpush1.bf16.msra.mxu0 %v34795_v11 }
 0xb10   : > { %22212 = vmatprep.subr.bf16.mxu0 %v34796_v9  ;;  %v34804_v9 = vld [vmem:[#allocation139_spill] sm:$0xff] }
 0xb11   : > { %22246 = vmatpush1.bf16.msra.mxu1 %v34797_v19  ;;  %v34805_v19 = vld [vmem:[#allocation53_spill] sm:$0xff] }
 0xb12   : > { %22248 = vmatprep.subr.bf16.mxu1 %v34703_v46  ;;  %v34806_v46 = vld [vmem:[#allocation153_spill] sm:$0xff] }
 0xb13   : > { %22214 = vmatpush1.bf16.msra.mxu0 %v34798_v45 }
 0xb14   : > { %22216 = vmatprep.subr.bf16.mxu0 %v34799_v26  ;;  %v34812_v26 = vld [vmem:[#allocation54_spill] sm:$0xff] }
 0xb15   : > { %22250 = vmatpush1.bf16.msra.mxu1 %v34800_v32  ;;  %v34823_v32 = vld [vmem:[#allocation172_spill] sm:$0xff] }
 0xb16   : > { %22252 = vmatprep.subr.bf16.mxu1 %v34706_v41  ;;  %v34807_v41 = vld [vmem:[#allocation48_spill] sm:$0xff] }
 0xb17   : > { %22218 = vmatpush1.bf16.msra.mxu0 %v34801_v8 }
 0xb18   : > { %22220 = vmatprep.subr.bf16.mxu0 %v34802_v58  ;;  %v34809_v58 = vld [vmem:[#allocation156_spill] sm:$0xff] }
 0xb19   : > { %22254 = vmatpush1.bf16.msra.mxu1 %v34803_v57  ;;  %v34821_v57 = vld [vmem:[#allocation150_spill] sm:$0xff] }
 0xb1a   : > { %22256 = vmatprep.subr.bf16.mxu1 %v34708_v18  ;;  %v34808_v18 = vld [vmem:[#allocation57_spill] sm:$0xff] }
 0xb1b   : > { %22222 = vmatpush1.bf16.msra.mxu0 %v34804_v9 }
 0xb1c   : > { %22269 = vmatprep.subr.msk.bf16.mxu0 %vm29421_vm10, %v34805_v19  ;;  %v34810_v19 = vld [vmem:[#allocation52_spill] sm:$0xff] }
 0xb1d   : > { %22258 = vmatpush1.bf16.msra.mxu1 %v34806_v46  ;;  %v34813_v46 = vld [vmem:[#allocation66_spill] sm:$0xff] }
 0xb1e   : > { %22260 = vmatprep.subr.bf16.mxu1 %v34710_v34  ;;  %17323 = vmatmul.mubr.f32.vlgmr.msra.gmra.mrb[122].mxu0 %v32844_v63  ;;  %v34811_v34 = vld [vmem:[#allocation162_spill] sm:$0xff] }
 0xb1f   : > { %22272 = vmatpush1.bf16.msk.msra.mxu0 %vm29421_vm10, %v34807_v41  ;;  %19867 = vmatprep.mubr.msk.f32.mxu0 %vm15377_vm12, %v32851_v53  ;;  %v34829_v41 = vld [vmem:[#allocation160_spill] sm:$0xff] }
 0xb20   : > { %22275 = vmatprep.subr.msk.bf16.mxu0 %vm29421_vm10, %v34808_v18  ;;  %v34814_v18 = vld [vmem:[#allocation146_spill] sm:$0xff] }
 0xb21   : > { %22262 = vmatpush1.bf16.msra.mxu1 %v34809_v58  ;;  %v34815_v58 = vld [vmem:[#allocation55_spill] sm:$0xff] }
 0xb22   : > { %22264 = vmatprep.subr.bf16.mxu1 %v34712_v13  ;;  %v34817_v13 = vld [vmem:[#allocation147_spill] sm:$0xff] }
 0xb23   : > { %22278 = vmatpush1.bf16.msk.msra.mxu0 %vm29421_vm10, %v34810_v19  ;;  %v34825_v19 = vld [vmem:[#allocation155_spill] sm:$0xff] }
 0xb24   : > { %22280 = vmatprep.subr.bf16.mxu0 %v34701_v54  ;;  %v34816_v54 = vld [vmem:[#allocation58_spill] sm:$0xff] }
 0xb25   : > { %22266 = vmatpush1.bf16.msra.mxu1 %v34811_v34  ;;  %v34819_v34 = vld [vmem:[#allocation59_spill] sm:$0xff] }
 0xb26   : > { %22313 = vmatprep.subr.msk.bf16.mxu1 %vm29421_vm10, %v34812_v26  ;;  %v34818_v26 = vld [vmem:[#allocation149_spill] sm:$0xff] }
 0xb27   : > { %22282 = vmatpush1.bf16.msra.mxu0 %v34813_v46  ;;  %v34824_v46 = vld [vmem:[#allocation177_spill] sm:$0xff] }
 0xb28   : > { %17394 = vmatmul.mubr.f32.vlgmr.msra.gmra.mrb[122].mxu1 %v32844_v63  ;;  %22284 = vmatprep.subr.bf16.mxu0 %v34814_v18  ;;  %v34820_v18 = vld [vmem:[#allocation169_spill] sm:$0xff] }
 0xb29   : > { %22316 = vmatpush1.bf16.msk.msra.mxu1 %vm29421_vm10, %v34815_v58  ;;  %19876 = vmatprep.mubr.msk.f32.mxu1 %vm15377_vm12, %v32851_v53  ;;  %v34822_v58 = vld [vmem:[#allocation152_spill] sm:$0xff] }
 0xb2a   : > { %22319 = vmatprep.subr.msk.bf16.mxu1 %vm29421_vm10, %v34816_v54  ;;  %v34826_v54 = vld [vmem:[#allocation157_spill] sm:$0xff] }
 0xb2b   : > { %22286 = vmatpush1.bf16.msra.mxu0 %v34817_v13  ;;  %v34827_v13 = vld [vmem:[#allocation178_spill] sm:$0xff] }
 0xb2c   : > { %22288 = vmatprep.subr.bf16.mxu0 %v34818_v26  ;;  %v34828_v26 = vld [vmem:[#allocation179_spill] sm:$0xff] }
 0xb2d   : > { %22322 = vmatpush1.bf16.msk.msra.mxu1 %vm29421_vm10, %v34819_v34  ;;  %v34830_v34 = vld [vmem:[#allocation161_spill] sm:$0xff] }
 0xb2e   : > { %22324 = vmatprep.subr.bf16.mxu1 %v34820_v18  ;;  %v34831_v18 = vld [vmem:[#allocation180_spill] sm:$0xff] }
 0xb2f   : > { %22290 = vmatpush1.bf16.msra.mxu0 %v34821_v57  ;;  %v34832_v57 = vld [vmem:[#allocation182_spill] sm:$0xff] }
 0xb30   : > { %22292 = vmatprep.subr.bf16.mxu0 %v34822_v58  ;;  %v34833_v58 = vld [vmem:[#allocation164_spill] sm:$0xff] }
 0xb31   : > { %22326 = vmatpush1.bf16.msra.mxu1 %v34823_v32  ;;  %v34834_v32 = vld [vmem:[#allocation165_spill] sm:$0xff] }
 0xb32   : > { %22328 = vmatprep.subr.bf16.mxu1 %v34824_v46  ;;  %v34835_v46 = vld [vmem:[#allocation183_spill] sm:$0xff] }
 0xb33   : > { %22294 = vmatpush1.bf16.msra.mxu0 %v34825_v19  ;;  %v34836_v19 = vld [vmem:[#allocation181_spill] sm:$0xff] }
 0xb34   : > { %22296 = vmatprep.subr.bf16.mxu0 %v34826_v54  ;;  %v34837_v54 = vld [vmem:[#allocation167_spill] sm:$0xff] }
 0xb35   : > { %22330 = vmatpush1.bf16.msra.mxu1 %v34827_v13  ;;  %v34838_v13 = vld [vmem:[#allocation168_spill] sm:$0xff] }
 0xb36   : > { %22332 = vmatprep.subr.bf16.mxu1 %v34828_v26  ;;  %v34839_v26 = vld [vmem:[#allocation186_spill] sm:$0xff] }
 0xb37   : > { %22298 = vmatpush1.bf16.msra.mxu0 %v34829_v41 }
 0xb38   : > { %22300 = vmatprep.subr.bf16.mxu0 %v34830_v34  ;;  %v34840_v34 = vld [vmem:[#allocation171_spill] sm:$0xff] }
 0xb39   : > { %22334 = vmatpush1.bf16.msra.mxu1 %v34831_v18  ;;  %v34841_v18 = vld [vmem:[#allocation61_spill] sm:$0xff] }
 0xb3a   : > { %22336 = vmatprep.subr.bf16.mxu1 %v34832_v57  ;;  %v34842_v57 = vld [vmem:[#allocation190_spill] sm:$0xff] }
 0xb3b   : > { %22302 = vmatpush1.bf16.msra.mxu0 %v34833_v58 }
 0xb3c   : > { %22304 = vmatprep.subr.bf16.mxu0 %v34834_v32  ;;  %v34848_v32 = vld [vmem:[#allocation198_spill] sm:$0xff] }
 0xb3d   : > { %22338 = vmatpush1.bf16.msra.mxu1 %v34835_v46  ;;  %v34851_v46 = vld [vmem:[#allocation176_spill] sm:$0xff] }
 0xb3e   : > { %22340 = vmatprep.subr.bf16.mxu1 %v34836_v19  ;;  %v34843_v19 = vld [vmem:[#allocation56_spill] sm:$0xff] }
 0xb3f   : > { %22306 = vmatpush1.bf16.msra.mxu0 %v34837_v54 }
 0xb40   : > { %22308 = vmatprep.subr.bf16.mxu0 %v34838_v13  ;;  %v34845_v13 = vld [vmem:[#allocation196_spill] sm:$0xff] }
 0xb41   : > { %22342 = vmatpush1.bf16.msra.mxu1 %v34839_v26  ;;  %v34862_v26 = vld [vmem:[#allocation193_spill] sm:$0xff] }
 0xb42   : > { %22344 = vmatprep.subr.bf16.mxu1 %v34762_v50  ;;  %v34844_v50 = vld [vmem:[#allocation69_spill] sm:$0xff] }
 0xb43   : > { %22310 = vmatpush1.bf16.msra.mxu0 %v34840_v34 }
 0xb44   : > { %22357 = vmatprep.subr.msk.bf16.mxu0 %vm29421_vm10, %v34841_v18  ;;  %v34846_v18 = vld [vmem:[#allocation60_spill] sm:$0xff] }
 0xb45   : > { %22346 = vmatpush1.bf16.msra.mxu1 %v34842_v57  ;;  %v34849_v57 = vld [vmem:[#allocation62_spill] sm:$0xff] }
 0xb46   : > { %22348 = vmatprep.subr.bf16.mxu1 %v34648_v33  ;;  %17465 = vmatmul.mubr.f32.vlgmr.msra.gmra.mrb[124].mxu0 %v32844_v63  ;;  %v34847_v33 = vld [vmem:[#allocation175_spill] sm:$0xff] }
 0xb47   : > { %22360 = vmatpush1.bf16.msk.msra.mxu0 %vm29421_vm10, %v34843_v19  ;;  %19885 = vmatprep.mubr.msk.f32.mxu0 %vm15377_vm12, %v32851_v53 }
 0xb48   : > { %22363 = vmatprep.subr.msk.bf16.mxu0 %vm29421_vm10, %v34844_v50  ;;  %v34852_v50 = vld [vmem:[#allocation184_spill] sm:$0xff] }
 0xb49   : > { %22350 = vmatpush1.bf16.msra.mxu1 %v34845_v13  ;;  %v34853_v13 = vld [vmem:[#allocation65_spill] sm:$0xff] }
 0xb4a   : > { %22352 = vmatprep.subr.bf16.mxu1 %v34652_v10  ;;  %v34855_v10 = vld [vmem:[#allocation185_spill] sm:$0xff] }
 0xb4b   : > { %22366 = vmatpush1.bf16.msk.msra.mxu0 %vm29421_vm10, %v34846_v18 }
 0xb4c   : > { %22368 = vmatprep.subr.bf16.mxu0 %v34847_v33  ;;  %v34854_v33 = vld [vmem:[#allocation70_spill] sm:$0xff] }
 0xb4d   : > { %22354 = vmatpush1.bf16.msra.mxu1 %v34848_v32  ;;  %v34857_v32 = vld [vmem:[#allocation75_spill] sm:$0xff] }
 0xb4e   : > { %22401 = vmatprep.subr.msk.bf16.mxu1 %vm29436_vm11, %v34849_v57  ;;  %v34856_v57 = vld [vmem:[#allocation187_spill] sm:$0xff] }
 0xb4f   : > { %22370 = vmatpush1.bf16.msra.mxu0 %v34851_v46  ;;  %v34859_v46 = vld [vmem:[#allocation188_spill] sm:$0xff] }
 0xb50   : > { %17536 = vmatmul.mubr.f32.vlgmr.msra.gmra.mrb[124].mxu1 %v32844_v63  ;;  %22372 = vmatprep.subr.bf16.mxu0 %v34852_v50  ;;  %v34858_v50 = vld [vmem:[#allocation85_spill] sm:$0xff] }
 0xb51   : > { %22404 = vmatpush1.bf16.msk.msra.mxu1 %vm29421_vm10, %v34853_v13  ;;  %19894 = vmatprep.mubr.msk.f32.mxu1 %vm15377_vm12, %v32851_v53  ;;  %v34860_v13 = vld [vmem:[#allocation112_spill] sm:$0xff]  ;;  %v34861_v53 = vld [vmem:[#allocation89_spill] sm:$0xff] }
 0xb52   : > { %22407 = vmatprep.subr.msk.bf16.mxu1 %vm29436_vm11, %v34854_v33  ;;  %v34863_v33 = vld [vmem:[#allocation76_spill] sm:$0xff] }
 0xb53   : > { %22374 = vmatpush1.bf16.msra.mxu0 %v34855_v10  ;;  %v34865_v10 = vld [vmem:[#allocation195_spill] sm:$0xff] }
 0xb54   : > { %22376 = vmatprep.subr.bf16.mxu0 %v34856_v57  ;;  %v34864_v57 = vld [vmem:[#allocation86_spill] sm:$0xff] }
 0xb55   : > { %22410 = vmatpush1.bf16.msk.msra.mxu1 %vm29421_vm10, %v34857_v32  ;;  %v34867_v32 = vld [vmem:[#allocation92_spill] sm:$0xff] }
 0xb56   : > { %22412 = vmatprep.subr.bf16.mxu1 %v34858_v50  ;;  %v34866_v50 = vld [vmem:[#allocation127_spill] sm:$0xff] }
 0xb57   : > { %22378 = vmatpush1.bf16.msra.mxu0 %v34859_v46 }
 0xb58   : > { %22380 = vmatprep.subr.bf16.mxu0 %v34764_v38  ;;  %v34868_v38 = vld [vmem:[#allocation200_spill] sm:$0xff] }
 0xb59   : > { %22414 = vmatpush1.bf16.msra.mxu1 %v34860_v13 }
 0xb5a   : > { %22416 = vmatprep.subr.bf16.mxu1 %v34861_v53  ;;  %v34869_v53 = vld [vmem:[#allocation87_spill] sm:$0xff] }
 0xb5b   : > { %22382 = vmatpush1.bf16.msra.mxu0 %v34862_v26 }
 0xb5c   : > { %22384 = vmatprep.subr.bf16.mxu0 %v34765_v56 }
 0xb5d   : > { %22418 = vmatpush1.bf16.msra.mxu1 %v34863_v33 }
 0xb5e   : > { %22420 = vmatprep.subr.bf16.mxu1 %v34864_v57  ;;  %v33098_v57 = vld [vmem:[#allocation13 + $0x20] sm:$0x77] }
 0xb5f   : > { %22386 = vmatpush1.bf16.msra.mxu0 %v34865_v10 }
 0xb60   : > { %22388 = vmatprep.subr.bf16.mxu0 %v34767_v24  ;;  %v34870_v24 = vld [vmem:[#allocation84_spill] sm:$0xff] }
 0xb61   : > { %22422 = vmatpush1.bf16.msra.mxu1 %v34866_v50 }
 0xb62   : > { %22424 = vmatprep.subr.bf16.mxu1 %v34867_v32  ;;  %v33105_v32 = vcombine.high %v33098_v57, %v33098_v57 }
 0xb63   : > { %22390 = vmatpush1.bf16.msra.mxu0 %v34868_v38 }
 0xb64   : > { %22392 = vmatprep.subr.bf16.mxu0 %v34770_v3 }
 0xb65   : > { %22426 = vmatpush1.bf16.msra.mxu1 %v34761_v5 }
 0xb66   : > { %22428 = vmatprep.subr.bf16.mxu1 %v34869_v53  ;;  %v34871_v53 = vld [vmem:[#allocation91_spill] sm:$0xff] }
 0xb67   : > { %22394 = vmatpush1.bf16.msra.mxu0 %v34763_v1 }
 0xb68   : > { %22396 = vmatprep.subr.bf16.mxu0 %v34773_v21  ;;  %v34872_v21 = vld [vmem:[#allocation36_spill] sm:$0xff] }
 0xb69   : > { %22430 = vmatpush1.bf16.msra.mxu1 %v32838_v6 }
 0xb6a   : > { %22432 = vmatprep.subr.bf16.mxu1 %v34870_v24  ;;  %v34873_v24 = vld [vmem:[#allocation81_spill] sm:$0xff] }
 0xb6b   : > { %22398 = vmatpush1.bf16.msra.mxu0 %v34649_v61 }
 0xb6c   : > { %22445 = vmatprep.subr.msk.bf16.mxu0 %vm29421_vm10, %v34508_v44  ;;  %v34874_v44 = vld [vmem:[#allocation38_spill] sm:$0xff] }
 0xb6d   : > { %22434 = vmatpush1.bf16.msra.mxu1 %v34766_v23 }
 0xb6e   : > { %22436 = vmatprep.subr.bf16.mxu1 %v34871_v53  ;;  %17607 = vmatmul.mubr.f32.vlgmr.msra.gmra.mrb[126].mxu0 %v32844_v63 }
 0xb6f   : > { %22448 = vmatpush1.bf16.msk.msra.mxu0 %vm29421_vm10, %v34872_v21  ;;  %19903 = vmatprep.mubr.msk.f32.mxu0 %vm15377_vm12, %v33105_v32  ;;  %v34903_v21 = vld [vmem:[#allocation155_spill] sm:$0xff] }
 0xb70   : > { %22451 = vmatprep.subr.msk.bf16.mxu0 %vm29421_vm10, %v34518_v28  ;;  %v34875_v28 = vld [vmem:[#allocation47_spill] sm:$0xff] }
 0xb71   : > { %22438 = vmatpush1.bf16.msra.mxu1 %v34873_v24 }
 0xb72   : > { %22440 = vmatprep.subr.bf16.mxu1 %v34874_v44 }
 0xb73   : > { %22454 = vmatpush1.bf16.msk.msra.mxu0 %vm29421_vm10, %v34531_v52  ;;  %v34879_v52 = vld [vmem:[#allocation99_spill] sm:$0xff] }
 0xb74   : > { %22456 = vmatprep.subr.bf16.mxu0 %v34532_v29  ;;  %v34880_v29 = vld [vmem:[#allocation49_spill] sm:$0xff] }
 0xb75   : > { %22442 = vmatpush1.bf16.msra.mxu1 %v34771_v51 }
 0xb76   : > { %22489 = vmatprep.subr.msk.bf16.mxu1 %vm29421_vm10, %v34779_v4  ;;  %v34907_v4 = vld [vmem:[#allocation63_spill] sm:$0xff] }
 0xb77   : > { %22458 = vmatpush1.bf16.msra.mxu0 %v34542_v40  ;;  %v34883_v40 = vld [vmem:[#allocation48_spill] sm:$0xff] }
 0xb78   : > { %17678 = vmatmul.mubr.f32.vlgmr.msra.gmra.mrb[126].mxu1 %v32844_v63  ;;  %22460 = vmatprep.subr.bf16.mxu0 %v34543_v27  ;;  %v34884_v27 = vld [vmem:[#allocation132_spill] sm:$0xff]  ;;  %v34902_v63 = vld [vmem:[#allocation142_spill] sm:$0xff] }
 0xb79   : > { %22492 = vmatpush1.bf16.msk.msra.mxu1 %vm29421_vm10, %v34658_v17  ;;  %19912 = vmatprep.mubr.msk.f32.mxu1 %vm15377_vm12, %v33105_v32  ;;  %v34896_v17 = vld [vmem:[#allocation105_spill] sm:$0xff] }
 0xb7a   : > { %22495 = vmatprep.subr.msk.bf16.mxu1 %vm29421_vm10, %v34782_v49  ;;  %v34909_v49 = vld [vmem:[#allocation144_spill] sm:$0xff] }
 0xb7b   : > { %22462 = vmatpush1.bf16.msra.mxu0 %v34549_v15  ;;  %v34882_v15 = vld [vmem:[#allocation67_spill] sm:$0xff] }
 0xb7c   : > { %22464 = vmatprep.subr.bf16.mxu0 %v34556_v7  ;;  %v34889_v7 = vld [vmem:[#allocation143_spill] sm:$0xff] }
 0xb7d   : > { %22498 = vmatpush1.bf16.msk.msra.mxu1 %vm29421_vm10, %v34660_v60  ;;  %v34897_v60 = vld [vmem:[#allocation148_spill] sm:$0xff] }
 0xb7e   : > { %22500 = vmatprep.subr.bf16.mxu1 %v34784_v55  ;;  %v34911_v55 = vld [vmem:[#allocation55_spill] sm:$0xff] }
 0xb7f   : > { %22466 = vmatpush1.bf16.msra.mxu0 %v34565_v43  ;;  %v34888_v43 = vld [vmem:[#allocation108_spill] sm:$0xff] }
 0xb80   : > { %22468 = vmatprep.subr.bf16.mxu0 %v34566_v22  ;;  %v34878_v22 = vld [vmem:[#allocation51_spill] sm:$0xff] }
 0xb81   : > { %22502 = vmatpush1.bf16.msra.mxu1 %v34664_v20  ;;  %v34901_v20 = vld [vmem:[#allocation153_spill] sm:$0xff] }
 0xb82   : > { %22504 = vmatprep.subr.bf16.mxu1 %v34786_v2  ;;  %v34895_v2 = vld [vmem:[#allocation147_spill] sm:$0xff] }
 0xb83   : > { %22470 = vmatpush1.bf16.msra.mxu0 %v34569_v48  ;;  %v34886_v48 = vld [vmem:[#allocation46_spill] sm:$0xff] }
 0xb84   : > { %22472 = vmatprep.subr.bf16.mxu0 %v34775_v36  ;;  %v34905_v36 = vld [vmem:[#allocation156_spill] sm:$0xff] }
 0xb85   : > { %22506 = vmatpush1.bf16.msra.mxu1 %v34667_v59  ;;  %v34898_v59 = vld [vmem:[#allocation140_spill] sm:$0xff] }
 0xb86   : > { %22508 = vmatprep.subr.bf16.mxu1 %v34788_v39  ;;  %v34876_v39 = vld [vmem:[#allocation130_spill] sm:$0xff] }
 0xb87   : > { %22474 = vmatpush1.bf16.msra.mxu0 %v34573_v62  ;;  %v34890_v62 = vld [vmem:[#allocation50_spill] sm:$0xff] }
 0xb88   : > { %22476 = vmatprep.subr.bf16.mxu0 %v34778_v47  ;;  %v34906_v47 = vld [vmem:[#allocation74_spill] sm:$0xff] }
 0xb89   : > { %22510 = vmatpush1.bf16.msra.mxu1 %v34671_v30  ;;  %v34877_v30 = vld [vmem:[#allocation45_spill] sm:$0xff] }
 0xb8a   : > { %22512 = vmatprep.subr.bf16.mxu1 %v34792_v35  ;;  %v34881_v35 = vld [vmem:[#allocation113_spill] sm:$0xff] }
 0xb8b   : > { %22478 = vmatpush1.bf16.msra.mxu0 %v34577_v25  ;;  %v34891_v25 = vld [vmem:[#allocation66_spill] sm:$0xff] }
 0xb8c   : > { %22480 = vmatprep.subr.bf16.mxu0 %v34781_v0  ;;  %v34908_v0 = vld [vmem:[#allocation162_spill] sm:$0xff] }
 0xb8d   : > { %22514 = vmatpush1.bf16.msra.mxu1 %v34675_v14  ;;  %v34893_v14 = vld [vmem:[#allocation145_spill] sm:$0xff] }
 0xb8e   : > { %22516 = vmatprep.subr.bf16.mxu1 %v34795_v11  ;;  %v34885_v11 = vld [vmem:[#allocation141_spill] sm:$0xff] }
 0xb8f   : > { %22482 = vmatpush1.bf16.msra.mxu0 %v34581_v37  ;;  %v34892_v37 = vld [vmem:[#allocation26_spill] sm:$0xff] }
 0xb90   : > { %22484 = vmatprep.subr.bf16.mxu0 %v34783_v42  ;;  %v34910_v42 = vld [vmem:[#allocation138_spill] sm:$0xff] }
 0xb91   : > { %22518 = vmatpush1.bf16.msra.mxu1 %v34678_v16  ;;  %v34899_v16 = vld [vmem:[#allocation150_spill] sm:$0xff] }
 0xb92   : > { %22520 = vmatprep.subr.bf16.mxu1 %v34798_v45  ;;  %v34894_v45 = vld [vmem:[#allocation135_spill] sm:$0xff] }
 0xb93   : > { %22486 = vmatpush1.bf16.msra.mxu0 %v34774_v31  ;;  %v34904_v31 = vld [vmem:[#allocation106_spill] sm:$0xff] }
 0xb94   : > { %22533 = vmatprep.subr.msk.bf16.mxu0 %vm29421_vm10, %v34875_v28  ;;  %v34912_v28 = vld [vmem:[#allocation151_spill] sm:$0xff] }
 0xb95   : > { %22522 = vmatpush1.bf16.msra.mxu1 %v34876_v39  ;;  %v34915_v39 = vld [vmem:[#allocation154_spill] sm:$0xff] }
 0xb96   : > { %22524 = vmatprep.subr.bf16.mxu1 %v34801_v8  ;;  %17771 = vmatmul.mubr.f32.vlgmr.msra.gmra.mrb[120].mxu0 %v33098_v57  ;;  %v34900_v8 = vld [vmem:[#allocation134_spill] sm:$0xff] }
 0xb97   : > { %22536 = vmatpush1.bf16.msk.msra.mxu0 %vm29421_vm10, %v34877_v30  ;;  %19921 = vmatprep.mubr.msk.f32.mxu0 %vm15377_vm12, %v33105_v32  ;;  %v34916_v30 = vld [vmem:[#allocation57_spill] sm:$0xff] }
 0xb98   : > { %22539 = vmatprep.subr.msk.bf16.mxu0 %vm29421_vm10, %v34878_v22  ;;  %v34918_v22 = vld [vmem:[#allocation158_spill] sm:$0xff] }
 0xb99   : > { %22526 = vmatpush1.bf16.msra.mxu1 %v34879_v52  ;;  %v34919_v52 = vld [vmem:[#allocation73_spill] sm:$0xff] }
 0xb9a   : > { %22528 = vmatprep.subr.bf16.mxu1 %v34804_v9  ;;  %v34887_v9 = vld [vmem:[#allocation52_spill] sm:$0xff] }
 0xb9b   : > { %22542 = vmatpush1.bf16.msk.msra.mxu0 %vm29421_vm10, %v34880_v29  ;;  %v34920_v29 = vld [vmem:[#allocation178_spill] sm:$0xff] }
 0xb9c   : > { %22544 = vmatprep.subr.bf16.mxu0 %v34881_v35  ;;  %v34921_v35 = vld [vmem:[#allocation54_spill] sm:$0xff] }
 0xb9d   : > { %22530 = vmatpush1.bf16.msra.mxu1 %v34882_v15  ;;  %v34924_v15 = vld [vmem:[#allocation58_spill] sm:$0xff] }
 0xb9e   : > { %22577 = vmatprep.subr.msk.bf16.mxu1 %vm29421_vm10, %v34883_v40  ;;  %v34925_v40 = vld [vmem:[#allocation176_spill] sm:$0xff] }
 0xb9f   : > { %22546 = vmatpush1.bf16.msra.mxu0 %v34884_v27  ;;  %v34926_v27 = vld [vmem:[#allocation149_spill] sm:$0xff] }
 0xba0   : > { %17842 = vmatmul.mubr.f32.vlgmr.msra.gmra.mrb[120].mxu1 %v33098_v57  ;;  %22548 = vmatprep.subr.bf16.mxu0 %v34885_v11  ;;  %v34927_v11 = vld [vmem:[#allocation183_spill] sm:$0xff] }
 0xba1   : > { %22580 = vmatpush1.bf16.msk.msra.mxu1 %vm29421_vm10, %v34886_v48  ;;  %19930 = vmatprep.mubr.msk.f32.mxu1 %vm15377_vm12, %v33105_v32  ;;  %v34928_v48 = vld [vmem:[#allocation169_spill] sm:$0xff] }
 0xba2   : > { %22583 = vmatprep.subr.msk.bf16.mxu1 %vm29421_vm10, %v34887_v9  ;;  %v34929_v9 = vld [vmem:[#allocation185_spill] sm:$0xff] }
 0xba3   : > { %22550 = vmatpush1.bf16.msra.mxu0 %v34888_v43  ;;  %v34930_v43 = vld [vmem:[#allocation152_spill] sm:$0xff] }
 0xba4   : > { %22552 = vmatprep.subr.bf16.mxu0 %v34889_v7  ;;  %v34932_v7 = vld [vmem:[#allocation177_spill] sm:$0xff] }
 0xba5   : > { %22586 = vmatpush1.bf16.msk.msra.mxu1 %vm29421_vm10, %v34890_v62  ;;  %v34933_v62 = vld [vmem:[#allocation157_spill] sm:$0xff] }
 0xba6   : > { %22588 = vmatprep.subr.bf16.mxu1 %v34891_v25  ;;  %v34934_v25 = vld [vmem:[#allocation190_spill] sm:$0xff] }
 0xba7   : > { %22554 = vmatpush1.bf16.msra.mxu0 %v34892_v37  ;;  %v34935_v37 = vld [vmem:[#allocation179_spill] sm:$0xff] }
 0xba8   : > { %22556 = vmatprep.subr.bf16.mxu0 %v34893_v14  ;;  %v34936_v14 = vld [vmem:[#allocation161_spill] sm:$0xff] }
 0xba9   : > { %22590 = vmatpush1.bf16.msra.mxu1 %v34894_v45  ;;  %v34937_v45 = vld [vmem:[#allocation196_spill] sm:$0xff] }
 0xbaa   : > { %22592 = vmatprep.subr.bf16.mxu1 %v34895_v2  ;;  %v34938_v2 = vld [vmem:[#allocation182_spill] sm:$0xff] }
 0xbab   : > { %22558 = vmatpush1.bf16.msra.mxu0 %v34896_v17  ;;  %v34939_v17 = vld [vmem:[#allocation165_spill] sm:$0xff] }
 0xbac   : > { %22560 = vmatprep.subr.bf16.mxu0 %v34897_v60  ;;  %v34940_v60 = vld [vmem:[#allocation198_spill] sm:$0xff] }
 0xbad   : > { %22594 = vmatpush1.bf16.msra.mxu1 %v34898_v59  ;;  %v34942_v59 = vld [vmem:[#allocation168_spill] sm:$0xff] }
 0xbae   : > { %22596 = vmatprep.subr.bf16.mxu1 %v34899_v16  ;;  %v34943_v16 = vld [vmem:[#allocation65_spill] sm:$0xff] }
 0xbaf   : > { %22562 = vmatpush1.bf16.msra.mxu0 %v34900_v8  ;;  %v34947_v8 = vld [vmem:[#allocation191_spill] sm:$0xff] }
 0xbb0   : > { %22564 = vmatprep.subr.bf16.mxu0 %v34901_v20  ;;  %v34948_v20 = vld [vmem:[#allocation69_spill] sm:$0xff] }
 0xbb1   : > { %22598 = vmatpush1.bf16.msra.mxu1 %v34902_v63  ;;  %v34950_v63 = vld [vmem:[#allocation64_spill] sm:$0xff] }
 0xbb2   : > { %22600 = vmatprep.subr.bf16.mxu1 %v34903_v21 }
 0xbb3   : > { %22566 = vmatpush1.bf16.msra.mxu0 %v34904_v31  ;;  %v34952_v31 = vld [vmem:[#allocation175_spill] sm:$0xff] }
 0xbb4   : > { %22568 = vmatprep.subr.bf16.mxu0 %v34905_v36  ;;  %v34953_v36 = vld [vmem:[#allocation62_spill] sm:$0xff] }
 0xbb5   : > { %22602 = vmatpush1.bf16.msra.mxu1 %v34906_v47  ;;  %v34958_v47 = vld [vmem:[#allocation79_spill] sm:$0xff] }
 0xbb6   : > { %22604 = vmatprep.subr.bf16.mxu1 %v34829_v41  ;;  %v34913_v41 = vld [vmem:[#allocation53_spill] sm:$0xff] }
 0xbb7   : > { %22570 = vmatpush1.bf16.msra.mxu0 %v34907_v4 }
 0xbb8   : > { %22572 = vmatprep.subr.bf16.mxu0 %v34908_v0  ;;  %v34960_v0 = vld [vmem:[#allocation187_spill] sm:$0xff] }
 0xbb9   : > { %22606 = vmatpush1.bf16.msra.mxu1 %v34909_v49  ;;  %v34962_v49 = vld [vmem:[#allocation115_spill] sm:$0xff] }
 0xbba   : > { %22608 = vmatprep.subr.bf16.mxu1 %v34833_v58  ;;  %v34914_v58 = vld [vmem:[#allocation59_spill] sm:$0xff] }
 0xbbb   : > { %22574 = vmatpush1.bf16.msra.mxu0 %v34910_v42  ;;  %v34963_v42 = vld [vmem:[#allocation82_spill] sm:$0xff] }
 0xbbc   : > { %22621 = vmatprep.subr.msk.bf16.mxu0 %vm29421_vm10, %v34911_v55  ;;  %v34964_v55 = vpack.c.bf16 %v34962_v49, %v34963_v42 }
 0xbbd   : > { %22610 = vmatpush1.bf16.msra.mxu1 %v34912_v28  ;;  %v34965_v28 = vld [vmem:[#allocation192_spill] sm:$0xff] }
 0xbbe   : > { %22612 = vmatprep.subr.bf16.mxu1 %v34837_v54  ;;  %17913 = vmatmul.mubr.f32.vlgmr.msra.gmra.mrb[122].mxu0 %v33098_v57  ;;  %v34917_v54 = vld [vmem:[#allocation172_spill] sm:$0xff] }
 0xbbf   : > { %22624 = vmatpush1.bf16.msk.msra.mxu0 %vm29421_vm10, %v34913_v41  ;;  %19939 = vmatprep.mubr.msk.f32.mxu0 %vm15377_vm12, %v33105_v32  ;;  %v34967_v41 = vld [vmem:[#allocation42_spill] sm:$0xff] }
 0xbc0   : > { %22627 = vmatprep.subr.msk.bf16.mxu0 %vm29421_vm10, %v34914_v58  ;;  %v34968_v58 = vld [vmem:[#allocation90_spill] sm:$0xff] }
 0xbc1   : > { %22614 = vmatpush1.bf16.msra.mxu1 %v34915_v39  ;;  %v34969_v39 = vpack.c.bf16 %v34967_v41, %v34968_v58 }
 0xbc2   : > { %22616 = vmatprep.subr.bf16.mxu1 %v34840_v34  ;;  %v34922_v34 = vld [vmem:[#allocation146_spill] sm:$0xff] }
 0xbc3   : > { %22630 = vmatpush1.bf16.msk.msra.mxu0 %vm29421_vm10, %v34916_v30  ;;  %v34971_v30 = vld [vmem:[#allocation101_spill] sm:$0xff] }
 0xbc4   : > { %22632 = vmatprep.subr.bf16.mxu0 %v34917_v54  ;;  %v34972_v54 = vld [vmem:[#allocation40_spill] sm:$0xff] }
 0xbc5   : > { %22618 = vmatpush1.bf16.msra.mxu1 %v34918_v22  ;;  %v34973_v22 = vpack.c.bf16 %v34971_v30, %v34972_v54 }
 0xbc6   : > { %22665 = vmatprep.subr.msk.bf16.mxu1 %vm29421_vm10, %v34843_v19  ;;  %v34923_v19 = vld [vmem:[#allocation180_spill] sm:$0xff] }
 0xbc7   : > { %22634 = vmatpush1.bf16.msra.mxu0 %v34919_v52  ;;  %v34974_v52 = vld [vmem:[#allocation199_spill] sm:$0xff] }
 0xbc8   : > { %17984 = vmatmul.mubr.f32.vlgmr.msra.gmra.mrb[122].mxu1 %v33098_v57  ;;  %22636 = vmatprep.subr.bf16.mxu0 %v34920_v29  ;;  %v34976_v29 = vld [vmem:[#allocation96_spill] sm:$0xff] }
 0xbc9   : > { %22668 = vmatpush1.bf16.msk.msra.mxu1 %vm29421_vm10, %v34921_v35  ;;  %19948 = vmatprep.mubr.msk.f32.mxu1 %vm15377_vm12, %v33105_v32  ;;  %v34977_v35 = vld [vmem:[#allocation94_spill] sm:$0xff] }
 0xbca   : > { %22671 = vmatprep.subr.msk.bf16.mxu1 %vm29421_vm10, %v34846_v18  ;;  %v34931_v18 = vld [vmem:[#allocation186_spill] sm:$0xff] }
 0xbcb   : > { %22638 = vmatpush1.bf16.msra.mxu0 %v34922_v34  ;;  %v34978_v34 = vpack.c.bf16 %v34976_v29, %v34977_v35 }
 0xbcc   : > { %22640 = vmatprep.subr.bf16.mxu0 %v34923_v19  ;;  %v34981_v19 = vld [vmem:[#allocation97_spill] sm:$0xff] }
 0xbcd   : > { %22674 = vmatpush1.bf16.msk.msra.mxu1 %vm29421_vm10, %v34924_v15 }
 0xbce   : > { %22676 = vmatprep.subr.bf16.mxu1 %v34925_v40  ;;  %v34983_v40 = vld [vmem:[#allocation25_spill] sm:$0xff] }
 0xbcf   : > { %22642 = vmatpush1.bf16.msra.mxu0 %v34926_v27  ;;  %v34985_v27 = vld [vmem:[#allocation121_spill] sm:$0xff] }
 0xbd0   : > { %22644 = vmatprep.subr.bf16.mxu0 %v34927_v11  ;;  %v34986_v11 = vld [vmem:[#allocation100_spill] sm:$0xff] }
 0xbd1   : > { %22678 = vmatpush1.bf16.msra.mxu1 %v34928_v48  ;;  %v34987_v48 = vpack.c.bf16 %v34985_v27, %v34986_v11 }
 0xbd2   : > { %22680 = vmatprep.subr.bf16.mxu1 %v34929_v9 }
 0xbd3   : > { %22646 = vmatpush1.bf16.msra.mxu0 %v34930_v43  ;;  %v18294_v43 = vpop.permute.xlu0 %18293 }
 0xbd4   : > { %22648 = vmatprep.subr.bf16.mxu0 %v34931_v18 }
 0xbd5   : > { %22682 = vmatpush1.bf16.msra.mxu1 %v34932_v7 }
 0xbd6   : > { %22684 = vmatprep.subr.bf16.mxu1 %v34859_v46  ;;  %v34941_v46 = vld [vmem:[#allocation181_spill] sm:$0xff] }
 0xbd7   : > { %22650 = vmatpush1.bf16.msra.mxu0 %v34933_v62 }
 0xbd8   : > { %22652 = vmatprep.subr.bf16.mxu0 %v34934_v25 }
 0xbd9   : > { %22686 = vmatpush1.bf16.msra.mxu1 %v34935_v37 }
 0xbda   : > { %22688 = vmatprep.subr.bf16.mxu1 %v34862_v26  ;;  %v34944_v26 = vld [vmem:[#allocation189_spill] sm:$0xff] }
 0xbdb   : > { %22654 = vmatpush1.bf16.msra.mxu0 %v34936_v14 }
 0xbdc   : > { %22656 = vmatprep.subr.bf16.mxu0 %v34937_v45 }
 0xbdd   : > { %22690 = vmatpush1.bf16.msra.mxu1 %v34938_v2 }
 0xbde   : > { %22692 = vmatprep.subr.bf16.mxu1 %v34865_v10  ;;  %v34945_v10 = vld [vmem:[#allocation61_spill] sm:$0xff] }
 0xbdf   : > { %22658 = vmatpush1.bf16.msra.mxu0 %v34939_v17 }
 0xbe0   : > { %22660 = vmatprep.subr.bf16.mxu0 %v34940_v60 }
 0xbe1   : > { %22694 = vmatpush1.bf16.msra.mxu1 %v34941_v46 }
 0xbe2   : > { %22696 = vmatprep.subr.bf16.mxu1 %v34868_v38  ;;  %v34946_v38 = vld [vmem:[#allocation75_spill] sm:$0xff] }
 0xbe3   : > { %22662 = vmatpush1.bf16.msra.mxu0 %v34942_v59 }
 0xbe4   : > { %22709 = vmatprep.subr.msk.bf16.mxu0 %vm29421_vm10, %v34943_v16 }
 0xbe5   : > { %22698 = vmatpush1.bf16.msra.mxu1 %v34944_v26 }
 0xbe6   : > { %22700 = vmatprep.subr.bf16.mxu1 %v34763_v1  ;;  %18055 = vmatmul.mubr.f32.vlgmr.msra.gmra.mrb[124].mxu0 %v33098_v57  ;;  %v34949_v1 = vld [vmem:[#allocation197_spill] sm:$0xff] }
 0xbe7   : > { %22712 = vmatpush1.bf16.msk.msra.mxu0 %vm29421_vm10, %v34945_v10  ;;  %19957 = vmatprep.mubr.msk.f32.mxu0 %vm15377_vm12, %v33105_v32 }
 0xbe8   : > { %22715 = vmatprep.subr.msk.bf16.mxu0 %vm29421_vm10, %v34946_v38 }
 0xbe9   : > { %22702 = vmatpush1.bf16.msra.mxu1 %v34947_v8 }
 0xbea   : > { %22704 = vmatprep.subr.bf16.mxu1 %v34649_v61  ;;  %v34956_v61 = vld [vmem:[#allocation70_spill] sm:$0xff] }
 0xbeb   : > { %22718 = vmatpush1.bf16.msk.msra.mxu0 %vm29421_vm10, %v34948_v20 }
 0xbec   : > { %22720 = vmatprep.subr.bf16.mxu0 %v34860_v13  ;;  %v34955_v13 = vld [vmem:[#allocation184_spill] sm:$0xff] }
 0xbed   : > { %22706 = vmatpush1.bf16.msra.mxu1 %v34949_v1 }
 0xbee   : > { %22753 = vmatprep.subr.msk.bf16.mxu1 %vm29436_vm11, %v34950_v63 }
 0xbef   : > { %22722 = vmatpush1.bf16.msra.mxu0 %v34952_v31 }
 0xbf0   : > { %18126 = vmatmul.mubr.f32.vlgmr.msra.gmra.mrb[124].mxu1 %v33098_v57  ;;  %22724 = vmatprep.subr.bf16.mxu0 %v34863_v33  ;;  %v34957_v33 = vld [vmem:[#allocation103_spill] sm:$0xff] }
 0xbf1   : > { %22756 = vmatpush1.bf16.msk.msra.mxu1 %vm29436_vm11, %v34953_v36  ;;  %19966 = vmatprep.mubr.msk.f32.mxu1 %vm15377_vm12, %v33105_v32  ;;  %v34959_v4 = vpack.c.bf16 %v34957_v33, %v34958_v47  ;;  %v34961_v32 = vld [vmem:[#allocation85_spill] sm:$0xff] }
 0xbf2   : > { %22759 = vmatprep.subr.msk.bf16.mxu1 %vm29436_vm11, %v34954_v12 }
 0xbf3   : > { %22726 = vmatpush1.bf16.msra.mxu0 %v34955_v13 }
 0xbf4   : > { %22728 = vmatprep.subr.bf16.mxu0 %v34866_v50  ;;  %v34966_v50 = vld [vmem:[#allocation89_spill] sm:$0xff] }
 0xbf5   : > { %22762 = vmatpush1.bf16.msk.msra.mxu1 %vm29436_vm11, %v34956_v61 }
 0xbf6   : > { %22764 = vmatprep.subr.bf16.mxu1 %v34959_v4 }
 0xbf7   : > { %22730 = vmatpush1.bf16.msra.mxu0 %v34960_v0 }
 0xbf8   : > { %22732 = vmatprep.subr.bf16.mxu0 %v34761_v5  ;;  %v34970_v5 = vld [vmem:[#allocation86_spill] sm:$0xff] }
 0xbf9   : > { %22766 = vmatpush1.bf16.msra.mxu1 %v34961_v32 }
 0xbfa   : > { %22768 = vmatprep.subr.bf16.mxu1 %v34964_v55 }
 0xbfb   : > { %22734 = vmatpush1.bf16.msra.mxu0 %v34965_v28 }
 0xbfc   : > { %22736 = vmatprep.subr.bf16.mxu0 %v32838_v6  ;;  %v34975_v6 = vld [vmem:[#allocation92_spill] sm:$0xff] }
 0xbfd   : > { %22770 = vmatpush1.bf16.msra.mxu1 %v34966_v50 }
 0xbfe   : > { %22772 = vmatprep.subr.bf16.mxu1 %v34969_v39 }
 0xbff   : > { %22738 = vmatpush1.bf16.msra.mxu0 %v34765_v56  ;;  %v34979_v56 = vld [vmem:[#allocation87_spill] sm:$0xff] }
 0xc00   : > { %22740 = vmatprep.subr.bf16.mxu0 %v34766_v23  ;;  %v34980_v23 = vld [vmem:[#allocation88_spill] sm:$0xff] }
 0xc01   : > { %22774 = vmatpush1.bf16.msra.mxu1 %v34970_v5  ;;  %v34982_v15 = vpack.c.bf16 %v34980_v23, %v34981_v19 }
 0xc02   : > { %22776 = vmatprep.subr.bf16.mxu1 %v34973_v22 }
 0xc03   : > { %22742 = vmatpush1.bf16.msra.mxu0 %v34974_v52 }
 0xc04   : > { %22744 = vmatprep.subr.bf16.mxu0 %v34873_v24  ;;  %v34984_v24 = vld [vmem:[#allocation84_spill] sm:$0xff] }
 0xc05   : > { %22778 = vmatpush1.bf16.msra.mxu1 %v34975_v6 }
 0xc06   : > { %22780 = vmatprep.subr.bf16.mxu1 %v34978_v34 }
 0xc07   : > { %22746 = vmatpush1.bf16.msra.mxu0 %v34770_v3  ;;  %v34988_v3 = vld [vmem:[#allocation123_spill] sm:$0xff] }
 0xc08   : > { %22748 = vmatprep.subr.bf16.mxu0 %v34771_v51  ;;  %v34989_v51 = vld [vmem:[#allocation110_spill] sm:$0xff] }
 0xc09   : > { %22782 = vmatpush1.bf16.msra.mxu1 %v34979_v56  ;;  %v34990_v9 = vpack.c.bf16 %v34988_v3, %v34989_v51 }
 0xc0a   : > { %22784 = vmatprep.subr.bf16.mxu1 %v34982_v15 }
 0xc0b   : > { %22750 = vmatpush1.bf16.msra.mxu0 %v34983_v40 }
 0xc0d   : > { %22786 = vmatpush1.bf16.msra.mxu1 %v34984_v24 }
 0xc0e   : > { %22788 = vmatprep.subr.bf16.mxu1 %v34987_v48  ;;  %18197 = vmatmul.mubr.f32.vlgmr.msra.gmra.mrb[126].mxu0 %v33098_v57 }
 0xc11   : > { %22790 = vmatpush1.bf16.msra.mxu1 %v34871_v53 }
 0xc12   : > { %22792 = vmatprep.subr.bf16.mxu1 %v34990_v9 }
 0xc15   : > { %22794 = vmatpush1.bf16.msra.mxu1 %v34874_v44 }
 0xc18   : > { %18268 = vmatmul.mubr.f32.vlgmr.msra.gmra.mrb[126].mxu1 %v33098_v57 }
 0xc69   : > { %v17772_v18 = vpop.f32.mrb[120].mxu0 }
 0xc6a   : > { %v18296_v7 = vadd.f32 %v18294_v43, %v17772_v18  ;;  %v17774_v62 = vpop.f32.mrb[121].mxu0 }
 0xc6b   : > { %v18297_v25 = vadd.f32 %v18294_v43, %v17774_v62 }
 0xc6d   : > { %v18328_v37 = vcombine.low %v18296_v7, %v18297_v25 }
 0xc6f   : > { %18344 = vst [vmem:[%s33379_s18] sm:$0x77] %v18328_v37 }
 0xc73   : > { %v17843_v53 = vpop.f32.mrb[120].mxu1 }
 0xc74   : > { %v18298_v14 = vadd.f32 %v18294_v43, %v17843_v53  ;;  %v17845_v45 = vpop.f32.mrb[121].mxu1 }
 0xc75   : > { %v18299_v44 = vadd.f32 %v18294_v43, %v17845_v45 }
 0xc77   : > { %v18329_v2 = vcombine.low %v18298_v14, %v18299_v44 }
 0xc79   : > { %18345 = vst [vmem:[%s33379_s18 + $0x8] sm:$0x77] %v18329_v2 }
 0xc91   : > { %v17914_v57 = vpop.f32.mrb[122].mxu0 }
 0xc92   : > { %v18300_v17 = vadd.f32 %v18294_v43, %v17914_v57  ;;  %v17916_v60 = vpop.f32.mrb[123].mxu0 }
 0xc93   : > { %v18301_v46 = vadd.f32 %v18294_v43, %v17916_v60 }
 0xc95   : > { %v18330_v59 = vcombine.low %v18300_v17, %v18301_v46 }
 0xc97   : > { %18346 = vst [vmem:[%s33379_s18 + $0x10] sm:$0x77] %v18330_v59 }
 0xc9b   : > { %v17985_v16 = vpop.f32.mrb[122].mxu1 }
 0xc9c   : > { %v18302_v26 = vadd.f32 %v18294_v43, %v17985_v16  ;;  %v17987_v10 = vpop.f32.mrb[123].mxu1 }
 0xc9d   : > { %v18303_v38 = vadd.f32 %v18294_v43, %v17987_v10 }
 0xc9f   : > { %v18331_v8 = vcombine.low %v18302_v26, %v18303_v38 }
 0xca1   : > { %18347 = vst [vmem:[%s33379_s18 + $0x18] sm:$0x77] %v18331_v8 }
 0xcb9   : > { %v18056_v20 = vpop.f32.mrb[124].mxu0 }
 0xcba   : > { %v18304_v1 = vadd.f32 %v18294_v43, %v18056_v20  ;;  %v18058_v63 = vpop.f32.mrb[125].mxu0 }
 0xcbb   : > { %v18305_v21 = vadd.f32 %v18294_v43, %v18058_v63 }
 0xcbd   : > { %v18332_v31 = vcombine.low %v18304_v1, %v18305_v21 }
 0xcbf   : > { %18348 = vst [vmem:[%s33379_s18 + $0x20] sm:$0x77] %v18332_v31 }
 0xcc3   : > { %v18127_v36 = vpop.f32.mrb[124].mxu1 }
 0xcc4   : > { %v18306_v12 = vadd.f32 %v18294_v43, %v18127_v36  ;;  %v18129_v13 = vpop.f32.mrb[125].mxu1 }
 0xcc5   : > { %v18307_v61 = vadd.f32 %v18294_v43, %v18129_v13 }
 0xcc7   : > { %v18333_v33 = vcombine.low %v18306_v12, %v18307_v61 }
 0xcc9   : > { %18349 = vst [vmem:[%s33379_s18 + $0x28] sm:$0x77] %v18333_v33 }
 0xce1   : > { %v18198_v47 = vpop.f32.mrb[126].mxu0 }
 0xce2   : > { %v18308_v4 = vadd.f32 %v18294_v43, %v18198_v47  ;;  %v18200_v0 = vpop.f32.mrb[127].mxu0 }
 0xce3   : > { %v18309_v32 = vadd.f32 %v18294_v43, %v18200_v0 }
 0xce5   : > { %v18334_v49 = vcombine.low %v18308_v4, %v18309_v32 }
 0xce7   : > { %18350 = vst [vmem:[%s33379_s18 + $0x30] sm:$0x77] %v18334_v49 }
 0xceb   : > { %v18269_v42 = vpop.f32.mrb[126].mxu1 }
 0xcec   : > { %v18310_v55 = vadd.f32 %v18294_v43, %v18269_v42  ;;  %v18271_v28 = vpop.f32.mrb[127].mxu1 }
 0xced   : > { %v18311_v50 = vadd.f32 %v18294_v43, %v18271_v28 }
 0xcef   : > { %v18335_v41 = vcombine.low %v18310_v55, %v18311_v50 }
 0xcf1   : > { %18351 = vst [vmem:[%s33379_s18 + $0x38] sm:$0x77] %v18335_v41 }
 0xcf2   : > { %25331 = shalt.err (!%p25328_p11)
}
 0xcf3   : > { %s25332_s13 = scalar_lea.hbm %s33393_s16, 1024  ;;  %s25336_s4 = scalar_lea.hbm %s34992_s25, 2048 }
 0xcf4   : > { %p25333_p8 = scmp.ne.s32.totalorder %s33393_s16, %s25332_s13  ;;  %p25337_p6 = scmp.lt.u32.totalorder %s33393_s16, %s34992_s25 }
 0xcf5   : > { %p25338_p2 = scmp.lt.u32.totalorder %s25336_s4, %s25332_s13  ;;  %p25340_p4 = scmp.lt.u32.totalorder %s25332_s13, %s33393_s16 }
 0xcf6   : > { %p25334_p3 = pnand %p25333_p8, %p34993_p9 }
 0xcf7   : > { %p25339_p13 = por %p25338_p2, %p25337_p6 }
 0xcf8   : > { %p25335_p12 = pneg %p25334_p3 }
 0xcf9   : > { %p25341_p0 = por %p25340_p4, %p25339_p13 }
 0xcfb   : > { %p25342_p7 = pnand %p25341_p0, %p25335_p12 }
 0xcfd   : > { %25345 = shalt.err (!%p25342_p7)
}
 0xcfe   : > { %24167 = dma.vmem_to_hbm [thread:$0]  (%p34993_p9), %s33395_s14, 1024, %s33393_s16, %s18353_s20  }
 0xcff PF: > { %s18381_s18 = sand.u32 1, %s25400_s27   ;;  %p34994_p5 = scmp.ne.s32.totalorder %s33943_s26, 0 }
 0xd00   : > { %p34995_p1 = scmp.ge.s32.totalorder %s25420_s10, 2  ;;  %s18382_s15 = scalar_lea.sflag [#allocation4], %s18381_s18 }
 0xd02   : > { %p24196_p10 = pnand %p34995_p1, %p34994_p5 }
 0xd04   : > { %25395 = dma.done.wait (!%p24196_p10), %s18382_s15, 1024  }
 0xd05   : > { %25397 = vsyncadd (!%p24196_p10), %s18382_s15, 4294966272  ;;  %s30_s10 = sadd.s32 1, %s25420_s10   ;;  %s34996_s27 = smov %s25404_s28 }
 0xd06   : > { %p27_p11 = scmp.ge.s32.totalorder %s30_s10, 4   ;;  %s34997_s28 = smov %s25408_s29 }
 0xd07   : > { %s34998_s29 = smov %s25708_s24  ;;  %s34999_s30 = smov %s25416_s9 }
 0xd08   : > { %s35000_s9 = smov %s35002_s19  ;;  %29 = sbr.rel (!%p27_p11) target bundleno = 18 (0x12), region = 172 }
 0xd0f   :  { %18387 = vsyncpa [#allocation3], 1 }
 0xd10   :  { %18389 = vsyncpa [#allocation3 + $0x1], 1 }
 0xd11   :  { %18390 = vsyncpa [#allocation6], 1 }
 0xd12   :  { %18392 = vsyncpa [#allocation6 + $0x1], 1 }
 0xd13   :  { %18393 = vsyncpa [#allocation9], 1 }
 0xd14   :  { %18394 = vsyncpa [#allocation12], 1 }
 0xd15   :  { %18395 = vsyncpa [#allocation15], 1 }
 0xd16   :  { %18396 = vsyncpa [#allocation4], 1 }
 0xd17   :  { %18398 = vsyncpa [#allocation4 + $0x1], 1 }

</bundles_post_ra>
